<compile_context>
chip_gen: v7x
topology: tpu7x:2x2x1
jax: 0.10.0
libtpu: 0.0.40
codegen_flags: <defaults>
</compile_context>

<pallas_src>
import jax
import jax.numpy as jnp
from jax import lax
from jax.experimental import pallas as pl
from jax.experimental.pallas import tpu as pltpu


# ----------------------------- schema & hyper-parameters -----------------------------------
NODE_TYPES = ('timeslice', 'diagnosis', 'medication')
EDGE_TYPES = (
    ('diagnosis', 'affects', 'timeslice'),
    ('medication', 'treats', 'timeslice'),
    ('timeslice', 'has', 'diagnosis'),
    ('timeslice', 'prescribed', 'medication'),
    ('timeslice', 'follows', 'timeslice'),
)


def edge_type_to_str(et):
    return f'{et[0]}__{et[1]}__{et[2]}'


NUM_NODES = {'timeslice': 16, 'diagnosis': 12, 'medication': 8}
TS_FEAT_DIM = 16          # timeslice_feat_dim
CONCEPT_EMB_DIM = 16      # concept_embedding_dim
HIDDEN = 32               # gnn_hidden_dim
HEADS = 4                 # num_gat_heads
DH = HIDDEN // HEADS      # per-head channels
NUM_LAYERS = 2            # num_gnn_layers
OUT_CLASSES = 1

VMEM = pltpu.MemorySpace.VMEM

SRC_OF = {nt: tuple(et for et in EDGE_TYPES if et[0] == nt) for nt in NODE_TYPES}
DST_OF = {nt: tuple(et for et in EDGE_TYPES if et[2] == nt) for nt in NODE_TYPES}


def _wcat_layout(nt):
    """Column layout of the per-node-type concatenated weight matrix."""
    off, c = {}, 0
    for et in SRC_OF[nt]:      # message projections (this nt is the source)
        off[('xs', et)] = c
        c += HIDDEN
    for et in DST_OF[nt]:      # destination attention logits (this nt is the dest)
        off[('ad', et)] = c
        c += HEADS
    return off, c


WCAT_OFF, WCAT_WIDTH = {}, {}
for _nt in NODE_TYPES:
    WCAT_OFF[_nt], WCAT_WIDTH[_nt] = _wcat_layout(_nt)
# row offsets inside the per-node-type stacked attW_src_T matrices
AST_OFF = {nt: {et: i * HEADS for i, et in enumerate(SRC_OF[nt])} for nt in NODE_TYPES}


# --------------------------------- fused Pallas kernel -------------------------------------
def _gat_message(xs, a_sT, a_d, adj, hm_all, bias):
    """One GATConv for one edge type; heads statically unrolled.

    xs   : [Ns, HIDDEN]  projected source features (messages)
    a_sT : [HEADS, Ns]   per-head source attention logits
    a_d  : [Nd, HEADS]   per-head destination attention logits
    adj  : [Nd, Ns]      0/1 adjacency (dst, src)
    hm_all: [HEADS, HIDDEN] head-block column mask
    bias : [1, HIDDEN]
    """
    msg = None
    for h in range(HEADS):                                  # static unrolled loop
        e = a_d[:, h:h + 1] + a_sT[h:h + 1, :]              # [Nd, Ns]
        e = jnp.where(e > 0, e, 0.2 * e)                    # LeakyReLU(0.2)
        e = jnp.where(adj > 0, e, -1e30)                    # mask non-edges
        m = jnp.max(e, axis=-1, keepdims=True)
        p = jnp.exp(e - m) * adj
        denom = jnp.sum(p, axis=-1, keepdims=True)
        denom_safe = jnp.where(denom > 0, denom, 1.0)
        inv = jnp.where(denom > 0, pl.reciprocal(denom_safe, approx=True), 0.0)
        alpha = p * inv                                     # softmax over incoming edges
        # head-mask trick: zero all columns except head-block h, one [Nd,Ns]@[Ns,HIDDEN]
        # matmul drops the result directly into columns h*DH:(h+1)*DH (no concatenate).
        contrib = jnp.dot(alpha, xs * hm_all[h:h + 1, :],
                          preferred_element_type=jnp.float32)
        msg = contrib if msg is None else msg + contrib
    return msg + bias


def fused_forward_kernel(*args):
    o_ref = args[-1]
    it = iter(args[:-1])
    nxt = lambda: next(it)[...]

    ts_x = nxt()
    emb = {'diagnosis': nxt(), 'medication': nxt()}
    w_ts, b_ts = nxt(), nxt()
    w_dg, b_dg = nxt(), nxt()
    w_md, b_md = nxt(), nxt()

    wcat, astcat, ebias = [], [], []
    for _ in range(NUM_LAYERS):
        wcat.append({nt: nxt() for nt in NODE_TYPES})
        astcat.append({nt: nxt() for nt in NODE_TYPES})
        ebias.append({et: nxt() for et in EDGE_TYPES})
    adj = {et: nxt() for et in EDGE_TYPES}
    hm_all = nxt()                                          # [HEADS, HIDDEN]
    w1, b1, w2, b2 = nxt(), nxt(), nxt(), nxt()

    # ---- initial projections (Embedding(arange(N)) == full embedding table) ----
    x = {
        'timeslice': jnp.dot(ts_x, w_ts, preferred_element_type=jnp.float32) + b_ts,
        'diagnosis': jnp.dot(emb['diagnosis'], w_dg, preferred_element_type=jnp.float32) + b_dg,
        'medication': jnp.dot(emb['medication'], w_md, preferred_element_type=jnp.float32) + b_md,
    }

    # ---- GNN layers: per-node-type wide matmuls + per-edge-type GAT attention ----
    for l in range(NUM_LAYERS):
        # one wide matmul per node type: [N_nt, H] @ [H, width_nt]
        proj = {nt: jnp.dot(x[nt], wcat[l][nt], preferred_element_type=jnp.float32)
                for nt in NODE_TYPES}
        # source attention logits in row form [HEADS*k, N_nt]  (q.k^T pattern: contract
        # the feature dims of both operands; no in-kernel transpose of activations).
        a_sT = {nt: lax.dot_general(astcat[l][nt], x[nt],
                                    (((1,), (1,)), ((), ())),
                                    preferred_element_type=jnp.float32)
                for nt in NODE_TYPES}

        agg = {}
        for et in EDGE_TYPES:
            src, _, dst = et
            xs_o = WCAT_OFF[src][('xs', et)]
            ad_o = WCAT_OFF[dst][('ad', et)]
            as_o = AST_OFF[src][et]
            xs = proj[src][:, xs_o:xs_o + HIDDEN]           # [Ns, HIDDEN]
            a_d = proj[dst][:, ad_o:ad_o + HEADS]           # [Nd, HEADS]
            asT = a_sT[src][as_o:as_o + HEADS, :]           # [HEADS, Ns]
            msg = _gat_message(xs, asT, a_d, adj[et], hm_all, ebias[l][et])
            agg[dst] = msg if dst not in agg else agg[dst] + msg   # HeteroConv aggr='sum'
        x = {nt: jnp.maximum(v, 0.0) for nt, v in agg.items()}     # ReLU after each layer

    # ---- mean read-out over timeslice nodes + 2-layer MLP classifier ----
    mean = jnp.sum(x['timeslice'], axis=0, keepdims=True) * (1.0 / NUM_NODES['timeslice'])
    h1 = jnp.maximum(jnp.dot(mean, w1, preferred_element_type=jnp.float32) + b1, 0.0)
    # Dropout is identity in eval mode.
    o_ref[...] = jnp.dot(h1, w2, preferred_element_type=jnp.float32) + b2


# --------------------------------- host-side glue -------------------------------------------
def _prepare_args(params, ts_x, adjs):
    """Flatten all inputs; concatenate weights per node type; reshape biases once."""
    args = [
        ts_x,
        params['emb']['diagnosis'], params['emb']['medication'],
        params['proj']['timeslice']['w'], params['proj']['timeslice']['b'].reshape(1, -1),
        params['proj']['diagnosis']['w'], params['proj']['diagnosis']['b'].reshape(1, -1),
        params['proj']['medication']['w'], params['proj']['medication']['b'].reshape(1, -1),
    ]
    for layer in params['layers']:
        for nt in NODE_TYPES:
            cols = [layer[edge_type_to_str(et)]['w_src'] for et in SRC_OF[nt]]
            cols += [layer[edge_type_to_str(et)]['attW_dst'] for et in DST_OF[nt]]
            args.append(jnp.concatenate(cols, axis=1))       # [HIDDEN, WCAT_WIDTH[nt]]
        for nt in NODE_TYPES:
            rows = [layer[edge_type_to_str(et)]['attW_src_T'] for et in SRC_OF[nt]]
            args.append(jnp.concatenate(rows, axis=0))       # [HEADS*k, HIDDEN]
        for et in EDGE_TYPES:
            args.append(layer[edge_type_to_str(et)]['bias'].reshape(1, -1))
    for et in EDGE_TYPES:
        args.append(adjs[et])
    headmask = (jnp.arange(HIDDEN)[None, :] // DH
                == jnp.arange(HEADS)[:, None]).astype(jnp.float32)   # [HEADS, HIDDEN]
    args.append(headmask)
    args += [params['cls']['w1'], params['cls']['b1'].reshape(1, -1),
             params['cls']['w2'], params['cls']['b2'].reshape(1, -1)]
    return args


@jax.jit
def forward(params, ts_x, adjs):
    args = _prepare_args(params, ts_x, adjs)
    logits = pl.pallas_call(
        fused_forward_kernel,
        out_shape=jax.ShapeDtypeStruct((1, OUT_CLASSES), jnp.float32),
        in_specs=[pl.BlockSpec(memory_space=VMEM)] * len(args),
        out_specs=pl.BlockSpec(memory_space=VMEM),
    )(*args)
    return logits[0, 0]     # output_classes == 1  ->  squeeze(-1)


# --------------------------------- parameters ----------------------------------------------
def init_params(key):
    keys = iter(jax.random.split(key, 64))
    nxt = lambda: next(keys)
    p = {'emb': {}, 'proj': {}, 'layers': [], 'cls': {}}
    for nt in ('diagnosis', 'medication'):
        p['emb'][nt] = jax.random.normal(nxt(), (NUM_NODES[nt], CONCEPT_EMB_DIM), jnp.float32)
        p['proj'][nt] = {
            'w': jax.random.normal(nxt(), (CONCEPT_EMB_DIM, HIDDEN), jnp.float32)
                 / jnp.sqrt(float(CONCEPT_EMB_DIM)),
            'b': jax.random.normal(nxt(), (HIDDEN,), jnp.float32) * 0.01,
        }
    p['proj']['timeslice'] = {
        'w': jax.random.normal(nxt(), (TS_FEAT_DIM, HIDDEN), jnp.float32)
             / jnp.sqrt(float(TS_FEAT_DIM)),
        'b': jax.random.normal(nxt(), (HIDDEN,), jnp.float32) * 0.01,
    }
    for _ in range(NUM_LAYERS):
        layer = {}
        for et in EDGE_TYPES:
            w_src = jax.random.normal(nxt(), (HIDDEN, HIDDEN), jnp.float32) / jnp.sqrt(float(HIDDEN))
            w_dst = jax.random.normal(nxt(), (HIDDEN, HIDDEN), jnp.float32) / jnp.sqrt(float(HIDDEN))
            att_src = jax.random.normal(nxt(), (HEADS, DH), jnp.float32) / jnp.sqrt(float(DH))
            att_dst = jax.random.normal(nxt(), (HEADS, DH), jnp.float32) / jnp.sqrt(float(DH))
            # block-diagonal attention matrices so attention logits become matmuls
            asm = jnp.zeros((HIDDEN, HEADS), jnp.float32)
            adm = jnp.zeros((HIDDEN, HEADS), jnp.float32)
            for h in range(HEADS):
                asm = asm.at[h * DH:(h + 1) * DH, h].set(att_src[h])
                adm = adm.at[h * DH:(h + 1) * DH, h].set(att_dst[h])
            layer[edge_type_to_str(et)] = {
                'w_src': w_src, 'w_dst': w_dst,
                'att_src': att_src, 'att_dst': att_dst,
                'attW_src_T': (w_src @ asm).T,    # [HEADS, HIDDEN]
                'attW_dst': w_dst @ adm,          # [HIDDEN, HEADS]
                'bias': jnp.zeros((HIDDEN,), jnp.float32),
            }
        p['layers'].append(layer)
    p['cls'] = {
        'w1': jax.random.normal(nxt(), (HIDDEN, HIDDEN // 2), jnp.float32) / jnp.sqrt(float(HIDDEN)),
        'b1': jax.random.normal(nxt(), (HIDDEN // 2,), jnp.float32) * 0.01,
        'w2': jax.random.normal(nxt(), (HIDDEN // 2, OUT_CLASSES), jnp.float32)
              / jnp.sqrt(float(HIDDEN // 2)),
        'b2': jnp.zeros((OUT_CLASSES,), jnp.float32),
    }
    return p


# --------------------------------- pure-JAX reference --------------------------------------
def _gat_ref(x_src, x_dst, adj, p):
    xs = (x_src @ p['w_src']).reshape(-1, HEADS, DH)
    xd = (x_dst @ p['w_dst']).reshape(-1, HEADS, DH)
    a_s = (xs * p['att_src'][None]).sum(-1)                 # [Ns, heads]
    a_d = (xd * p['att_dst'][None]).sum(-1)                 # [Nd, heads]
    e = a_d[:, None, :] + a_s[None, :, :]                   # [Nd, Ns, heads]
    e = jnp.where(e > 0, e, 0.2 * e)
    e = jnp.where(adj[:, :, None] > 0, e, -1e30)
    m = e.max(axis=1, keepdims=True)
    pe = jnp.exp(e - m) * adj[:, :, None]
    denom = pe.sum(axis=1, keepdims=True)
    alpha = pe * jnp.where(denom > 0, 1.0 / denom, 0.0)
    out = jnp.einsum('dsh,sho->dho', alpha, xs).reshape(x_dst.shape[0], HIDDEN)
    return out + p['bias'][None]


def forward_ref(params, ts_x, adjs):
    x = {'timeslice': ts_x @ params['proj']['timeslice']['w'] + params['proj']['timeslice']['b']}
    for nt in ('diagnosis', 'medication'):
        x[nt] = params['emb'][nt] @ params['proj'][nt]['w'] + params['proj'][nt]['b']
    for layer in params['layers']:
        agg = {}
        for et in EDGE_TYPES:
            src, _, dst = et
            msg = _gat_ref(x[src], x[dst], adjs[et], layer[edge_type_to_str(et)])
            agg[dst] = msg if dst not in agg else agg[dst] + msg
        x = {k: jnp.maximum(v, 0.0) for k, v in agg.items()}
    g = x['timeslice'].mean(axis=0)
    h1 = jnp.maximum(g @ params['cls']['w1'] + params['cls']['b1'], 0.0)
    return (h1 @ params['cls']['w2'] + params['cls']['b2'])[0]


# --------------------------------- main -----------------------------------------------------
if __name__ == "__main__":
    key = jax.random.PRNGKey(0)
    kp, kx, *kadj = jax.random.split(key, 2 + len(EDGE_TYPES))
    params = init_params(kp)
    ts_x = jax.random.normal(kx, (NUM_NODES['timeslice'], TS_FEAT_DIM), jnp.float32)
    adjs = {}
    for et, k in zip(EDGE_TYPES, kadj):
        src, _, dst = et
        adjs[et] = (jax.random.uniform(k, (NUM_NODES[dst], NUM_NODES[src])) < 0.35
                    ).astype(jnp.float32)

    out = forward(params, ts_x, adjs)
    out = jax.block_until_ready(out)

    ref = forward_ref(params, ts_x, adjs)
    # slightly looser tolerance: softmax denominator uses the EUP approximate reciprocal
    assert jnp.allclose(out, ref, atol=5e-3, rtol=5e-3), (float(out), float(ref))

    print("KERNEL_OK")
</pallas_src>

<mosaic_0001>
module attributes {stable_mosaic.version = 11 : i64} {
  func.func @fused_forward_kernel(%arg0: memref<16x16xf32, #tpu.memory_space<vmem>>, %arg1: memref<12x16xf32, #tpu.memory_space<vmem>>, %arg2: memref<8x16xf32, #tpu.memory_space<vmem>>, %arg3: memref<16x32xf32, #tpu.memory_space<vmem>>, %arg4: memref<1x32xf32, #tpu.memory_space<vmem>>, %arg5: memref<16x32xf32, #tpu.memory_space<vmem>>, %arg6: memref<1x32xf32, #tpu.memory_space<vmem>>, %arg7: memref<16x32xf32, #tpu.memory_space<vmem>>, %arg8: memref<1x32xf32, #tpu.memory_space<vmem>>, %arg9: memref<32x108xf32, #tpu.memory_space<vmem>>, %arg10: memref<32x36xf32, #tpu.memory_space<vmem>>, %arg11: memref<32x36xf32, #tpu.memory_space<vmem>>, %arg12: memref<12x32xf32, #tpu.memory_space<vmem>>, %arg13: memref<4x32xf32, #tpu.memory_space<vmem>>, %arg14: memref<4x32xf32, #tpu.memory_space<vmem>>, %arg15: memref<1x32xf32, #tpu.memory_space<vmem>>, %arg16: memref<1x32xf32, #tpu.memory_space<vmem>>, %arg17: memref<1x32xf32, #tpu.memory_space<vmem>>, %arg18: memref<1x32xf32, #tpu.memory_space<vmem>>, %arg19: memref<1x32xf32, #tpu.memory_space<vmem>>, %arg20: memref<32x108xf32, #tpu.memory_space<vmem>>, %arg21: memref<32x36xf32, #tpu.memory_space<vmem>>, %arg22: memref<32x36xf32, #tpu.memory_space<vmem>>, %arg23: memref<12x32xf32, #tpu.memory_space<vmem>>, %arg24: memref<4x32xf32, #tpu.memory_space<vmem>>, %arg25: memref<4x32xf32, #tpu.memory_space<vmem>>, %arg26: memref<1x32xf32, #tpu.memory_space<vmem>>, %arg27: memref<1x32xf32, #tpu.memory_space<vmem>>, %arg28: memref<1x32xf32, #tpu.memory_space<vmem>>, %arg29: memref<1x32xf32, #tpu.memory_space<vmem>>, %arg30: memref<1x32xf32, #tpu.memory_space<vmem>>, %arg31: memref<16x12xf32, #tpu.memory_space<vmem>>, %arg32: memref<16x8xf32, #tpu.memory_space<vmem>>, %arg33: memref<12x16xf32, #tpu.memory_space<vmem>>, %arg34: memref<8x16xf32, #tpu.memory_space<vmem>>, %arg35: memref<16x16xf32, #tpu.memory_space<vmem>>, %arg36: memref<4x32xf32, #tpu.memory_space<vmem>>, %arg37: memref<32x16xf32, #tpu.memory_space<vmem>>, %arg38: memref<1x16xf32, #tpu.memory_space<vmem>>, %arg39: memref<16x1xf32, #tpu.memory_space<vmem>>, %arg40: memref<1x1xf32, #tpu.memory_space<vmem>>, %arg41: memref<1x1xf32, #tpu.memory_space<vmem>>) attributes {dimension_semantics = [], scalar_prefetch = 0 : i64, scratch_operands = 0 : i64, tpu.core_type = #tpu.core_type<tc>} {
    %c0 = arith.constant 0 : index
    %c0_0 = arith.constant 0 : index
    %0 = vector.load %arg0[%c0, %c0_0] : memref<16x16xf32, #tpu.memory_space<vmem>>, vector<16x16xf32>
    %c0_1 = arith.constant 0 : index
    %c0_2 = arith.constant 0 : index
    %1 = vector.load %arg1[%c0_1, %c0_2] : memref<12x16xf32, #tpu.memory_space<vmem>>, vector<12x16xf32>
    %c0_3 = arith.constant 0 : index
    %c0_4 = arith.constant 0 : index
    %2 = vector.load %arg2[%c0_3, %c0_4] : memref<8x16xf32, #tpu.memory_space<vmem>>, vector<8x16xf32>
    %c0_5 = arith.constant 0 : index
    %c0_6 = arith.constant 0 : index
    %3 = vector.load %arg3[%c0_5, %c0_6] : memref<16x32xf32, #tpu.memory_space<vmem>>, vector<16x32xf32>
    %c0_7 = arith.constant 0 : index
    %c0_8 = arith.constant 0 : index
    %4 = vector.load %arg4[%c0_7, %c0_8] : memref<1x32xf32, #tpu.memory_space<vmem>>, vector<1x32xf32>
    %c0_9 = arith.constant 0 : index
    %c0_10 = arith.constant 0 : index
    %5 = vector.load %arg5[%c0_9, %c0_10] : memref<16x32xf32, #tpu.memory_space<vmem>>, vector<16x32xf32>
    %c0_11 = arith.constant 0 : index
    %c0_12 = arith.constant 0 : index
    %6 = vector.load %arg6[%c0_11, %c0_12] : memref<1x32xf32, #tpu.memory_space<vmem>>, vector<1x32xf32>
    %c0_13 = arith.constant 0 : index
    %c0_14 = arith.constant 0 : index
    %7 = vector.load %arg7[%c0_13, %c0_14] : memref<16x32xf32, #tpu.memory_space<vmem>>, vector<16x32xf32>
    %c0_15 = arith.constant 0 : index
    %c0_16 = arith.constant 0 : index
    %8 = vector.load %arg8[%c0_15, %c0_16] : memref<1x32xf32, #tpu.memory_space<vmem>>, vector<1x32xf32>
    %c0_17 = arith.constant 0 : index
    %c0_18 = arith.constant 0 : index
    %9 = vector.load %arg9[%c0_17, %c0_18] : memref<32x108xf32, #tpu.memory_space<vmem>>, vector<32x108xf32>
    %c0_19 = arith.constant 0 : index
    %c0_20 = arith.constant 0 : index
    %10 = vector.load %arg10[%c0_19, %c0_20] : memref<32x36xf32, #tpu.memory_space<vmem>>, vector<32x36xf32>
    %c0_21 = arith.constant 0 : index
    %c0_22 = arith.constant 0 : index
    %11 = vector.load %arg11[%c0_21, %c0_22] : memref<32x36xf32, #tpu.memory_space<vmem>>, vector<32x36xf32>
    %c0_23 = arith.constant 0 : index
    %c0_24 = arith.constant 0 : index
    %12 = vector.load %arg12[%c0_23, %c0_24] : memref<12x32xf32, #tpu.memory_space<vmem>>, vector<12x32xf32>
    %c0_25 = arith.constant 0 : index
    %c0_26 = arith.constant 0 : index
    %13 = vector.load %arg13[%c0_25, %c0_26] : memref<4x32xf32, #tpu.memory_space<vmem>>, vector<4x32xf32>
    %c0_27 = arith.constant 0 : index
    %c0_28 = arith.constant 0 : index
    %14 = vector.load %arg14[%c0_27, %c0_28] : memref<4x32xf32, #tpu.memory_space<vmem>>, vector<4x32xf32>
    %c0_29 = arith.constant 0 : index
    %c0_30 = arith.constant 0 : index
    %15 = vector.load %arg15[%c0_29, %c0_30] : memref<1x32xf32, #tpu.memory_space<vmem>>, vector<1x32xf32>
    %c0_31 = arith.constant 0 : index
    %c0_32 = arith.constant 0 : index
    %16 = vector.load %arg16[%c0_31, %c0_32] : memref<1x32xf32, #tpu.memory_space<vmem>>, vector<1x32xf32>
    %c0_33 = arith.constant 0 : index
    %c0_34 = arith.constant 0 : index
    %17 = vector.load %arg17[%c0_33, %c0_34] : memref<1x32xf32, #tpu.memory_space<vmem>>, vector<1x32xf32>
    %c0_35 = arith.constant 0 : index
    %c0_36 = arith.constant 0 : index
    %18 = vector.load %arg18[%c0_35, %c0_36] : memref<1x32xf32, #tpu.memory_space<vmem>>, vector<1x32xf32>
    %c0_37 = arith.constant 0 : index
    %c0_38 = arith.constant 0 : index
    %19 = vector.load %arg19[%c0_37, %c0_38] : memref<1x32xf32, #tpu.memory_space<vmem>>, vector<1x32xf32>
    %c0_39 = arith.constant 0 : index
    %c0_40 = arith.constant 0 : index
    %20 = vector.load %arg20[%c0_39, %c0_40] : memref<32x108xf32, #tpu.memory_space<vmem>>, vector<32x108xf32>
    %c0_41 = arith.constant 0 : index
    %c0_42 = arith.constant 0 : index
    %21 = vector.load %arg21[%c0_41, %c0_42] : memref<32x36xf32, #tpu.memory_space<vmem>>, vector<32x36xf32>
    %c0_43 = arith.constant 0 : index
    %c0_44 = arith.constant 0 : index
    %22 = vector.load %arg22[%c0_43, %c0_44] : memref<32x36xf32, #tpu.memory_space<vmem>>, vector<32x36xf32>
    %c0_45 = arith.constant 0 : index
    %c0_46 = arith.constant 0 : index
    %23 = vector.load %arg23[%c0_45, %c0_46] : memref<12x32xf32, #tpu.memory_space<vmem>>, vector<12x32xf32>
    %c0_47 = arith.constant 0 : index
    %c0_48 = arith.constant 0 : index
    %24 = vector.load %arg24[%c0_47, %c0_48] : memref<4x32xf32, #tpu.memory_space<vmem>>, vector<4x32xf32>
    %c0_49 = arith.constant 0 : index
    %c0_50 = arith.constant 0 : index
    %25 = vector.load %arg25[%c0_49, %c0_50] : memref<4x32xf32, #tpu.memory_space<vmem>>, vector<4x32xf32>
    %c0_51 = arith.constant 0 : index
    %c0_52 = arith.constant 0 : index
    %26 = vector.load %arg26[%c0_51, %c0_52] : memref<1x32xf32, #tpu.memory_space<vmem>>, vector<1x32xf32>
    %c0_53 = arith.constant 0 : index
    %c0_54 = arith.constant 0 : index
    %27 = vector.load %arg27[%c0_53, %c0_54] : memref<1x32xf32, #tpu.memory_space<vmem>>, vector<1x32xf32>
    %c0_55 = arith.constant 0 : index
    %c0_56 = arith.constant 0 : index
    %28 = vector.load %arg30[%c0_55, %c0_56] : memref<1x32xf32, #tpu.memory_space<vmem>>, vector<1x32xf32>
    %c0_57 = arith.constant 0 : index
    %c0_58 = arith.constant 0 : index
    %29 = vector.load %arg31[%c0_57, %c0_58] : memref<16x12xf32, #tpu.memory_space<vmem>>, vector<16x12xf32>
    %c0_59 = arith.constant 0 : index
    %c0_60 = arith.constant 0 : index
    %30 = vector.load %arg32[%c0_59, %c0_60] : memref<16x8xf32, #tpu.memory_space<vmem>>, vector<16x8xf32>
    %c0_61 = arith.constant 0 : index
    %c0_62 = arith.constant 0 : index
    %31 = vector.load %arg33[%c0_61, %c0_62] : memref<12x16xf32, #tpu.memory_space<vmem>>, vector<12x16xf32>
    %c0_63 = arith.constant 0 : index
    %c0_64 = arith.constant 0 : index
    %32 = vector.load %arg34[%c0_63, %c0_64] : memref<8x16xf32, #tpu.memory_space<vmem>>, vector<8x16xf32>
    %c0_65 = arith.constant 0 : index
    %c0_66 = arith.constant 0 : index
    %33 = vector.load %arg35[%c0_65, %c0_66] : memref<16x16xf32, #tpu.memory_space<vmem>>, vector<16x16xf32>
    %c0_67 = arith.constant 0 : index
    %c0_68 = arith.constant 0 : index
    %34 = vector.load %arg36[%c0_67, %c0_68] : memref<4x32xf32, #tpu.memory_space<vmem>>, vector<4x32xf32>
    %c0_69 = arith.constant 0 : index
    %c0_70 = arith.constant 0 : index
    %35 = vector.load %arg37[%c0_69, %c0_70] : memref<32x16xf32, #tpu.memory_space<vmem>>, vector<32x16xf32>
    %c0_71 = arith.constant 0 : index
    %c0_72 = arith.constant 0 : index
    %36 = vector.load %arg38[%c0_71, %c0_72] : memref<1x16xf32, #tpu.memory_space<vmem>>, vector<1x16xf32>
    %c0_73 = arith.constant 0 : index
    %c0_74 = arith.constant 0 : index
    %37 = vector.load %arg39[%c0_73, %c0_74] : memref<16x1xf32, #tpu.memory_space<vmem>>, vector<16x1xf32>
    %c0_75 = arith.constant 0 : index
    %c0_76 = arith.constant 0 : index
    %38 = vector.load %arg40[%c0_75, %c0_76] : memref<1x1xf32, #tpu.memory_space<vmem>>, vector<1x1xf32>
    %cst = arith.constant dense<0.000000e+00> : vector<16x32xf32>
    %39 = tpu.matmul %0, %3, %cst {dimension_numbers = #tpu.dot_dimension_numbers<[1], [0], [0], [1], [0, 0, 1, 1], [], []>} : vector<16x16xf32>, vector<16x32xf32>, vector<16x32xf32> -> vector<16x32xf32>
    %40 = vector.broadcast %4 : vector<1x32xf32> to vector<16x32xf32>
    %41 = arith.addf %39, %40 : vector<16x32xf32>
    %cst_77 = arith.constant dense<0.000000e+00> : vector<12x32xf32>
    %42 = tpu.matmul %1, %5, %cst_77 {dimension_numbers = #tpu.dot_dimension_numbers<[1], [0], [0], [1], [0, 0, 1, 1], [], []>} : vector<12x16xf32>, vector<16x32xf32>, vector<12x32xf32> -> vector<12x32xf32>
    %43 = vector.broadcast %6 : vector<1x32xf32> to vector<12x32xf32>
    %44 = arith.addf %42, %43 : vector<12x32xf32>
    %cst_78 = arith.constant dense<0.000000e+00> : vector<8x32xf32>
    %45 = tpu.matmul %2, %7, %cst_78 {dimension_numbers = #tpu.dot_dimension_numbers<[1], [0], [0], [1], [0, 0, 1, 1], [], []>} : vector<8x16xf32>, vector<16x32xf32>, vector<8x32xf32> -> vector<8x32xf32>
    %46 = vector.broadcast %8 : vector<1x32xf32> to vector<8x32xf32>
    %47 = arith.addf %45, %46 : vector<8x32xf32>
    %cst_79 = arith.constant dense<0.000000e+00> : vector<16x108xf32>
    %48 = tpu.matmul %41, %9, %cst_79 {dimension_numbers = #tpu.dot_dimension_numbers<[1], [0], [0], [1], [0, 0, 1, 1], [], []>} : vector<16x32xf32>, vector<32x108xf32>, vector<16x108xf32> -> vector<16x108xf32>
    %cst_80 = arith.constant dense<0.000000e+00> : vector<12x36xf32>
    %49 = tpu.matmul %44, %10, %cst_80 {dimension_numbers = #tpu.dot_dimension_numbers<[1], [0], [0], [1], [0, 0, 1, 1], [], []>} : vector<12x32xf32>, vector<32x36xf32>, vector<12x36xf32> -> vector<12x36xf32>
    %cst_81 = arith.constant dense<0.000000e+00> : vector<8x36xf32>
    %50 = tpu.matmul %47, %11, %cst_81 {dimension_numbers = #tpu.dot_dimension_numbers<[1], [0], [0], [1], [0, 0, 1, 1], [], []>} : vector<8x32xf32>, vector<32x36xf32>, vector<8x36xf32> -> vector<8x36xf32>
    %cst_82 = arith.constant dense<0.000000e+00> : vector<12x16xf32>
    %51 = tpu.matmul %12, %41, %cst_82 {dimension_numbers = #tpu.dot_dimension_numbers<[1], [1], [0], [0], [0, 0, 1, 0], [], []>} : vector<12x32xf32>, vector<16x32xf32>, vector<12x16xf32> -> vector<12x16xf32>
    %cst_83 = arith.constant dense<0.000000e+00> : vector<4x12xf32>
    %52 = tpu.matmul %13, %44, %cst_83 {dimension_numbers = #tpu.dot_dimension_numbers<[1], [1], [0], [0], [0, 0, 1, 0], [], []>} : vector<4x32xf32>, vector<12x32xf32>, vector<4x12xf32> -> vector<4x12xf32>
    %cst_84 = arith.constant dense<0.000000e+00> : vector<4x8xf32>
    %53 = tpu.matmul %14, %47, %cst_84 {dimension_numbers = #tpu.dot_dimension_numbers<[1], [1], [0], [0], [0, 0, 1, 0], [], []>} : vector<4x32xf32>, vector<8x32xf32>, vector<4x8xf32> -> vector<4x8xf32>
    %54 = vector.extract_strided_slice %49 {offsets = [0, 0], sizes = [12, 32], strides = [1, 1]} : vector<12x36xf32> to vector<12x32xf32>
    %55 = vector.extract_strided_slice %48 {offsets = [0, 96], sizes = [16, 4], strides = [1, 1]} : vector<16x108xf32> to vector<16x4xf32>
    %56 = vector.extract_strided_slice %55 {offsets = [0, 0], sizes = [16, 1], strides = [1, 1]} : vector<16x4xf32> to vector<16x1xf32>
    %57 = vector.extract_strided_slice %52 {offsets = [0, 0], sizes = [1, 12], strides = [1, 1]} : vector<4x12xf32> to vector<1x12xf32>
    %58 = vector.broadcast %56 : vector<16x1xf32> to vector<16x12xf32>
    %59 = vector.broadcast %57 : vector<1x12xf32> to vector<16x12xf32>
    %60 = arith.addf %58, %59 : vector<16x12xf32>
    %cst_85 = arith.constant 0.000000e+00 : f32
    %61 = vector.broadcast %cst_85 : f32 to vector<16x12xf32>
    %62 = arith.cmpf ogt, %60, %61 : vector<16x12xf32>
    %cst_86 = arith.constant 2.000000e-01 : f32
    %63 = vector.broadcast %cst_86 : f32 to vector<16x12xf32>
    %64 = arith.mulf %63, %60 : vector<16x12xf32>
    %65 = arith.select %62, %60, %64 : vector<16x12xi1>, vector<16x12xf32>
    %cst_87 = arith.constant 0.000000e+00 : f32
    %66 = vector.broadcast %cst_87 : f32 to vector<16x12xf32>
    %67 = arith.cmpf ogt, %29, %66 : vector<16x12xf32>
    %cst_88 = arith.constant -1.000000e+30 : f32
    %68 = vector.broadcast %cst_88 : f32 to vector<16x12xf32>
    %69 = arith.select %67, %65, %68 : vector<16x12xi1>, vector<16x12xf32>
    %cst_89 = arith.constant dense<0xFF800000> : vector<16xf32>
    %70 = vector.multi_reduction <maximumf>, %69, %cst_89 [1] : vector<16x12xf32> to vector<16xf32>
    %71 = vector.shape_cast %70 : vector<16xf32> to vector<16x1xf32>
    %72 = vector.broadcast %71 : vector<16x1xf32> to vector<16x12xf32>
    %73 = arith.subf %69, %72 : vector<16x12xf32>
    %74 = math.exp %73 : vector<16x12xf32>
    %75 = arith.mulf %74, %29 : vector<16x12xf32>
    %cst_90 = arith.constant dense<0.000000e+00> : vector<16xf32>
    %76 = vector.multi_reduction <add>, %75, %cst_90 [1] : vector<16x12xf32> to vector<16xf32>
    %77 = vector.shape_cast %76 : vector<16xf32> to vector<16x1xf32>
    %cst_91 = arith.constant 0.000000e+00 : f32
    %78 = vector.broadcast %cst_91 : f32 to vector<16x1xf32>
    %79 = arith.cmpf ogt, %77, %78 : vector<16x1xf32>
    %cst_92 = arith.constant 1.000000e+00 : f32
    %80 = vector.broadcast %cst_92 : f32 to vector<16x1xf32>
    %81 = arith.select %79, %77, %80 : vector<16x1xi1>, vector<16x1xf32>
    %cst_93 = arith.constant 0.000000e+00 : f32
    %82 = vector.broadcast %cst_93 : f32 to vector<16x1xf32>
    %83 = arith.cmpf ogt, %77, %82 : vector<16x1xf32>
    %84 = tpu.reciprocal %81 {approx = true} : vector<16x1xf32> -> vector<16x1xf32>
    %cst_94 = arith.constant 0.000000e+00 : f32
    %85 = vector.broadcast %cst_94 : f32 to vector<16x1xf32>
    %86 = arith.select %83, %84, %85 : vector<16x1xi1>, vector<16x1xf32>
    %87 = vector.broadcast %86 : vector<16x1xf32> to vector<16x12xf32>
    %88 = arith.mulf %75, %87 : vector<16x12xf32>
    %89 = vector.extract_strided_slice %34 {offsets = [0, 0], sizes = [1, 32], strides = [1, 1]} : vector<4x32xf32> to vector<1x32xf32>
    %90 = vector.broadcast %89 : vector<1x32xf32> to vector<12x32xf32>
    %91 = arith.mulf %54, %90 : vector<12x32xf32>
    %cst_95 = arith.constant dense<0.000000e+00> : vector<16x32xf32>
    %92 = tpu.matmul %88, %91, %cst_95 {dimension_numbers = #tpu.dot_dimension_numbers<[1], [0], [0], [1], [0, 0, 1, 1], [], []>} : vector<16x12xf32>, vector<12x32xf32>, vector<16x32xf32> -> vector<16x32xf32>
    %93 = vector.extract_strided_slice %55 {offsets = [0, 1], sizes = [16, 1], strides = [1, 1]} : vector<16x4xf32> to vector<16x1xf32>
    %94 = vector.extract_strided_slice %52 {offsets = [1, 0], sizes = [1, 12], strides = [1, 1]} : vector<4x12xf32> to vector<1x12xf32>
    %95 = vector.broadcast %93 : vector<16x1xf32> to vector<16x12xf32>
    %96 = vector.broadcast %94 : vector<1x12xf32> to vector<16x12xf32>
    %97 = arith.addf %95, %96 : vector<16x12xf32>
    %cst_96 = arith.constant 0.000000e+00 : f32
    %98 = vector.broadcast %cst_96 : f32 to vector<16x12xf32>
    %99 = arith.cmpf ogt, %97, %98 : vector<16x12xf32>
    %cst_97 = arith.constant 2.000000e-01 : f32
    %100 = vector.broadcast %cst_97 : f32 to vector<16x12xf32>
    %101 = arith.mulf %100, %97 : vector<16x12xf32>
    %102 = arith.select %99, %97, %101 : vector<16x12xi1>, vector<16x12xf32>
    %cst_98 = arith.constant 0.000000e+00 : f32
    %103 = vector.broadcast %cst_98 : f32 to vector<16x12xf32>
    %104 = arith.cmpf ogt, %29, %103 : vector<16x12xf32>
    %cst_99 = arith.constant -1.000000e+30 : f32
    %105 = vector.broadcast %cst_99 : f32 to vector<16x12xf32>
    %106 = arith.select %104, %102, %105 : vector<16x12xi1>, vector<16x12xf32>
    %cst_100 = arith.constant dense<0xFF800000> : vector<16xf32>
    %107 = vector.multi_reduction <maximumf>, %106, %cst_100 [1] : vector<16x12xf32> to vector<16xf32>
    %108 = vector.shape_cast %107 : vector<16xf32> to vector<16x1xf32>
    %109 = vector.broadcast %108 : vector<16x1xf32> to vector<16x12xf32>
    %110 = arith.subf %106, %109 : vector<16x12xf32>
    %111 = math.exp %110 : vector<16x12xf32>
    %112 = arith.mulf %111, %29 : vector<16x12xf32>
    %cst_101 = arith.constant dense<0.000000e+00> : vector<16xf32>
    %113 = vector.multi_reduction <add>, %112, %cst_101 [1] : vector<16x12xf32> to vector<16xf32>
    %114 = vector.shape_cast %113 : vector<16xf32> to vector<16x1xf32>
    %cst_102 = arith.constant 0.000000e+00 : f32
    %115 = vector.broadcast %cst_102 : f32 to vector<16x1xf32>
    %116 = arith.cmpf ogt, %114, %115 : vector<16x1xf32>
    %cst_103 = arith.constant 1.000000e+00 : f32
    %117 = vector.broadcast %cst_103 : f32 to vector<16x1xf32>
    %118 = arith.select %116, %114, %117 : vector<16x1xi1>, vector<16x1xf32>
    %cst_104 = arith.constant 0.000000e+00 : f32
    %119 = vector.broadcast %cst_104 : f32 to vector<16x1xf32>
    %120 = arith.cmpf ogt, %114, %119 : vector<16x1xf32>
    %121 = tpu.reciprocal %118 {approx = true} : vector<16x1xf32> -> vector<16x1xf32>
    %cst_105 = arith.constant 0.000000e+00 : f32
    %122 = vector.broadcast %cst_105 : f32 to vector<16x1xf32>
    %123 = arith.select %120, %121, %122 : vector<16x1xi1>, vector<16x1xf32>
    %124 = vector.broadcast %123 : vector<16x1xf32> to vector<16x12xf32>
    %125 = arith.mulf %112, %124 : vector<16x12xf32>
    %126 = vector.extract_strided_slice %34 {offsets = [1, 0], sizes = [1, 32], strides = [1, 1]} : vector<4x32xf32> to vector<1x32xf32>
    %127 = vector.broadcast %126 : vector<1x32xf32> to vector<12x32xf32>
    %128 = arith.mulf %54, %127 : vector<12x32xf32>
    %cst_106 = arith.constant dense<0.000000e+00> : vector<16x32xf32>
    %129 = tpu.matmul %125, %128, %cst_106 {dimension_numbers = #tpu.dot_dimension_numbers<[1], [0], [0], [1], [0, 0, 1, 1], [], []>} : vector<16x12xf32>, vector<12x32xf32>, vector<16x32xf32> -> vector<16x32xf32>
    %130 = arith.addf %92, %129 : vector<16x32xf32>
    %131 = vector.extract_strided_slice %55 {offsets = [0, 2], sizes = [16, 1], strides = [1, 1]} : vector<16x4xf32> to vector<16x1xf32>
    %132 = vector.extract_strided_slice %52 {offsets = [2, 0], sizes = [1, 12], strides = [1, 1]} : vector<4x12xf32> to vector<1x12xf32>
    %133 = vector.broadcast %131 : vector<16x1xf32> to vector<16x12xf32>
    %134 = vector.broadcast %132 : vector<1x12xf32> to vector<16x12xf32>
    %135 = arith.addf %133, %134 : vector<16x12xf32>
    %cst_107 = arith.constant 0.000000e+00 : f32
    %136 = vector.broadcast %cst_107 : f32 to vector<16x12xf32>
    %137 = arith.cmpf ogt, %135, %136 : vector<16x12xf32>
    %cst_108 = arith.constant 2.000000e-01 : f32
    %138 = vector.broadcast %cst_108 : f32 to vector<16x12xf32>
    %139 = arith.mulf %138, %135 : vector<16x12xf32>
    %140 = arith.select %137, %135, %139 : vector<16x12xi1>, vector<16x12xf32>
    %cst_109 = arith.constant 0.000000e+00 : f32
    %141 = vector.broadcast %cst_109 : f32 to vector<16x12xf32>
    %142 = arith.cmpf ogt, %29, %141 : vector<16x12xf32>
    %cst_110 = arith.constant -1.000000e+30 : f32
    %143 = vector.broadcast %cst_110 : f32 to vector<16x12xf32>
    %144 = arith.select %142, %140, %143 : vector<16x12xi1>, vector<16x12xf32>
    %cst_111 = arith.constant dense<0xFF800000> : vector<16xf32>
    %145 = vector.multi_reduction <maximumf>, %144, %cst_111 [1] : vector<16x12xf32> to vector<16xf32>
    %146 = vector.shape_cast %145 : vector<16xf32> to vector<16x1xf32>
    %147 = vector.broadcast %146 : vector<16x1xf32> to vector<16x12xf32>
    %148 = arith.subf %144, %147 : vector<16x12xf32>
    %149 = math.exp %148 : vector<16x12xf32>
    %150 = arith.mulf %149, %29 : vector<16x12xf32>
    %cst_112 = arith.constant dense<0.000000e+00> : vector<16xf32>
    %151 = vector.multi_reduction <add>, %150, %cst_112 [1] : vector<16x12xf32> to vector<16xf32>
    %152 = vector.shape_cast %151 : vector<16xf32> to vector<16x1xf32>
    %cst_113 = arith.constant 0.000000e+00 : f32
    %153 = vector.broadcast %cst_113 : f32 to vector<16x1xf32>
    %154 = arith.cmpf ogt, %152, %153 : vector<16x1xf32>
    %cst_114 = arith.constant 1.000000e+00 : f32
    %155 = vector.broadcast %cst_114 : f32 to vector<16x1xf32>
    %156 = arith.select %154, %152, %155 : vector<16x1xi1>, vector<16x1xf32>
    %cst_115 = arith.constant 0.000000e+00 : f32
    %157 = vector.broadcast %cst_115 : f32 to vector<16x1xf32>
    %158 = arith.cmpf ogt, %152, %157 : vector<16x1xf32>
    %159 = tpu.reciprocal %156 {approx = true} : vector<16x1xf32> -> vector<16x1xf32>
    %cst_116 = arith.constant 0.000000e+00 : f32
    %160 = vector.broadcast %cst_116 : f32 to vector<16x1xf32>
    %161 = arith.select %158, %159, %160 : vector<16x1xi1>, vector<16x1xf32>
    %162 = vector.broadcast %161 : vector<16x1xf32> to vector<16x12xf32>
    %163 = arith.mulf %150, %162 : vector<16x12xf32>
    %164 = vector.extract_strided_slice %34 {offsets = [2, 0], sizes = [1, 32], strides = [1, 1]} : vector<4x32xf32> to vector<1x32xf32>
    %165 = vector.broadcast %164 : vector<1x32xf32> to vector<12x32xf32>
    %166 = arith.mulf %54, %165 : vector<12x32xf32>
    %cst_117 = arith.constant dense<0.000000e+00> : vector<16x32xf32>
    %167 = tpu.matmul %163, %166, %cst_117 {dimension_numbers = #tpu.dot_dimension_numbers<[1], [0], [0], [1], [0, 0, 1, 1], [], []>} : vector<16x12xf32>, vector<12x32xf32>, vector<16x32xf32> -> vector<16x32xf32>
    %168 = arith.addf %130, %167 : vector<16x32xf32>
    %169 = vector.extract_strided_slice %55 {offsets = [0, 3], sizes = [16, 1], strides = [1, 1]} : vector<16x4xf32> to vector<16x1xf32>
    %170 = vector.extract_strided_slice %52 {offsets = [3, 0], sizes = [1, 12], strides = [1, 1]} : vector<4x12xf32> to vector<1x12xf32>
    %171 = vector.broadcast %169 : vector<16x1xf32> to vector<16x12xf32>
    %172 = vector.broadcast %170 : vector<1x12xf32> to vector<16x12xf32>
    %173 = arith.addf %171, %172 : vector<16x12xf32>
    %cst_118 = arith.constant 0.000000e+00 : f32
    %174 = vector.broadcast %cst_118 : f32 to vector<16x12xf32>
    %175 = arith.cmpf ogt, %173, %174 : vector<16x12xf32>
    %cst_119 = arith.constant 2.000000e-01 : f32
    %176 = vector.broadcast %cst_119 : f32 to vector<16x12xf32>
    %177 = arith.mulf %176, %173 : vector<16x12xf32>
    %178 = arith.select %175, %173, %177 : vector<16x12xi1>, vector<16x12xf32>
    %cst_120 = arith.constant 0.000000e+00 : f32
    %179 = vector.broadcast %cst_120 : f32 to vector<16x12xf32>
    %180 = arith.cmpf ogt, %29, %179 : vector<16x12xf32>
    %cst_121 = arith.constant -1.000000e+30 : f32
    %181 = vector.broadcast %cst_121 : f32 to vector<16x12xf32>
    %182 = arith.select %180, %178, %181 : vector<16x12xi1>, vector<16x12xf32>
    %cst_122 = arith.constant dense<0xFF800000> : vector<16xf32>
    %183 = vector.multi_reduction <maximumf>, %182, %cst_122 [1] : vector<16x12xf32> to vector<16xf32>
    %184 = vector.shape_cast %183 : vector<16xf32> to vector<16x1xf32>
    %185 = vector.broadcast %184 : vector<16x1xf32> to vector<16x12xf32>
    %186 = arith.subf %182, %185 : vector<16x12xf32>
    %187 = math.exp %186 : vector<16x12xf32>
    %188 = arith.mulf %187, %29 : vector<16x12xf32>
    %cst_123 = arith.constant dense<0.000000e+00> : vector<16xf32>
    %189 = vector.multi_reduction <add>, %188, %cst_123 [1] : vector<16x12xf32> to vector<16xf32>
    %190 = vector.shape_cast %189 : vector<16xf32> to vector<16x1xf32>
    %cst_124 = arith.constant 0.000000e+00 : f32
    %191 = vector.broadcast %cst_124 : f32 to vector<16x1xf32>
    %192 = arith.cmpf ogt, %190, %191 : vector<16x1xf32>
    %cst_125 = arith.constant 1.000000e+00 : f32
    %193 = vector.broadcast %cst_125 : f32 to vector<16x1xf32>
    %194 = arith.select %192, %190, %193 : vector<16x1xi1>, vector<16x1xf32>
    %cst_126 = arith.constant 0.000000e+00 : f32
    %195 = vector.broadcast %cst_126 : f32 to vector<16x1xf32>
    %196 = arith.cmpf ogt, %190, %195 : vector<16x1xf32>
    %197 = tpu.reciprocal %194 {approx = true} : vector<16x1xf32> -> vector<16x1xf32>
    %cst_127 = arith.constant 0.000000e+00 : f32
    %198 = vector.broadcast %cst_127 : f32 to vector<16x1xf32>
    %199 = arith.select %196, %197, %198 : vector<16x1xi1>, vector<16x1xf32>
    %200 = vector.broadcast %199 : vector<16x1xf32> to vector<16x12xf32>
    %201 = arith.mulf %188, %200 : vector<16x12xf32>
    %202 = vector.extract_strided_slice %34 {offsets = [3, 0], sizes = [1, 32], strides = [1, 1]} : vector<4x32xf32> to vector<1x32xf32>
    %203 = vector.broadcast %202 : vector<1x32xf32> to vector<12x32xf32>
    %204 = arith.mulf %54, %203 : vector<12x32xf32>
    %cst_128 = arith.constant dense<0.000000e+00> : vector<16x32xf32>
    %205 = tpu.matmul %201, %204, %cst_128 {dimension_numbers = #tpu.dot_dimension_numbers<[1], [0], [0], [1], [0, 0, 1, 1], [], []>} : vector<16x12xf32>, vector<12x32xf32>, vector<16x32xf32> -> vector<16x32xf32>
    %206 = arith.addf %168, %205 : vector<16x32xf32>
    %207 = vector.broadcast %15 : vector<1x32xf32> to vector<16x32xf32>
    %208 = arith.addf %206, %207 : vector<16x32xf32>
    %209 = vector.extract_strided_slice %50 {offsets = [0, 0], sizes = [8, 32], strides = [1, 1]} : vector<8x36xf32> to vector<8x32xf32>
    %210 = vector.extract_strided_slice %48 {offsets = [0, 100], sizes = [16, 4], strides = [1, 1]} : vector<16x108xf32> to vector<16x4xf32>
    %211 = vector.extract_strided_slice %210 {offsets = [0, 0], sizes = [16, 1], strides = [1, 1]} : vector<16x4xf32> to vector<16x1xf32>
    %212 = vector.extract_strided_slice %53 {offsets = [0, 0], sizes = [1, 8], strides = [1, 1]} : vector<4x8xf32> to vector<1x8xf32>
    %213 = vector.broadcast %211 : vector<16x1xf32> to vector<16x8xf32>
    %214 = vector.broadcast %212 : vector<1x8xf32> to vector<16x8xf32>
    %215 = arith.addf %213, %214 : vector<16x8xf32>
    %cst_129 = arith.constant 0.000000e+00 : f32
    %216 = vector.broadcast %cst_129 : f32 to vector<16x8xf32>
    %217 = arith.cmpf ogt, %215, %216 : vector<16x8xf32>
    %cst_130 = arith.constant 2.000000e-01 : f32
    %218 = vector.broadcast %cst_130 : f32 to vector<16x8xf32>
    %219 = arith.mulf %218, %215 : vector<16x8xf32>
    %220 = arith.select %217, %215, %219 : vector<16x8xi1>, vector<16x8xf32>
    %cst_131 = arith.constant 0.000000e+00 : f32
    %221 = vector.broadcast %cst_131 : f32 to vector<16x8xf32>
    %222 = arith.cmpf ogt, %30, %221 : vector<16x8xf32>
    %cst_132 = arith.constant -1.000000e+30 : f32
    %223 = vector.broadcast %cst_132 : f32 to vector<16x8xf32>
    %224 = arith.select %222, %220, %223 : vector<16x8xi1>, vector<16x8xf32>
    %cst_133 = arith.constant dense<0xFF800000> : vector<16xf32>
    %225 = vector.multi_reduction <maximumf>, %224, %cst_133 [1] : vector<16x8xf32> to vector<16xf32>
    %226 = vector.shape_cast %225 : vector<16xf32> to vector<16x1xf32>
    %227 = vector.broadcast %226 : vector<16x1xf32> to vector<16x8xf32>
    %228 = arith.subf %224, %227 : vector<16x8xf32>
    %229 = math.exp %228 : vector<16x8xf32>
    %230 = arith.mulf %229, %30 : vector<16x8xf32>
    %cst_134 = arith.constant dense<0.000000e+00> : vector<16xf32>
    %231 = vector.multi_reduction <add>, %230, %cst_134 [1] : vector<16x8xf32> to vector<16xf32>
    %232 = vector.shape_cast %231 : vector<16xf32> to vector<16x1xf32>
    %cst_135 = arith.constant 0.000000e+00 : f32
    %233 = vector.broadcast %cst_135 : f32 to vector<16x1xf32>
    %234 = arith.cmpf ogt, %232, %233 : vector<16x1xf32>
    %cst_136 = arith.constant 1.000000e+00 : f32
    %235 = vector.broadcast %cst_136 : f32 to vector<16x1xf32>
    %236 = arith.select %234, %232, %235 : vector<16x1xi1>, vector<16x1xf32>
    %cst_137 = arith.constant 0.000000e+00 : f32
    %237 = vector.broadcast %cst_137 : f32 to vector<16x1xf32>
    %238 = arith.cmpf ogt, %232, %237 : vector<16x1xf32>
    %239 = tpu.reciprocal %236 {approx = true} : vector<16x1xf32> -> vector<16x1xf32>
    %cst_138 = arith.constant 0.000000e+00 : f32
    %240 = vector.broadcast %cst_138 : f32 to vector<16x1xf32>
    %241 = arith.select %238, %239, %240 : vector<16x1xi1>, vector<16x1xf32>
    %242 = vector.broadcast %241 : vector<16x1xf32> to vector<16x8xf32>
    %243 = arith.mulf %230, %242 : vector<16x8xf32>
    %244 = vector.extract_strided_slice %34 {offsets = [0, 0], sizes = [1, 32], strides = [1, 1]} : vector<4x32xf32> to vector<1x32xf32>
    %245 = vector.broadcast %244 : vector<1x32xf32> to vector<8x32xf32>
    %246 = arith.mulf %209, %245 : vector<8x32xf32>
    %cst_139 = arith.constant dense<0.000000e+00> : vector<16x32xf32>
    %247 = tpu.matmul %243, %246, %cst_139 {dimension_numbers = #tpu.dot_dimension_numbers<[1], [0], [0], [1], [0, 0, 1, 1], [], []>} : vector<16x8xf32>, vector<8x32xf32>, vector<16x32xf32> -> vector<16x32xf32>
    %248 = vector.extract_strided_slice %210 {offsets = [0, 1], sizes = [16, 1], strides = [1, 1]} : vector<16x4xf32> to vector<16x1xf32>
    %249 = vector.extract_strided_slice %53 {offsets = [1, 0], sizes = [1, 8], strides = [1, 1]} : vector<4x8xf32> to vector<1x8xf32>
    %250 = vector.broadcast %248 : vector<16x1xf32> to vector<16x8xf32>
    %251 = vector.broadcast %249 : vector<1x8xf32> to vector<16x8xf32>
    %252 = arith.addf %250, %251 : vector<16x8xf32>
    %cst_140 = arith.constant 0.000000e+00 : f32
    %253 = vector.broadcast %cst_140 : f32 to vector<16x8xf32>
    %254 = arith.cmpf ogt, %252, %253 : vector<16x8xf32>
    %cst_141 = arith.constant 2.000000e-01 : f32
    %255 = vector.broadcast %cst_141 : f32 to vector<16x8xf32>
    %256 = arith.mulf %255, %252 : vector<16x8xf32>
    %257 = arith.select %254, %252, %256 : vector<16x8xi1>, vector<16x8xf32>
    %cst_142 = arith.constant 0.000000e+00 : f32
    %258 = vector.broadcast %cst_142 : f32 to vector<16x8xf32>
    %259 = arith.cmpf ogt, %30, %258 : vector<16x8xf32>
    %cst_143 = arith.constant -1.000000e+30 : f32
    %260 = vector.broadcast %cst_143 : f32 to vector<16x8xf32>
    %261 = arith.select %259, %257, %260 : vector<16x8xi1>, vector<16x8xf32>
    %cst_144 = arith.constant dense<0xFF800000> : vector<16xf32>
    %262 = vector.multi_reduction <maximumf>, %261, %cst_144 [1] : vector<16x8xf32> to vector<16xf32>
    %263 = vector.shape_cast %262 : vector<16xf32> to vector<16x1xf32>
    %264 = vector.broadcast %263 : vector<16x1xf32> to vector<16x8xf32>
    %265 = arith.subf %261, %264 : vector<16x8xf32>
    %266 = math.exp %265 : vector<16x8xf32>
    %267 = arith.mulf %266, %30 : vector<16x8xf32>
    %cst_145 = arith.constant dense<0.000000e+00> : vector<16xf32>
    %268 = vector.multi_reduction <add>, %267, %cst_145 [1] : vector<16x8xf32> to vector<16xf32>
    %269 = vector.shape_cast %268 : vector<16xf32> to vector<16x1xf32>
    %cst_146 = arith.constant 0.000000e+00 : f32
    %270 = vector.broadcast %cst_146 : f32 to vector<16x1xf32>
    %271 = arith.cmpf ogt, %269, %270 : vector<16x1xf32>
    %cst_147 = arith.constant 1.000000e+00 : f32
    %272 = vector.broadcast %cst_147 : f32 to vector<16x1xf32>
    %273 = arith.select %271, %269, %272 : vector<16x1xi1>, vector<16x1xf32>
    %cst_148 = arith.constant 0.000000e+00 : f32
    %274 = vector.broadcast %cst_148 : f32 to vector<16x1xf32>
    %275 = arith.cmpf ogt, %269, %274 : vector<16x1xf32>
    %276 = tpu.reciprocal %273 {approx = true} : vector<16x1xf32> -> vector<16x1xf32>
    %cst_149 = arith.constant 0.000000e+00 : f32
    %277 = vector.broadcast %cst_149 : f32 to vector<16x1xf32>
    %278 = arith.select %275, %276, %277 : vector<16x1xi1>, vector<16x1xf32>
    %279 = vector.broadcast %278 : vector<16x1xf32> to vector<16x8xf32>
    %280 = arith.mulf %267, %279 : vector<16x8xf32>
    %281 = vector.extract_strided_slice %34 {offsets = [1, 0], sizes = [1, 32], strides = [1, 1]} : vector<4x32xf32> to vector<1x32xf32>
    %282 = vector.broadcast %281 : vector<1x32xf32> to vector<8x32xf32>
    %283 = arith.mulf %209, %282 : vector<8x32xf32>
    %cst_150 = arith.constant dense<0.000000e+00> : vector<16x32xf32>
    %284 = tpu.matmul %280, %283, %cst_150 {dimension_numbers = #tpu.dot_dimension_numbers<[1], [0], [0], [1], [0, 0, 1, 1], [], []>} : vector<16x8xf32>, vector<8x32xf32>, vector<16x32xf32> -> vector<16x32xf32>
    %285 = arith.addf %247, %284 : vector<16x32xf32>
    %286 = vector.extract_strided_slice %210 {offsets = [0, 2], sizes = [16, 1], strides = [1, 1]} : vector<16x4xf32> to vector<16x1xf32>
    %287 = vector.extract_strided_slice %53 {offsets = [2, 0], sizes = [1, 8], strides = [1, 1]} : vector<4x8xf32> to vector<1x8xf32>
    %288 = vector.broadcast %286 : vector<16x1xf32> to vector<16x8xf32>
    %289 = vector.broadcast %287 : vector<1x8xf32> to vector<16x8xf32>
    %290 = arith.addf %288, %289 : vector<16x8xf32>
    %cst_151 = arith.constant 0.000000e+00 : f32
    %291 = vector.broadcast %cst_151 : f32 to vector<16x8xf32>
    %292 = arith.cmpf ogt, %290, %291 : vector<16x8xf32>
    %cst_152 = arith.constant 2.000000e-01 : f32
    %293 = vector.broadcast %cst_152 : f32 to vector<16x8xf32>
    %294 = arith.mulf %293, %290 : vector<16x8xf32>
    %295 = arith.select %292, %290, %294 : vector<16x8xi1>, vector<16x8xf32>
    %cst_153 = arith.constant 0.000000e+00 : f32
    %296 = vector.broadcast %cst_153 : f32 to vector<16x8xf32>
    %297 = arith.cmpf ogt, %30, %296 : vector<16x8xf32>
    %cst_154 = arith.constant -1.000000e+30 : f32
    %298 = vector.broadcast %cst_154 : f32 to vector<16x8xf32>
    %299 = arith.select %297, %295, %298 : vector<16x8xi1>, vector<16x8xf32>
    %cst_155 = arith.constant dense<0xFF800000> : vector<16xf32>
    %300 = vector.multi_reduction <maximumf>, %299, %cst_155 [1] : vector<16x8xf32> to vector<16xf32>
    %301 = vector.shape_cast %300 : vector<16xf32> to vector<16x1xf32>
    %302 = vector.broadcast %301 : vector<16x1xf32> to vector<16x8xf32>
    %303 = arith.subf %299, %302 : vector<16x8xf32>
    %304 = math.exp %303 : vector<16x8xf32>
    %305 = arith.mulf %304, %30 : vector<16x8xf32>
    %cst_156 = arith.constant dense<0.000000e+00> : vector<16xf32>
    %306 = vector.multi_reduction <add>, %305, %cst_156 [1] : vector<16x8xf32> to vector<16xf32>
    %307 = vector.shape_cast %306 : vector<16xf32> to vector<16x1xf32>
    %cst_157 = arith.constant 0.000000e+00 : f32
    %308 = vector.broadcast %cst_157 : f32 to vector<16x1xf32>
    %309 = arith.cmpf ogt, %307, %308 : vector<16x1xf32>
    %cst_158 = arith.constant 1.000000e+00 : f32
    %310 = vector.broadcast %cst_158 : f32 to vector<16x1xf32>
    %311 = arith.select %309, %307, %310 : vector<16x1xi1>, vector<16x1xf32>
    %cst_159 = arith.constant 0.000000e+00 : f32
    %312 = vector.broadcast %cst_159 : f32 to vector<16x1xf32>
    %313 = arith.cmpf ogt, %307, %312 : vector<16x1xf32>
    %314 = tpu.reciprocal %311 {approx = true} : vector<16x1xf32> -> vector<16x1xf32>
    %cst_160 = arith.constant 0.000000e+00 : f32
    %315 = vector.broadcast %cst_160 : f32 to vector<16x1xf32>
    %316 = arith.select %313, %314, %315 : vector<16x1xi1>, vector<16x1xf32>
    %317 = vector.broadcast %316 : vector<16x1xf32> to vector<16x8xf32>
    %318 = arith.mulf %305, %317 : vector<16x8xf32>
    %319 = vector.extract_strided_slice %34 {offsets = [2, 0], sizes = [1, 32], strides = [1, 1]} : vector<4x32xf32> to vector<1x32xf32>
    %320 = vector.broadcast %319 : vector<1x32xf32> to vector<8x32xf32>
    %321 = arith.mulf %209, %320 : vector<8x32xf32>
    %cst_161 = arith.constant dense<0.000000e+00> : vector<16x32xf32>
    %322 = tpu.matmul %318, %321, %cst_161 {dimension_numbers = #tpu.dot_dimension_numbers<[1], [0], [0], [1], [0, 0, 1, 1], [], []>} : vector<16x8xf32>, vector<8x32xf32>, vector<16x32xf32> -> vector<16x32xf32>
    %323 = arith.addf %285, %322 : vector<16x32xf32>
    %324 = vector.extract_strided_slice %210 {offsets = [0, 3], sizes = [16, 1], strides = [1, 1]} : vector<16x4xf32> to vector<16x1xf32>
    %325 = vector.extract_strided_slice %53 {offsets = [3, 0], sizes = [1, 8], strides = [1, 1]} : vector<4x8xf32> to vector<1x8xf32>
    %326 = vector.broadcast %324 : vector<16x1xf32> to vector<16x8xf32>
    %327 = vector.broadcast %325 : vector<1x8xf32> to vector<16x8xf32>
    %328 = arith.addf %326, %327 : vector<16x8xf32>
    %cst_162 = arith.constant 0.000000e+00 : f32
    %329 = vector.broadcast %cst_162 : f32 to vector<16x8xf32>
    %330 = arith.cmpf ogt, %328, %329 : vector<16x8xf32>
    %cst_163 = arith.constant 2.000000e-01 : f32
    %331 = vector.broadcast %cst_163 : f32 to vector<16x8xf32>
    %332 = arith.mulf %331, %328 : vector<16x8xf32>
    %333 = arith.select %330, %328, %332 : vector<16x8xi1>, vector<16x8xf32>
    %cst_164 = arith.constant 0.000000e+00 : f32
    %334 = vector.broadcast %cst_164 : f32 to vector<16x8xf32>
    %335 = arith.cmpf ogt, %30, %334 : vector<16x8xf32>
    %cst_165 = arith.constant -1.000000e+30 : f32
    %336 = vector.broadcast %cst_165 : f32 to vector<16x8xf32>
    %337 = arith.select %335, %333, %336 : vector<16x8xi1>, vector<16x8xf32>
    %cst_166 = arith.constant dense<0xFF800000> : vector<16xf32>
    %338 = vector.multi_reduction <maximumf>, %337, %cst_166 [1] : vector<16x8xf32> to vector<16xf32>
    %339 = vector.shape_cast %338 : vector<16xf32> to vector<16x1xf32>
    %340 = vector.broadcast %339 : vector<16x1xf32> to vector<16x8xf32>
    %341 = arith.subf %337, %340 : vector<16x8xf32>
    %342 = math.exp %341 : vector<16x8xf32>
    %343 = arith.mulf %342, %30 : vector<16x8xf32>
    %cst_167 = arith.constant dense<0.000000e+00> : vector<16xf32>
    %344 = vector.multi_reduction <add>, %343, %cst_167 [1] : vector<16x8xf32> to vector<16xf32>
    %345 = vector.shape_cast %344 : vector<16xf32> to vector<16x1xf32>
    %cst_168 = arith.constant 0.000000e+00 : f32
    %346 = vector.broadcast %cst_168 : f32 to vector<16x1xf32>
    %347 = arith.cmpf ogt, %345, %346 : vector<16x1xf32>
    %cst_169 = arith.constant 1.000000e+00 : f32
    %348 = vector.broadcast %cst_169 : f32 to vector<16x1xf32>
    %349 = arith.select %347, %345, %348 : vector<16x1xi1>, vector<16x1xf32>
    %cst_170 = arith.constant 0.000000e+00 : f32
    %350 = vector.broadcast %cst_170 : f32 to vector<16x1xf32>
    %351 = arith.cmpf ogt, %345, %350 : vector<16x1xf32>
    %352 = tpu.reciprocal %349 {approx = true} : vector<16x1xf32> -> vector<16x1xf32>
    %cst_171 = arith.constant 0.000000e+00 : f32
    %353 = vector.broadcast %cst_171 : f32 to vector<16x1xf32>
    %354 = arith.select %351, %352, %353 : vector<16x1xi1>, vector<16x1xf32>
    %355 = vector.broadcast %354 : vector<16x1xf32> to vector<16x8xf32>
    %356 = arith.mulf %343, %355 : vector<16x8xf32>
    %357 = vector.extract_strided_slice %34 {offsets = [3, 0], sizes = [1, 32], strides = [1, 1]} : vector<4x32xf32> to vector<1x32xf32>
    %358 = vector.broadcast %357 : vector<1x32xf32> to vector<8x32xf32>
    %359 = arith.mulf %209, %358 : vector<8x32xf32>
    %cst_172 = arith.constant dense<0.000000e+00> : vector<16x32xf32>
    %360 = tpu.matmul %356, %359, %cst_172 {dimension_numbers = #tpu.dot_dimension_numbers<[1], [0], [0], [1], [0, 0, 1, 1], [], []>} : vector<16x8xf32>, vector<8x32xf32>, vector<16x32xf32> -> vector<16x32xf32>
    %361 = arith.addf %323, %360 : vector<16x32xf32>
    %362 = vector.broadcast %16 : vector<1x32xf32> to vector<16x32xf32>
    %363 = arith.addf %361, %362 : vector<16x32xf32>
    %364 = arith.addf %208, %363 : vector<16x32xf32>
    %365 = vector.extract_strided_slice %48 {offsets = [0, 0], sizes = [16, 32], strides = [1, 1]} : vector<16x108xf32> to vector<16x32xf32>
    %366 = vector.extract_strided_slice %49 {offsets = [0, 32], sizes = [12, 4], strides = [1, 1]} : vector<12x36xf32> to vector<12x4xf32>
    %367 = vector.extract_strided_slice %51 {offsets = [0, 0], sizes = [4, 16], strides = [1, 1]} : vector<12x16xf32> to vector<4x16xf32>
    %368 = vector.extract_strided_slice %366 {offsets = [0, 0], sizes = [12, 1], strides = [1, 1]} : vector<12x4xf32> to vector<12x1xf32>
    %369 = vector.extract_strided_slice %367 {offsets = [0, 0], sizes = [1, 16], strides = [1, 1]} : vector<4x16xf32> to vector<1x16xf32>
    %370 = vector.broadcast %368 : vector<12x1xf32> to vector<12x16xf32>
    %371 = vector.broadcast %369 : vector<1x16xf32> to vector<12x16xf32>
    %372 = arith.addf %370, %371 : vector<12x16xf32>
    %cst_173 = arith.constant 0.000000e+00 : f32
    %373 = vector.broadcast %cst_173 : f32 to vector<12x16xf32>
    %374 = arith.cmpf ogt, %372, %373 : vector<12x16xf32>
    %cst_174 = arith.constant 2.000000e-01 : f32
    %375 = vector.broadcast %cst_174 : f32 to vector<12x16xf32>
    %376 = arith.mulf %375, %372 : vector<12x16xf32>
    %377 = arith.select %374, %372, %376 : vector<12x16xi1>, vector<12x16xf32>
    %cst_175 = arith.constant 0.000000e+00 : f32
    %378 = vector.broadcast %cst_175 : f32 to vector<12x16xf32>
    %379 = arith.cmpf ogt, %31, %378 : vector<12x16xf32>
    %cst_176 = arith.constant -1.000000e+30 : f32
    %380 = vector.broadcast %cst_176 : f32 to vector<12x16xf32>
    %381 = arith.select %379, %377, %380 : vector<12x16xi1>, vector<12x16xf32>
    %cst_177 = arith.constant dense<0xFF800000> : vector<12xf32>
    %382 = vector.multi_reduction <maximumf>, %381, %cst_177 [1] : vector<12x16xf32> to vector<12xf32>
    %383 = vector.shape_cast %382 : vector<12xf32> to vector<12x1xf32>
    %384 = vector.broadcast %383 : vector<12x1xf32> to vector<12x16xf32>
    %385 = arith.subf %381, %384 : vector<12x16xf32>
    %386 = math.exp %385 : vector<12x16xf32>
    %387 = arith.mulf %386, %31 : vector<12x16xf32>
    %cst_178 = arith.constant dense<0.000000e+00> : vector<12xf32>
    %388 = vector.multi_reduction <add>, %387, %cst_178 [1] : vector<12x16xf32> to vector<12xf32>
    %389 = vector.shape_cast %388 : vector<12xf32> to vector<12x1xf32>
    %cst_179 = arith.constant 0.000000e+00 : f32
    %390 = vector.broadcast %cst_179 : f32 to vector<12x1xf32>
    %391 = arith.cmpf ogt, %389, %390 : vector<12x1xf32>
    %cst_180 = arith.constant 1.000000e+00 : f32
    %392 = vector.broadcast %cst_180 : f32 to vector<12x1xf32>
    %393 = arith.select %391, %389, %392 : vector<12x1xi1>, vector<12x1xf32>
    %cst_181 = arith.constant 0.000000e+00 : f32
    %394 = vector.broadcast %cst_181 : f32 to vector<12x1xf32>
    %395 = arith.cmpf ogt, %389, %394 : vector<12x1xf32>
    %396 = tpu.reciprocal %393 {approx = true} : vector<12x1xf32> -> vector<12x1xf32>
    %cst_182 = arith.constant 0.000000e+00 : f32
    %397 = vector.broadcast %cst_182 : f32 to vector<12x1xf32>
    %398 = arith.select %395, %396, %397 : vector<12x1xi1>, vector<12x1xf32>
    %399 = vector.broadcast %398 : vector<12x1xf32> to vector<12x16xf32>
    %400 = arith.mulf %387, %399 : vector<12x16xf32>
    %401 = vector.extract_strided_slice %34 {offsets = [0, 0], sizes = [1, 32], strides = [1, 1]} : vector<4x32xf32> to vector<1x32xf32>
    %402 = vector.broadcast %401 : vector<1x32xf32> to vector<16x32xf32>
    %403 = arith.mulf %365, %402 : vector<16x32xf32>
    %cst_183 = arith.constant dense<0.000000e+00> : vector<12x32xf32>
    %404 = tpu.matmul %400, %403, %cst_183 {dimension_numbers = #tpu.dot_dimension_numbers<[1], [0], [0], [1], [0, 0, 1, 1], [], []>} : vector<12x16xf32>, vector<16x32xf32>, vector<12x32xf32> -> vector<12x32xf32>
    %405 = vector.extract_strided_slice %366 {offsets = [0, 1], sizes = [12, 1], strides = [1, 1]} : vector<12x4xf32> to vector<12x1xf32>
    %406 = vector.extract_strided_slice %367 {offsets = [1, 0], sizes = [1, 16], strides = [1, 1]} : vector<4x16xf32> to vector<1x16xf32>
    %407 = vector.broadcast %405 : vector<12x1xf32> to vector<12x16xf32>
    %408 = vector.broadcast %406 : vector<1x16xf32> to vector<12x16xf32>
    %409 = arith.addf %407, %408 : vector<12x16xf32>
    %cst_184 = arith.constant 0.000000e+00 : f32
    %410 = vector.broadcast %cst_184 : f32 to vector<12x16xf32>
    %411 = arith.cmpf ogt, %409, %410 : vector<12x16xf32>
    %cst_185 = arith.constant 2.000000e-01 : f32
    %412 = vector.broadcast %cst_185 : f32 to vector<12x16xf32>
    %413 = arith.mulf %412, %409 : vector<12x16xf32>
    %414 = arith.select %411, %409, %413 : vector<12x16xi1>, vector<12x16xf32>
    %cst_186 = arith.constant 0.000000e+00 : f32
    %415 = vector.broadcast %cst_186 : f32 to vector<12x16xf32>
    %416 = arith.cmpf ogt, %31, %415 : vector<12x16xf32>
    %cst_187 = arith.constant -1.000000e+30 : f32
    %417 = vector.broadcast %cst_187 : f32 to vector<12x16xf32>
    %418 = arith.select %416, %414, %417 : vector<12x16xi1>, vector<12x16xf32>
    %cst_188 = arith.constant dense<0xFF800000> : vector<12xf32>
    %419 = vector.multi_reduction <maximumf>, %418, %cst_188 [1] : vector<12x16xf32> to vector<12xf32>
    %420 = vector.shape_cast %419 : vector<12xf32> to vector<12x1xf32>
    %421 = vector.broadcast %420 : vector<12x1xf32> to vector<12x16xf32>
    %422 = arith.subf %418, %421 : vector<12x16xf32>
    %423 = math.exp %422 : vector<12x16xf32>
    %424 = arith.mulf %423, %31 : vector<12x16xf32>
    %cst_189 = arith.constant dense<0.000000e+00> : vector<12xf32>
    %425 = vector.multi_reduction <add>, %424, %cst_189 [1] : vector<12x16xf32> to vector<12xf32>
    %426 = vector.shape_cast %425 : vector<12xf32> to vector<12x1xf32>
    %cst_190 = arith.constant 0.000000e+00 : f32
    %427 = vector.broadcast %cst_190 : f32 to vector<12x1xf32>
    %428 = arith.cmpf ogt, %426, %427 : vector<12x1xf32>
    %cst_191 = arith.constant 1.000000e+00 : f32
    %429 = vector.broadcast %cst_191 : f32 to vector<12x1xf32>
    %430 = arith.select %428, %426, %429 : vector<12x1xi1>, vector<12x1xf32>
    %cst_192 = arith.constant 0.000000e+00 : f32
    %431 = vector.broadcast %cst_192 : f32 to vector<12x1xf32>
    %432 = arith.cmpf ogt, %426, %431 : vector<12x1xf32>
    %433 = tpu.reciprocal %430 {approx = true} : vector<12x1xf32> -> vector<12x1xf32>
    %cst_193 = arith.constant 0.000000e+00 : f32
    %434 = vector.broadcast %cst_193 : f32 to vector<12x1xf32>
    %435 = arith.select %432, %433, %434 : vector<12x1xi1>, vector<12x1xf32>
    %436 = vector.broadcast %435 : vector<12x1xf32> to vector<12x16xf32>
    %437 = arith.mulf %424, %436 : vector<12x16xf32>
    %438 = vector.extract_strided_slice %34 {offsets = [1, 0], sizes = [1, 32], strides = [1, 1]} : vector<4x32xf32> to vector<1x32xf32>
    %439 = vector.broadcast %438 : vector<1x32xf32> to vector<16x32xf32>
    %440 = arith.mulf %365, %439 : vector<16x32xf32>
    %cst_194 = arith.constant dense<0.000000e+00> : vector<12x32xf32>
    %441 = tpu.matmul %437, %440, %cst_194 {dimension_numbers = #tpu.dot_dimension_numbers<[1], [0], [0], [1], [0, 0, 1, 1], [], []>} : vector<12x16xf32>, vector<16x32xf32>, vector<12x32xf32> -> vector<12x32xf32>
    %442 = arith.addf %404, %441 : vector<12x32xf32>
    %443 = vector.extract_strided_slice %366 {offsets = [0, 2], sizes = [12, 1], strides = [1, 1]} : vector<12x4xf32> to vector<12x1xf32>
    %444 = vector.extract_strided_slice %367 {offsets = [2, 0], sizes = [1, 16], strides = [1, 1]} : vector<4x16xf32> to vector<1x16xf32>
    %445 = vector.broadcast %443 : vector<12x1xf32> to vector<12x16xf32>
    %446 = vector.broadcast %444 : vector<1x16xf32> to vector<12x16xf32>
    %447 = arith.addf %445, %446 : vector<12x16xf32>
    %cst_195 = arith.constant 0.000000e+00 : f32
    %448 = vector.broadcast %cst_195 : f32 to vector<12x16xf32>
    %449 = arith.cmpf ogt, %447, %448 : vector<12x16xf32>
    %cst_196 = arith.constant 2.000000e-01 : f32
    %450 = vector.broadcast %cst_196 : f32 to vector<12x16xf32>
    %451 = arith.mulf %450, %447 : vector<12x16xf32>
    %452 = arith.select %449, %447, %451 : vector<12x16xi1>, vector<12x16xf32>
    %cst_197 = arith.constant 0.000000e+00 : f32
    %453 = vector.broadcast %cst_197 : f32 to vector<12x16xf32>
    %454 = arith.cmpf ogt, %31, %453 : vector<12x16xf32>
    %cst_198 = arith.constant -1.000000e+30 : f32
    %455 = vector.broadcast %cst_198 : f32 to vector<12x16xf32>
    %456 = arith.select %454, %452, %455 : vector<12x16xi1>, vector<12x16xf32>
    %cst_199 = arith.constant dense<0xFF800000> : vector<12xf32>
    %457 = vector.multi_reduction <maximumf>, %456, %cst_199 [1] : vector<12x16xf32> to vector<12xf32>
    %458 = vector.shape_cast %457 : vector<12xf32> to vector<12x1xf32>
    %459 = vector.broadcast %458 : vector<12x1xf32> to vector<12x16xf32>
    %460 = arith.subf %456, %459 : vector<12x16xf32>
    %461 = math.exp %460 : vector<12x16xf32>
    %462 = arith.mulf %461, %31 : vector<12x16xf32>
    %cst_200 = arith.constant dense<0.000000e+00> : vector<12xf32>
    %463 = vector.multi_reduction <add>, %462, %cst_200 [1] : vector<12x16xf32> to vector<12xf32>
    %464 = vector.shape_cast %463 : vector<12xf32> to vector<12x1xf32>
    %cst_201 = arith.constant 0.000000e+00 : f32
    %465 = vector.broadcast %cst_201 : f32 to vector<12x1xf32>
    %466 = arith.cmpf ogt, %464, %465 : vector<12x1xf32>
    %cst_202 = arith.constant 1.000000e+00 : f32
    %467 = vector.broadcast %cst_202 : f32 to vector<12x1xf32>
    %468 = arith.select %466, %464, %467 : vector<12x1xi1>, vector<12x1xf32>
    %cst_203 = arith.constant 0.000000e+00 : f32
    %469 = vector.broadcast %cst_203 : f32 to vector<12x1xf32>
    %470 = arith.cmpf ogt, %464, %469 : vector<12x1xf32>
    %471 = tpu.reciprocal %468 {approx = true} : vector<12x1xf32> -> vector<12x1xf32>
    %cst_204 = arith.constant 0.000000e+00 : f32
    %472 = vector.broadcast %cst_204 : f32 to vector<12x1xf32>
    %473 = arith.select %470, %471, %472 : vector<12x1xi1>, vector<12x1xf32>
    %474 = vector.broadcast %473 : vector<12x1xf32> to vector<12x16xf32>
    %475 = arith.mulf %462, %474 : vector<12x16xf32>
    %476 = vector.extract_strided_slice %34 {offsets = [2, 0], sizes = [1, 32], strides = [1, 1]} : vector<4x32xf32> to vector<1x32xf32>
    %477 = vector.broadcast %476 : vector<1x32xf32> to vector<16x32xf32>
    %478 = arith.mulf %365, %477 : vector<16x32xf32>
    %cst_205 = arith.constant dense<0.000000e+00> : vector<12x32xf32>
    %479 = tpu.matmul %475, %478, %cst_205 {dimension_numbers = #tpu.dot_dimension_numbers<[1], [0], [0], [1], [0, 0, 1, 1], [], []>} : vector<12x16xf32>, vector<16x32xf32>, vector<12x32xf32> -> vector<12x32xf32>
    %480 = arith.addf %442, %479 : vector<12x32xf32>
    %481 = vector.extract_strided_slice %366 {offsets = [0, 3], sizes = [12, 1], strides = [1, 1]} : vector<12x4xf32> to vector<12x1xf32>
    %482 = vector.extract_strided_slice %367 {offsets = [3, 0], sizes = [1, 16], strides = [1, 1]} : vector<4x16xf32> to vector<1x16xf32>
    %483 = vector.broadcast %481 : vector<12x1xf32> to vector<12x16xf32>
    %484 = vector.broadcast %482 : vector<1x16xf32> to vector<12x16xf32>
    %485 = arith.addf %483, %484 : vector<12x16xf32>
    %cst_206 = arith.constant 0.000000e+00 : f32
    %486 = vector.broadcast %cst_206 : f32 to vector<12x16xf32>
    %487 = arith.cmpf ogt, %485, %486 : vector<12x16xf32>
    %cst_207 = arith.constant 2.000000e-01 : f32
    %488 = vector.broadcast %cst_207 : f32 to vector<12x16xf32>
    %489 = arith.mulf %488, %485 : vector<12x16xf32>
    %490 = arith.select %487, %485, %489 : vector<12x16xi1>, vector<12x16xf32>
    %cst_208 = arith.constant 0.000000e+00 : f32
    %491 = vector.broadcast %cst_208 : f32 to vector<12x16xf32>
    %492 = arith.cmpf ogt, %31, %491 : vector<12x16xf32>
    %cst_209 = arith.constant -1.000000e+30 : f32
    %493 = vector.broadcast %cst_209 : f32 to vector<12x16xf32>
    %494 = arith.select %492, %490, %493 : vector<12x16xi1>, vector<12x16xf32>
    %cst_210 = arith.constant dense<0xFF800000> : vector<12xf32>
    %495 = vector.multi_reduction <maximumf>, %494, %cst_210 [1] : vector<12x16xf32> to vector<12xf32>
    %496 = vector.shape_cast %495 : vector<12xf32> to vector<12x1xf32>
    %497 = vector.broadcast %496 : vector<12x1xf32> to vector<12x16xf32>
    %498 = arith.subf %494, %497 : vector<12x16xf32>
    %499 = math.exp %498 : vector<12x16xf32>
    %500 = arith.mulf %499, %31 : vector<12x16xf32>
    %cst_211 = arith.constant dense<0.000000e+00> : vector<12xf32>
    %501 = vector.multi_reduction <add>, %500, %cst_211 [1] : vector<12x16xf32> to vector<12xf32>
    %502 = vector.shape_cast %501 : vector<12xf32> to vector<12x1xf32>
    %cst_212 = arith.constant 0.000000e+00 : f32
    %503 = vector.broadcast %cst_212 : f32 to vector<12x1xf32>
    %504 = arith.cmpf ogt, %502, %503 : vector<12x1xf32>
    %cst_213 = arith.constant 1.000000e+00 : f32
    %505 = vector.broadcast %cst_213 : f32 to vector<12x1xf32>
    %506 = arith.select %504, %502, %505 : vector<12x1xi1>, vector<12x1xf32>
    %cst_214 = arith.constant 0.000000e+00 : f32
    %507 = vector.broadcast %cst_214 : f32 to vector<12x1xf32>
    %508 = arith.cmpf ogt, %502, %507 : vector<12x1xf32>
    %509 = tpu.reciprocal %506 {approx = true} : vector<12x1xf32> -> vector<12x1xf32>
    %cst_215 = arith.constant 0.000000e+00 : f32
    %510 = vector.broadcast %cst_215 : f32 to vector<12x1xf32>
    %511 = arith.select %508, %509, %510 : vector<12x1xi1>, vector<12x1xf32>
    %512 = vector.broadcast %511 : vector<12x1xf32> to vector<12x16xf32>
    %513 = arith.mulf %500, %512 : vector<12x16xf32>
    %514 = vector.extract_strided_slice %34 {offsets = [3, 0], sizes = [1, 32], strides = [1, 1]} : vector<4x32xf32> to vector<1x32xf32>
    %515 = vector.broadcast %514 : vector<1x32xf32> to vector<16x32xf32>
    %516 = arith.mulf %365, %515 : vector<16x32xf32>
    %cst_216 = arith.constant dense<0.000000e+00> : vector<12x32xf32>
    %517 = tpu.matmul %513, %516, %cst_216 {dimension_numbers = #tpu.dot_dimension_numbers<[1], [0], [0], [1], [0, 0, 1, 1], [], []>} : vector<12x16xf32>, vector<16x32xf32>, vector<12x32xf32> -> vector<12x32xf32>
    %518 = arith.addf %480, %517 : vector<12x32xf32>
    %519 = vector.broadcast %17 : vector<1x32xf32> to vector<12x32xf32>
    %520 = arith.addf %518, %519 : vector<12x32xf32>
    %521 = vector.extract_strided_slice %48 {offsets = [0, 32], sizes = [16, 32], strides = [1, 1]} : vector<16x108xf32> to vector<16x32xf32>
    %522 = vector.extract_strided_slice %50 {offsets = [0, 32], sizes = [8, 4], strides = [1, 1]} : vector<8x36xf32> to vector<8x4xf32>
    %523 = vector.extract_strided_slice %51 {offsets = [4, 0], sizes = [4, 16], strides = [1, 1]} : vector<12x16xf32> to vector<4x16xf32>
    %524 = vector.extract_strided_slice %522 {offsets = [0, 0], sizes = [8, 1], strides = [1, 1]} : vector<8x4xf32> to vector<8x1xf32>
    %525 = vector.extract_strided_slice %523 {offsets = [0, 0], sizes = [1, 16], strides = [1, 1]} : vector<4x16xf32> to vector<1x16xf32>
    %526 = vector.broadcast %524 : vector<8x1xf32> to vector<8x16xf32>
    %527 = vector.broadcast %525 : vector<1x16xf32> to vector<8x16xf32>
    %528 = arith.addf %526, %527 : vector<8x16xf32>
    %cst_217 = arith.constant 0.000000e+00 : f32
    %529 = vector.broadcast %cst_217 : f32 to vector<8x16xf32>
    %530 = arith.cmpf ogt, %528, %529 : vector<8x16xf32>
    %cst_218 = arith.constant 2.000000e-01 : f32
    %531 = vector.broadcast %cst_218 : f32 to vector<8x16xf32>
    %532 = arith.mulf %531, %528 : vector<8x16xf32>
    %533 = arith.select %530, %528, %532 : vector<8x16xi1>, vector<8x16xf32>
    %cst_219 = arith.constant 0.000000e+00 : f32
    %534 = vector.broadcast %cst_219 : f32 to vector<8x16xf32>
    %535 = arith.cmpf ogt, %32, %534 : vector<8x16xf32>
    %cst_220 = arith.constant -1.000000e+30 : f32
    %536 = vector.broadcast %cst_220 : f32 to vector<8x16xf32>
    %537 = arith.select %535, %533, %536 : vector<8x16xi1>, vector<8x16xf32>
    %cst_221 = arith.constant dense<0xFF800000> : vector<8xf32>
    %538 = vector.multi_reduction <maximumf>, %537, %cst_221 [1] : vector<8x16xf32> to vector<8xf32>
    %539 = vector.shape_cast %538 : vector<8xf32> to vector<8x1xf32>
    %540 = vector.broadcast %539 : vector<8x1xf32> to vector<8x16xf32>
    %541 = arith.subf %537, %540 : vector<8x16xf32>
    %542 = math.exp %541 : vector<8x16xf32>
    %543 = arith.mulf %542, %32 : vector<8x16xf32>
    %cst_222 = arith.constant dense<0.000000e+00> : vector<8xf32>
    %544 = vector.multi_reduction <add>, %543, %cst_222 [1] : vector<8x16xf32> to vector<8xf32>
    %545 = vector.shape_cast %544 : vector<8xf32> to vector<8x1xf32>
    %cst_223 = arith.constant 0.000000e+00 : f32
    %546 = vector.broadcast %cst_223 : f32 to vector<8x1xf32>
    %547 = arith.cmpf ogt, %545, %546 : vector<8x1xf32>
    %cst_224 = arith.constant 1.000000e+00 : f32
    %548 = vector.broadcast %cst_224 : f32 to vector<8x1xf32>
    %549 = arith.select %547, %545, %548 : vector<8x1xi1>, vector<8x1xf32>
    %cst_225 = arith.constant 0.000000e+00 : f32
    %550 = vector.broadcast %cst_225 : f32 to vector<8x1xf32>
    %551 = arith.cmpf ogt, %545, %550 : vector<8x1xf32>
    %552 = tpu.reciprocal %549 {approx = true} : vector<8x1xf32> -> vector<8x1xf32>
    %cst_226 = arith.constant 0.000000e+00 : f32
    %553 = vector.broadcast %cst_226 : f32 to vector<8x1xf32>
    %554 = arith.select %551, %552, %553 : vector<8x1xi1>, vector<8x1xf32>
    %555 = vector.broadcast %554 : vector<8x1xf32> to vector<8x16xf32>
    %556 = arith.mulf %543, %555 : vector<8x16xf32>
    %557 = vector.extract_strided_slice %34 {offsets = [0, 0], sizes = [1, 32], strides = [1, 1]} : vector<4x32xf32> to vector<1x32xf32>
    %558 = vector.broadcast %557 : vector<1x32xf32> to vector<16x32xf32>
    %559 = arith.mulf %521, %558 : vector<16x32xf32>
    %cst_227 = arith.constant dense<0.000000e+00> : vector<8x32xf32>
    %560 = tpu.matmul %556, %559, %cst_227 {dimension_numbers = #tpu.dot_dimension_numbers<[1], [0], [0], [1], [0, 0, 1, 1], [], []>} : vector<8x16xf32>, vector<16x32xf32>, vector<8x32xf32> -> vector<8x32xf32>
    %561 = vector.extract_strided_slice %522 {offsets = [0, 1], sizes = [8, 1], strides = [1, 1]} : vector<8x4xf32> to vector<8x1xf32>
    %562 = vector.extract_strided_slice %523 {offsets = [1, 0], sizes = [1, 16], strides = [1, 1]} : vector<4x16xf32> to vector<1x16xf32>
    %563 = vector.broadcast %561 : vector<8x1xf32> to vector<8x16xf32>
    %564 = vector.broadcast %562 : vector<1x16xf32> to vector<8x16xf32>
    %565 = arith.addf %563, %564 : vector<8x16xf32>
    %cst_228 = arith.constant 0.000000e+00 : f32
    %566 = vector.broadcast %cst_228 : f32 to vector<8x16xf32>
    %567 = arith.cmpf ogt, %565, %566 : vector<8x16xf32>
    %cst_229 = arith.constant 2.000000e-01 : f32
    %568 = vector.broadcast %cst_229 : f32 to vector<8x16xf32>
    %569 = arith.mulf %568, %565 : vector<8x16xf32>
    %570 = arith.select %567, %565, %569 : vector<8x16xi1>, vector<8x16xf32>
    %cst_230 = arith.constant 0.000000e+00 : f32
    %571 = vector.broadcast %cst_230 : f32 to vector<8x16xf32>
    %572 = arith.cmpf ogt, %32, %571 : vector<8x16xf32>
    %cst_231 = arith.constant -1.000000e+30 : f32
    %573 = vector.broadcast %cst_231 : f32 to vector<8x16xf32>
    %574 = arith.select %572, %570, %573 : vector<8x16xi1>, vector<8x16xf32>
    %cst_232 = arith.constant dense<0xFF800000> : vector<8xf32>
    %575 = vector.multi_reduction <maximumf>, %574, %cst_232 [1] : vector<8x16xf32> to vector<8xf32>
    %576 = vector.shape_cast %575 : vector<8xf32> to vector<8x1xf32>
    %577 = vector.broadcast %576 : vector<8x1xf32> to vector<8x16xf32>
    %578 = arith.subf %574, %577 : vector<8x16xf32>
    %579 = math.exp %578 : vector<8x16xf32>
    %580 = arith.mulf %579, %32 : vector<8x16xf32>
    %cst_233 = arith.constant dense<0.000000e+00> : vector<8xf32>
    %581 = vector.multi_reduction <add>, %580, %cst_233 [1] : vector<8x16xf32> to vector<8xf32>
    %582 = vector.shape_cast %581 : vector<8xf32> to vector<8x1xf32>
    %cst_234 = arith.constant 0.000000e+00 : f32
    %583 = vector.broadcast %cst_234 : f32 to vector<8x1xf32>
    %584 = arith.cmpf ogt, %582, %583 : vector<8x1xf32>
    %cst_235 = arith.constant 1.000000e+00 : f32
    %585 = vector.broadcast %cst_235 : f32 to vector<8x1xf32>
    %586 = arith.select %584, %582, %585 : vector<8x1xi1>, vector<8x1xf32>
    %cst_236 = arith.constant 0.000000e+00 : f32
    %587 = vector.broadcast %cst_236 : f32 to vector<8x1xf32>
    %588 = arith.cmpf ogt, %582, %587 : vector<8x1xf32>
    %589 = tpu.reciprocal %586 {approx = true} : vector<8x1xf32> -> vector<8x1xf32>
    %cst_237 = arith.constant 0.000000e+00 : f32
    %590 = vector.broadcast %cst_237 : f32 to vector<8x1xf32>
    %591 = arith.select %588, %589, %590 : vector<8x1xi1>, vector<8x1xf32>
    %592 = vector.broadcast %591 : vector<8x1xf32> to vector<8x16xf32>
    %593 = arith.mulf %580, %592 : vector<8x16xf32>
    %594 = vector.extract_strided_slice %34 {offsets = [1, 0], sizes = [1, 32], strides = [1, 1]} : vector<4x32xf32> to vector<1x32xf32>
    %595 = vector.broadcast %594 : vector<1x32xf32> to vector<16x32xf32>
    %596 = arith.mulf %521, %595 : vector<16x32xf32>
    %cst_238 = arith.constant dense<0.000000e+00> : vector<8x32xf32>
    %597 = tpu.matmul %593, %596, %cst_238 {dimension_numbers = #tpu.dot_dimension_numbers<[1], [0], [0], [1], [0, 0, 1, 1], [], []>} : vector<8x16xf32>, vector<16x32xf32>, vector<8x32xf32> -> vector<8x32xf32>
    %598 = arith.addf %560, %597 : vector<8x32xf32>
    %599 = vector.extract_strided_slice %522 {offsets = [0, 2], sizes = [8, 1], strides = [1, 1]} : vector<8x4xf32> to vector<8x1xf32>
    %600 = vector.extract_strided_slice %523 {offsets = [2, 0], sizes = [1, 16], strides = [1, 1]} : vector<4x16xf32> to vector<1x16xf32>
    %601 = vector.broadcast %599 : vector<8x1xf32> to vector<8x16xf32>
    %602 = vector.broadcast %600 : vector<1x16xf32> to vector<8x16xf32>
    %603 = arith.addf %601, %602 : vector<8x16xf32>
    %cst_239 = arith.constant 0.000000e+00 : f32
    %604 = vector.broadcast %cst_239 : f32 to vector<8x16xf32>
    %605 = arith.cmpf ogt, %603, %604 : vector<8x16xf32>
    %cst_240 = arith.constant 2.000000e-01 : f32
    %606 = vector.broadcast %cst_240 : f32 to vector<8x16xf32>
    %607 = arith.mulf %606, %603 : vector<8x16xf32>
    %608 = arith.select %605, %603, %607 : vector<8x16xi1>, vector<8x16xf32>
    %cst_241 = arith.constant 0.000000e+00 : f32
    %609 = vector.broadcast %cst_241 : f32 to vector<8x16xf32>
    %610 = arith.cmpf ogt, %32, %609 : vector<8x16xf32>
    %cst_242 = arith.constant -1.000000e+30 : f32
    %611 = vector.broadcast %cst_242 : f32 to vector<8x16xf32>
    %612 = arith.select %610, %608, %611 : vector<8x16xi1>, vector<8x16xf32>
    %cst_243 = arith.constant dense<0xFF800000> : vector<8xf32>
    %613 = vector.multi_reduction <maximumf>, %612, %cst_243 [1] : vector<8x16xf32> to vector<8xf32>
    %614 = vector.shape_cast %613 : vector<8xf32> to vector<8x1xf32>
    %615 = vector.broadcast %614 : vector<8x1xf32> to vector<8x16xf32>
    %616 = arith.subf %612, %615 : vector<8x16xf32>
    %617 = math.exp %616 : vector<8x16xf32>
    %618 = arith.mulf %617, %32 : vector<8x16xf32>
    %cst_244 = arith.constant dense<0.000000e+00> : vector<8xf32>
    %619 = vector.multi_reduction <add>, %618, %cst_244 [1] : vector<8x16xf32> to vector<8xf32>
    %620 = vector.shape_cast %619 : vector<8xf32> to vector<8x1xf32>
    %cst_245 = arith.constant 0.000000e+00 : f32
    %621 = vector.broadcast %cst_245 : f32 to vector<8x1xf32>
    %622 = arith.cmpf ogt, %620, %621 : vector<8x1xf32>
    %cst_246 = arith.constant 1.000000e+00 : f32
    %623 = vector.broadcast %cst_246 : f32 to vector<8x1xf32>
    %624 = arith.select %622, %620, %623 : vector<8x1xi1>, vector<8x1xf32>
    %cst_247 = arith.constant 0.000000e+00 : f32
    %625 = vector.broadcast %cst_247 : f32 to vector<8x1xf32>
    %626 = arith.cmpf ogt, %620, %625 : vector<8x1xf32>
    %627 = tpu.reciprocal %624 {approx = true} : vector<8x1xf32> -> vector<8x1xf32>
    %cst_248 = arith.constant 0.000000e+00 : f32
    %628 = vector.broadcast %cst_248 : f32 to vector<8x1xf32>
    %629 = arith.select %626, %627, %628 : vector<8x1xi1>, vector<8x1xf32>
    %630 = vector.broadcast %629 : vector<8x1xf32> to vector<8x16xf32>
    %631 = arith.mulf %618, %630 : vector<8x16xf32>
    %632 = vector.extract_strided_slice %34 {offsets = [2, 0], sizes = [1, 32], strides = [1, 1]} : vector<4x32xf32> to vector<1x32xf32>
    %633 = vector.broadcast %632 : vector<1x32xf32> to vector<16x32xf32>
    %634 = arith.mulf %521, %633 : vector<16x32xf32>
    %cst_249 = arith.constant dense<0.000000e+00> : vector<8x32xf32>
    %635 = tpu.matmul %631, %634, %cst_249 {dimension_numbers = #tpu.dot_dimension_numbers<[1], [0], [0], [1], [0, 0, 1, 1], [], []>} : vector<8x16xf32>, vector<16x32xf32>, vector<8x32xf32> -> vector<8x32xf32>
    %636 = arith.addf %598, %635 : vector<8x32xf32>
    %637 = vector.extract_strided_slice %522 {offsets = [0, 3], sizes = [8, 1], strides = [1, 1]} : vector<8x4xf32> to vector<8x1xf32>
    %638 = vector.extract_strided_slice %523 {offsets = [3, 0], sizes = [1, 16], strides = [1, 1]} : vector<4x16xf32> to vector<1x16xf32>
    %639 = vector.broadcast %637 : vector<8x1xf32> to vector<8x16xf32>
    %640 = vector.broadcast %638 : vector<1x16xf32> to vector<8x16xf32>
    %641 = arith.addf %639, %640 : vector<8x16xf32>
    %cst_250 = arith.constant 0.000000e+00 : f32
    %642 = vector.broadcast %cst_250 : f32 to vector<8x16xf32>
    %643 = arith.cmpf ogt, %641, %642 : vector<8x16xf32>
    %cst_251 = arith.constant 2.000000e-01 : f32
    %644 = vector.broadcast %cst_251 : f32 to vector<8x16xf32>
    %645 = arith.mulf %644, %641 : vector<8x16xf32>
    %646 = arith.select %643, %641, %645 : vector<8x16xi1>, vector<8x16xf32>
    %cst_252 = arith.constant 0.000000e+00 : f32
    %647 = vector.broadcast %cst_252 : f32 to vector<8x16xf32>
    %648 = arith.cmpf ogt, %32, %647 : vector<8x16xf32>
    %cst_253 = arith.constant -1.000000e+30 : f32
    %649 = vector.broadcast %cst_253 : f32 to vector<8x16xf32>
    %650 = arith.select %648, %646, %649 : vector<8x16xi1>, vector<8x16xf32>
    %cst_254 = arith.constant dense<0xFF800000> : vector<8xf32>
    %651 = vector.multi_reduction <maximumf>, %650, %cst_254 [1] : vector<8x16xf32> to vector<8xf32>
    %652 = vector.shape_cast %651 : vector<8xf32> to vector<8x1xf32>
    %653 = vector.broadcast %652 : vector<8x1xf32> to vector<8x16xf32>
    %654 = arith.subf %650, %653 : vector<8x16xf32>
    %655 = math.exp %654 : vector<8x16xf32>
    %656 = arith.mulf %655, %32 : vector<8x16xf32>
    %cst_255 = arith.constant dense<0.000000e+00> : vector<8xf32>
    %657 = vector.multi_reduction <add>, %656, %cst_255 [1] : vector<8x16xf32> to vector<8xf32>
    %658 = vector.shape_cast %657 : vector<8xf32> to vector<8x1xf32>
    %cst_256 = arith.constant 0.000000e+00 : f32
    %659 = vector.broadcast %cst_256 : f32 to vector<8x1xf32>
    %660 = arith.cmpf ogt, %658, %659 : vector<8x1xf32>
    %cst_257 = arith.constant 1.000000e+00 : f32
    %661 = vector.broadcast %cst_257 : f32 to vector<8x1xf32>
    %662 = arith.select %660, %658, %661 : vector<8x1xi1>, vector<8x1xf32>
    %cst_258 = arith.constant 0.000000e+00 : f32
    %663 = vector.broadcast %cst_258 : f32 to vector<8x1xf32>
    %664 = arith.cmpf ogt, %658, %663 : vector<8x1xf32>
    %665 = tpu.reciprocal %662 {approx = true} : vector<8x1xf32> -> vector<8x1xf32>
    %cst_259 = arith.constant 0.000000e+00 : f32
    %666 = vector.broadcast %cst_259 : f32 to vector<8x1xf32>
    %667 = arith.select %664, %665, %666 : vector<8x1xi1>, vector<8x1xf32>
    %668 = vector.broadcast %667 : vector<8x1xf32> to vector<8x16xf32>
    %669 = arith.mulf %656, %668 : vector<8x16xf32>
    %670 = vector.extract_strided_slice %34 {offsets = [3, 0], sizes = [1, 32], strides = [1, 1]} : vector<4x32xf32> to vector<1x32xf32>
    %671 = vector.broadcast %670 : vector<1x32xf32> to vector<16x32xf32>
    %672 = arith.mulf %521, %671 : vector<16x32xf32>
    %cst_260 = arith.constant dense<0.000000e+00> : vector<8x32xf32>
    %673 = tpu.matmul %669, %672, %cst_260 {dimension_numbers = #tpu.dot_dimension_numbers<[1], [0], [0], [1], [0, 0, 1, 1], [], []>} : vector<8x16xf32>, vector<16x32xf32>, vector<8x32xf32> -> vector<8x32xf32>
    %674 = arith.addf %636, %673 : vector<8x32xf32>
    %675 = vector.broadcast %18 : vector<1x32xf32> to vector<8x32xf32>
    %676 = arith.addf %674, %675 : vector<8x32xf32>
    %677 = vector.extract_strided_slice %48 {offsets = [0, 64], sizes = [16, 32], strides = [1, 1]} : vector<16x108xf32> to vector<16x32xf32>
    %678 = vector.extract_strided_slice %48 {offsets = [0, 104], sizes = [16, 4], strides = [1, 1]} : vector<16x108xf32> to vector<16x4xf32>
    %679 = vector.extract_strided_slice %51 {offsets = [8, 0], sizes = [4, 16], strides = [1, 1]} : vector<12x16xf32> to vector<4x16xf32>
    %680 = vector.extract_strided_slice %678 {offsets = [0, 0], sizes = [16, 1], strides = [1, 1]} : vector<16x4xf32> to vector<16x1xf32>
    %681 = vector.extract_strided_slice %679 {offsets = [0, 0], sizes = [1, 16], strides = [1, 1]} : vector<4x16xf32> to vector<1x16xf32>
    %682 = vector.broadcast %680 : vector<16x1xf32> to vector<16x16xf32>
    %683 = vector.broadcast %681 : vector<1x16xf32> to vector<16x16xf32>
    %684 = arith.addf %682, %683 : vector<16x16xf32>
    %cst_261 = arith.constant 0.000000e+00 : f32
    %685 = vector.broadcast %cst_261 : f32 to vector<16x16xf32>
    %686 = arith.cmpf ogt, %684, %685 : vector<16x16xf32>
    %cst_262 = arith.constant 2.000000e-01 : f32
    %687 = vector.broadcast %cst_262 : f32 to vector<16x16xf32>
    %688 = arith.mulf %687, %684 : vector<16x16xf32>
    %689 = arith.select %686, %684, %688 : vector<16x16xi1>, vector<16x16xf32>
    %cst_263 = arith.constant 0.000000e+00 : f32
    %690 = vector.broadcast %cst_263 : f32 to vector<16x16xf32>
    %691 = arith.cmpf ogt, %33, %690 : vector<16x16xf32>
    %cst_264 = arith.constant -1.000000e+30 : f32
    %692 = vector.broadcast %cst_264 : f32 to vector<16x16xf32>
    %693 = arith.select %691, %689, %692 : vector<16x16xi1>, vector<16x16xf32>
    %cst_265 = arith.constant dense<0xFF800000> : vector<16xf32>
    %694 = vector.multi_reduction <maximumf>, %693, %cst_265 [1] : vector<16x16xf32> to vector<16xf32>
    %695 = vector.shape_cast %694 : vector<16xf32> to vector<16x1xf32>
    %696 = vector.broadcast %695 : vector<16x1xf32> to vector<16x16xf32>
    %697 = arith.subf %693, %696 : vector<16x16xf32>
    %698 = math.exp %697 : vector<16x16xf32>
    %699 = arith.mulf %698, %33 : vector<16x16xf32>
    %cst_266 = arith.constant dense<0.000000e+00> : vector<16xf32>
    %700 = vector.multi_reduction <add>, %699, %cst_266 [1] : vector<16x16xf32> to vector<16xf32>
    %701 = vector.shape_cast %700 : vector<16xf32> to vector<16x1xf32>
    %cst_267 = arith.constant 0.000000e+00 : f32
    %702 = vector.broadcast %cst_267 : f32 to vector<16x1xf32>
    %703 = arith.cmpf ogt, %701, %702 : vector<16x1xf32>
    %cst_268 = arith.constant 1.000000e+00 : f32
    %704 = vector.broadcast %cst_268 : f32 to vector<16x1xf32>
    %705 = arith.select %703, %701, %704 : vector<16x1xi1>, vector<16x1xf32>
    %cst_269 = arith.constant 0.000000e+00 : f32
    %706 = vector.broadcast %cst_269 : f32 to vector<16x1xf32>
    %707 = arith.cmpf ogt, %701, %706 : vector<16x1xf32>
    %708 = tpu.reciprocal %705 {approx = true} : vector<16x1xf32> -> vector<16x1xf32>
    %cst_270 = arith.constant 0.000000e+00 : f32
    %709 = vector.broadcast %cst_270 : f32 to vector<16x1xf32>
    %710 = arith.select %707, %708, %709 : vector<16x1xi1>, vector<16x1xf32>
    %711 = vector.broadcast %710 : vector<16x1xf32> to vector<16x16xf32>
    %712 = arith.mulf %699, %711 : vector<16x16xf32>
    %713 = vector.extract_strided_slice %34 {offsets = [0, 0], sizes = [1, 32], strides = [1, 1]} : vector<4x32xf32> to vector<1x32xf32>
    %714 = vector.broadcast %713 : vector<1x32xf32> to vector<16x32xf32>
    %715 = arith.mulf %677, %714 : vector<16x32xf32>
    %cst_271 = arith.constant dense<0.000000e+00> : vector<16x32xf32>
    %716 = tpu.matmul %712, %715, %cst_271 {dimension_numbers = #tpu.dot_dimension_numbers<[1], [0], [0], [1], [0, 0, 1, 1], [], []>} : vector<16x16xf32>, vector<16x32xf32>, vector<16x32xf32> -> vector<16x32xf32>
    %717 = vector.extract_strided_slice %678 {offsets = [0, 1], sizes = [16, 1], strides = [1, 1]} : vector<16x4xf32> to vector<16x1xf32>
    %718 = vector.extract_strided_slice %679 {offsets = [1, 0], sizes = [1, 16], strides = [1, 1]} : vector<4x16xf32> to vector<1x16xf32>
    %719 = vector.broadcast %717 : vector<16x1xf32> to vector<16x16xf32>
    %720 = vector.broadcast %718 : vector<1x16xf32> to vector<16x16xf32>
    %721 = arith.addf %719, %720 : vector<16x16xf32>
    %cst_272 = arith.constant 0.000000e+00 : f32
    %722 = vector.broadcast %cst_272 : f32 to vector<16x16xf32>
    %723 = arith.cmpf ogt, %721, %722 : vector<16x16xf32>
    %cst_273 = arith.constant 2.000000e-01 : f32
    %724 = vector.broadcast %cst_273 : f32 to vector<16x16xf32>
    %725 = arith.mulf %724, %721 : vector<16x16xf32>
    %726 = arith.select %723, %721, %725 : vector<16x16xi1>, vector<16x16xf32>
    %cst_274 = arith.constant 0.000000e+00 : f32
    %727 = vector.broadcast %cst_274 : f32 to vector<16x16xf32>
    %728 = arith.cmpf ogt, %33, %727 : vector<16x16xf32>
    %cst_275 = arith.constant -1.000000e+30 : f32
    %729 = vector.broadcast %cst_275 : f32 to vector<16x16xf32>
    %730 = arith.select %728, %726, %729 : vector<16x16xi1>, vector<16x16xf32>
    %cst_276 = arith.constant dense<0xFF800000> : vector<16xf32>
    %731 = vector.multi_reduction <maximumf>, %730, %cst_276 [1] : vector<16x16xf32> to vector<16xf32>
    %732 = vector.shape_cast %731 : vector<16xf32> to vector<16x1xf32>
    %733 = vector.broadcast %732 : vector<16x1xf32> to vector<16x16xf32>
    %734 = arith.subf %730, %733 : vector<16x16xf32>
    %735 = math.exp %734 : vector<16x16xf32>
    %736 = arith.mulf %735, %33 : vector<16x16xf32>
    %cst_277 = arith.constant dense<0.000000e+00> : vector<16xf32>
    %737 = vector.multi_reduction <add>, %736, %cst_277 [1] : vector<16x16xf32> to vector<16xf32>
    %738 = vector.shape_cast %737 : vector<16xf32> to vector<16x1xf32>
    %cst_278 = arith.constant 0.000000e+00 : f32
    %739 = vector.broadcast %cst_278 : f32 to vector<16x1xf32>
    %740 = arith.cmpf ogt, %738, %739 : vector<16x1xf32>
    %cst_279 = arith.constant 1.000000e+00 : f32
    %741 = vector.broadcast %cst_279 : f32 to vector<16x1xf32>
    %742 = arith.select %740, %738, %741 : vector<16x1xi1>, vector<16x1xf32>
    %cst_280 = arith.constant 0.000000e+00 : f32
    %743 = vector.broadcast %cst_280 : f32 to vector<16x1xf32>
    %744 = arith.cmpf ogt, %738, %743 : vector<16x1xf32>
    %745 = tpu.reciprocal %742 {approx = true} : vector<16x1xf32> -> vector<16x1xf32>
    %cst_281 = arith.constant 0.000000e+00 : f32
    %746 = vector.broadcast %cst_281 : f32 to vector<16x1xf32>
    %747 = arith.select %744, %745, %746 : vector<16x1xi1>, vector<16x1xf32>
    %748 = vector.broadcast %747 : vector<16x1xf32> to vector<16x16xf32>
    %749 = arith.mulf %736, %748 : vector<16x16xf32>
    %750 = vector.extract_strided_slice %34 {offsets = [1, 0], sizes = [1, 32], strides = [1, 1]} : vector<4x32xf32> to vector<1x32xf32>
    %751 = vector.broadcast %750 : vector<1x32xf32> to vector<16x32xf32>
    %752 = arith.mulf %677, %751 : vector<16x32xf32>
    %cst_282 = arith.constant dense<0.000000e+00> : vector<16x32xf32>
    %753 = tpu.matmul %749, %752, %cst_282 {dimension_numbers = #tpu.dot_dimension_numbers<[1], [0], [0], [1], [0, 0, 1, 1], [], []>} : vector<16x16xf32>, vector<16x32xf32>, vector<16x32xf32> -> vector<16x32xf32>
    %754 = arith.addf %716, %753 : vector<16x32xf32>
    %755 = vector.extract_strided_slice %678 {offsets = [0, 2], sizes = [16, 1], strides = [1, 1]} : vector<16x4xf32> to vector<16x1xf32>
    %756 = vector.extract_strided_slice %679 {offsets = [2, 0], sizes = [1, 16], strides = [1, 1]} : vector<4x16xf32> to vector<1x16xf32>
    %757 = vector.broadcast %755 : vector<16x1xf32> to vector<16x16xf32>
    %758 = vector.broadcast %756 : vector<1x16xf32> to vector<16x16xf32>
    %759 = arith.addf %757, %758 : vector<16x16xf32>
    %cst_283 = arith.constant 0.000000e+00 : f32
    %760 = vector.broadcast %cst_283 : f32 to vector<16x16xf32>
    %761 = arith.cmpf ogt, %759, %760 : vector<16x16xf32>
    %cst_284 = arith.constant 2.000000e-01 : f32
    %762 = vector.broadcast %cst_284 : f32 to vector<16x16xf32>
    %763 = arith.mulf %762, %759 : vector<16x16xf32>
    %764 = arith.select %761, %759, %763 : vector<16x16xi1>, vector<16x16xf32>
    %cst_285 = arith.constant 0.000000e+00 : f32
    %765 = vector.broadcast %cst_285 : f32 to vector<16x16xf32>
    %766 = arith.cmpf ogt, %33, %765 : vector<16x16xf32>
    %cst_286 = arith.constant -1.000000e+30 : f32
    %767 = vector.broadcast %cst_286 : f32 to vector<16x16xf32>
    %768 = arith.select %766, %764, %767 : vector<16x16xi1>, vector<16x16xf32>
    %cst_287 = arith.constant dense<0xFF800000> : vector<16xf32>
    %769 = vector.multi_reduction <maximumf>, %768, %cst_287 [1] : vector<16x16xf32> to vector<16xf32>
    %770 = vector.shape_cast %769 : vector<16xf32> to vector<16x1xf32>
    %771 = vector.broadcast %770 : vector<16x1xf32> to vector<16x16xf32>
    %772 = arith.subf %768, %771 : vector<16x16xf32>
    %773 = math.exp %772 : vector<16x16xf32>
    %774 = arith.mulf %773, %33 : vector<16x16xf32>
    %cst_288 = arith.constant dense<0.000000e+00> : vector<16xf32>
    %775 = vector.multi_reduction <add>, %774, %cst_288 [1] : vector<16x16xf32> to vector<16xf32>
    %776 = vector.shape_cast %775 : vector<16xf32> to vector<16x1xf32>
    %cst_289 = arith.constant 0.000000e+00 : f32
    %777 = vector.broadcast %cst_289 : f32 to vector<16x1xf32>
    %778 = arith.cmpf ogt, %776, %777 : vector<16x1xf32>
    %cst_290 = arith.constant 1.000000e+00 : f32
    %779 = vector.broadcast %cst_290 : f32 to vector<16x1xf32>
    %780 = arith.select %778, %776, %779 : vector<16x1xi1>, vector<16x1xf32>
    %cst_291 = arith.constant 0.000000e+00 : f32
    %781 = vector.broadcast %cst_291 : f32 to vector<16x1xf32>
    %782 = arith.cmpf ogt, %776, %781 : vector<16x1xf32>
    %783 = tpu.reciprocal %780 {approx = true} : vector<16x1xf32> -> vector<16x1xf32>
    %cst_292 = arith.constant 0.000000e+00 : f32
    %784 = vector.broadcast %cst_292 : f32 to vector<16x1xf32>
    %785 = arith.select %782, %783, %784 : vector<16x1xi1>, vector<16x1xf32>
    %786 = vector.broadcast %785 : vector<16x1xf32> to vector<16x16xf32>
    %787 = arith.mulf %774, %786 : vector<16x16xf32>
    %788 = vector.extract_strided_slice %34 {offsets = [2, 0], sizes = [1, 32], strides = [1, 1]} : vector<4x32xf32> to vector<1x32xf32>
    %789 = vector.broadcast %788 : vector<1x32xf32> to vector<16x32xf32>
    %790 = arith.mulf %677, %789 : vector<16x32xf32>
    %cst_293 = arith.constant dense<0.000000e+00> : vector<16x32xf32>
    %791 = tpu.matmul %787, %790, %cst_293 {dimension_numbers = #tpu.dot_dimension_numbers<[1], [0], [0], [1], [0, 0, 1, 1], [], []>} : vector<16x16xf32>, vector<16x32xf32>, vector<16x32xf32> -> vector<16x32xf32>
    %792 = arith.addf %754, %791 : vector<16x32xf32>
    %793 = vector.extract_strided_slice %678 {offsets = [0, 3], sizes = [16, 1], strides = [1, 1]} : vector<16x4xf32> to vector<16x1xf32>
    %794 = vector.extract_strided_slice %679 {offsets = [3, 0], sizes = [1, 16], strides = [1, 1]} : vector<4x16xf32> to vector<1x16xf32>
    %795 = vector.broadcast %793 : vector<16x1xf32> to vector<16x16xf32>
    %796 = vector.broadcast %794 : vector<1x16xf32> to vector<16x16xf32>
    %797 = arith.addf %795, %796 : vector<16x16xf32>
    %cst_294 = arith.constant 0.000000e+00 : f32
    %798 = vector.broadcast %cst_294 : f32 to vector<16x16xf32>
    %799 = arith.cmpf ogt, %797, %798 : vector<16x16xf32>
    %cst_295 = arith.constant 2.000000e-01 : f32
    %800 = vector.broadcast %cst_295 : f32 to vector<16x16xf32>
    %801 = arith.mulf %800, %797 : vector<16x16xf32>
    %802 = arith.select %799, %797, %801 : vector<16x16xi1>, vector<16x16xf32>
    %cst_296 = arith.constant 0.000000e+00 : f32
    %803 = vector.broadcast %cst_296 : f32 to vector<16x16xf32>
    %804 = arith.cmpf ogt, %33, %803 : vector<16x16xf32>
    %cst_297 = arith.constant -1.000000e+30 : f32
    %805 = vector.broadcast %cst_297 : f32 to vector<16x16xf32>
    %806 = arith.select %804, %802, %805 : vector<16x16xi1>, vector<16x16xf32>
    %cst_298 = arith.constant dense<0xFF800000> : vector<16xf32>
    %807 = vector.multi_reduction <maximumf>, %806, %cst_298 [1] : vector<16x16xf32> to vector<16xf32>
    %808 = vector.shape_cast %807 : vector<16xf32> to vector<16x1xf32>
    %809 = vector.broadcast %808 : vector<16x1xf32> to vector<16x16xf32>
    %810 = arith.subf %806, %809 : vector<16x16xf32>
    %811 = math.exp %810 : vector<16x16xf32>
    %812 = arith.mulf %811, %33 : vector<16x16xf32>
    %cst_299 = arith.constant dense<0.000000e+00> : vector<16xf32>
    %813 = vector.multi_reduction <add>, %812, %cst_299 [1] : vector<16x16xf32> to vector<16xf32>
    %814 = vector.shape_cast %813 : vector<16xf32> to vector<16x1xf32>
    %cst_300 = arith.constant 0.000000e+00 : f32
    %815 = vector.broadcast %cst_300 : f32 to vector<16x1xf32>
    %816 = arith.cmpf ogt, %814, %815 : vector<16x1xf32>
    %cst_301 = arith.constant 1.000000e+00 : f32
    %817 = vector.broadcast %cst_301 : f32 to vector<16x1xf32>
    %818 = arith.select %816, %814, %817 : vector<16x1xi1>, vector<16x1xf32>
    %cst_302 = arith.constant 0.000000e+00 : f32
    %819 = vector.broadcast %cst_302 : f32 to vector<16x1xf32>
    %820 = arith.cmpf ogt, %814, %819 : vector<16x1xf32>
    %821 = tpu.reciprocal %818 {approx = true} : vector<16x1xf32> -> vector<16x1xf32>
    %cst_303 = arith.constant 0.000000e+00 : f32
    %822 = vector.broadcast %cst_303 : f32 to vector<16x1xf32>
    %823 = arith.select %820, %821, %822 : vector<16x1xi1>, vector<16x1xf32>
    %824 = vector.broadcast %823 : vector<16x1xf32> to vector<16x16xf32>
    %825 = arith.mulf %812, %824 : vector<16x16xf32>
    %826 = vector.extract_strided_slice %34 {offsets = [3, 0], sizes = [1, 32], strides = [1, 1]} : vector<4x32xf32> to vector<1x32xf32>
    %827 = vector.broadcast %826 : vector<1x32xf32> to vector<16x32xf32>
    %828 = arith.mulf %677, %827 : vector<16x32xf32>
    %cst_304 = arith.constant dense<0.000000e+00> : vector<16x32xf32>
    %829 = tpu.matmul %825, %828, %cst_304 {dimension_numbers = #tpu.dot_dimension_numbers<[1], [0], [0], [1], [0, 0, 1, 1], [], []>} : vector<16x16xf32>, vector<16x32xf32>, vector<16x32xf32> -> vector<16x32xf32>
    %830 = arith.addf %792, %829 : vector<16x32xf32>
    %831 = vector.broadcast %19 : vector<1x32xf32> to vector<16x32xf32>
    %832 = arith.addf %830, %831 : vector<16x32xf32>
    %833 = arith.addf %364, %832 : vector<16x32xf32>
    %cst_305 = arith.constant 0.000000e+00 : f32
    %834 = vector.broadcast %cst_305 : f32 to vector<16x32xf32>
    %835 = arith.maximumf %833, %834 : vector<16x32xf32>
    %cst_306 = arith.constant 0.000000e+00 : f32
    %836 = vector.broadcast %cst_306 : f32 to vector<12x32xf32>
    %837 = arith.maximumf %520, %836 : vector<12x32xf32>
    %cst_307 = arith.constant 0.000000e+00 : f32
    %838 = vector.broadcast %cst_307 : f32 to vector<8x32xf32>
    %839 = arith.maximumf %676, %838 : vector<8x32xf32>
    %cst_308 = arith.constant dense<0.000000e+00> : vector<16x108xf32>
    %840 = tpu.matmul %835, %20, %cst_308 {dimension_numbers = #tpu.dot_dimension_numbers<[1], [0], [0], [1], [0, 0, 1, 1], [], []>} : vector<16x32xf32>, vector<32x108xf32>, vector<16x108xf32> -> vector<16x108xf32>
    %cst_309 = arith.constant dense<0.000000e+00> : vector<12x36xf32>
    %841 = tpu.matmul %837, %21, %cst_309 {dimension_numbers = #tpu.dot_dimension_numbers<[1], [0], [0], [1], [0, 0, 1, 1], [], []>} : vector<12x32xf32>, vector<32x36xf32>, vector<12x36xf32> -> vector<12x36xf32>
    %cst_310 = arith.constant dense<0.000000e+00> : vector<8x36xf32>
    %842 = tpu.matmul %839, %22, %cst_310 {dimension_numbers = #tpu.dot_dimension_numbers<[1], [0], [0], [1], [0, 0, 1, 1], [], []>} : vector<8x32xf32>, vector<32x36xf32>, vector<8x36xf32> -> vector<8x36xf32>
    %cst_311 = arith.constant dense<0.000000e+00> : vector<12x16xf32>
    %843 = tpu.matmul %23, %835, %cst_311 {dimension_numbers = #tpu.dot_dimension_numbers<[1], [1], [0], [0], [0, 0, 1, 0], [], []>} : vector<12x32xf32>, vector<16x32xf32>, vector<12x16xf32> -> vector<12x16xf32>
    %cst_312 = arith.constant dense<0.000000e+00> : vector<4x12xf32>
    %844 = tpu.matmul %24, %837, %cst_312 {dimension_numbers = #tpu.dot_dimension_numbers<[1], [1], [0], [0], [0, 0, 1, 0], [], []>} : vector<4x32xf32>, vector<12x32xf32>, vector<4x12xf32> -> vector<4x12xf32>
    %cst_313 = arith.constant dense<0.000000e+00> : vector<4x8xf32>
    %845 = tpu.matmul %25, %839, %cst_313 {dimension_numbers = #tpu.dot_dimension_numbers<[1], [1], [0], [0], [0, 0, 1, 0], [], []>} : vector<4x32xf32>, vector<8x32xf32>, vector<4x8xf32> -> vector<4x8xf32>
    %846 = vector.extract_strided_slice %841 {offsets = [0, 0], sizes = [12, 32], strides = [1, 1]} : vector<12x36xf32> to vector<12x32xf32>
    %847 = vector.extract_strided_slice %840 {offsets = [0, 96], sizes = [16, 4], strides = [1, 1]} : vector<16x108xf32> to vector<16x4xf32>
    %848 = vector.extract_strided_slice %847 {offsets = [0, 0], sizes = [16, 1], strides = [1, 1]} : vector<16x4xf32> to vector<16x1xf32>
    %849 = vector.extract_strided_slice %844 {offsets = [0, 0], sizes = [1, 12], strides = [1, 1]} : vector<4x12xf32> to vector<1x12xf32>
    %850 = vector.broadcast %848 : vector<16x1xf32> to vector<16x12xf32>
    %851 = vector.broadcast %849 : vector<1x12xf32> to vector<16x12xf32>
    %852 = arith.addf %850, %851 : vector<16x12xf32>
    %cst_314 = arith.constant 0.000000e+00 : f32
    %853 = vector.broadcast %cst_314 : f32 to vector<16x12xf32>
    %854 = arith.cmpf ogt, %852, %853 : vector<16x12xf32>
    %cst_315 = arith.constant 2.000000e-01 : f32
    %855 = vector.broadcast %cst_315 : f32 to vector<16x12xf32>
    %856 = arith.mulf %855, %852 : vector<16x12xf32>
    %857 = arith.select %854, %852, %856 : vector<16x12xi1>, vector<16x12xf32>
    %cst_316 = arith.constant 0.000000e+00 : f32
    %858 = vector.broadcast %cst_316 : f32 to vector<16x12xf32>
    %859 = arith.cmpf ogt, %29, %858 : vector<16x12xf32>
    %cst_317 = arith.constant -1.000000e+30 : f32
    %860 = vector.broadcast %cst_317 : f32 to vector<16x12xf32>
    %861 = arith.select %859, %857, %860 : vector<16x12xi1>, vector<16x12xf32>
    %cst_318 = arith.constant dense<0xFF800000> : vector<16xf32>
    %862 = vector.multi_reduction <maximumf>, %861, %cst_318 [1] : vector<16x12xf32> to vector<16xf32>
    %863 = vector.shape_cast %862 : vector<16xf32> to vector<16x1xf32>
    %864 = vector.broadcast %863 : vector<16x1xf32> to vector<16x12xf32>
    %865 = arith.subf %861, %864 : vector<16x12xf32>
    %866 = math.exp %865 : vector<16x12xf32>
    %867 = arith.mulf %866, %29 : vector<16x12xf32>
    %cst_319 = arith.constant dense<0.000000e+00> : vector<16xf32>
    %868 = vector.multi_reduction <add>, %867, %cst_319 [1] : vector<16x12xf32> to vector<16xf32>
    %869 = vector.shape_cast %868 : vector<16xf32> to vector<16x1xf32>
    %cst_320 = arith.constant 0.000000e+00 : f32
    %870 = vector.broadcast %cst_320 : f32 to vector<16x1xf32>
    %871 = arith.cmpf ogt, %869, %870 : vector<16x1xf32>
    %cst_321 = arith.constant 1.000000e+00 : f32
    %872 = vector.broadcast %cst_321 : f32 to vector<16x1xf32>
    %873 = arith.select %871, %869, %872 : vector<16x1xi1>, vector<16x1xf32>
    %cst_322 = arith.constant 0.000000e+00 : f32
    %874 = vector.broadcast %cst_322 : f32 to vector<16x1xf32>
    %875 = arith.cmpf ogt, %869, %874 : vector<16x1xf32>
    %876 = tpu.reciprocal %873 {approx = true} : vector<16x1xf32> -> vector<16x1xf32>
    %cst_323 = arith.constant 0.000000e+00 : f32
    %877 = vector.broadcast %cst_323 : f32 to vector<16x1xf32>
    %878 = arith.select %875, %876, %877 : vector<16x1xi1>, vector<16x1xf32>
    %879 = vector.broadcast %878 : vector<16x1xf32> to vector<16x12xf32>
    %880 = arith.mulf %867, %879 : vector<16x12xf32>
    %881 = vector.extract_strided_slice %34 {offsets = [0, 0], sizes = [1, 32], strides = [1, 1]} : vector<4x32xf32> to vector<1x32xf32>
    %882 = vector.broadcast %881 : vector<1x32xf32> to vector<12x32xf32>
    %883 = arith.mulf %846, %882 : vector<12x32xf32>
    %cst_324 = arith.constant dense<0.000000e+00> : vector<16x32xf32>
    %884 = tpu.matmul %880, %883, %cst_324 {dimension_numbers = #tpu.dot_dimension_numbers<[1], [0], [0], [1], [0, 0, 1, 1], [], []>} : vector<16x12xf32>, vector<12x32xf32>, vector<16x32xf32> -> vector<16x32xf32>
    %885 = vector.extract_strided_slice %847 {offsets = [0, 1], sizes = [16, 1], strides = [1, 1]} : vector<16x4xf32> to vector<16x1xf32>
    %886 = vector.extract_strided_slice %844 {offsets = [1, 0], sizes = [1, 12], strides = [1, 1]} : vector<4x12xf32> to vector<1x12xf32>
    %887 = vector.broadcast %885 : vector<16x1xf32> to vector<16x12xf32>
    %888 = vector.broadcast %886 : vector<1x12xf32> to vector<16x12xf32>
    %889 = arith.addf %887, %888 : vector<16x12xf32>
    %cst_325 = arith.constant 0.000000e+00 : f32
    %890 = vector.broadcast %cst_325 : f32 to vector<16x12xf32>
    %891 = arith.cmpf ogt, %889, %890 : vector<16x12xf32>
    %cst_326 = arith.constant 2.000000e-01 : f32
    %892 = vector.broadcast %cst_326 : f32 to vector<16x12xf32>
    %893 = arith.mulf %892, %889 : vector<16x12xf32>
    %894 = arith.select %891, %889, %893 : vector<16x12xi1>, vector<16x12xf32>
    %cst_327 = arith.constant 0.000000e+00 : f32
    %895 = vector.broadcast %cst_327 : f32 to vector<16x12xf32>
    %896 = arith.cmpf ogt, %29, %895 : vector<16x12xf32>
    %cst_328 = arith.constant -1.000000e+30 : f32
    %897 = vector.broadcast %cst_328 : f32 to vector<16x12xf32>
    %898 = arith.select %896, %894, %897 : vector<16x12xi1>, vector<16x12xf32>
    %cst_329 = arith.constant dense<0xFF800000> : vector<16xf32>
    %899 = vector.multi_reduction <maximumf>, %898, %cst_329 [1] : vector<16x12xf32> to vector<16xf32>
    %900 = vector.shape_cast %899 : vector<16xf32> to vector<16x1xf32>
    %901 = vector.broadcast %900 : vector<16x1xf32> to vector<16x12xf32>
    %902 = arith.subf %898, %901 : vector<16x12xf32>
    %903 = math.exp %902 : vector<16x12xf32>
    %904 = arith.mulf %903, %29 : vector<16x12xf32>
    %cst_330 = arith.constant dense<0.000000e+00> : vector<16xf32>
    %905 = vector.multi_reduction <add>, %904, %cst_330 [1] : vector<16x12xf32> to vector<16xf32>
    %906 = vector.shape_cast %905 : vector<16xf32> to vector<16x1xf32>
    %cst_331 = arith.constant 0.000000e+00 : f32
    %907 = vector.broadcast %cst_331 : f32 to vector<16x1xf32>
    %908 = arith.cmpf ogt, %906, %907 : vector<16x1xf32>
    %cst_332 = arith.constant 1.000000e+00 : f32
    %909 = vector.broadcast %cst_332 : f32 to vector<16x1xf32>
    %910 = arith.select %908, %906, %909 : vector<16x1xi1>, vector<16x1xf32>
    %cst_333 = arith.constant 0.000000e+00 : f32
    %911 = vector.broadcast %cst_333 : f32 to vector<16x1xf32>
    %912 = arith.cmpf ogt, %906, %911 : vector<16x1xf32>
    %913 = tpu.reciprocal %910 {approx = true} : vector<16x1xf32> -> vector<16x1xf32>
    %cst_334 = arith.constant 0.000000e+00 : f32
    %914 = vector.broadcast %cst_334 : f32 to vector<16x1xf32>
    %915 = arith.select %912, %913, %914 : vector<16x1xi1>, vector<16x1xf32>
    %916 = vector.broadcast %915 : vector<16x1xf32> to vector<16x12xf32>
    %917 = arith.mulf %904, %916 : vector<16x12xf32>
    %918 = vector.extract_strided_slice %34 {offsets = [1, 0], sizes = [1, 32], strides = [1, 1]} : vector<4x32xf32> to vector<1x32xf32>
    %919 = vector.broadcast %918 : vector<1x32xf32> to vector<12x32xf32>
    %920 = arith.mulf %846, %919 : vector<12x32xf32>
    %cst_335 = arith.constant dense<0.000000e+00> : vector<16x32xf32>
    %921 = tpu.matmul %917, %920, %cst_335 {dimension_numbers = #tpu.dot_dimension_numbers<[1], [0], [0], [1], [0, 0, 1, 1], [], []>} : vector<16x12xf32>, vector<12x32xf32>, vector<16x32xf32> -> vector<16x32xf32>
    %922 = arith.addf %884, %921 : vector<16x32xf32>
    %923 = vector.extract_strided_slice %847 {offsets = [0, 2], sizes = [16, 1], strides = [1, 1]} : vector<16x4xf32> to vector<16x1xf32>
    %924 = vector.extract_strided_slice %844 {offsets = [2, 0], sizes = [1, 12], strides = [1, 1]} : vector<4x12xf32> to vector<1x12xf32>
    %925 = vector.broadcast %923 : vector<16x1xf32> to vector<16x12xf32>
    %926 = vector.broadcast %924 : vector<1x12xf32> to vector<16x12xf32>
    %927 = arith.addf %925, %926 : vector<16x12xf32>
    %cst_336 = arith.constant 0.000000e+00 : f32
    %928 = vector.broadcast %cst_336 : f32 to vector<16x12xf32>
    %929 = arith.cmpf ogt, %927, %928 : vector<16x12xf32>
    %cst_337 = arith.constant 2.000000e-01 : f32
    %930 = vector.broadcast %cst_337 : f32 to vector<16x12xf32>
    %931 = arith.mulf %930, %927 : vector<16x12xf32>
    %932 = arith.select %929, %927, %931 : vector<16x12xi1>, vector<16x12xf32>
    %cst_338 = arith.constant 0.000000e+00 : f32
    %933 = vector.broadcast %cst_338 : f32 to vector<16x12xf32>
    %934 = arith.cmpf ogt, %29, %933 : vector<16x12xf32>
    %cst_339 = arith.constant -1.000000e+30 : f32
    %935 = vector.broadcast %cst_339 : f32 to vector<16x12xf32>
    %936 = arith.select %934, %932, %935 : vector<16x12xi1>, vector<16x12xf32>
    %cst_340 = arith.constant dense<0xFF800000> : vector<16xf32>
    %937 = vector.multi_reduction <maximumf>, %936, %cst_340 [1] : vector<16x12xf32> to vector<16xf32>
    %938 = vector.shape_cast %937 : vector<16xf32> to vector<16x1xf32>
    %939 = vector.broadcast %938 : vector<16x1xf32> to vector<16x12xf32>
    %940 = arith.subf %936, %939 : vector<16x12xf32>
    %941 = math.exp %940 : vector<16x12xf32>
    %942 = arith.mulf %941, %29 : vector<16x12xf32>
    %cst_341 = arith.constant dense<0.000000e+00> : vector<16xf32>
    %943 = vector.multi_reduction <add>, %942, %cst_341 [1] : vector<16x12xf32> to vector<16xf32>
    %944 = vector.shape_cast %943 : vector<16xf32> to vector<16x1xf32>
    %cst_342 = arith.constant 0.000000e+00 : f32
    %945 = vector.broadcast %cst_342 : f32 to vector<16x1xf32>
    %946 = arith.cmpf ogt, %944, %945 : vector<16x1xf32>
    %cst_343 = arith.constant 1.000000e+00 : f32
    %947 = vector.broadcast %cst_343 : f32 to vector<16x1xf32>
    %948 = arith.select %946, %944, %947 : vector<16x1xi1>, vector<16x1xf32>
    %cst_344 = arith.constant 0.000000e+00 : f32
    %949 = vector.broadcast %cst_344 : f32 to vector<16x1xf32>
    %950 = arith.cmpf ogt, %944, %949 : vector<16x1xf32>
    %951 = tpu.reciprocal %948 {approx = true} : vector<16x1xf32> -> vector<16x1xf32>
    %cst_345 = arith.constant 0.000000e+00 : f32
    %952 = vector.broadcast %cst_345 : f32 to vector<16x1xf32>
    %953 = arith.select %950, %951, %952 : vector<16x1xi1>, vector<16x1xf32>
    %954 = vector.broadcast %953 : vector<16x1xf32> to vector<16x12xf32>
    %955 = arith.mulf %942, %954 : vector<16x12xf32>
    %956 = vector.extract_strided_slice %34 {offsets = [2, 0], sizes = [1, 32], strides = [1, 1]} : vector<4x32xf32> to vector<1x32xf32>
    %957 = vector.broadcast %956 : vector<1x32xf32> to vector<12x32xf32>
    %958 = arith.mulf %846, %957 : vector<12x32xf32>
    %cst_346 = arith.constant dense<0.000000e+00> : vector<16x32xf32>
    %959 = tpu.matmul %955, %958, %cst_346 {dimension_numbers = #tpu.dot_dimension_numbers<[1], [0], [0], [1], [0, 0, 1, 1], [], []>} : vector<16x12xf32>, vector<12x32xf32>, vector<16x32xf32> -> vector<16x32xf32>
    %960 = arith.addf %922, %959 : vector<16x32xf32>
    %961 = vector.extract_strided_slice %847 {offsets = [0, 3], sizes = [16, 1], strides = [1, 1]} : vector<16x4xf32> to vector<16x1xf32>
    %962 = vector.extract_strided_slice %844 {offsets = [3, 0], sizes = [1, 12], strides = [1, 1]} : vector<4x12xf32> to vector<1x12xf32>
    %963 = vector.broadcast %961 : vector<16x1xf32> to vector<16x12xf32>
    %964 = vector.broadcast %962 : vector<1x12xf32> to vector<16x12xf32>
    %965 = arith.addf %963, %964 : vector<16x12xf32>
    %cst_347 = arith.constant 0.000000e+00 : f32
    %966 = vector.broadcast %cst_347 : f32 to vector<16x12xf32>
    %967 = arith.cmpf ogt, %965, %966 : vector<16x12xf32>
    %cst_348 = arith.constant 2.000000e-01 : f32
    %968 = vector.broadcast %cst_348 : f32 to vector<16x12xf32>
    %969 = arith.mulf %968, %965 : vector<16x12xf32>
    %970 = arith.select %967, %965, %969 : vector<16x12xi1>, vector<16x12xf32>
    %cst_349 = arith.constant 0.000000e+00 : f32
    %971 = vector.broadcast %cst_349 : f32 to vector<16x12xf32>
    %972 = arith.cmpf ogt, %29, %971 : vector<16x12xf32>
    %cst_350 = arith.constant -1.000000e+30 : f32
    %973 = vector.broadcast %cst_350 : f32 to vector<16x12xf32>
    %974 = arith.select %972, %970, %973 : vector<16x12xi1>, vector<16x12xf32>
    %cst_351 = arith.constant dense<0xFF800000> : vector<16xf32>
    %975 = vector.multi_reduction <maximumf>, %974, %cst_351 [1] : vector<16x12xf32> to vector<16xf32>
    %976 = vector.shape_cast %975 : vector<16xf32> to vector<16x1xf32>
    %977 = vector.broadcast %976 : vector<16x1xf32> to vector<16x12xf32>
    %978 = arith.subf %974, %977 : vector<16x12xf32>
    %979 = math.exp %978 : vector<16x12xf32>
    %980 = arith.mulf %979, %29 : vector<16x12xf32>
    %cst_352 = arith.constant dense<0.000000e+00> : vector<16xf32>
    %981 = vector.multi_reduction <add>, %980, %cst_352 [1] : vector<16x12xf32> to vector<16xf32>
    %982 = vector.shape_cast %981 : vector<16xf32> to vector<16x1xf32>
    %cst_353 = arith.constant 0.000000e+00 : f32
    %983 = vector.broadcast %cst_353 : f32 to vector<16x1xf32>
    %984 = arith.cmpf ogt, %982, %983 : vector<16x1xf32>
    %cst_354 = arith.constant 1.000000e+00 : f32
    %985 = vector.broadcast %cst_354 : f32 to vector<16x1xf32>
    %986 = arith.select %984, %982, %985 : vector<16x1xi1>, vector<16x1xf32>
    %cst_355 = arith.constant 0.000000e+00 : f32
    %987 = vector.broadcast %cst_355 : f32 to vector<16x1xf32>
    %988 = arith.cmpf ogt, %982, %987 : vector<16x1xf32>
    %989 = tpu.reciprocal %986 {approx = true} : vector<16x1xf32> -> vector<16x1xf32>
    %cst_356 = arith.constant 0.000000e+00 : f32
    %990 = vector.broadcast %cst_356 : f32 to vector<16x1xf32>
    %991 = arith.select %988, %989, %990 : vector<16x1xi1>, vector<16x1xf32>
    %992 = vector.broadcast %991 : vector<16x1xf32> to vector<16x12xf32>
    %993 = arith.mulf %980, %992 : vector<16x12xf32>
    %994 = vector.extract_strided_slice %34 {offsets = [3, 0], sizes = [1, 32], strides = [1, 1]} : vector<4x32xf32> to vector<1x32xf32>
    %995 = vector.broadcast %994 : vector<1x32xf32> to vector<12x32xf32>
    %996 = arith.mulf %846, %995 : vector<12x32xf32>
    %cst_357 = arith.constant dense<0.000000e+00> : vector<16x32xf32>
    %997 = tpu.matmul %993, %996, %cst_357 {dimension_numbers = #tpu.dot_dimension_numbers<[1], [0], [0], [1], [0, 0, 1, 1], [], []>} : vector<16x12xf32>, vector<12x32xf32>, vector<16x32xf32> -> vector<16x32xf32>
    %998 = arith.addf %960, %997 : vector<16x32xf32>
    %999 = vector.broadcast %26 : vector<1x32xf32> to vector<16x32xf32>
    %1000 = arith.addf %998, %999 : vector<16x32xf32>
    %1001 = vector.extract_strided_slice %842 {offsets = [0, 0], sizes = [8, 32], strides = [1, 1]} : vector<8x36xf32> to vector<8x32xf32>
    %1002 = vector.extract_strided_slice %840 {offsets = [0, 100], sizes = [16, 4], strides = [1, 1]} : vector<16x108xf32> to vector<16x4xf32>
    %1003 = vector.extract_strided_slice %1002 {offsets = [0, 0], sizes = [16, 1], strides = [1, 1]} : vector<16x4xf32> to vector<16x1xf32>
    %1004 = vector.extract_strided_slice %845 {offsets = [0, 0], sizes = [1, 8], strides = [1, 1]} : vector<4x8xf32> to vector<1x8xf32>
    %1005 = vector.broadcast %1003 : vector<16x1xf32> to vector<16x8xf32>
    %1006 = vector.broadcast %1004 : vector<1x8xf32> to vector<16x8xf32>
    %1007 = arith.addf %1005, %1006 : vector<16x8xf32>
    %cst_358 = arith.constant 0.000000e+00 : f32
    %1008 = vector.broadcast %cst_358 : f32 to vector<16x8xf32>
    %1009 = arith.cmpf ogt, %1007, %1008 : vector<16x8xf32>
    %cst_359 = arith.constant 2.000000e-01 : f32
    %1010 = vector.broadcast %cst_359 : f32 to vector<16x8xf32>
    %1011 = arith.mulf %1010, %1007 : vector<16x8xf32>
    %1012 = arith.select %1009, %1007, %1011 : vector<16x8xi1>, vector<16x8xf32>
    %cst_360 = arith.constant 0.000000e+00 : f32
    %1013 = vector.broadcast %cst_360 : f32 to vector<16x8xf32>
    %1014 = arith.cmpf ogt, %30, %1013 : vector<16x8xf32>
    %cst_361 = arith.constant -1.000000e+30 : f32
    %1015 = vector.broadcast %cst_361 : f32 to vector<16x8xf32>
    %1016 = arith.select %1014, %1012, %1015 : vector<16x8xi1>, vector<16x8xf32>
    %cst_362 = arith.constant dense<0xFF800000> : vector<16xf32>
    %1017 = vector.multi_reduction <maximumf>, %1016, %cst_362 [1] : vector<16x8xf32> to vector<16xf32>
    %1018 = vector.shape_cast %1017 : vector<16xf32> to vector<16x1xf32>
    %1019 = vector.broadcast %1018 : vector<16x1xf32> to vector<16x8xf32>
    %1020 = arith.subf %1016, %1019 : vector<16x8xf32>
    %1021 = math.exp %1020 : vector<16x8xf32>
    %1022 = arith.mulf %1021, %30 : vector<16x8xf32>
    %cst_363 = arith.constant dense<0.000000e+00> : vector<16xf32>
    %1023 = vector.multi_reduction <add>, %1022, %cst_363 [1] : vector<16x8xf32> to vector<16xf32>
    %1024 = vector.shape_cast %1023 : vector<16xf32> to vector<16x1xf32>
    %cst_364 = arith.constant 0.000000e+00 : f32
    %1025 = vector.broadcast %cst_364 : f32 to vector<16x1xf32>
    %1026 = arith.cmpf ogt, %1024, %1025 : vector<16x1xf32>
    %cst_365 = arith.constant 1.000000e+00 : f32
    %1027 = vector.broadcast %cst_365 : f32 to vector<16x1xf32>
    %1028 = arith.select %1026, %1024, %1027 : vector<16x1xi1>, vector<16x1xf32>
    %cst_366 = arith.constant 0.000000e+00 : f32
    %1029 = vector.broadcast %cst_366 : f32 to vector<16x1xf32>
    %1030 = arith.cmpf ogt, %1024, %1029 : vector<16x1xf32>
    %1031 = tpu.reciprocal %1028 {approx = true} : vector<16x1xf32> -> vector<16x1xf32>
    %cst_367 = arith.constant 0.000000e+00 : f32
    %1032 = vector.broadcast %cst_367 : f32 to vector<16x1xf32>
    %1033 = arith.select %1030, %1031, %1032 : vector<16x1xi1>, vector<16x1xf32>
    %1034 = vector.broadcast %1033 : vector<16x1xf32> to vector<16x8xf32>
    %1035 = arith.mulf %1022, %1034 : vector<16x8xf32>
    %1036 = vector.extract_strided_slice %34 {offsets = [0, 0], sizes = [1, 32], strides = [1, 1]} : vector<4x32xf32> to vector<1x32xf32>
    %1037 = vector.broadcast %1036 : vector<1x32xf32> to vector<8x32xf32>
    %1038 = arith.mulf %1001, %1037 : vector<8x32xf32>
    %cst_368 = arith.constant dense<0.000000e+00> : vector<16x32xf32>
    %1039 = tpu.matmul %1035, %1038, %cst_368 {dimension_numbers = #tpu.dot_dimension_numbers<[1], [0], [0], [1], [0, 0, 1, 1], [], []>} : vector<16x8xf32>, vector<8x32xf32>, vector<16x32xf32> -> vector<16x32xf32>
    %1040 = vector.extract_strided_slice %1002 {offsets = [0, 1], sizes = [16, 1], strides = [1, 1]} : vector<16x4xf32> to vector<16x1xf32>
    %1041 = vector.extract_strided_slice %845 {offsets = [1, 0], sizes = [1, 8], strides = [1, 1]} : vector<4x8xf32> to vector<1x8xf32>
    %1042 = vector.broadcast %1040 : vector<16x1xf32> to vector<16x8xf32>
    %1043 = vector.broadcast %1041 : vector<1x8xf32> to vector<16x8xf32>
    %1044 = arith.addf %1042, %1043 : vector<16x8xf32>
    %cst_369 = arith.constant 0.000000e+00 : f32
    %1045 = vector.broadcast %cst_369 : f32 to vector<16x8xf32>
    %1046 = arith.cmpf ogt, %1044, %1045 : vector<16x8xf32>
    %cst_370 = arith.constant 2.000000e-01 : f32
    %1047 = vector.broadcast %cst_370 : f32 to vector<16x8xf32>
    %1048 = arith.mulf %1047, %1044 : vector<16x8xf32>
    %1049 = arith.select %1046, %1044, %1048 : vector<16x8xi1>, vector<16x8xf32>
    %cst_371 = arith.constant 0.000000e+00 : f32
    %1050 = vector.broadcast %cst_371 : f32 to vector<16x8xf32>
    %1051 = arith.cmpf ogt, %30, %1050 : vector<16x8xf32>
    %cst_372 = arith.constant -1.000000e+30 : f32
    %1052 = vector.broadcast %cst_372 : f32 to vector<16x8xf32>
    %1053 = arith.select %1051, %1049, %1052 : vector<16x8xi1>, vector<16x8xf32>
    %cst_373 = arith.constant dense<0xFF800000> : vector<16xf32>
    %1054 = vector.multi_reduction <maximumf>, %1053, %cst_373 [1] : vector<16x8xf32> to vector<16xf32>
    %1055 = vector.shape_cast %1054 : vector<16xf32> to vector<16x1xf32>
    %1056 = vector.broadcast %1055 : vector<16x1xf32> to vector<16x8xf32>
    %1057 = arith.subf %1053, %1056 : vector<16x8xf32>
    %1058 = math.exp %1057 : vector<16x8xf32>
    %1059 = arith.mulf %1058, %30 : vector<16x8xf32>
    %cst_374 = arith.constant dense<0.000000e+00> : vector<16xf32>
    %1060 = vector.multi_reduction <add>, %1059, %cst_374 [1] : vector<16x8xf32> to vector<16xf32>
    %1061 = vector.shape_cast %1060 : vector<16xf32> to vector<16x1xf32>
    %cst_375 = arith.constant 0.000000e+00 : f32
    %1062 = vector.broadcast %cst_375 : f32 to vector<16x1xf32>
    %1063 = arith.cmpf ogt, %1061, %1062 : vector<16x1xf32>
    %cst_376 = arith.constant 1.000000e+00 : f32
    %1064 = vector.broadcast %cst_376 : f32 to vector<16x1xf32>
    %1065 = arith.select %1063, %1061, %1064 : vector<16x1xi1>, vector<16x1xf32>
    %cst_377 = arith.constant 0.000000e+00 : f32
    %1066 = vector.broadcast %cst_377 : f32 to vector<16x1xf32>
    %1067 = arith.cmpf ogt, %1061, %1066 : vector<16x1xf32>
    %1068 = tpu.reciprocal %1065 {approx = true} : vector<16x1xf32> -> vector<16x1xf32>
    %cst_378 = arith.constant 0.000000e+00 : f32
    %1069 = vector.broadcast %cst_378 : f32 to vector<16x1xf32>
    %1070 = arith.select %1067, %1068, %1069 : vector<16x1xi1>, vector<16x1xf32>
    %1071 = vector.broadcast %1070 : vector<16x1xf32> to vector<16x8xf32>
    %1072 = arith.mulf %1059, %1071 : vector<16x8xf32>
    %1073 = vector.extract_strided_slice %34 {offsets = [1, 0], sizes = [1, 32], strides = [1, 1]} : vector<4x32xf32> to vector<1x32xf32>
    %1074 = vector.broadcast %1073 : vector<1x32xf32> to vector<8x32xf32>
    %1075 = arith.mulf %1001, %1074 : vector<8x32xf32>
    %cst_379 = arith.constant dense<0.000000e+00> : vector<16x32xf32>
    %1076 = tpu.matmul %1072, %1075, %cst_379 {dimension_numbers = #tpu.dot_dimension_numbers<[1], [0], [0], [1], [0, 0, 1, 1], [], []>} : vector<16x8xf32>, vector<8x32xf32>, vector<16x32xf32> -> vector<16x32xf32>
    %1077 = arith.addf %1039, %1076 : vector<16x32xf32>
    %1078 = vector.extract_strided_slice %1002 {offsets = [0, 2], sizes = [16, 1], strides = [1, 1]} : vector<16x4xf32> to vector<16x1xf32>
    %1079 = vector.extract_strided_slice %845 {offsets = [2, 0], sizes = [1, 8], strides = [1, 1]} : vector<4x8xf32> to vector<1x8xf32>
    %1080 = vector.broadcast %1078 : vector<16x1xf32> to vector<16x8xf32>
    %1081 = vector.broadcast %1079 : vector<1x8xf32> to vector<16x8xf32>
    %1082 = arith.addf %1080, %1081 : vector<16x8xf32>
    %cst_380 = arith.constant 0.000000e+00 : f32
    %1083 = vector.broadcast %cst_380 : f32 to vector<16x8xf32>
    %1084 = arith.cmpf ogt, %1082, %1083 : vector<16x8xf32>
    %cst_381 = arith.constant 2.000000e-01 : f32
    %1085 = vector.broadcast %cst_381 : f32 to vector<16x8xf32>
    %1086 = arith.mulf %1085, %1082 : vector<16x8xf32>
    %1087 = arith.select %1084, %1082, %1086 : vector<16x8xi1>, vector<16x8xf32>
    %cst_382 = arith.constant 0.000000e+00 : f32
    %1088 = vector.broadcast %cst_382 : f32 to vector<16x8xf32>
    %1089 = arith.cmpf ogt, %30, %1088 : vector<16x8xf32>
    %cst_383 = arith.constant -1.000000e+30 : f32
    %1090 = vector.broadcast %cst_383 : f32 to vector<16x8xf32>
    %1091 = arith.select %1089, %1087, %1090 : vector<16x8xi1>, vector<16x8xf32>
    %cst_384 = arith.constant dense<0xFF800000> : vector<16xf32>
    %1092 = vector.multi_reduction <maximumf>, %1091, %cst_384 [1] : vector<16x8xf32> to vector<16xf32>
    %1093 = vector.shape_cast %1092 : vector<16xf32> to vector<16x1xf32>
    %1094 = vector.broadcast %1093 : vector<16x1xf32> to vector<16x8xf32>
    %1095 = arith.subf %1091, %1094 : vector<16x8xf32>
    %1096 = math.exp %1095 : vector<16x8xf32>
    %1097 = arith.mulf %1096, %30 : vector<16x8xf32>
    %cst_385 = arith.constant dense<0.000000e+00> : vector<16xf32>
    %1098 = vector.multi_reduction <add>, %1097, %cst_385 [1] : vector<16x8xf32> to vector<16xf32>
    %1099 = vector.shape_cast %1098 : vector<16xf32> to vector<16x1xf32>
    %cst_386 = arith.constant 0.000000e+00 : f32
    %1100 = vector.broadcast %cst_386 : f32 to vector<16x1xf32>
    %1101 = arith.cmpf ogt, %1099, %1100 : vector<16x1xf32>
    %cst_387 = arith.constant 1.000000e+00 : f32
    %1102 = vector.broadcast %cst_387 : f32 to vector<16x1xf32>
    %1103 = arith.select %1101, %1099, %1102 : vector<16x1xi1>, vector<16x1xf32>
    %cst_388 = arith.constant 0.000000e+00 : f32
    %1104 = vector.broadcast %cst_388 : f32 to vector<16x1xf32>
    %1105 = arith.cmpf ogt, %1099, %1104 : vector<16x1xf32>
    %1106 = tpu.reciprocal %1103 {approx = true} : vector<16x1xf32> -> vector<16x1xf32>
    %cst_389 = arith.constant 0.000000e+00 : f32
    %1107 = vector.broadcast %cst_389 : f32 to vector<16x1xf32>
    %1108 = arith.select %1105, %1106, %1107 : vector<16x1xi1>, vector<16x1xf32>
    %1109 = vector.broadcast %1108 : vector<16x1xf32> to vector<16x8xf32>
    %1110 = arith.mulf %1097, %1109 : vector<16x8xf32>
    %1111 = vector.extract_strided_slice %34 {offsets = [2, 0], sizes = [1, 32], strides = [1, 1]} : vector<4x32xf32> to vector<1x32xf32>
    %1112 = vector.broadcast %1111 : vector<1x32xf32> to vector<8x32xf32>
    %1113 = arith.mulf %1001, %1112 : vector<8x32xf32>
    %cst_390 = arith.constant dense<0.000000e+00> : vector<16x32xf32>
    %1114 = tpu.matmul %1110, %1113, %cst_390 {dimension_numbers = #tpu.dot_dimension_numbers<[1], [0], [0], [1], [0, 0, 1, 1], [], []>} : vector<16x8xf32>, vector<8x32xf32>, vector<16x32xf32> -> vector<16x32xf32>
    %1115 = arith.addf %1077, %1114 : vector<16x32xf32>
    %1116 = vector.extract_strided_slice %1002 {offsets = [0, 3], sizes = [16, 1], strides = [1, 1]} : vector<16x4xf32> to vector<16x1xf32>
    %1117 = vector.extract_strided_slice %845 {offsets = [3, 0], sizes = [1, 8], strides = [1, 1]} : vector<4x8xf32> to vector<1x8xf32>
    %1118 = vector.broadcast %1116 : vector<16x1xf32> to vector<16x8xf32>
    %1119 = vector.broadcast %1117 : vector<1x8xf32> to vector<16x8xf32>
    %1120 = arith.addf %1118, %1119 : vector<16x8xf32>
    %cst_391 = arith.constant 0.000000e+00 : f32
    %1121 = vector.broadcast %cst_391 : f32 to vector<16x8xf32>
    %1122 = arith.cmpf ogt, %1120, %1121 : vector<16x8xf32>
    %cst_392 = arith.constant 2.000000e-01 : f32
    %1123 = vector.broadcast %cst_392 : f32 to vector<16x8xf32>
    %1124 = arith.mulf %1123, %1120 : vector<16x8xf32>
    %1125 = arith.select %1122, %1120, %1124 : vector<16x8xi1>, vector<16x8xf32>
    %cst_393 = arith.constant 0.000000e+00 : f32
    %1126 = vector.broadcast %cst_393 : f32 to vector<16x8xf32>
    %1127 = arith.cmpf ogt, %30, %1126 : vector<16x8xf32>
    %cst_394 = arith.constant -1.000000e+30 : f32
    %1128 = vector.broadcast %cst_394 : f32 to vector<16x8xf32>
    %1129 = arith.select %1127, %1125, %1128 : vector<16x8xi1>, vector<16x8xf32>
    %cst_395 = arith.constant dense<0xFF800000> : vector<16xf32>
    %1130 = vector.multi_reduction <maximumf>, %1129, %cst_395 [1] : vector<16x8xf32> to vector<16xf32>
    %1131 = vector.shape_cast %1130 : vector<16xf32> to vector<16x1xf32>
    %1132 = vector.broadcast %1131 : vector<16x1xf32> to vector<16x8xf32>
    %1133 = arith.subf %1129, %1132 : vector<16x8xf32>
    %1134 = math.exp %1133 : vector<16x8xf32>
    %1135 = arith.mulf %1134, %30 : vector<16x8xf32>
    %cst_396 = arith.constant dense<0.000000e+00> : vector<16xf32>
    %1136 = vector.multi_reduction <add>, %1135, %cst_396 [1] : vector<16x8xf32> to vector<16xf32>
    %1137 = vector.shape_cast %1136 : vector<16xf32> to vector<16x1xf32>
    %cst_397 = arith.constant 0.000000e+00 : f32
    %1138 = vector.broadcast %cst_397 : f32 to vector<16x1xf32>
    %1139 = arith.cmpf ogt, %1137, %1138 : vector<16x1xf32>
    %cst_398 = arith.constant 1.000000e+00 : f32
    %1140 = vector.broadcast %cst_398 : f32 to vector<16x1xf32>
    %1141 = arith.select %1139, %1137, %1140 : vector<16x1xi1>, vector<16x1xf32>
    %cst_399 = arith.constant 0.000000e+00 : f32
    %1142 = vector.broadcast %cst_399 : f32 to vector<16x1xf32>
    %1143 = arith.cmpf ogt, %1137, %1142 : vector<16x1xf32>
    %1144 = tpu.reciprocal %1141 {approx = true} : vector<16x1xf32> -> vector<16x1xf32>
    %cst_400 = arith.constant 0.000000e+00 : f32
    %1145 = vector.broadcast %cst_400 : f32 to vector<16x1xf32>
    %1146 = arith.select %1143, %1144, %1145 : vector<16x1xi1>, vector<16x1xf32>
    %1147 = vector.broadcast %1146 : vector<16x1xf32> to vector<16x8xf32>
    %1148 = arith.mulf %1135, %1147 : vector<16x8xf32>
    %1149 = vector.extract_strided_slice %34 {offsets = [3, 0], sizes = [1, 32], strides = [1, 1]} : vector<4x32xf32> to vector<1x32xf32>
    %1150 = vector.broadcast %1149 : vector<1x32xf32> to vector<8x32xf32>
    %1151 = arith.mulf %1001, %1150 : vector<8x32xf32>
    %cst_401 = arith.constant dense<0.000000e+00> : vector<16x32xf32>
    %1152 = tpu.matmul %1148, %1151, %cst_401 {dimension_numbers = #tpu.dot_dimension_numbers<[1], [0], [0], [1], [0, 0, 1, 1], [], []>} : vector<16x8xf32>, vector<8x32xf32>, vector<16x32xf32> -> vector<16x32xf32>
    %1153 = arith.addf %1115, %1152 : vector<16x32xf32>
    %1154 = vector.broadcast %27 : vector<1x32xf32> to vector<16x32xf32>
    %1155 = arith.addf %1153, %1154 : vector<16x32xf32>
    %1156 = arith.addf %1000, %1155 : vector<16x32xf32>
    %1157 = vector.extract_strided_slice %840 {offsets = [0, 64], sizes = [16, 32], strides = [1, 1]} : vector<16x108xf32> to vector<16x32xf32>
    %1158 = vector.extract_strided_slice %840 {offsets = [0, 104], sizes = [16, 4], strides = [1, 1]} : vector<16x108xf32> to vector<16x4xf32>
    %1159 = vector.extract_strided_slice %843 {offsets = [8, 0], sizes = [4, 16], strides = [1, 1]} : vector<12x16xf32> to vector<4x16xf32>
    %1160 = vector.extract_strided_slice %1158 {offsets = [0, 0], sizes = [16, 1], strides = [1, 1]} : vector<16x4xf32> to vector<16x1xf32>
    %1161 = vector.extract_strided_slice %1159 {offsets = [0, 0], sizes = [1, 16], strides = [1, 1]} : vector<4x16xf32> to vector<1x16xf32>
    %1162 = vector.broadcast %1160 : vector<16x1xf32> to vector<16x16xf32>
    %1163 = vector.broadcast %1161 : vector<1x16xf32> to vector<16x16xf32>
    %1164 = arith.addf %1162, %1163 : vector<16x16xf32>
    %cst_402 = arith.constant 0.000000e+00 : f32
    %1165 = vector.broadcast %cst_402 : f32 to vector<16x16xf32>
    %1166 = arith.cmpf ogt, %1164, %1165 : vector<16x16xf32>
    %cst_403 = arith.constant 2.000000e-01 : f32
    %1167 = vector.broadcast %cst_403 : f32 to vector<16x16xf32>
    %1168 = arith.mulf %1167, %1164 : vector<16x16xf32>
    %1169 = arith.select %1166, %1164, %1168 : vector<16x16xi1>, vector<16x16xf32>
    %cst_404 = arith.constant 0.000000e+00 : f32
    %1170 = vector.broadcast %cst_404 : f32 to vector<16x16xf32>
    %1171 = arith.cmpf ogt, %33, %1170 : vector<16x16xf32>
    %cst_405 = arith.constant -1.000000e+30 : f32
    %1172 = vector.broadcast %cst_405 : f32 to vector<16x16xf32>
    %1173 = arith.select %1171, %1169, %1172 : vector<16x16xi1>, vector<16x16xf32>
    %cst_406 = arith.constant dense<0xFF800000> : vector<16xf32>
    %1174 = vector.multi_reduction <maximumf>, %1173, %cst_406 [1] : vector<16x16xf32> to vector<16xf32>
    %1175 = vector.shape_cast %1174 : vector<16xf32> to vector<16x1xf32>
    %1176 = vector.broadcast %1175 : vector<16x1xf32> to vector<16x16xf32>
    %1177 = arith.subf %1173, %1176 : vector<16x16xf32>
    %1178 = math.exp %1177 : vector<16x16xf32>
    %1179 = arith.mulf %1178, %33 : vector<16x16xf32>
    %cst_407 = arith.constant dense<0.000000e+00> : vector<16xf32>
    %1180 = vector.multi_reduction <add>, %1179, %cst_407 [1] : vector<16x16xf32> to vector<16xf32>
    %1181 = vector.shape_cast %1180 : vector<16xf32> to vector<16x1xf32>
    %cst_408 = arith.constant 0.000000e+00 : f32
    %1182 = vector.broadcast %cst_408 : f32 to vector<16x1xf32>
    %1183 = arith.cmpf ogt, %1181, %1182 : vector<16x1xf32>
    %cst_409 = arith.constant 1.000000e+00 : f32
    %1184 = vector.broadcast %cst_409 : f32 to vector<16x1xf32>
    %1185 = arith.select %1183, %1181, %1184 : vector<16x1xi1>, vector<16x1xf32>
    %cst_410 = arith.constant 0.000000e+00 : f32
    %1186 = vector.broadcast %cst_410 : f32 to vector<16x1xf32>
    %1187 = arith.cmpf ogt, %1181, %1186 : vector<16x1xf32>
    %1188 = tpu.reciprocal %1185 {approx = true} : vector<16x1xf32> -> vector<16x1xf32>
    %cst_411 = arith.constant 0.000000e+00 : f32
    %1189 = vector.broadcast %cst_411 : f32 to vector<16x1xf32>
    %1190 = arith.select %1187, %1188, %1189 : vector<16x1xi1>, vector<16x1xf32>
    %1191 = vector.broadcast %1190 : vector<16x1xf32> to vector<16x16xf32>
    %1192 = arith.mulf %1179, %1191 : vector<16x16xf32>
    %1193 = vector.extract_strided_slice %34 {offsets = [0, 0], sizes = [1, 32], strides = [1, 1]} : vector<4x32xf32> to vector<1x32xf32>
    %1194 = vector.broadcast %1193 : vector<1x32xf32> to vector<16x32xf32>
    %1195 = arith.mulf %1157, %1194 : vector<16x32xf32>
    %cst_412 = arith.constant dense<0.000000e+00> : vector<16x32xf32>
    %1196 = tpu.matmul %1192, %1195, %cst_412 {dimension_numbers = #tpu.dot_dimension_numbers<[1], [0], [0], [1], [0, 0, 1, 1], [], []>} : vector<16x16xf32>, vector<16x32xf32>, vector<16x32xf32> -> vector<16x32xf32>
    %1197 = vector.extract_strided_slice %1158 {offsets = [0, 1], sizes = [16, 1], strides = [1, 1]} : vector<16x4xf32> to vector<16x1xf32>
    %1198 = vector.extract_strided_slice %1159 {offsets = [1, 0], sizes = [1, 16], strides = [1, 1]} : vector<4x16xf32> to vector<1x16xf32>
    %1199 = vector.broadcast %1197 : vector<16x1xf32> to vector<16x16xf32>
    %1200 = vector.broadcast %1198 : vector<1x16xf32> to vector<16x16xf32>
    %1201 = arith.addf %1199, %1200 : vector<16x16xf32>
    %cst_413 = arith.constant 0.000000e+00 : f32
    %1202 = vector.broadcast %cst_413 : f32 to vector<16x16xf32>
    %1203 = arith.cmpf ogt, %1201, %1202 : vector<16x16xf32>
    %cst_414 = arith.constant 2.000000e-01 : f32
    %1204 = vector.broadcast %cst_414 : f32 to vector<16x16xf32>
    %1205 = arith.mulf %1204, %1201 : vector<16x16xf32>
    %1206 = arith.select %1203, %1201, %1205 : vector<16x16xi1>, vector<16x16xf32>
    %cst_415 = arith.constant 0.000000e+00 : f32
    %1207 = vector.broadcast %cst_415 : f32 to vector<16x16xf32>
    %1208 = arith.cmpf ogt, %33, %1207 : vector<16x16xf32>
    %cst_416 = arith.constant -1.000000e+30 : f32
    %1209 = vector.broadcast %cst_416 : f32 to vector<16x16xf32>
    %1210 = arith.select %1208, %1206, %1209 : vector<16x16xi1>, vector<16x16xf32>
    %cst_417 = arith.constant dense<0xFF800000> : vector<16xf32>
    %1211 = vector.multi_reduction <maximumf>, %1210, %cst_417 [1] : vector<16x16xf32> to vector<16xf32>
    %1212 = vector.shape_cast %1211 : vector<16xf32> to vector<16x1xf32>
    %1213 = vector.broadcast %1212 : vector<16x1xf32> to vector<16x16xf32>
    %1214 = arith.subf %1210, %1213 : vector<16x16xf32>
    %1215 = math.exp %1214 : vector<16x16xf32>
    %1216 = arith.mulf %1215, %33 : vector<16x16xf32>
    %cst_418 = arith.constant dense<0.000000e+00> : vector<16xf32>
    %1217 = vector.multi_reduction <add>, %1216, %cst_418 [1] : vector<16x16xf32> to vector<16xf32>
    %1218 = vector.shape_cast %1217 : vector<16xf32> to vector<16x1xf32>
    %cst_419 = arith.constant 0.000000e+00 : f32
    %1219 = vector.broadcast %cst_419 : f32 to vector<16x1xf32>
    %1220 = arith.cmpf ogt, %1218, %1219 : vector<16x1xf32>
    %cst_420 = arith.constant 1.000000e+00 : f32
    %1221 = vector.broadcast %cst_420 : f32 to vector<16x1xf32>
    %1222 = arith.select %1220, %1218, %1221 : vector<16x1xi1>, vector<16x1xf32>
    %cst_421 = arith.constant 0.000000e+00 : f32
    %1223 = vector.broadcast %cst_421 : f32 to vector<16x1xf32>
    %1224 = arith.cmpf ogt, %1218, %1223 : vector<16x1xf32>
    %1225 = tpu.reciprocal %1222 {approx = true} : vector<16x1xf32> -> vector<16x1xf32>
    %cst_422 = arith.constant 0.000000e+00 : f32
    %1226 = vector.broadcast %cst_422 : f32 to vector<16x1xf32>
    %1227 = arith.select %1224, %1225, %1226 : vector<16x1xi1>, vector<16x1xf32>
    %1228 = vector.broadcast %1227 : vector<16x1xf32> to vector<16x16xf32>
    %1229 = arith.mulf %1216, %1228 : vector<16x16xf32>
    %1230 = vector.extract_strided_slice %34 {offsets = [1, 0], sizes = [1, 32], strides = [1, 1]} : vector<4x32xf32> to vector<1x32xf32>
    %1231 = vector.broadcast %1230 : vector<1x32xf32> to vector<16x32xf32>
    %1232 = arith.mulf %1157, %1231 : vector<16x32xf32>
    %cst_423 = arith.constant dense<0.000000e+00> : vector<16x32xf32>
    %1233 = tpu.matmul %1229, %1232, %cst_423 {dimension_numbers = #tpu.dot_dimension_numbers<[1], [0], [0], [1], [0, 0, 1, 1], [], []>} : vector<16x16xf32>, vector<16x32xf32>, vector<16x32xf32> -> vector<16x32xf32>
    %1234 = arith.addf %1196, %1233 : vector<16x32xf32>
    %1235 = vector.extract_strided_slice %1158 {offsets = [0, 2], sizes = [16, 1], strides = [1, 1]} : vector<16x4xf32> to vector<16x1xf32>
    %1236 = vector.extract_strided_slice %1159 {offsets = [2, 0], sizes = [1, 16], strides = [1, 1]} : vector<4x16xf32> to vector<1x16xf32>
    %1237 = vector.broadcast %1235 : vector<16x1xf32> to vector<16x16xf32>
    %1238 = vector.broadcast %1236 : vector<1x16xf32> to vector<16x16xf32>
    %1239 = arith.addf %1237, %1238 : vector<16x16xf32>
    %cst_424 = arith.constant 0.000000e+00 : f32
    %1240 = vector.broadcast %cst_424 : f32 to vector<16x16xf32>
    %1241 = arith.cmpf ogt, %1239, %1240 : vector<16x16xf32>
    %cst_425 = arith.constant 2.000000e-01 : f32
    %1242 = vector.broadcast %cst_425 : f32 to vector<16x16xf32>
    %1243 = arith.mulf %1242, %1239 : vector<16x16xf32>
    %1244 = arith.select %1241, %1239, %1243 : vector<16x16xi1>, vector<16x16xf32>
    %cst_426 = arith.constant 0.000000e+00 : f32
    %1245 = vector.broadcast %cst_426 : f32 to vector<16x16xf32>
    %1246 = arith.cmpf ogt, %33, %1245 : vector<16x16xf32>
    %cst_427 = arith.constant -1.000000e+30 : f32
    %1247 = vector.broadcast %cst_427 : f32 to vector<16x16xf32>
    %1248 = arith.select %1246, %1244, %1247 : vector<16x16xi1>, vector<16x16xf32>
    %cst_428 = arith.constant dense<0xFF800000> : vector<16xf32>
    %1249 = vector.multi_reduction <maximumf>, %1248, %cst_428 [1] : vector<16x16xf32> to vector<16xf32>
    %1250 = vector.shape_cast %1249 : vector<16xf32> to vector<16x1xf32>
    %1251 = vector.broadcast %1250 : vector<16x1xf32> to vector<16x16xf32>
    %1252 = arith.subf %1248, %1251 : vector<16x16xf32>
    %1253 = math.exp %1252 : vector<16x16xf32>
    %1254 = arith.mulf %1253, %33 : vector<16x16xf32>
    %cst_429 = arith.constant dense<0.000000e+00> : vector<16xf32>
    %1255 = vector.multi_reduction <add>, %1254, %cst_429 [1] : vector<16x16xf32> to vector<16xf32>
    %1256 = vector.shape_cast %1255 : vector<16xf32> to vector<16x1xf32>
    %cst_430 = arith.constant 0.000000e+00 : f32
    %1257 = vector.broadcast %cst_430 : f32 to vector<16x1xf32>
    %1258 = arith.cmpf ogt, %1256, %1257 : vector<16x1xf32>
    %cst_431 = arith.constant 1.000000e+00 : f32
    %1259 = vector.broadcast %cst_431 : f32 to vector<16x1xf32>
    %1260 = arith.select %1258, %1256, %1259 : vector<16x1xi1>, vector<16x1xf32>
    %cst_432 = arith.constant 0.000000e+00 : f32
    %1261 = vector.broadcast %cst_432 : f32 to vector<16x1xf32>
    %1262 = arith.cmpf ogt, %1256, %1261 : vector<16x1xf32>
    %1263 = tpu.reciprocal %1260 {approx = true} : vector<16x1xf32> -> vector<16x1xf32>
    %cst_433 = arith.constant 0.000000e+00 : f32
    %1264 = vector.broadcast %cst_433 : f32 to vector<16x1xf32>
    %1265 = arith.select %1262, %1263, %1264 : vector<16x1xi1>, vector<16x1xf32>
    %1266 = vector.broadcast %1265 : vector<16x1xf32> to vector<16x16xf32>
    %1267 = arith.mulf %1254, %1266 : vector<16x16xf32>
    %1268 = vector.extract_strided_slice %34 {offsets = [2, 0], sizes = [1, 32], strides = [1, 1]} : vector<4x32xf32> to vector<1x32xf32>
    %1269 = vector.broadcast %1268 : vector<1x32xf32> to vector<16x32xf32>
    %1270 = arith.mulf %1157, %1269 : vector<16x32xf32>
    %cst_434 = arith.constant dense<0.000000e+00> : vector<16x32xf32>
    %1271 = tpu.matmul %1267, %1270, %cst_434 {dimension_numbers = #tpu.dot_dimension_numbers<[1], [0], [0], [1], [0, 0, 1, 1], [], []>} : vector<16x16xf32>, vector<16x32xf32>, vector<16x32xf32> -> vector<16x32xf32>
    %1272 = arith.addf %1234, %1271 : vector<16x32xf32>
    %1273 = vector.extract_strided_slice %1158 {offsets = [0, 3], sizes = [16, 1], strides = [1, 1]} : vector<16x4xf32> to vector<16x1xf32>
    %1274 = vector.extract_strided_slice %1159 {offsets = [3, 0], sizes = [1, 16], strides = [1, 1]} : vector<4x16xf32> to vector<1x16xf32>
    %1275 = vector.broadcast %1273 : vector<16x1xf32> to vector<16x16xf32>
    %1276 = vector.broadcast %1274 : vector<1x16xf32> to vector<16x16xf32>
    %1277 = arith.addf %1275, %1276 : vector<16x16xf32>
    %cst_435 = arith.constant 0.000000e+00 : f32
    %1278 = vector.broadcast %cst_435 : f32 to vector<16x16xf32>
    %1279 = arith.cmpf ogt, %1277, %1278 : vector<16x16xf32>
    %cst_436 = arith.constant 2.000000e-01 : f32
    %1280 = vector.broadcast %cst_436 : f32 to vector<16x16xf32>
    %1281 = arith.mulf %1280, %1277 : vector<16x16xf32>
    %1282 = arith.select %1279, %1277, %1281 : vector<16x16xi1>, vector<16x16xf32>
    %cst_437 = arith.constant 0.000000e+00 : f32
    %1283 = vector.broadcast %cst_437 : f32 to vector<16x16xf32>
    %1284 = arith.cmpf ogt, %33, %1283 : vector<16x16xf32>
    %cst_438 = arith.constant -1.000000e+30 : f32
    %1285 = vector.broadcast %cst_438 : f32 to vector<16x16xf32>
    %1286 = arith.select %1284, %1282, %1285 : vector<16x16xi1>, vector<16x16xf32>
    %cst_439 = arith.constant dense<0xFF800000> : vector<16xf32>
    %1287 = vector.multi_reduction <maximumf>, %1286, %cst_439 [1] : vector<16x16xf32> to vector<16xf32>
    %1288 = vector.shape_cast %1287 : vector<16xf32> to vector<16x1xf32>
    %1289 = vector.broadcast %1288 : vector<16x1xf32> to vector<16x16xf32>
    %1290 = arith.subf %1286, %1289 : vector<16x16xf32>
    %1291 = math.exp %1290 : vector<16x16xf32>
    %1292 = arith.mulf %1291, %33 : vector<16x16xf32>
    %cst_440 = arith.constant dense<0.000000e+00> : vector<16xf32>
    %1293 = vector.multi_reduction <add>, %1292, %cst_440 [1] : vector<16x16xf32> to vector<16xf32>
    %1294 = vector.shape_cast %1293 : vector<16xf32> to vector<16x1xf32>
    %cst_441 = arith.constant 0.000000e+00 : f32
    %1295 = vector.broadcast %cst_441 : f32 to vector<16x1xf32>
    %1296 = arith.cmpf ogt, %1294, %1295 : vector<16x1xf32>
    %cst_442 = arith.constant 1.000000e+00 : f32
    %1297 = vector.broadcast %cst_442 : f32 to vector<16x1xf32>
    %1298 = arith.select %1296, %1294, %1297 : vector<16x1xi1>, vector<16x1xf32>
    %cst_443 = arith.constant 0.000000e+00 : f32
    %1299 = vector.broadcast %cst_443 : f32 to vector<16x1xf32>
    %1300 = arith.cmpf ogt, %1294, %1299 : vector<16x1xf32>
    %1301 = tpu.reciprocal %1298 {approx = true} : vector<16x1xf32> -> vector<16x1xf32>
    %cst_444 = arith.constant 0.000000e+00 : f32
    %1302 = vector.broadcast %cst_444 : f32 to vector<16x1xf32>
    %1303 = arith.select %1300, %1301, %1302 : vector<16x1xi1>, vector<16x1xf32>
    %1304 = vector.broadcast %1303 : vector<16x1xf32> to vector<16x16xf32>
    %1305 = arith.mulf %1292, %1304 : vector<16x16xf32>
    %1306 = vector.extract_strided_slice %34 {offsets = [3, 0], sizes = [1, 32], strides = [1, 1]} : vector<4x32xf32> to vector<1x32xf32>
    %1307 = vector.broadcast %1306 : vector<1x32xf32> to vector<16x32xf32>
    %1308 = arith.mulf %1157, %1307 : vector<16x32xf32>
    %cst_445 = arith.constant dense<0.000000e+00> : vector<16x32xf32>
    %1309 = tpu.matmul %1305, %1308, %cst_445 {dimension_numbers = #tpu.dot_dimension_numbers<[1], [0], [0], [1], [0, 0, 1, 1], [], []>} : vector<16x16xf32>, vector<16x32xf32>, vector<16x32xf32> -> vector<16x32xf32>
    %1310 = arith.addf %1272, %1309 : vector<16x32xf32>
    %1311 = vector.broadcast %28 : vector<1x32xf32> to vector<16x32xf32>
    %1312 = arith.addf %1310, %1311 : vector<16x32xf32>
    %1313 = arith.addf %1156, %1312 : vector<16x32xf32>
    %cst_446 = arith.constant 0.000000e+00 : f32
    %1314 = vector.broadcast %cst_446 : f32 to vector<16x32xf32>
    %1315 = arith.maximumf %1313, %1314 : vector<16x32xf32>
    %cst_447 = arith.constant dense<0.000000e+00> : vector<32xf32>
    %1316 = vector.multi_reduction <add>, %1315, %cst_447 [0] : vector<16x32xf32> to vector<32xf32>
    %1317 = vector.shape_cast %1316 : vector<32xf32> to vector<1x32xf32>
    %cst_448 = arith.constant 6.250000e-02 : f32
    %1318 = vector.broadcast %cst_448 : f32 to vector<1x32xf32>
    %1319 = arith.mulf %1317, %1318 : vector<1x32xf32>
    %cst_449 = arith.constant dense<0.000000e+00> : vector<1x16xf32>
    %1320 = tpu.matmul %1319, %35, %cst_449 {dimension_numbers = #tpu.dot_dimension_numbers<[1], [0], [0], [1], [0, 0, 1, 1], [], []>} : vector<1x32xf32>, vector<32x16xf32>, vector<1x16xf32> -> vector<1x16xf32>
    %1321 = arith.addf %1320, %36 : vector<1x16xf32>
    %cst_450 = arith.constant 0.000000e+00 : f32
    %1322 = vector.broadcast %cst_450 : f32 to vector<1x16xf32>
    %1323 = arith.maximumf %1321, %1322 : vector<1x16xf32>
    %cst_451 = arith.constant dense<0.000000e+00> : vector<1x1xf32>
    %1324 = tpu.matmul %1323, %37, %cst_451 {dimension_numbers = #tpu.dot_dimension_numbers<[1], [0], [0], [1], [0, 0, 1, 1], [], []>} : vector<1x16xf32>, vector<16x1xf32>, vector<1x1xf32> -> vector<1x1xf32>
    %1325 = arith.addf %1324, %38 : vector<1x1xf32>
    %c0_452 = arith.constant 0 : index
    %c0_453 = arith.constant 0 : index
    %1326 = vector.load %arg41[%c0_452, %c0_453] : memref<1x1xf32, #tpu.memory_space<vmem>>, vector<1x1xf32>
    tpu.vector_store %arg41[%c0_452, %c0_453], %1325 {strides = array<i32>} : memref<1x1xf32, #tpu.memory_space<vmem>>, vector<1x1xf32>,
    return
  }
}

</mosaic_0001>

<bundles_post_ra>
// kernel: forward.1
= control target key start
LH: loop header
LB: loop body
LE: loop exit
PB: predicated region body
PF: predicated region fallthrough
CT: control target
= control target key end

     0   :  { %s7469_s6 = smov 1   ;;  %s7470_s10 = smov 2   ;;  %s9644_s0 = inlined_call_operand.smem [shape: u32[42], index: -1, kind: input, shape index: {}] }
   0x1   :  { %s7540_s5 = sld [smem:[%s9644_s0]]   ;;  %s7471_s14 = smov 3  }
   0x2   :  { %s7545_s9 = sld [smem:[%s9644_s0 + %s7469_s6]]   ;;  %s7472_s18 = smov 4  }
   0x3   :  { %s7550_s13 = sld [smem:[%s9644_s0 + %s7470_s10]]   ;;  %s7473_s22 = smov 5  }
   0x4   :  { %s7555_s17 = sld [smem:[%s9644_s0 + %s7471_s14]]   ;;  %s7474_s26 = smov 6  }
   0x5   :  { %s7560_s21 = sld [smem:[%s9644_s0 + %s7472_s18]]   ;;  %s7475_s30 = smov 7  }
   0x6   :  { %s7565_s25 = sld [smem:[%s9644_s0 + %s7473_s22]]   ;;  %s7476_s4 = smov 8  }
   0x7   :  { %s7570_s29 = sld [smem:[%s9644_s0 + %s7474_s26]]   ;;  %s7477_s10 = smov 9  }
   0x8   :  { %s7575_s3 = sld [smem:[%s9644_s0 + %s7475_s30]]   ;;  %s7478_s15 = smov 10  }
   0x9   :  { %s7580_s8 = sld [smem:[%s9644_s0 + %s7476_s4]]   ;;  %s7479_s20 = smov 11  }
   0xa   :  { %s7585_s14 = sld [smem:[%s9644_s0 + %s7477_s10]]   ;;  %s7480_s26 = smov 12  }
   0xb   :  { %s7590_s19 = sld [smem:[%s9644_s0 + %s7478_s15]]   ;;  %s7481_s1 = smov 13  }
   0xc   :  { %s7595_s24 = sld [smem:[%s9644_s0 + %s7479_s20]]   ;;  %s7482_s7 = smov 14  }
   0xd   :  { %s7600_s30 = sld [smem:[%s9644_s0 + %s7480_s26]]   ;;  %s7483_s15 = smov 15  }
   0xe   :  { %s7605_s6 = sld [smem:[%s9644_s0 + %s7481_s1]]   ;;  %s7484_s22 = smov 16  }
   0xf   :  { %s7610_s12 = sld [smem:[%s9644_s0 + %s7482_s7]]   ;;  %s7485_s28 = smov 17  }
  0x10   :  { %s7615_s20 = sld [smem:[%s9644_s0 + %s7483_s15]]   ;;  %s7486_s7 = smov 18  }
  0x11   :  { %s7620_s27 = sld [smem:[%s9644_s0 + %s7484_s22]]   ;;  %s7487_s15 = smov 19  }
  0x12   :  { %s7625_s4 = sld [smem:[%s9644_s0 + %s7485_s28]]   ;;  %s7488_s22 = smov 20  }
  0x13   :  { %9747 = sst [smem:[#allocation6_spill]] %s7600_s30  ;;  %s7489_s28 = smov 21  }
  0x14   :  { %s7507_s16 = smov 41  }
  0x15   :  { %9748 = sst [smem:[#allocation7_spill]] %s7610_s12 }
  0x16   :  { %9749 = sst [smem:[#allocation8_spill]] %s7615_s20 }
  0x17   :  { %9750 = sst [smem:[#allocation9_spill]] %s7620_s27 }
  0x18   :  { %9751 = sst [smem:[#allocation10_spill]] %s7625_s4 }
  0x19   :  { %s7630_s12 = sld [smem:[%s9644_s0 + %s7486_s7]]   ;;  %s7490_s7 = smov 22  }
  0x1a   :  { %s7635_s20 = sld [smem:[%s9644_s0 + %s7487_s15]]   ;;  %s7491_s15 = smov 23  }
  0x1b   :  { %s7640_s27 = sld [smem:[%s9644_s0 + %s7488_s22]]   ;;  %s7492_s22 = smov 24  }
  0x1c   :  { %s7645_s4 = sld [smem:[%s9644_s0 + %s7489_s28]]   ;;  %s7493_s28 = smov 25  }
  0x1f   :  { %9752 = sst [smem:[#allocation11_spill]] %s7630_s12 }
  0x20   :  { %9753 = sst [smem:[#allocation12_spill]] %s7635_s20 }
  0x21   :  { %9754 = sst [smem:[#allocation13_spill]] %s7640_s27 }
  0x22   :  { %9755 = sst [smem:[#allocation14_spill]] %s7645_s4 }
  0x23   :  { %s7650_s12 = sld [smem:[%s9644_s0 + %s7490_s7]]   ;;  %s7494_s7 = smov 26  }
  0x24   :  { %s7655_s20 = sld [smem:[%s9644_s0 + %s7491_s15]]   ;;  %s7495_s15 = smov 27  }
  0x25   :  { %s7660_s27 = sld [smem:[%s9644_s0 + %s7492_s22]]   ;;  %s7496_s22 = smov 30  }
  0x26   :  { %s7665_s4 = sld [smem:[%s9644_s0 + %s7493_s28]]   ;;  %s7497_s28 = smov 31  }
  0x29   :  { %9756 = sst [smem:[#allocation15_spill]] %s7650_s12 }
  0x2a   :  { %9757 = sst [smem:[#allocation16_spill]] %s7655_s20 }
  0x2b   :  { %9758 = sst [smem:[#allocation17_spill]] %s7660_s27 }
  0x2c   :  { %9759 = sst [smem:[#allocation18_spill]] %s7665_s4 }
  0x2d   :  { %s7670_s12 = sld [smem:[%s9644_s0 + %s7494_s7]]   ;;  %s7498_s7 = smov 32  }
  0x2e   :  { %s7675_s20 = sld [smem:[%s9644_s0 + %s7495_s15]]   ;;  %s7499_s15 = smov 33  }
  0x2f   :  { %s7680_s27 = sld [smem:[%s9644_s0 + %s7496_s22]]   ;;  %s7500_s22 = smov 34  }
  0x30   :  { %s7685_s4 = sld [smem:[%s9644_s0 + %s7497_s28]]   ;;  %s7501_s28 = smov 35  }
  0x33   :  { %9760 = sst [smem:[#allocation19_spill]] %s7670_s12 }
  0x34   :  { %9761 = sst [smem:[#allocation20_spill]] %s7675_s20 }
  0x35   :  { %9762 = sst [smem:[#allocation21_spill]] %s7680_s27 }
  0x36   :  { %9763 = sst [smem:[#allocation22_spill]] %s7685_s4 }
  0x37   :  { %s7690_s12 = sld [smem:[%s9644_s0 + %s7498_s7]]   ;;  %s7502_s7 = smov 36  }
  0x38   :  { %s7695_s20 = sld [smem:[%s9644_s0 + %s7499_s15]]   ;;  %s7503_s15 = smov 37  }
  0x39   :  { %s7700_s27 = sld [smem:[%s9644_s0 + %s7500_s22]]   ;;  %s7504_s22 = smov 38  }
  0x3a   :  { %s7705_s4 = sld [smem:[%s9644_s0 + %s7501_s28]]   ;;  %s7505_s28 = smov 39  }
  0x3d   :  { %9764 = sst [smem:[#allocation23_spill]] %s7690_s12 }
  0x3e   :  { %9765 = sst [smem:[#allocation24_spill]] %s7695_s20 }
  0x3f   :  { %9766 = sst [smem:[#allocation25_spill]] %s7700_s27 }
  0x40   :  { %9767 = sst [smem:[#allocation26_spill]] %s7705_s4 }
  0x41   :  { %s7710_s12 = sld [smem:[%s9644_s0 + %s7502_s7]]   ;;  %s7506_s7 = smov 40  }
  0x42   :  { %s7715_s20 = sld [smem:[%s9644_s0 + %s7503_s15]]  }
  0x43   :  { %s7720_s27 = sld [smem:[%s9644_s0 + %s7504_s22]]  }
  0x44   :  { %s7725_s4 = sld [smem:[%s9644_s0 + %s7505_s28]]  }
  0x45   :  { %s6109_s30 = sld [smem:[%s9644_s0 + %s7506_s7]]  }
  0x48   :  { %9768 = sst [smem:[#allocation27_spill]] %s7715_s20 }
  0x49   :  { %s7733_s20 = sld [smem:[%s9644_s0 + %s7507_s16]]  }
  0x4b   :  { %v88_v0 = vstv %s6109_s30 }
  0x4c   :  { %89 = vst [vmem:[#allocation2] sm:$0x1] %v88_v0 }
  0x4d   :  { %v178_v1 = vld [vmem:[%s7555_s17] sm:$0xff]  ;;  %v179_v2 = vld [vmem:[%s7555_s17 + $0x8] sm:$0xff]  ;;  %vm251_vm0 = vcmask 130048  }
  0x4e   :  { %v173_v3 = vld [vmem:[%s7540_s5] sm:$0xff]  ;;  %v6763_v4 = vpack.c.bf16 %v179_v2, %v178_v1  ;;  %v182_v6 = vld [vmem:[%s7565_s25 + $0x8] sm:$0xff] }
  0x4f   :  { %6416 = vmatprep.mubr.msk.f32.mxu0 %vm251_vm0, %v173_v3  ;;  %v181_v5 = vld [vmem:[%s7565_s25] sm:$0xff]  ;;  %v185_v10 = vld [vmem:[%s7575_s3 + $0x8] sm:$0xff] }
  0x50   :  { %v6767_v7 = vpack.c.bf16 %v182_v6, %v181_v5  ;;  %v175_v8 = vld [vmem:[%s7545_s9] sm:$0xff]  ;;  %6764 = vmatprep.subr.bf16.mxu0 %v6763_v4  ;;  %v174_v12 = vld [vmem:[%s7540_s5 + $0x8] sm:$0xff] }
  0x51   :  { %v184_v9 = vld [vmem:[%s7575_s3] sm:$0xff]  ;;  %6423 = vmatprep.mubr.msk.f32.mxu1 %vm251_vm0, %v175_v8  ;;  %6766 = vmatpush3.bf16.msra.mxu0 %v6763_v4  ;;  %v188_v14 = vld [vmem:[%s7585_s14 + $0x8] sm:$0xff] }
  0x52   :  { %v187_v11 = vld [vmem:[%s7585_s14] sm:$0xff]  ;;  %6768 = vmatprep.subr.bf16.mxu1 %v6767_v7  ;;  %v6772_v13 = vpack.c.bf16 %v185_v10, %v184_v9 }
  0x53   :  { %90 = vsyncpa [#allocation4], 0  ;;  %6770 = vmatpush3.bf16.msra.mxu1 %v6767_v7  ;;  %v176_v15 = vld [vmem:[%s7545_s9 + $0x8] sm:$0xf]  ;;  %v9679_v16 = vmov 0.0|0.0   ;;  %v6774_v17 = vpack.c.bf16 %v188_v14, %v187_v11  ;;  %v177_v18 = vld [vmem:[%s7550_s13] sm:$0xff]  ;;  %v972_v26 = vlaneseq }
  0x54   :  { %6771 = vmatprep.subr.bf16.mxu0 %v9679_v16  ;;  %6802 = vmatprep.subr.bf16.mxu1 %v9679_v16  ;;  %vm7509_vm1 = vmmov 0   ;;  %v9677_v19 = vmov 0.0   ;;  %v189_v20 = vld [vmem:[%s7585_s14 + $0x10] sm:$0xff]  ;;  %v190_v21 = vld [vmem:[%s7585_s14 + $0x18] sm:$0xff]  ;;  %v191_v23 = vld [vmem:[%s7590_s19] sm:$0xff]  ;;  %v9664_v31 = vmov 97  }
  0x55   :  { %6417 = vmatmul.mubr.msk.f32.vlgmr.msra.gmra.mrb[0].mxu0 %vm251_vm0, %v174_v12  ;;  %v6778_v22 = vpack.c.bf16 %v190_v21, %v189_v20  ;;  %v192_v24 = vld [vmem:[%s7590_s19 + $0x8] sm:$0xff]  ;;  %v7763_v27 = vshrl.u32 %v972_v26, 7  ;;  %v7766_v28 = vld [vmem:[%s7710_s12] sm:$0xf]  ;;  %7080 = vset.pattern.permute.xlu0 %v9664_v31  ;;  %v9659_v32 = vmov 96   ;;  %s7513_s0 = smov 64  }
  0x56   :  { %6424 = vmatmul.mubr.msk.f32.vlgmr.msra.gmra.mrb[0].mxu1 %vm251_vm0, %v176_v15  ;;  %6773 = vmatpush3.bf16.msra.mxu0 %v6772_v13  ;;  %v6782_v25 = vpack.c.bf16 %v192_v24, %v191_v23  ;;  %v6111_v35 = vld [vmem:[%s7560_s21] ss:$0 sm:$0xff]  ;;  %v193_v38 = vld [vmem:[%s7590_s19 + $0x10] sm:$0xff]  ;;  %v194_v39 = vld [vmem:[%s7590_s19 + $0x18] sm:$0xff]  ;;  %vm499_vm2 = vcmask 261120   ;;  %v9772_v52 = vmov 0 }
  0x57   :  { %6430 = vmatprep.mubr.msk.f32.mxu0 %vm7509_vm1, %v9677_v19  ;;  %6775 = vmatprep.subr.bf16.mxu0 %v6774_v17  ;;  %v7769_v29 = vsub.s32 1, %v7763_v27  ;;  %v7772_v30 = vsub.s32 0, %v7763_v27  ;;  %v6114_v37 = vld [vmem:[%s7570_s29] ss:$0 sm:$0xff]  ;;  %v6786_v46 = vpack.c.bf16 %v194_v39, %v193_v38  ;;  %vm7797_vm3 = vmpackc.low %vm499_vm2, %vm499_vm2  ;;  %v196_v54 = vld [vmem:[%s7595_s24 + $0x8] sm:$0xff]  ;;  %s9775_s5 = sld [smem:[#allocation6_spill]] }
  0x58   :  { %6477 = vmatprep.mubr.msk.f32.mxu1 %vm7509_vm1, %v9677_v19  ;;  %7081 = vset.pattern.permute.xlu1 %v9659_v32  ;;  %v9773_v52 = vsel %vm7797_vm3, 4294967295, %v9772_v52  ;;  %v195_v53 = vld [vmem:[%s7595_s24] sm:$0xff]  ;;  %v197_v56 = vld [vmem:[%s7595_s24 + $0x10] sm:$0xff]  ;;  %v198_v57 = vld [vmem:[%s7595_s24 + $0x18] sm:$0xff]  ;;  %s9776_s9 = sld [smem:[#allocation7_spill]]  ;;  %v7831_v1 = vsub.s32 2, %v7763_v27 }
  0x59   :  { %6431 = vmatmul.mubr.msk.f32.vlgmr.msra.gmra.mrb[2].mxu0 %vm251_vm0, %v177_v18  ;;  %9769 = vst [vmem:[#allocation28_spill] sm:$0xff] %v7769_v29  ;;  %9770 = vst [vmem:[#allocation29_spill] sm:$0xff] %v7772_v30  ;;  %v7778_v33 = vrot.slane %v7766_v28, %v7769_v29  ;;  %v7782_v34 = vrot.slane %v7766_v28, %v7772_v30  ;;  %v6791_v55 = vpack.c.bf16 %v196_v54, %v195_v53  ;;  %v201_v58 = vld [vmem:[%s7605_s6] sm:$0xf]  ;;  %v9673_v26 = vmov 98   ;;  %s9791_s13 = sld [smem:[#allocation22_spill]] }
  0x5a   :  { %6777 = vmatpush3.bf16.msra.mxu0 %v6774_v17  ;;  %9774 = vst [vmem:[#allocation31_spill] sm:$0xff] %v9773_v52  ;;  %v6794_v59 = vpack.c.bf16 %v198_v57, %v197_v56  ;;  %v6117_v60 = vld [vmem:[%s7580_s8] ss:$0 sm:$0xff]  ;;  %9777 = vst [vmem:[#allocation32_spill] sm:$0xff] %v7831_v1  ;;  %v7834_v2 = vsub.s32 3, %v7763_v27  ;;  %v7842_v5 = vrot.slane %v7766_v28, %v7831_v1  ;;  %vm1089_vm4 = vcmask 1043456  }
  0x5b   :  { %6779 = vmatprep.subr.bf16.mxu0 %v6778_v22  ;;  %9771 = vst [vmem:[#allocation30_spill] sm:$0xff] %v7778_v33  ;;  %3240 = vrot.lane.b32.xlu0 %v7778_v33, %s7513_s0  ;;  %vm7518_vm5 = vmmov 1   ;;  %v9665_v57 = vmov 100   ;;  %vm9745_vm10 = vcmask 97280   ;;  %s9793_s17 = sld [smem:[#allocation23_spill]]  ;;  %s9795_s21 = sld [smem:[#allocation26_spill]] }
  0x5c   :  { %3183 = vrot.lane.b32.xlu1 %v7782_v34, %s7513_s0  ;;  %9778 = vst [vmem:[#allocation33_spill] sm:$0xff] %v7834_v2  ;;  %v7846_v6 = vrot.slane %v7766_v28, %v7834_v2  ;;  %v9669_v28 = vmov 99   ;;  %vm7924_vm6 = vmpackc.low %vm1089_vm4, %vm7518_vm5  ;;  %vm1572_vm4 = vcmask 64512   ;;  %s9800_s25 = sld [smem:[#allocation24_spill]]  ;;  %s9805_s29 = sld [smem:[#allocation25_spill]] }
  0x5d   :  { %v199_v62 = vld [vmem:[%s9775_s5] sm:$0xff]  ;;  %v200_v63 = vld [vmem:[%s9775_s5 + $0x8] sm:$0xf]  ;;  %s7529_s3 = smov 32   ;;  %s7530_s8 = smov 96  }
  0x5e   :  { %6781 = vmatpush3.bf16.msra.mxu0 %v6778_v22  ;;  %v202_v0 = vld [vmem:[%s9776_s9] sm:$0xf]  ;;  %s9850_s14 = sld [smem:[#allocation13_spill]]  ;;  %s9852_s19 = sld [smem:[#allocation14_spill]] }
  0x5f   :  { %6783 = vmatprep.subr.bf16.mxu0 %v6782_v25  ;;  %s9853_s24 = sld [smem:[#allocation15_spill]]  ;;  %s9854_s30 = sld [smem:[#allocation8_spill]] }
  0x60   :  { %s9855_s6 = sld [smem:[#allocation9_spill]]  ;;  %s9856_s12 = sld [smem:[#allocation12_spill]] }
  0x61   :  { %s9857_s22 = sld [smem:[#allocation10_spill]]  ;;  %s9858_s23 = sld [smem:[#allocation16_spill]] }
  0x62   :  { %s9860_s26 = sld [smem:[#allocation11_spill]]  ;;  %s9861_s28 = sld [smem:[#allocation18_spill]] }
  0x63   :  { %s9862_s1 = sld [smem:[#allocation17_spill]]  ;;  %s9938_s2 = sld [smem:[#allocation27_spill]] }
  0x64   :  { %s9939_s7 = sld [smem:[#allocation19_spill]]  ;;  %s9940_s10 = sld [smem:[#allocation20_spill]] }
  0x65   :  { %s9941_s11 = sld [smem:[#allocation21_spill]]  ;;  %s7531_s16 = smov [#allocation3]  }
  0x66   :  { %s6064_s15 = sshll.u32 %s7531_s16, 4  ;;  %s6065_s15 = int_to_ptr.vmem [resolvable:$true] %s6064_s15 }
  0x67   :  { %s7445_s18 = scalar_lea.vmem %s6065_s15, 16  ;;  %p7450_p1 = scmp.lt.s32.totalorder %s6065_s15, %s6065_s15 }
  0x68   :  { %p7446_p0 = scmp.ne.s32.totalorder %s6065_s15, %s7445_s18 }
  0xcd   :  { %v7838_v4 = vpop.permute.xlu0 %3240 }
  0xce   :  { %v7836_v3 = vpop.permute.xlu1 %3183  ;;  %9780 = vst [vmem:[#allocation35_spill] sm:$0xff] %v7838_v4 }
  0xcf   :  { %9779 = vst [vmem:[#allocation34_spill] sm:$0xff] %v7836_v3 }
 0x128   :  { %v6418_v36 = vpop.f32.mrb[0].mxu0 }
 0x129   :  { %v330_v40 = vadd.f32 %v6418_v36, %v6111_v35  ;;  %v324_v41 = vpop.f32.mrb[1].mxu0  ;;  %v6425_v42 = vpop.f32.mrb[0].mxu1 }
 0x12a   :  { %v325_v43 = vadd.f32 %v6111_v35, %v324_v41  ;;  %v411_v44 = vpop.f32.mrb[1].mxu1  ;;  %v417_v45 = vadd.f32 %v6425_v42, %v6114_v37 }
 0x12b   :  { %v412_v47 = vadd.f32 %v6114_v37, %v411_v44  ;;  %v9662_v44 = vmov 102  }
 0x12c   :  { %v6796_v48 = vpack.c.bf16 %v330_v40, %v325_v43  ;;  %6441 = vmatprep.mubr.msk.f32.mxu0 %vm499_vm2, %v325_v43  ;;  %v495_v49 = vpop.f32.mrb[2].mxu0  ;;  %v9675_v43 = vmov 101  }
 0x12d   :  { %6442 = vmatmul.mubr.msk.f32.vlgmr.msra.gmra.mrb[4].mxu0 %vm499_vm2, %v330_v40  ;;  %v6803_v50 = vpack.c.bf16 %v417_v45, %v412_v47  ;;  %v6432_v51 = vpop.f32.mrb[3].mxu0  ;;  %v496_v61 = vadd.f32 %v6117_v60, %v495_v49  ;;  %v9784_v49 = vmov 0 }
 0x12e   :  { %6785 = vmatpush3.bf16.msra.mxu0 %v6782_v25  ;;  %6452 = vmatprep.mubr.msk.f32.mxu0 %vm499_vm2, %v412_v47  ;;  %v9785_v49 = vsel %vm7924_vm6, 4294967295, %v9784_v49 }
 0x12f   :  { %6787 = vmatprep.subr.bf16.mxu0 %v6786_v46  ;;  %6805 = vmatpush3.bf16.xpose.msk.msra.mxu1 %vm7797_vm3, %v6803_v50  ;;  %9786 = vst [vmem:[#allocation39_spill] sm:$0xff] %v9785_v49 }
 0x132   :  { %6789 = vmatpush3.bf16.msra.mxu0 %v6786_v46 }
 0x133   :  { %6790 = vmatprep.subr.bf16.mxu0 %v9679_v16 }
 0x135   :  { %6453 = vmatmul.mubr.msk.f32.vlgmr.msra.gmra.mrb[6].mxu0 %vm499_vm2, %v417_v45 }
 0x136   :  { %6792 = vmatpush3.bf16.msra.mxu0 %v6791_v55  ;;  %6463 = vmatprep.mubr.msk.f32.mxu0 %vm7509_vm1, %v9677_v19 }
 0x137   :  { %6793 = vmatprep.subr.bf16.mxu0 %v9679_v16  ;;  %6478 = vmatmul.mubr.msk.f32.vlgmr.msra.gmra.mrb[2].mxu1 %vm499_vm2, %v201_v58  ;;  %v9655_v58 = vmov 107  }
 0x13a   :  { %6795 = vmatpush3.bf16.msra.mxu0 %v6794_v59 }
 0x13b   :  { %6798 = vmatprep.subr.msk.bf16.mxu0 %vm7797_vm3, %v6796_v48 }
 0x13d   :  { %6464 = vmatmul.mubr.msk.f32.vlgmr.msra.gmra.mrb[8].mxu0 %vm499_vm2, %v496_v61 }
 0x13e   :  { %6470 = vmatprep.mubr.msk.f32.mxu0 %vm499_vm2, %v199_v62  ;;  %v9671_v62 = vmov 103  }
 0x143   :  { %6801 = vmatpush3.bf16.xpose.msk.msra.mxu0 %vm7797_vm3, %v6796_v48 }
 0x144   :  { %6480 = vmatprep.subr.mxu0 %v9677_v19 }
 0x14a   :  { %6471 = vmatmul.mubr.msk.f32.vlgmr.msra.gmra.mrb[10].mxu0 %vm499_vm2, %v200_v63  ;;  %v9660_v63 = vmov 105  }
 0x14b   :  { %6481 = vmatpush3.xpose.msk.msra.mxu0 %vm499_vm2, %v496_v61  ;;  %6482 = vmatprep.mubr.msk.f32.mxu0 %vm7509_vm1, %v9677_v19  ;;  %v8114_v19 = vld [vmem:[%s9795_s21 + $0x8] sm:$0xff] }
 0x14c   :  { %9796 = vst [vmem:[#allocation46_spill] sm:$0xff] %v8114_v19 }
 0x14e   :  { %6483 = vmatmul.mubr.msk.f32.vlgmr.msra.gmra.mrb[12].mxu0 %vm499_vm2, %v202_v0 }
 0x200   :  { %v7848_v7 = vpop.f32.mrb[4].mxu0 }
 0x201   :  { %969 = vperm.xlu1 %7081, %v7848_v7   ;;  %1030 = vperm.xlu0 %7080, %v7848_v7   ;;  %v7852_v8 = vpop.f32.mrb[5].mxu0  ;;  %v2213_v9 = vmul.f32 %v7848_v7, %v7778_v33  ;;  %v2159_v10 = vmul.f32 %v7848_v7, %v7782_v34  ;;  %v7860_v11 = vmul.f32 %v7848_v7, %v7836_v3 }
 0x202   :  { %v2212_v12 = vmul.f32 %v7778_v33, %v7852_v8  ;;  %v2158_v13 = vmul.f32 %v7782_v34, %v7852_v8  ;;  %v7868_v14 = vmul.f32 %v7836_v3, %v7852_v8  ;;  %v7872_v15 = vmul.f32 %v7838_v4, %v7852_v8 }
 0x203   :  { %v7876_v17 = vmul.f32 %v7848_v7, %v7838_v4  ;;  %v2428_v18 = vmul.f32 %v7842_v5, %v7852_v8  ;;  %v2429_v20 = vmul.f32 %v7848_v7, %v7842_v5  ;;  %v2565_v21 = vmul.f32 %v7846_v6, %v7852_v8 }
 0x204   :  { %v6830_v22 = vpack.c.bf16 %v2213_v9, %v2212_v12  ;;  %v7884_v23 = vpack.c.bf16 %v2159_v10, %v2158_v13  ;;  %v2566_v25 = vmul.f32 %v7848_v7, %v7846_v6  ;;  %v9667_v9 = vmov 104  }
 0x205   :  { %7082 = vset.pattern.permute.xlu1 %v9673_v26  ;;  %7083 = vset.pattern.permute.xlu0 %v9669_v28  ;;  %v7894_v36 = vpack.c.bf16 %v2429_v20, %v2428_v18  ;;  %v9657_v18 = vmov 106   ;;  %v7525_v20 = vmov 33  }
 0x206   :  { %9781 = vst [vmem:[#allocation36_spill] sm:$0xff] %v7884_v23  ;;  %1257 = vperm.xlu1 %7082, %v7848_v7   ;;  %1401 = vperm.xlu0 %7083, %v7848_v7   ;;  %v7898_v37 = vpack.c.bf16 %v2566_v25, %v2565_v21  ;;  %v7526_v21 = vmov 34   ;;  %v7528_v25 = vmov 35  }
 0x207   :  { %9782 = vst [vmem:[#allocation37_spill] sm:$0xff] %v7894_v36  ;;  %6831 = vmatprep.subr.bf16.mxu1 %v6830_v22 }
 0x208   :  { %9783 = vst [vmem:[#allocation38_spill] sm:$0xff] %v7898_v37  ;;  %6833 = vmatpush3.bf16.msra.mxu1 %v6830_v22  ;;  %v7900_v38 = vpop.f32.mrb[6].mxu0  ;;  %v7527_v22 = vmov 32  }
 0x209   :  { %6835 = vmatprep.subr.bf16.mxu1 %v7884_v23  ;;  %v7903_v39 = vpop.f32.mrb[7].mxu0  ;;  %v1082_v40 = vmul.f32 %v7900_v38, %v7778_v33  ;;  %v1024_v41 = vmul.f32 %v7900_v38, %v7782_v34  ;;  %v1309_v42 = vmul.f32 %v7900_v38, %v7842_v5  ;;  %v1453_v51 = vmul.f32 %v7900_v38, %v7846_v6 }
 0x20a   :  { %7084 = vset.pattern.permute.xlu1 %v9675_v43  ;;  %7086 = vset.pattern.permute.xlu0 %v9662_v44  ;;  %v1081_v45 = vmul.f32 %v7778_v33, %v7903_v39  ;;  %v1023_v46 = vmul.f32 %v7782_v34, %v7903_v39  ;;  %v7917_v47 = vpop.f32.mrb[2].mxu1  ;;  %v1308_v48 = vmul.f32 %v7842_v5, %v7903_v39 }
 0x20b   :  { %1609 = vperm.xlu1 %7084, %v7848_v7   ;;  %1824 = vperm.xlu0 %7086, %v7848_v7   ;;  %v6479_v50 = vpop.f32.mrb[3].mxu1  ;;  %v1452_v56 = vmul.f32 %v7846_v6, %v7903_v39 }
 0x20c   :  { %v6806_v53 = vpack.c.bf16 %v1082_v40, %v1081_v45  ;;  %v7930_v54 = vpack.c.bf16 %v1024_v41, %v1023_v46  ;;  %v7932_v55 = vpack.c.bf16 %v1309_v42, %v1308_v48  ;;  %v8009_v40 = vrot.slane %v7917_v47, %v7769_v29  ;;  %v8012_v41 = vld [vmem:[%s9791_s13 + $0x8] sm:$0xff] }
 0x20d   :  { %v7940_v59 = vpack.c.bf16 %v1453_v51, %v1452_v56  ;;  %9792 = vst [vmem:[#allocation44_spill] sm:$0xff] %v8012_v41  ;;  %v8018_v48 = vrot.slane %v7917_v47, %v7831_v1  ;;  %v8022_v50 = vrot.slane %v7917_v47, %v7834_v2  ;;  %vm9746_vm7 = vcmp.gt.f32.partialorder %v8012_v41, 0.0 }
 0x20e   :  { %9787 = vst [vmem:[#allocation40_spill] sm:$0xff] %v7930_v54  ;;  %9788 = vst [vmem:[#allocation41_spill] sm:$0xff] %v7932_v55  ;;  %6808 = vmatprep.subr.msk.bf16.mxu0 %vm7924_vm6, %v6806_v53  ;;  %v8241_v55 = vld [vmem:[%s9800_s25 + $0x8] sm:$0xf] }
 0x20f   :  { %7085 = vset.pattern.permute.xlu1 %v9665_v57  ;;  %7091 = vset.pattern.permute.xlu0 %v9655_v58  ;;  %9789 = vst [vmem:[#allocation42_spill] sm:$0xff] %v7940_v59 }
 0x210   :  { %1553 = vperm.xlu1 %7085, %v7848_v7   ;;  %3576 = vperm.xlu0 %7091, %v7848_v7   ;;  %v7944_v60 = vpop.f32.mrb[8].mxu0 }
 0x211   :  { %9790 = vst [vmem:[#allocation43_spill] sm:$0xff] %v7944_v60  ;;  %6811 = vmatpush3.bf16.msk.msra.mxu0 %vm7924_vm6, %v6806_v53  ;;  %v6465_v61 = vpop.f32.mrb[9].mxu0 }
 0x212   :  { %6814 = vmatprep.subr.msk.bf16.mxu0 %vm7924_vm6, %v7930_v54  ;;  %v2700_v54 = vsub.s32 5, %v7763_v27 }
 0x214   :  { %7087 = vset.pattern.permute.xlu1 %v9671_v62  ;;  %7092 = vset.pattern.permute.xlu0 %v9664_v31 }
 0x215   :  { %1960 = vperm.xlu1 %7087, %v7848_v7   ;;  %1026 = vperm.xlu0 %7092, %v7852_v8  }
 0x219   :  { %7088 = vset.pattern.permute.xlu1 %v9660_v63  ;;  %7094 = vset.pattern.permute.xlu0 %v9673_v26 }
 0x21a   :  { %3193 = vperm.xlu1 %7088, %v7848_v7   ;;  %1253 = vperm.xlu0 %7094, %v7852_v8  }
 0x21d   :  { %v7959_v0 = vpop.f32.mrb[10].mxu0 }
 0x21e   :  { %7089 = vset.pattern.permute.xlu1 %v9667_v9  ;;  %7097 = vset.pattern.permute.xlu0 %v9665_v57  ;;  %v7963_v10 = vpop.f32.mrb[11].mxu0  ;;  %v3434_v3 = vrot.slane %v7959_v0, %v7831_v1 }
 0x21f   :  { %3134 = vperm.xlu1 %7089, %v7848_v7   ;;  %1549 = vperm.xlu0 %7097, %v7852_v8  }
 0x221   :  { %v7967_v12 = vpop.f32.mrb[12].mxu0 }
 0x222   :  { %v6484_v13 = vpop.f32.mrb[13].mxu0  ;;  %v8078_v57 = vrot.slane %v7967_v12, %v7834_v2 }
 0x223   :  { %7090 = vset.pattern.permute.xlu1 %v9657_v18  ;;  %7100 = vset.pattern.permute.xlu0 %v9660_v63 }
 0x224   :  { %3428 = vperm.xlu1 %7090, %v7848_v7   ;;  %3189 = vperm.xlu0 %7100, %v7852_v8  }
 0x228   :  { %7093 = vset.pattern.permute.xlu1 %v9659_v32  ;;  %7101 = vset.pattern.permute.xlu0 %v9667_v9 }
 0x229   :  { %964 = vperm.xlu1 %7093, %v7852_v8   ;;  %3130 = vperm.xlu0 %7101, %v7852_v8  }
 0x22d   :  { %7095 = vset.pattern.permute.xlu1 %v9669_v28  ;;  %7102 = vset.pattern.permute.xlu0 %v9657_v18 }
 0x22e   :  { %1397 = vperm.xlu1 %7095, %v7852_v8   ;;  %3424 = vperm.xlu0 %7102, %v7852_v8  }
 0x232   :  { %7096 = vset.pattern.permute.xlu1 %v9675_v43  ;;  %7104 = vset.pattern.permute.xlu0 %v7525_v20  ;;  %v8111_v43 = vrot.slane %v7959_v0, %v7772_v30 }
 0x233   :  { %1605 = vperm.xlu1 %7096, %v7852_v8   ;;  %2165 = vperm.xlu0 %7104, %v7900_v38  }
 0x237   :  { %7098 = vset.pattern.permute.xlu1 %v9662_v44  ;;  %7106 = vset.pattern.permute.xlu0 %v7526_v21 }
 0x238   :  { %1820 = vperm.xlu1 %7098, %v7852_v8   ;;  %2381 = vperm.xlu0 %7106, %v7900_v38  }
 0x23c   :  { %7099 = vset.pattern.permute.xlu1 %v9671_v62  ;;  %7109 = vset.pattern.permute.xlu0 %v7527_v22 }
 0x23d   :  { %1956 = vperm.xlu1 %7099, %v7852_v8   ;;  %2103 = vperm.xlu0 %7109, %v7903_v39  }
 0x241   :  { %7103 = vset.pattern.permute.xlu1 %v9655_v58  ;;  %7111 = vset.pattern.permute.xlu0 %v7528_v25 }
 0x242   :  { %3572 = vperm.xlu1 %7103, %v7852_v8   ;;  %2514 = vperm.xlu0 %7111, %v7903_v39  }
 0x246   :  { %7105 = vset.pattern.permute.xlu1 %v7527_v22  ;;  %7112 = vset.pattern.permute.xlu0 %v7525_v20 }
 0x247   :  { %2108 = vperm.xlu1 %7105, %v7900_v38   ;;  %2695 = vperm.xlu0 %7112, %v7944_v60  }
 0x24b   :  { %7107 = vset.pattern.permute.xlu1 %v7528_v25  ;;  %7113 = vset.pattern.permute.xlu0 %v7527_v22 }
 0x24c   :  { %2518 = vperm.xlu1 %7107, %v7900_v38   ;;  %2660 = vperm.xlu0 %7113, %v7944_v60   ;;  %v8005_v38 = vrot.slane %v7917_v47, %v7772_v30 }
 0x250   :  { %7108 = vset.pattern.permute.xlu1 %v7525_v20  ;;  %7156 = vset.pattern.permute.xlu0 %v9659_v32 }
 0x251   :  { %2161 = vperm.xlu1 %7108, %v7903_v39  }
 0x255   :  { %7110 = vset.pattern.permute.xlu1 %v7526_v21 }
 0x256   :  { %2377 = vperm.xlu1 %7110, %v7903_v39  }
 0x25a   :  { %2891 = vperm.xlu1 %7110, %v7944_v60  }
 0x25e   :  { %7114 = vset.pattern.permute.xlu1 %v7528_v25 }
 0x25f   :  { %3007 = vperm.xlu1 %7114, %v7944_v60  }
 0x263   :  { %7155 = vset.pattern.permute.xlu1 %v9664_v31 }
 0x280   :  { %v970_v42 = vpop.permute.xlu1 %969  ;;  %v1031_v45 = vpop.permute.xlu0 %1030 }
 0x281   :  { %v977_v39 = vadd.f32 %v8005_v38, %v970_v42  ;;  %v1038_v46 = vadd.f32 %v8009_v40, %v1031_v45 }
 0x283   :  { %v981_v51 = vmul.f32 0.2, %v977_v39  ;;  %v1042_v53 = vmul.f32 0.2, %v1038_v46  ;;  %vm979_vm8 = vcmp.gt.f32.partialorder %v977_v39, 0.0  ;;  %vm1040_vm9 = vcmp.gt.f32.partialorder %v1038_v46, 0.0 }
 0x285   :  { %v1258_v56 = vpop.permute.xlu1 %1257  ;;  %v1402_v61 = vpop.permute.xlu0 %1401  ;;  %v983_v13 = vsel %vm979_vm8, %v977_v39, %v981_v51  ;;  %v1044_v20 = vsel %vm1040_vm9, %v1038_v46, %v1042_v53  ;;  %v8041_v39 = vrot.slane %v7967_v12, %v7769_v29  ;;  %v8045_v46 = vrot.slane %v7967_v12, %v7831_v1 }
 0x286   :  { %v1265_v21 = vadd.f32 %v8018_v48, %v1258_v56  ;;  %v1409_v22 = vadd.f32 %v8022_v50, %v1402_v61  ;;  %v8029_v47 = vsel %vm9746_vm7, %v983_v13, -1e+30  ;;  %v8033_v25 = vsel %vm9746_vm7, %v1044_v20, -1e+30  ;;  %v8048_v56 = vld [vmem:[%s9793_s17 + $0x8] sm:$0xff] }
 0x287   :  { %v992_v42 = vsel %vm9745_vm10, %v8029_v47, -inf  ;;  %v1050_v45 = vsel %vm9745_vm10, %v8033_v25, -inf  ;;  %9794 = vst [vmem:[#allocation45_spill] sm:$0xff] %v8048_v56  ;;  %vm9713_vm13 = vcmp.gt.f32.partialorder %v8048_v56, 0.0 }
 0x288   :  { %v1269_v51 = vmul.f32 0.2, %v1265_v21  ;;  %v1413_v53 = vmul.f32 0.2, %v1409_v22  ;;  %993 = vmax.xlane.f32.xlu1 %v992_v42  ;;  %1051 = vmax.xlane.f32.xlu0 %v1050_v45  ;;  %vm1267_vm11 = vcmp.gt.f32.partialorder %v1265_v21, 0.0  ;;  %vm1411_vm12 = vcmp.gt.f32.partialorder %v1409_v22, 0.0 }
 0x289   :  { %v8060_v45 = vrot.slane %v7967_v12, %v7772_v30 }
 0x28a   :  { %v1610_v61 = vpop.permute.xlu1 %1609  ;;  %v1825_v13 = vpop.permute.xlu0 %1824  ;;  %v1271_v20 = vsel %vm1267_vm11, %v1265_v21, %v1269_v51  ;;  %v1415_v58 = vsel %vm1411_vm12, %v1409_v22, %v1413_v53  ;;  %vm9698_vm11 = vcmp.gt.f32.partialorder %v8114_v19, 0.0 }
 0x28b   :  { %v1617_v18 = vadd.f32 %v8041_v39, %v1610_v61  ;;  %v1832_v32 = vadd.f32 %v8045_v46, %v1825_v13  ;;  %v8054_v63 = vsel %vm9746_vm7, %v1271_v20, -1e+30  ;;  %v8064_v44 = vsel %vm9746_vm7, %v1415_v58, -1e+30 }
 0x28c   :  { %v1277_v42 = vsel %vm9745_vm10, %v8054_v63, -inf  ;;  %v1421_v31 = vsel %vm9745_vm10, %v8064_v44, -inf }
 0x28d   :  { %v1621_v21 = vmul.f32 0.2, %v1617_v18  ;;  %v1836_v22 = vmul.f32 0.2, %v1832_v32  ;;  %1278 = vmax.xlane.f32.xlu1 %v1277_v42  ;;  %vm1834_vm14 = vcmp.gt.f32.partialorder %v1832_v32, 0.0  ;;  %vm1619_vm15 = vcmp.gt.f32.partialorder %v1617_v18, 0.0 }
 0x28f   :  { %v1554_v51 = vpop.permute.xlu1 %1553  ;;  %v3577_v53 = vpop.permute.xlu0 %3576  ;;  %v1838_v61 = vsel %vm1834_vm14, %v1832_v32, %v1836_v22  ;;  %v1623_v13 = vsel %vm1619_vm15, %v1617_v18, %v1621_v21 }
 0x290   :  { %v1561_v20 = vadd.f32 %v8060_v45, %v1554_v51  ;;  %v8072_v58 = vsel %vm9713_vm13, %v1838_v61, -1e+30  ;;  %v8082_v32 = vsel %vm9713_vm13, %v1623_v13, -1e+30  ;;  %v8093_v13 = vrot.slane %v7959_v0, %v7834_v2 }
 0x291   :  { %1422 = vmax.xlane.f32.xlu1 %v1421_v31  ;;  %v1844_v42 = vsel %vm1572_vm4, %v8072_v58, -inf  ;;  %v1629_v51 = vsel %vm1572_vm4, %v8082_v32, -inf }
 0x292   :  { %v1565_v18 = vmul.f32 0.2, %v1561_v20  ;;  %1845 = vmax.xlane.f32.xlu0 %v1844_v42  ;;  %vm1563_vm5 = vcmp.gt.f32.partialorder %v1561_v20, 0.0  ;;  %v8097_v42 = vrot.slane %v7959_v0, %v7769_v29  ;;  %v8139_v0 = vld [vmem:[%s9791_s13] sm:$0xff] }
 0x293   :  { %9797 = vst [vmem:[#allocation47_spill] sm:$0xff] %v8139_v0 }
 0x294   :  { %v1961_v21 = vpop.permute.xlu1 %1960  ;;  %v1027_v22 = vpop.permute.xlu0 %1026  ;;  %v1567_v31 = vsel %vm1563_vm5, %v1561_v20, %v1565_v18 }
 0x295   :  { %v1968_v61 = vadd.f32 %v8078_v57, %v1961_v21  ;;  %1630 = vmax.xlane.f32.xlu1 %v1629_v51  ;;  %v8089_v12 = vsel %vm9713_vm13, %v1567_v31, -1e+30  ;;  %v3584_v31 = vadd.f32 %v8093_v13, %v3577_v53  ;;  %v1037_v35 = vadd.f32 %v8009_v40, %v1027_v22 }
 0x296   :  { %v1576_v20 = vsel %vm1572_vm4, %v8089_v12, -inf }
 0x297   :  { %v1972_v9 = vmul.f32 0.2, %v1968_v61  ;;  %vm1970_vm8 = vcmp.gt.f32.partialorder %v1968_v61, 0.0  ;;  %vm3586_vm12 = vcmp.gt.f32.partialorder %v3584_v31, 0.0  ;;  %v1041_v52 = vmul.f32 0.2, %v1037_v35 }
 0x298   :  { %vm1039_vm15 = vcmp.gt.f32.partialorder %v1037_v35, 0.0 }
 0x299   :  { %v3194_v18 = vpop.permute.xlu1 %3193  ;;  %v1254_v21 = vpop.permute.xlu0 %1253  ;;  %1577 = vmax.xlane.f32.xlu1 %v1576_v20  ;;  %v1974_v51 = vsel %vm1970_vm8, %v1968_v61, %v1972_v9  ;;  %v3588_v9 = vmul.f32 0.2, %v3584_v31  ;;  %vm9717_vm8 = vcmp.gt.f32.partialorder %v8139_v0, 0.0 }
 0x29a   :  { %v3201_v28 = vadd.f32 %v8097_v42, %v3194_v18  ;;  %v8105_v62 = vsel %vm9713_vm13, %v1974_v51, -1e+30  ;;  %v1264_v40 = vadd.f32 %v8018_v48, %v1254_v21  ;;  %v1043_v21 = vsel %vm1039_vm15, %v1037_v35, %v1041_v52 }
 0x29b   :  { %v1980_v26 = vsel %vm1572_vm4, %v8105_v62, -inf  ;;  %v8156_v52 = vsel %vm9717_vm8, %v1043_v21, -1e+30  ;;  %v8167_v21 = vld [vmem:[%s9793_s17] sm:$0xff] }
 0x29c   :  { %v3205_v16 = vmul.f32 0.2, %v3201_v28  ;;  %vm3203_vm9 = vcmp.gt.f32.partialorder %v3201_v28, 0.0  ;;  %9798 = vst [vmem:[#allocation48_spill] sm:$0xff] %v8167_v21 }
 0x29d   :  { %1981 = vmax.xlane.f32.xlu1 %v1980_v26 }
 0x29e   :  { %v3135_v53 = vpop.permute.xlu1 %3134  ;;  %v1550_v61 = vpop.permute.xlu0 %1549  ;;  %v3207_v20 = vsel %vm3203_vm9, %v3201_v28, %v3205_v16  ;;  %v3590_v16 = vsel %vm3586_vm12, %v3584_v31, %v3588_v9  ;;  %vm1266_vm9 = vcmp.gt.f32.partialorder %v1264_v40, 0.0 }
 0x29f   :  { %v3142_v18 = vadd.f32 %v8111_v43, %v3135_v53  ;;  %v8120_v51 = vsel %vm9698_vm11, %v3207_v20, -1e+30 }
 0x2a0   :  { %v3213_v24 = vsel %vm251_vm0, %v8120_v51, -inf }
 0x2a1   :  { %v3146_v26 = vmul.f32 0.2, %v3142_v18  ;;  %3214 = vmax.xlane.f32.xlu1 %v3213_v24  ;;  %vm3144_vm14 = vcmp.gt.f32.partialorder %v3142_v18, 0.0  ;;  %v8136_v24 = vsel %vm9698_vm11, %v3590_v16, -1e+30  ;;  %v1560_v16 = vadd.f32 %v8060_v45, %v1550_v61 }
 0x2a3   :  { %v3429_v28 = vpop.permute.xlu1 %3428  ;;  %v3190_v53 = vpop.permute.xlu0 %3189  ;;  %v3148_v4 = vsel %vm3144_vm14, %v3142_v18, %v3146_v26  ;;  %v1268_v26 = vmul.f32 0.2, %v1264_v40  ;;  %v1564_v35 = vmul.f32 0.2, %v1560_v16  ;;  %vm1562_vm14 = vcmp.gt.f32.partialorder %v1560_v16, 0.0 }
 0x2a4   :  { %v3436_v20 = vadd.f32 %v3434_v3, %v3429_v28  ;;  %v8129_v37 = vsel %vm9698_vm11, %v3148_v4, -1e+30  ;;  %v3596_v4 = vsel %vm251_vm0, %v8136_v24, -inf }
 0x2a5   :  { %v3156_v22 = vsel %vm251_vm0, %v8129_v37, -inf }
 0x2a6   :  { %v3440_v31 = vmul.f32 0.2, %v3436_v20  ;;  %3157 = vmax.xlane.f32.xlu0 %v3156_v22  ;;  %vm3438_vm5 = vcmp.gt.f32.partialorder %v3436_v20, 0.0 }
 0x2a8   :  { %v965_v9 = vpop.permute.xlu1 %964  ;;  %v8141_v18 = vpop.permute.xlu0 %3130  ;;  %v3442_v48 = vsel %vm3438_vm5, %v3436_v20, %v3440_v31  ;;  %v1270_v31 = vsel %vm1266_vm9, %v1264_v40, %v1268_v26  ;;  %v1566_v26 = vsel %vm1562_vm14, %v1560_v16, %v1564_v35  ;;  %vm9716_vm5 = vcmp.gt.f32.partialorder %v8167_v21, 0.0 }
 0x2a9   :  { %v976_v28 = vadd.f32 %v8005_v38, %v965_v9  ;;  %v8150_v36 = vsel %vm9698_vm11, %v3442_v48, -1e+30  ;;  %v3200_v38 = vadd.f32 %v8097_v42, %v3190_v53  ;;  %v8190_v16 = vsel %vm9716_vm5, %v1566_v26, -1e+30 }
 0x2aa   :  { %3597 = vmax.xlane.f32.xlu0 %v3596_v4  ;;  %v3448_v22 = vsel %vm251_vm0, %v8150_v36, -inf  ;;  %v1047_v4 = vsel %vm9745_vm10, %v8156_v52, -inf }
 0x2ab   :  { %v980_v23 = vmul.f32 0.2, %v976_v28  ;;  %3449 = vmax.xlane.f32.xlu1 %v3448_v22  ;;  %vm978_vm12 = vcmp.gt.f32.partialorder %v976_v28, 0.0  ;;  %vm3202_vm9 = vcmp.gt.f32.partialorder %v3200_v38, 0.0 }
 0x2ad   :  { %v1398_v45 = vpop.permute.xlu1 %1397  ;;  %v3425_v61 = vpop.permute.xlu0 %3424  ;;  %v982_v20 = vsel %vm978_vm12, %v976_v28, %v980_v23  ;;  %v8173_v23 = vsel %vm9717_vm8, %v1270_v31, -1e+30  ;;  %v8177_v28 = vld [vmem:[%s9795_s21] sm:$0xff] }
 0x2ae   :  { %v1408_v9 = vadd.f32 %v8022_v50, %v1398_v45  ;;  %v8164_v48 = vsel %vm9717_vm8, %v982_v20, -1e+30  ;;  %v3204_v50 = vmul.f32 0.2, %v3200_v38  ;;  %v3435_v40 = vadd.f32 %v3434_v3, %v3425_v61  ;;  %9799 = vst [vmem:[#allocation49_spill] sm:$0xff] %v8177_v28 }
 0x2af   :  { %1048 = vmax.xlane.f32.xlu1 %v1047_v4  ;;  %v989_v42 = vsel %vm9745_vm10, %v8164_v48, -inf  ;;  %vm9712_vm12 = vcmp.gt.f32.partialorder %v8177_v28, 0.0 }
 0x2b0   :  { %v1412_v53 = vmul.f32 0.2, %v1408_v9  ;;  %990 = vmax.xlane.f32.xlu0 %v989_v42  ;;  %vm1410_vm15 = vcmp.gt.f32.partialorder %v1408_v9, 0.0  ;;  %v1274_v42 = vsel %vm9745_vm10, %v8173_v23, -inf  ;;  %v3439_v35 = vmul.f32 0.2, %v3435_v40 }
 0x2b2   :  { %v1606_v22 = vpop.permute.xlu1 %1605  ;;  %v2166_v45 = vpop.permute.xlu0 %2165  ;;  %v1414_v20 = vsel %vm1410_vm15, %v1408_v9, %v1412_v53  ;;  %vm3437_vm15 = vcmp.gt.f32.partialorder %v3435_v40, 0.0 }
 0x2b3   :  { %v1616_v4 = vadd.f32 %v8041_v39, %v1606_v22  ;;  %v8184_v31 = vsel %vm9717_vm8, %v1414_v20, -1e+30  ;;  %v3206_v39 = vsel %vm3202_vm9, %v3200_v38, %v3204_v50  ;;  %v1573_v22 = vsel %vm1572_vm4, %v8190_v16, -inf }
 0x2b4   :  { %1275 = vmax.xlane.f32.xlu0 %v1274_v42  ;;  %v1418_v3 = vsel %vm9745_vm10, %v8184_v31, -inf  ;;  %v8202_v60 = vsel %vm9712_vm12, %v3206_v39, -1e+30  ;;  %v3141_v38 = vadd.f32 %v8111_v43, %v8141_v18 }
 0x2b5   :  { %v1620_v61 = vmul.f32 0.2, %v1616_v4  ;;  %1419 = vmax.xlane.f32.xlu1 %v1418_v3  ;;  %vm1618_vm14 = vcmp.gt.f32.partialorder %v1616_v4, 0.0  ;;  %v3441_v3 = vsel %vm3437_vm15, %v3435_v40, %v3439_v35 }
 0x2b6   :  { %v8220_v18 = vsel %vm9712_vm12, %v3441_v3, -1e+30  ;;  %v3145_v40 = vmul.f32 0.2, %v3141_v38 }
 0x2b7   :  { %v1821_v9 = vpop.permute.xlu1 %1820  ;;  %v2382_v53 = vpop.permute.xlu0 %2381  ;;  %v1622_v20 = vsel %vm1618_vm14, %v1616_v4, %v1620_v61  ;;  %v3210_v4 = vsel %vm251_vm0, %v8202_v60, -inf  ;;  %v8216_v61 = vrot.slane %v7963_v10, %v7769_v29  ;;  %vm3143_vm14 = vcmp.gt.f32.partialorder %v3141_v38, 0.0 }
 0x2b8   :  { %v1831_v42 = vadd.f32 %v8045_v46, %v1821_v9  ;;  %1574 = vmax.xlane.f32.xlu0 %v1573_v22  ;;  %v8198_v26 = vsel %vm9716_vm5, %v1622_v20, -1e+30  ;;  %v8210_v46 = vrot.slane %v7963_v10, %v7831_v1 }
 0x2b9   :  { %v1626_v50 = vsel %vm1572_vm4, %v8198_v26, -inf }
 0x2ba   :  { %v1835_v59 = vmul.f32 0.2, %v1831_v42  ;;  %1627 = vmax.xlane.f32.xlu1 %v1626_v50  ;;  %vm1833_vm9 = vcmp.gt.f32.partialorder %v1831_v42, 0.0  ;;  %v2389_v35 = vadd.f32 %v8210_v46, %v2382_v53  ;;  %v2173_v50 = vadd.f32 %v8216_v61, %v2166_v45 }
 0x2bc   :  { %v1957_v39 = vpop.permute.xlu1 %1956  ;;  %3211 = vmax.xlane.f32.xlu0 %v3210_v4  ;;  %v1837_v43 = vsel %vm1833_vm9, %v1831_v42, %v1835_v59  ;;  %v2104_v22 = vpop.permute.xlu0 %2103  ;;  %v3445_v42 = vsel %vm251_vm0, %v8220_v18, -inf  ;;  %vm2391_vm9 = vcmp.gt.f32.partialorder %v2389_v35, 0.0  ;;  %vm2175_vm11 = vcmp.gt.f32.partialorder %v2173_v50, 0.0 }
 0x2bd   :  { %v1967_v9 = vadd.f32 %v8078_v57, %v1957_v39  ;;  %v8226_v20 = vsel %vm9716_vm5, %v1837_v43, -1e+30  ;;  %v2393_v57 = vmul.f32 0.2, %v2389_v35  ;;  %v3147_v39 = vsel %vm3143_vm14, %v3141_v38, %v3145_v40 }
 0x2be   :  { %v1841_v4 = vsel %vm1572_vm4, %v8226_v20, -inf  ;;  %v2177_v43 = vmul.f32 0.2, %v2173_v50  ;;  %v8245_v38 = vsel %vm9712_vm12, %v3147_v39, -1e+30 }
 0x2bf   :  { %v1971_v59 = vmul.f32 0.2, %v1967_v9  ;;  %1842 = vmax.xlane.f32.xlu1 %v1841_v4  ;;  %vm1969_vm15 = vcmp.gt.f32.partialorder %v1967_v9, 0.0  ;;  %v2395_v40 = vsel %vm2391_vm9, %v2389_v35, %v2393_v57  ;;  %v3153_v49 = vsel %vm251_vm0, %v8245_v38, -inf }
 0x2c0   :  { %3446 = vmax.xlane.f32.xlu0 %v3445_v42 }
 0x2c1   :  { %v3573_v53 = vpop.permute.xlu1 %3572  ;;  %v1973_v3 = vsel %vm1969_vm15, %v1967_v9, %v1971_v59  ;;  %v2515_v29 = vpop.permute.xlu0 %2514  ;;  %vm2124_vm15 = vcmp.gt.f32.partialorder %v8241_v55, 0.0 }
 0x2c2   :  { %v3583_v1 = vadd.f32 %v8093_v13, %v3573_v53  ;;  %v8236_v45 = vsel %vm9716_vm5, %v1973_v3, -1e+30  ;;  %v2114_v13 = vrot.slane %v7963_v10, %v7772_v30  ;;  %v2179_v53 = vsel %vm2175_vm11, %v2173_v50, %v2177_v43 }
 0x2c3   :  { %v1977_v4 = vsel %vm1572_vm4, %v8236_v45, -inf  ;;  %v8260_v35 = vsel %vm2124_vm15, %v2395_v40, -1e+30  ;;  %vm2130_vm11 = vcmask 125952   ;;  %v8264_v50 = vsel %vm2124_vm15, %v2179_v53, -1e+30 }
 0x2c4   :  { %v3587_v42 = vmul.f32 0.2, %v3583_v1  ;;  %1978 = vmax.xlane.f32.xlu1 %v1977_v4  ;;  %vm3585_vm14 = vcmp.gt.f32.partialorder %v3583_v1, 0.0  ;;  %9801 = vst [vmem:[#allocation50_spill] sm:$0xff] %v8260_v35  ;;  %9802 = vst [vmem:[#allocation51_spill] sm:$0xff] %v8264_v50  ;;  %v2524_v43 = vrot.slane %v7963_v10, %v7834_v2  ;;  %v2665_v40 = vsub.s32 4, %v7763_v27 }
 0x2c5   :  { %v2115_v30 = vadd.f32 %v2114_v13, %v2104_v22 }
 0x2c6   :  { %v2109_v9 = vpop.permute.xlu1 %2108  ;;  %v3589_v59 = vsel %vm3585_vm14, %v3583_v1, %v3587_v42  ;;  %v2696_v57 = vpop.permute.xlu0 %2695  ;;  %v2401_v42 = vsel %vm2130_vm11, %v8260_v35, -inf  ;;  %v2525_v22 = vadd.f32 %v2524_v43, %v2515_v29  ;;  %v2896_v29 = vsub.s32 6, %v7763_v27 }
 0x2c7   :  { %v2116_v3 = vadd.f32 %v2114_v13, %v2109_v9  ;;  %v8254_v4 = vsel %vm9712_vm12, %v3589_v59, -1e+30  ;;  %v2119_v28 = vmul.f32 0.2, %v2115_v30 }
 0x2c8   :  { %3154 = vmax.xlane.f32.xlu1 %v3153_v49  ;;  %v3593_v39 = vsel %vm251_vm0, %v8254_v4, -inf }
 0x2c9   :  { %v2120_v1 = vmul.f32 0.2, %v2116_v3  ;;  %3594 = vmax.xlane.f32.xlu0 %v3593_v39  ;;  %vm2118_vm9 = vcmp.gt.f32.partialorder %v2116_v3, 0.0  ;;  %v2185_v39 = vsel %vm2130_vm11, %v8264_v50, -inf }
 0x2cb   :  { %v2519_v49 = vpop.permute.xlu1 %2518  ;;  %v2122_v9 = vsel %vm2118_vm9, %v2116_v3, %v2120_v1  ;;  %v2661_v35 = vpop.permute.xlu0 %2660  ;;  %v2666_v3 = vrot.slane %v7963_v10, %v2665_v40  ;;  %vm2117_vm9 = vcmp.gt.f32.partialorder %v2115_v30, 0.0  ;;  %v2701_v40 = vrot.slane %v7963_v10, %v2700_v54 }
 0x2cc   :  { %v2526_v59 = vadd.f32 %v2524_v43, %v2519_v49  ;;  %2402 = vmax.xlane.f32.xlu1 %v2401_v42  ;;  %v8275_v53 = vsel %vm2124_vm15, %v2122_v9, -1e+30 }
 0x2cd   :  { %2186 = vmax.xlane.f32.xlu0 %v2185_v39  ;;  %9803 = vst [vmem:[#allocation52_spill] sm:$0xff] %v8275_v53  ;;  %v2131_v49 = vsel %vm2130_vm11, %v8275_v53, -inf  ;;  %v8287_v39 = vld [vmem:[%s9800_s25] sm:$0xff]  ;;  %v2667_v50 = vadd.f32 %v2666_v3, %v2661_v35  ;;  %v2702_v43 = vadd.f32 %v2701_v40, %v2696_v57 }
 0x2ce   :  { %v2530_v2 = vmul.f32 0.2, %v2526_v59  ;;  %vm2528_vm14 = vcmp.gt.f32.partialorder %v2526_v59, 0.0  ;;  %v8303_v57 = vld [vmem:[%s9805_s29] sm:$0xff] }
 0x2cf   :  { %v2669_v35 = vmul.f32 0.2, %v2667_v50  ;;  %vm2668_vm13 = vcmp.gt.f32.partialorder %v2667_v50, 0.0 }
 0x2d0   :  { %v2162_v1 = vpop.permute.xlu1 %2161  ;;  %v2532_v42 = vsel %vm2528_vm14, %v2526_v59, %v2530_v2  ;;  %vm2123_vm14 = vcmp.gt.f32.partialorder %v8287_v39, 0.0 }
 0x2d1   :  { %v2172_v13 = vadd.f32 %v8216_v61, %v2162_v1  ;;  %2132 = vmax.xlane.f32.xlu0 %v2131_v49  ;;  %v8284_v9 = vsel %vm2124_vm15, %v2532_v42, -1e+30  ;;  %v2529_v61 = vmul.f32 0.2, %v2525_v22  ;;  %v2121_v49 = vsel %vm2117_vm9, %v2115_v30, %v2119_v28 }
 0x2d2   :  { %9804 = vst [vmem:[#allocation53_spill] sm:$0xff] %v8284_v9  ;;  %v2538_v2 = vsel %vm2130_vm11, %v8284_v9, -inf  ;;  %vm2527_vm15 = vcmp.gt.f32.partialorder %v2525_v22, 0.0  ;;  %v2897_v9 = vrot.slane %v7963_v10, %v2896_v29  ;;  %v8307_v28 = vsel %vm2123_vm14, %v2121_v49, -1e+30 }
 0x2d3   :  { %v2176_v33 = vmul.f32 0.2, %v2172_v13  ;;  %vm2174_vm12 = vcmp.gt.f32.partialorder %v2172_v13, 0.0  ;;  %vm2671_vm9 = vcmp.gt.f32.partialorder %v8303_v57, 0.0  ;;  %v2127_v49 = vsel %vm251_vm0, %v8307_v28, -inf }
 0x2d5   :  { %v2378_v59 = vpop.permute.xlu1 %2377  ;;  %2539 = vmax.xlane.f32.xlu0 %v2538_v2  ;;  %v2178_v1 = vsel %vm2174_vm12, %v2172_v13, %v2176_v33  ;;  %v2704_v33 = vmul.f32 0.2, %v2702_v43  ;;  %v2531_v13 = vsel %vm2527_vm15, %v2525_v22, %v2529_v61  ;;  %vm2703_vm12 = vcmp.gt.f32.partialorder %v2702_v43, 0.0 }
 0x2d6   :  { %v2388_v3 = vadd.f32 %v8210_v46, %v2378_v59  ;;  %v8297_v54 = vsel %vm2123_vm14, %v2178_v1, -1e+30  ;;  %v3012_v46 = vsub.s32 7, %v7763_v27  ;;  %v2670_v59 = vsel %vm2668_vm13, %v2667_v50, %v2669_v35 }
 0x2d7   :  { %v2182_v42 = vsel %vm251_vm0, %v8297_v54, -inf  ;;  %v8322_v50 = vsel %vm2671_vm9, %v2670_v59, -1e+30  ;;  %v2705_v22 = vsel %vm2703_vm12, %v2702_v43, %v2704_v33 }
 0x2d8   :  { %v2392_v53 = vmul.f32 0.2, %v2388_v3  ;;  %vm2390_vm5 = vcmp.gt.f32.partialorder %v2388_v3, 0.0  ;;  %v3013_v27 = vrot.slane %v7963_v10, %v3012_v46  ;;  %v8334_v10 = vsel %vm2671_vm9, %v2705_v22, -1e+30 }
 0x2d9   :  { %v2892_v30 = vpop.permute.xlu1 %2891  ;;  %2183 = vmax.xlane.f32.xlu0 %v2182_v42 }
 0x2da   :  { %v2898_v40 = vadd.f32 %v2897_v9, %v2892_v30  ;;  %v2394_v2 = vsel %vm2390_vm5, %v2388_v3, %v2392_v53  ;;  %v8326_v53 = vsel %vm2123_vm14, %v2531_v13, -1e+30  ;;  %v2673_v3 = vsel %vm251_vm0, %v8322_v50, -inf }
 0x2db   :  { %v8312_v29 = vsel %vm2123_vm14, %v2394_v2, -1e+30  ;;  %v2535_v30 = vsel %vm251_vm0, %v8326_v53, -inf }
 0x2dc   :  { %v2900_v1 = vmul.f32 0.2, %v2898_v40  ;;  %v2398_v42 = vsel %vm251_vm0, %v8312_v29, -inf  ;;  %vm2899_vm8 = vcmp.gt.f32.partialorder %v2898_v40, 0.0 }
 0x2dd   :  { %2399 = vmax.xlane.f32.xlu1 %v2398_v42  ;;  %2128 = vmax.xlane.f32.xlu0 %v2127_v49 }
 0x2de   :  { %v3008_v9 = vpop.permute.xlu1 %3007  ;;  %v2901_v61 = vsel %vm2899_vm8, %v2898_v40, %v2900_v1  ;;  %v2707_v40 = vsel %vm251_vm0, %v8334_v10, -inf }
 0x2df   :  { %v3014_v35 = vadd.f32 %v3013_v27, %v3008_v9  ;;  %v8338_v13 = vsel %vm2671_vm9, %v2901_v61, -1e+30 }
 0x2e0   :  { %v2903_v33 = vsel %vm251_vm0, %v8338_v13, -inf }
 0x2e1   :  { %v3016_v46 = vmul.f32 0.2, %v3014_v35  ;;  %2674 = vmax.xlane.f32.xlu1 %v2673_v3  ;;  %2536 = vmax.xlane.f32.xlu0 %v2535_v30  ;;  %vm3015_vm13 = vcmp.gt.f32.partialorder %v3014_v35, 0.0 }
 0x2e3   :  { %v3017_v43 = vsel %vm3015_vm13, %v3014_v35, %v3016_v46 }
 0x2e4   :  { %v8346_v2 = vsel %vm2671_vm9, %v3017_v43, -1e+30 }
 0x2e5   :  { %2904 = vmax.xlane.f32.xlu1 %v2903_v33  ;;  %2708 = vmax.xlane.f32.xlu0 %v2707_v40 }
 0x2fb   :  { %3475 = vrot.lane.b32.xlu0 %v7842_v5, %s7513_s0 }
 0x315   :  { %v994_v59 = vpop.xlane.xlu1 %993  ;;  %v1052_v1 = vpop.xlane.xlu0 %1051 }
 0x316   :  { %v996_v42 = vsub.f32 %v8029_v47, %v994_v59  ;;  %v1054_v49 = vsub.f32 %v8033_v25, %v1052_v1 }
 0x318   :  { %v999_v27 = vmul.f32 1.442695, %v996_v42  ;;  %v1057_v22 = vmul.f32 1.442695, %v1054_v49 }
 0x31a   :  { %7199 = vpow2.f32 %v999_v27  ;;  %v1279_v9 = vpop.xlane.xlu1 %1278 }
 0x31b   :  { %7201 = vpow2.f32 %v1057_v22  ;;  %v1281_v61 = vsub.f32 %v8054_v63, %v1279_v9 }
 0x31d   :  { %v1284_v35 = vmul.f32 1.442695, %v1281_v61 }
 0x31e   :  { %v1423_v3 = vpop.xlane.xlu1 %1422 }
 0x31f   :  { %7203 = vpow2.f32 %v1284_v35  ;;  %v1425_v30 = vsub.f32 %v8064_v44, %v1423_v3  ;;  %v1846_v46 = vpop.xlane.xlu0 %1845 }
 0x320   :  { %v1848_v43 = vsub.f32 %v8072_v58, %v1846_v46 }
 0x321   :  { %v1428_v33 = vmul.f32 1.442695, %v1425_v30 }
 0x322   :  { %v1851_v40 = vmul.f32 1.442695, %v1848_v43  ;;  %v1631_v47 = vpop.xlane.xlu1 %1630 }
 0x323   :  { %7205 = vpow2.f32 %v1428_v33  ;;  %v1633_v25 = vsub.f32 %v8082_v32, %v1631_v47 }
 0x324   :  { %v7200_v59 = vpop.eup %7199  ;;  %7207 = vpow2.f32 %v1851_v40 }
 0x325   :  { %v7202_v1 = vpop.eup %7201  ;;  %v1636_v42 = vmul.f32 1.442695, %v1633_v25  ;;  %v8363_v27 = vmul.f32 %v7200_v59, %v8012_v41 }
 0x326   :  { %v1578_v49 = vpop.xlane.xlu1 %1577  ;;  %v8357_v63 = vmul.f32 %v7202_v1, %v8012_v41 }
 0x327   :  { %7209 = vpow2.f32 %v1636_v42  ;;  %v1580_v44 = vsub.f32 %v8089_v12, %v1578_v49  ;;  %v1006_v3 = vsel %vm9745_vm10, %v8363_v27, 0.0 }
 0x328   :  { %v1064_v58 = vsel %vm9745_vm10, %v8357_v63, 0.0 }
 0x329   :  { %v7204_v22 = vpop.eup %7203  ;;  %v1583_v9 = vmul.f32 1.442695, %v1580_v44  ;;  %1065 = vadd.xlane.f32.xlu0 %v1064_v58 }
 0x32a   :  { %v1982_v32 = vpop.xlane.xlu1 %1981  ;;  %v8366_v61 = vmul.f32 %v7204_v22, %v8012_v41 }
 0x32b   :  { %7211 = vpow2.f32 %v1583_v9  ;;  %v1984_v35 = vsub.f32 %v8105_v62, %v1982_v32 }
 0x32c   :  { %v1291_v12 = vsel %vm9745_vm10, %v8366_v61, 0.0 }
 0x32d   :  { %v7206_v30 = vpop.eup %7205  ;;  %v1987_v46 = vmul.f32 1.442695, %v1984_v35  ;;  %1007 = vadd.xlane.f32.xlu0 %v1006_v3  ;;  %1292 = vadd.xlane.f32.xlu1 %v1291_v12 }
 0x32e   :  { %v3215_v43 = vpop.xlane.xlu1 %3214  ;;  %v8374_v33 = vmul.f32 %v7206_v30, %v8012_v41  ;;  %v7208_v47 = vpop.eup %7207 }
 0x32f   :  { %7213 = vpow2.f32 %v1987_v46  ;;  %v3217_v40 = vsub.f32 %v8120_v51, %v3215_v43  ;;  %v8386_v58 = vmul.f32 %v7208_v47, %v8048_v56 }
 0x330   :  { %v1435_v62 = vsel %vm9745_vm10, %v8374_v33, 0.0 }
 0x331   :  { %v7210_v25 = vpop.eup %7209  ;;  %v3220_v59 = vmul.f32 1.442695, %v3217_v40  ;;  %1436 = vadd.xlane.f32.xlu1 %v1435_v62 }
 0x332   :  { %v8380_v1 = vmul.f32 %v7210_v25, %v8048_v56 }
 0x333   :  { %7215 = vpow2.f32 %v3220_v59  ;;  %v3158_v42 = vpop.xlane.xlu0 %3157 }
 0x334   :  { %v3160_v49 = vsub.f32 %v8129_v37, %v3158_v42  ;;  %v1643_v44 = vsel %vm1572_vm4, %v8380_v1, 0.0  ;;  %v1858_v37 = vsel %vm1572_vm4, %v8386_v58, 0.0 }
 0x335   :  { %v7212_v51 = vpop.eup %7211  ;;  %1644 = vadd.xlane.f32.xlu1 %v1643_v44 }
 0x336   :  { %v3163_v22 = vmul.f32 1.442695, %v3160_v49  ;;  %v8389_v9 = vmul.f32 %v7212_v51, %v8048_v56 }
 0x337   :  { %v3598_v32 = vpop.xlane.xlu0 %3597 }
 0x338   :  { %7217 = vpow2.f32 %v3163_v22  ;;  %v3600_v35 = vsub.f32 %v8136_v24, %v3598_v32  ;;  %v3450_v3 = vpop.xlane.xlu1 %3449  ;;  %v1590_v12 = vsel %vm1572_vm4, %v8389_v9, 0.0 }
 0x339   :  { %v7214_v30 = vpop.eup %7213  ;;  %v3452_v46 = vsub.f32 %v8150_v36, %v3450_v3  ;;  %1859 = vadd.xlane.f32.xlu1 %v1858_v37  ;;  %1591 = vadd.xlane.f32.xlu0 %v1590_v12 }
 0x33a   :  { %v3603_v43 = vmul.f32 1.442695, %v3600_v35  ;;  %v8398_v40 = vmul.f32 %v7214_v30, %v8048_v56 }
 0x33b   :  { %v3455_v47 = vmul.f32 1.442695, %v3452_v46 }
 0x33c   :  { %7219 = vpow2.f32 %v3603_v43  ;;  %v1049_v62 = vpop.xlane.xlu1 %1048  ;;  %v1994_v24 = vsel %vm1572_vm4, %v8398_v40, 0.0 }
 0x33d   :  { %v7216_v25 = vpop.eup %7215  ;;  %7221 = vpow2.f32 %v3455_v47  ;;  %v1053_v59 = vsub.f32 %v8156_v52, %v1049_v62  ;;  %v991_v42 = vpop.xlane.xlu0 %990  ;;  %1995 = vadd.xlane.f32.xlu1 %v1994_v24 }
 0x33e   :  { %v995_v36 = vsub.f32 %v8164_v48, %v991_v42  ;;  %v8405_v49 = vmul.f32 %v7216_v25, %v8114_v19 }
 0x33f   :  { %v1055_v44 = vmul.f32 1.442695, %v1053_v59 }
 0x340   :  { %9806 = vst [vmem:[#allocation54_spill] sm:$0xff] %v8405_v49  ;;  %v997_v51 = vmul.f32 1.442695, %v995_v36  ;;  %v3227_v22 = vsel %vm251_vm0, %v8405_v49, 0.0 }
 0x341   :  { %7223 = vpow2.f32 %v1055_v44  ;;  %v1276_v32 = vpop.xlane.xlu0 %1275  ;;  %3228 = vadd.xlane.f32.xlu1 %v3227_v22 }
 0x342   :  { %v7218_v35 = vpop.eup %7217  ;;  %7225 = vpow2.f32 %v997_v51  ;;  %v1280_v3 = vsub.f32 %v8173_v23, %v1276_v32 }
 0x343   :  { %v8411_v52 = vmul.f32 %v7218_v35, %v8114_v19 }
 0x344   :  { %v1282_v37 = vmul.f32 1.442695, %v1280_v3 }
 0x345   :  { %9807 = vst [vmem:[#allocation55_spill] sm:$0xff] %v8411_v52  ;;  %v3170_v48 = vsel %vm251_vm0, %v8411_v52, 0.0  ;;  %v1575_v30 = vpop.xlane.xlu0 %1574 }
 0x346   :  { %v7220_v12 = vpop.eup %7219  ;;  %7227 = vpow2.f32 %v1282_v37  ;;  %3171 = vadd.xlane.f32.xlu1 %v3170_v48  ;;  %v1579_v52 = vsub.f32 %v8190_v16, %v1575_v30 }
 0x347   :  { %v7222_v46 = vpop.eup %7221  ;;  %v8421_v23 = vmul.f32 %v7220_v12, %v8114_v19 }
 0x348   :  { %v8416_v43 = vmul.f32 %v7222_v46, %v8114_v19  ;;  %v9810_v46 = vpack.i.bf16 %v7860_v11, %v7868_v14 }
 0x349   :  { %9809 = vst [vmem:[#allocation57_spill] sm:$0xff] %v8421_v23  ;;  %v3212_v25 = vpop.xlane.xlu0 %3211  ;;  %v3610_v42 = vsel %vm251_vm0, %v8421_v23, 0.0  ;;  %v3019_v23 = vsel %vm251_vm0, %v8346_v2, -inf }
 0x34a   :  { %9808 = vst [vmem:[#allocation56_spill] sm:$0xff] %v8416_v43  ;;  %v3462_v47 = vsel %vm251_vm0, %v8416_v43, 0.0 }
 0x34b   :  { %v7224_v62 = vpop.eup %7223  ;;  %3463 = vadd.xlane.f32.xlu1 %v3462_v47 }
 0x34c   :  { %v7226_v24 = vpop.eup %7225  ;;  %v8424_v59 = vmul.f32 %v7224_v62, %v8139_v0 }
 0x34d   :  { %v8431_v44 = vmul.f32 %v7226_v24, %v8139_v0  ;;  %v8433_v22 = vpop.xlane.xlu0 %3446 }
 0x34e   :  { %v1061_v36 = vsel %vm9745_vm10, %v8424_v59, 0.0 }
 0x34f   :  { %3611 = vadd.xlane.f32.xlu1 %v3610_v42  ;;  %1062 = vadd.xlane.f32.xlu0 %v1061_v36  ;;  %v1003_v32 = vsel %vm9745_vm10, %v8431_v44, 0.0 }
 0x350   :  { %v7228_v51 = vpop.eup %7227 }
 0x351   :  { %v8438_v35 = vmul.f32 %v7228_v51, %v8139_v0 }
 0x353   :  { %1004 = vadd.xlane.f32.xlu0 %v1003_v32  ;;  %v1288_v37 = vsel %vm9745_vm10, %v8438_v35, 0.0 }
 0x356   :  { %v8440_v3 = vpop.xlane.xlu0 %3594 }
 0x357   :  { %1289 = vadd.xlane.f32.xlu0 %v1288_v37  ;;  %v1420_v37 = vpop.xlane.xlu1 %1419 }
 0x35a   :  { %v8444_v48 = vpop.xlane.xlu0 %2186 }
 0x35b   :  { %v1628_v19 = vpop.xlane.xlu1 %1627 }
 0x35c   :  { %v1632_v41 = vsub.f32 %v8198_v26, %v1628_v19  ;;  %v3216_v19 = vsub.f32 %v8202_v60, %v3212_v25  ;;  %v3451_v60 = vsub.f32 %v8220_v18, %v8433_v22  ;;  %v9813_v22 = vld [vmem:[#allocation30_spill] sm:$0xff] }
 0x35e   :  { %v8446_v12 = vpop.xlane.xlu0 %2132  ;;  %v1634_v49 = vmul.f32 1.442695, %v1632_v41  ;;  %v3218_v41 = vmul.f32 1.442695, %v3216_v19 }
 0x35f   :  { %v1843_v43 = vpop.xlane.xlu1 %1842 }
 0x360   :  { %7121 = vrot.lane.b32.xlu1 %v9810_v46, %s7513_s0  ;;  %v1424_v46 = vsub.f32 %v8184_v31, %v1420_v37 }
 0x362   :  { %v8452_v47 = vpop.xlane.xlu0 %2539  ;;  %v1426_v56 = vmul.f32 1.442695, %v1424_v46 }
 0x364   :  { %2689 = vrot.lane.b32.xlu1 %v7782_v34, %s7529_s3  ;;  %7229 = vpow2.f32 %v1426_v56 }
 0x365   :  { %7231 = vpow2.f32 %v1634_v49 }
 0x366   :  { %v8456_v62 = vpop.xlane.xlu0 %2183 }
 0x36a   :  { %v8458_v24 = vpop.xlane.xlu0 %2128 }
 0x36d   :  { %3623 = vrot.lane.b32.xlu0 %v7846_v6, %s7513_s0 }
 0x36e   :  { %v8462_v42 = vpop.xlane.xlu0 %2536  ;;  %v7230_v37 = vpop.eup %7229 }
 0x36f   :  { %v8482_v56 = vmul.f32 %v7230_v37, %v8139_v0  ;;  %v7232_v16 = vpop.eup %7231 }
 0x372   :  { %v8464_v36 = vpop.xlane.xlu0 %2708 }
 0x376   :  { %v8466_v51 = vpop.permute.xlu0 %3475 }
 0x377   :  { %9811 = vst [vmem:[#allocation58_spill] sm:$0xff] %v8466_v51  ;;  %v3478_v11 = vmul.f32 %v8466_v51, %v7852_v8  ;;  %v3479_v14 = vmul.f32 %v7848_v7, %v8466_v51  ;;  %v1581_v51 = vmul.f32 1.442695, %v1579_v52  ;;  %v8488_v52 = vmul.f32 %v7232_v16, %v8167_v21 }
 0x379   :  { %v7125_v32 = vpack.i.bf16 %v3479_v14, %v3478_v11  ;;  %v1847_v11 = vsub.f32 %v8226_v20, %v1843_v43  ;;  %v1979_v14 = vpop.xlane.xlu1 %1978  ;;  %7233 = vpow2.f32 %v1581_v51  ;;  %v1432_v20 = vsel %vm9745_vm10, %v8482_v56, 0.0 }
 0x37a   :  { %v9812_v43 = vpack.i.bf16 %v7876_v17, %v7872_v15  ;;  %v3453_v51 = vmul.f32 1.442695, %v3451_v60 }
 0x37b   :  { %7126 = vrot.lane.b32.xlu1 %v7125_v32, %s7513_s0  ;;  %v1849_v31 = vmul.f32 1.442695, %v1847_v11  ;;  %v1983_v32 = vsub.f32 %v8236_v45, %v1979_v14  ;;  %v3599_v11 = vsub.f32 %v8254_v4, %v8440_v3 }
 0x37d   :  { %7235 = vpow2.f32 %v1849_v31  ;;  %v1985_v26 = vmul.f32 1.442695, %v1983_v32  ;;  %v3155_v46 = vpop.xlane.xlu1 %3154  ;;  %v3601_v31 = vmul.f32 1.442695, %v3599_v11  ;;  %v9814_v32 = vld [vmem:[#allocation51_spill] sm:$0xff] }
 0x37e   :  { %v3159_v49 = vsub.f32 %v8245_v38, %v3155_v46  ;;  %v1640_v38 = vsel %vm1572_vm4, %v8488_v52, 0.0  ;;  %v2189_v37 = vsub.f32 %v9814_v32, %v8444_v48 }
 0x37f   :  { %7237 = vpow2.f32 %v1985_v26 }
 0x380   :  { %7239 = vpow2.f32 %v3218_v41  ;;  %v3161_v30 = vmul.f32 1.442695, %v3159_v49  ;;  %v2192_v46 = vmul.f32 1.442695, %v2189_v37  ;;  %v9815_v41 = vld [vmem:[#allocation49_spill] sm:$0xff]  ;;  %v9818_v37 = vld [vmem:[#allocation50_spill] sm:$0xff] }
 0x381   :  { %v2403_v18 = vpop.xlane.xlu1 %2402 }
 0x382   :  { %7241 = vpow2.f32 %v3161_v30 }
 0x383   :  { %v7234_v45 = vpop.eup %7233  ;;  %7243 = vpow2.f32 %v3453_v51 }
 0x384   :  { %7245 = vpow2.f32 %v3601_v31 }
 0x385   :  { %v2400_v19 = vpop.xlane.xlu1 %2399  ;;  %7247 = vpow2.f32 %v2192_v46 }
 0x387   :  { %v7236_v25 = vpop.eup %7235 }
 0x388   :  { %v8508_v17 = vmul.f32 %v7236_v25, %v8167_v21  ;;  %v2134_v25 = vsub.f32 %v8307_v28, %v8458_v24 }
 0x389   :  { %v7238_v14 = vpop.eup %7237 }
 0x38a   :  { %v1855_v4 = vsel %vm1572_vm4, %v8508_v17, 0.0  ;;  %v8517_v3 = vmul.f32 %v7238_v14, %v8167_v21  ;;  %v7240_v26 = vpop.eup %7239  ;;  %v2136_v14 = vmul.f32 1.442695, %v2134_v25 }
 0x38b   :  { %v8522_v49 = vmul.f32 %v7240_v26, %v9815_v41 }
 0x38c   :  { %3020 = vmax.xlane.f32.xlu0 %v3019_v23  ;;  %v8499_v23 = vmul.f32 %v7234_v45, %v8167_v21  ;;  %v1991_v16 = vsel %vm1572_vm4, %v8517_v3, 0.0  ;;  %v7242_v48 = vpop.eup %7241  ;;  %v2675_v45 = vpop.xlane.xlu1 %2674 }
 0x38d   :  { %v3224_v60 = vsel %vm251_vm0, %v8522_v49, 0.0  ;;  %v8529_v30 = vmul.f32 %v7242_v48, %v9815_v41  ;;  %v2541_v48 = vsub.f32 %v8326_v53, %v8462_v42  ;;  %v2676_v42 = vsub.f32 %v8322_v50, %v2675_v45 }
 0x38e   :  { %v1587_v15 = vsel %vm1572_vm4, %v8499_v23, 0.0 }
 0x38f   :  { %v2543_v25 = vmul.f32 1.442695, %v2541_v48 }
 0x390   :  { %v8533_v51 = vpop.xlane.xlu1 %2904 }
 0x39f   :  { %1433 = vadd.xlane.f32.xlu1 %v1432_v20  ;;  %v2188_v20 = vsub.f32 %v8297_v54, %v8456_v62  ;;  %v3167_v54 = vsel %vm251_vm0, %v8529_v30, 0.0 }
 0x3a2   :  { %7116 = vrot.lane.b32.xlu0 %v9812_v43, %s7513_s0  ;;  %v7244_v43 = vpop.eup %7243 }
 0x3a3   :  { %1641 = vadd.xlane.f32.xlu1 %v1640_v38  ;;  %v2190_v38 = vmul.f32 1.442695, %v2188_v20  ;;  %v8538_v62 = vmul.f32 %v7244_v43, %v9815_v41  ;;  %v7246_v11 = vpop.eup %7245  ;;  %v9819_v43 = vld [vmem:[#allocation53_spill] sm:$0xff] }
 0x3a4   :  { %v8546_v24 = vmul.f32 %v7246_v11, %v9815_v41  ;;  %v7248_v32 = vpop.eup %7247 }
 0x3a5   :  { %9816 = vst [vmem:[#allocation30_spill] sm:$0xff] %v8538_v62  ;;  %7249 = vpow2.f32 %v2190_v38  ;;  %v3459_v28 = vsel %vm251_vm0, %v8538_v62, 0.0  ;;  %v2542_v38 = vsub.f32 %v9819_v43, %v8452_v47 }
 0x3a6   :  { %2723 = vrot.lane.b32.xlu0 %v9813_v22, %s7529_s3  ;;  %9817 = vst [vmem:[#allocation51_spill] sm:$0xff] %v8546_v24  ;;  %7251 = vpow2.f32 %v2136_v14 }
 0x3a7   :  { %1588 = vadd.xlane.f32.xlu1 %v1587_v15  ;;  %v2404_v15 = vsub.f32 %v8312_v29, %v2400_v19  ;;  %v3607_v29 = vsel %vm251_vm0, %v8546_v24, 0.0  ;;  %v8554_v19 = vmul.f32 %v7248_v32, %v8241_v55  ;;  %v2545_v53 = vmul.f32 1.442695, %v2542_v38 }
 0x3a9   :  { %v2406_v26 = vmul.f32 1.442695, %v2404_v15 }
 0x3aa   :  { %2919 = vrot.lane.b32.xlu0 %v7842_v5, %s7529_s3 }
 0x3ab   :  { %1856 = vadd.xlane.f32.xlu1 %v1855_v4  ;;  %v2405_v4 = vsub.f32 %v9818_v37, %v2403_v18  ;;  %7253 = vpow2.f32 %v2406_v26  ;;  %v2199_v18 = vsel %vm2130_vm11, %v8554_v19, 0.0  ;;  %v2677_v37 = vmul.f32 1.442695, %v2676_v42 }
 0x3af   :  { %1992 = vadd.xlane.f32.xlu1 %v1991_v16  ;;  %v2408_v16 = vmul.f32 1.442695, %v2405_v4  ;;  %v7250_v20 = vpop.eup %7249 }
 0x3b0   :  { %v7252_v11 = vpop.eup %7251 }
 0x3b1   :  { %7255 = vpow2.f32 %v2408_v16 }
 0x3b2   :  { %7257 = vpow2.f32 %v2543_v25 }
 0x3b3   :  { %3225 = vadd.xlane.f32.xlu1 %v3224_v60  ;;  %7259 = vpow2.f32 %v2545_v53 }
 0x3b4   :  { %7261 = vpow2.f32 %v2677_v37 }
 0x3b5   :  { %v7254_v32 = vpop.eup %7253 }
 0x3b6   :  { %v8580_v26 = vmul.f32 %v7254_v32, %v8287_v39  ;;  %v1066_v45 = vpop.xlane.xlu0 %1065 }
 0x3b7   :  { %3168 = vadd.xlane.f32.xlu1 %v3167_v54  ;;  %v8565_v54 = vmul.f32 %v7250_v20, %v8287_v39  ;;  %vm1068_vm8 = vcmp.gt.f32.partialorder %v1066_v45, 0.0 }
 0x3b8   :  { %9821 = vst [vmem:[#allocation53_spill] sm:$0xff] %v8580_v26  ;;  %v2412_v16 = vsel %vm251_vm0, %v8580_v26, 0.0 }
 0x3b9   :  { %v2196_v14 = vsel %vm251_vm0, %v8565_v54, 0.0 }
 0x3ba   :  { %v8541_v31 = vpop.xlane.xlu1 %1292  ;;  %v8591_v43 = vpop.xlane.xlu0 %1007 }
 0x3bb   :  { %3460 = vadd.xlane.f32.xlu1 %v3459_v28  ;;  %v8573_v28 = vmul.f32 %v7252_v11, %v8287_v39  ;;  %v7256_v50 = vpop.eup %7255  ;;  %vm1010_vm14 = vcmp.gt.f32.partialorder %v8591_v43, 0.0  ;;  %vm1295_vm9 = vcmp.gt.f32.partialorder %v8541_v31, 0.0 }
 0x3bc   :  { %v8587_v48 = vmul.f32 %v7256_v50, %v8241_v55  ;;  %v7258_v20 = vpop.eup %7257  ;;  %v1297_v26 = vsel %vm1295_vm9, %v8541_v31, 1.0 }
 0x3bd   :  { %9820 = vst [vmem:[#allocation50_spill] sm:$0xff] %v8573_v28  ;;  %v2142_v4 = vsel %vm251_vm0, %v8573_v28, 0.0  ;;  %v8596_v25 = vmul.f32 %v7258_v20, %v8287_v39  ;;  %v7260_v11 = vpop.eup %7259  ;;  %v1070_v39 = vsel %vm1068_vm8, %v1066_v45, 1.0 }
 0x3be   :  { %v8549_v46 = vpop.xlane.xlu1 %1436  ;;  %9822 = vst [vmem:[#allocation59_spill] sm:$0xff] %v8587_v48  ;;  %v2415_v38 = vsel %vm2130_vm11, %v8587_v48, 0.0  ;;  %v8607_v32 = vmul.f32 %v7260_v11, %v8241_v55  ;;  %v7262_v37 = vpop.eup %7261  ;;  %7263 = vrcp.f32 %v1070_v39 }
 0x3bf   :  { %3608 = vadd.xlane.f32.xlu1 %v3607_v29  ;;  %9823 = vst [vmem:[#allocation60_spill] sm:$0xff] %v8596_v25  ;;  %v8615_v20 = vmul.f32 %v7262_v37, %v8303_v57  ;;  %v1012_v37 = vsel %vm1010_vm14, %v8591_v43, 1.0  ;;  %v9831_v43 = vld [vmem:[#allocation42_spill] sm:$0xff] }
 0x3c0   :  { %9824 = vst [vmem:[#allocation61_spill] sm:$0xff] %v8607_v32 }
 0x3c1   :  { %9825 = vst [vmem:[#allocation62_spill] sm:$0xff] %v8615_v20  ;;  %v2680_v41 = vsel %vm251_vm0, %v8615_v20, 0.0 }
 0x3c2   :  { %v8558_v60 = vpop.xlane.xlu1 %1644 }
 0x3c3   :  { %2200 = vadd.xlane.f32.xlu1 %v2199_v18 }
 0x3c6   :  { %v8567_v15 = vpop.xlane.xlu1 %1859  ;;  %v8600_v53 = vpop.xlane.xlu0 %1591 }
 0x3c9   :  { %2197 = vadd.xlane.f32.xlu0 %v2196_v14  ;;  %v2549_v14 = vsel %vm251_vm0, %v8596_v25, 0.0 }
 0x3ca   :  { %v8575_v47 = vpop.xlane.xlu1 %1995 }
 0x3cd   :  { %2143 = vadd.xlane.f32.xlu0 %v2142_v4 }
 0x3ce   :  { %v8582_v29 = vpop.xlane.xlu1 %3228 }
 0x3d1   :  { %2413 = vadd.xlane.f32.xlu0 %v2412_v16  ;;  %v2552_v16 = vsel %vm2130_vm11, %v8607_v32, 0.0 }
 0x3d3   :  { %v8589_v18 = vpop.xlane.xlu1 %3171 }
 0x3d4   :  { %3035 = vrot.lane.b32.xlu1 %v7846_v6, %s7529_s3 }
 0x3d5   :  { %2416 = vadd.xlane.f32.xlu0 %v2415_v38 }
 0x3d8   :  { %v8602_v42 = vpop.xlane.xlu1 %3463 }
 0x3d9   :  { %2550 = vadd.xlane.f32.xlu0 %v2549_v14 }
 0x3dc   :  { %v8610_v4 = vpop.xlane.xlu1 %3611  ;;  %v1063_v50 = vpop.xlane.xlu0 %1062 }
 0x3dd   :  { %vm1067_vm5 = vcmp.gt.f32.partialorder %v1063_v50, 0.0  ;;  %2553 = vadd.xlane.f32.xlu0 %v2552_v16 }
 0x3de   :  { %v1069_v38 = vsel %vm1067_vm5, %v1063_v50, 1.0  ;;  %v9827_v50 = vld [vmem:[#allocation40_spill] sm:$0xff] }
 0x3df   :  { %7265 = vrcp.f32 %v1069_v38 }
 0x3e0   :  { %v8619_v11 = vpop.permute.xlu1 %7121  ;;  %v1005_v14 = vpop.xlane.xlu0 %1004 }
 0x3e1   :  { %vm1009_vm15 = vcmp.gt.f32.partialorder %v1005_v14, 0.0  ;;  %2681 = vadd.xlane.f32.xlu0 %v2680_v41  ;;  %v7264_v41 = vpop.eup %7263 }
 0x3e2   :  { %v1011_v39 = vsel %vm1009_vm15, %v1005_v14, 1.0  ;;  %v1074_v48 = vsel %vm1068_vm8, %v7264_v41, 0.0  ;;  %vm1647_vm8 = vcmp.gt.f32.partialorder %v8558_v60, 0.0 }
 0x3e3   :  { %7267 = vrcp.f32 %v1011_v39  ;;  %v1076_v28 = vmul.f32 %v1074_v48, %v8357_v63  ;;  %v9830_v48 = vld [vmem:[#allocation52_spill] sm:$0xff] }
 0x3e4   :  { %v2690_v16 = vpop.permute.xlu1 %2689  ;;  %v1290_v21 = vpop.xlane.xlu0 %1289  ;;  %7269 = vrcp.f32 %v1012_v37 }
 0x3e5   :  { %v8628_v38 = vmul.f32 %v2690_v16, %v7852_v8  ;;  %v8631_v0 = vmul.f32 %v7848_v7, %v2690_v16  ;;  %vm1294_vm12 = vcmp.gt.f32.partialorder %v1290_v21, 0.0 }
 0x3e6   :  { %v1296_v20 = vsel %vm1294_vm12, %v1290_v21, 1.0 }
 0x3e7   :  { %7271 = vrcp.f32 %v1296_v20 }
 0x3e8   :  { %v8637_v39 = vpop.permute.xlu0 %3623  ;;  %7273 = vrcp.f32 %v1297_v26 }
 0x3e9   :  { %9826 = vst [vmem:[#allocation63_spill] sm:$0xff] %v8637_v39  ;;  %v3626_v37 = vmul.f32 %v8637_v39, %v7852_v8  ;;  %v3627_v25 = vmul.f32 %v7848_v7, %v8637_v39  ;;  %v7266_v16 = vpop.eup %7265 }
 0x3ea   :  { %v1073_v24 = vsel %vm1067_vm5, %v7266_v16, 0.0 }
 0x3eb   :  { %v7130_v62 = vpack.i.bf16 %v3627_v25, %v3626_v37  ;;  %v1075_v20 = vmul.f32 %v1073_v24, %v8424_v59  ;;  %v9829_v24 = vld [vmem:[#allocation41_spill] sm:$0xff]  ;;  %v2135_v25 = vsub.f32 %v9830_v48, %v8446_v12 }
 0x3ed   :  { %v7268_v32 = vpop.eup %7267  ;;  %7131 = vrot.lane.b32.xlu1 %v7130_v62, %s7513_s0  ;;  %6489 = vmatprep.mubr.msk.f32.mxu0 %vm9745_vm10, %v1075_v20 }
 0x3ee   :  { %v1015_v39 = vsel %vm1009_vm15, %v7268_v32, 0.0  ;;  %v7270_v45 = vpop.eup %7269  ;;  %6490 = vmatmul.mubr.msk.f32.vlgmr.msra.gmra.mrb[14].mxu0 %vm9745_vm10, %v1076_v28  ;;  %v2906_v32 = vsub.f32 %v8338_v13, %v8533_v51  ;;  %vm1594_vm15 = vcmp.gt.f32.partialorder %v8600_v53, 0.0 }
 0x3ef   :  { %v1017_v41 = vmul.f32 %v1015_v39, %v8431_v44  ;;  %6817 = vmatpush3.bf16.msk.msra.mxu0 %vm7924_vm6, %v9827_v50  ;;  %v1016_v63 = vsel %vm1010_vm14, %v7270_v45, 0.0  ;;  %v9832_v39 = vld [vmem:[#allocation43_spill] sm:$0xff] }
 0x3f0   :  { %6820 = vmatprep.subr.msk.bf16.mxu0 %vm7924_vm6, %v9829_v24  ;;  %v1018_v44 = vmul.f32 %v1016_v63, %v8363_v27  ;;  %v2138_v27 = vmul.f32 1.442695, %v2135_v25  ;;  %v8687_v37 = vmul.f32 %v9813_v22, %v9832_v39 }
 0x3f1   :  { %v7272_v59 = vpop.eup %7271  ;;  %6496 = vmatprep.mubr.msk.f32.mxu0 %vm9745_vm10, %v1017_v41 }
 0x3f2   :  { %v1300_v62 = vsel %vm1294_vm12, %v7272_v59, 0.0  ;;  %v7274_v26 = vpop.eup %7273  ;;  %7275 = vpow2.f32 %v2138_v27  ;;  %v8716_v27 = vpop.permute.xlu1 %7126 }
 0x3f3   :  { %v1302_v28 = vmul.f32 %v1300_v62, %v8438_v35  ;;  %v1301_v21 = vsel %vm1295_vm9, %v7274_v26, 0.0  ;;  %v2710_v35 = vsub.f32 %v8334_v10, %v8464_v36  ;;  %v2907_v10 = vmul.f32 1.442695, %v2906_v32 }
 0x3f4   :  { %v1303_v12 = vmul.f32 %v1301_v21, %v8366_v61  ;;  %vm1862_vm9 = vcmp.gt.f32.partialorder %v8567_v15, 0.0 }
 0x3f5   :  { %v2711_v14 = vmul.f32 1.442695, %v2710_v35 }
 0x3f6   :  { %6497 = vmatmul.mubr.msk.f32.vlgmr.msra.gmra.mrb[14].mxu0 %vm9745_vm10, %v1018_v44 }
 0x3f7   :  { %6823 = vmatpush3.bf16.msk.msra.mxu0 %vm7924_vm6, %v9829_v24  ;;  %6503 = vmatprep.mubr.msk.f32.mxu0 %vm9745_vm10, %v1302_v28  ;;  %7277 = vpow2.f32 %v2711_v14 }
 0x3f8   :  { %6826 = vmatprep.subr.msk.bf16.mxu0 %vm7924_vm6, %v9831_v43  ;;  %7279 = vpow2.f32 %v2907_v10 }
 0x3fc   :  { %v7276_v61 = vpop.eup %7275 }
 0x3fd   :  { %v8694_v36 = vmul.f32 %v7276_v61, %v8241_v55 }
 0x3fe   :  { %6504 = vmatmul.mubr.msk.f32.vlgmr.msra.gmra.mrb[14].mxu0 %vm9745_vm10, %v1303_v12 }
 0x3ff   :  { %6829 = vmatpush3.bf16.msk.msra.mxu0 %vm7924_vm6, %v9831_v43  ;;  %v2145_v51 = vsel %vm2130_vm11, %v8694_v36, 0.0  ;;  %vm1439_vm11 = vcmp.gt.f32.partialorder %v8549_v46, 0.0 }
 0x400   :  { %6513 = vmatprep.subr.mxu0 %v8687_v37  ;;  %v1441_v35 = vsel %vm1439_vm11, %v8549_v46, 1.0 }
 0x401   :  { %v7278_v13 = vpop.eup %7277 }
 0x402   :  { %v8699_v31 = vmul.f32 %v7278_v13, %v8303_v57  ;;  %v7280_v20 = vpop.eup %7279 }
 0x403   :  { %v8704_v41 = vmul.f32 %v7280_v20, %v8303_v57 }
 0x404   :  { %v2714_v45 = vsel %vm251_vm0, %v8699_v31, 0.0 }
 0x405   :  { %v2910_v55 = vsel %vm251_vm0, %v8704_v41, 0.0 }
 0x411   :  { %2146 = vadd.xlane.f32.xlu1 %v2145_v51 }
 0x415   :  { %2715 = vadd.xlane.f32.xlu1 %v2714_v45 }
 0x419   :  { %2911 = vadd.xlane.f32.xlu1 %v2910_v55  ;;  %v3021_v50 = vpop.xlane.xlu0 %3020 }
 0x41a   :  { %v3022_v59 = vsub.f32 %v8346_v2, %v3021_v50 }
 0x41c   :  { %v3023_v24 = vmul.f32 1.442695, %v3022_v59 }
 0x41d   :  { %v8709_v63 = vpop.permute.xlu0 %7116 }
 0x41e   :  { %7281 = vpow2.f32 %v3023_v24  ;;  %v1596_v24 = vsel %vm1594_vm15, %v8600_v53, 1.0 }
 0x41f   :  { %7283 = vrcp.f32 %v1441_v35 }
 0x421   :  { %v2724_v62 = vpop.permute.xlu0 %2723 }
 0x422   :  { %v2726_v44 = vmul.f32 %v2724_v62, %v7852_v8  ;;  %v2727_v28 = vmul.f32 %v7848_v7, %v2724_v62 }
 0x424   :  { %v7135_v26 = vpack.i.bf16 %v2727_v28, %v2726_v44 }
 0x425   :  { %v2920_v48 = vpop.permute.xlu0 %2919 }
 0x426   :  { %v2922_v25 = vmul.f32 %v2920_v48, %v7852_v8  ;;  %v2923_v43 = vmul.f32 %v7848_v7, %v2920_v48 }
 0x428   :  { %v7282_v21 = vpop.eup %7281  ;;  %v7145_v2 = vpack.i.bf16 %v2923_v43, %v2922_v25 }
 0x429   :  { %v8722_v12 = vmul.f32 %v7282_v21, %v8303_v57  ;;  %v1649_v57 = vsel %vm1647_vm8, %v8558_v60, 1.0  ;;  %v7284_v20 = vpop.eup %7283  ;;  %v1603_v21 = vmul.f32 %v7782_v34, %v9832_v39 }
 0x42a   :  { %7136 = vrot.lane.b32.xlu1 %v7135_v26, %s7530_s8  ;;  %v1445_v59 = vsel %vm1439_vm11, %v7284_v20, 0.0 }
 0x42b   :  { %v3026_v32 = vsel %vm251_vm0, %v8722_v12, 0.0  ;;  %v1447_v26 = vmul.f32 %v1445_v59, %v8374_v33 }
 0x42c   :  { %v1434_v14 = vpop.xlane.xlu1 %1433  ;;  %3027 = vadd.xlane.f32.xlu0 %v3026_v32  ;;  %v1864_v32 = vsel %vm1862_vm9, %v8567_v15, 1.0 }
 0x42d   :  { %vm1438_vm13 = vcmp.gt.f32.partialorder %v1434_v14, 0.0 }
 0x42e   :  { %v1440_v10 = vsel %vm1438_vm13, %v1434_v14, 1.0  ;;  %7146 = vrot.lane.b32.xlu1 %v7145_v2, %s7530_s8 }
 0x42f   :  { %7285 = vrcp.f32 %v1440_v10 }
 0x430   :  { %v1642_v61 = vpop.xlane.xlu1 %1641 }
 0x431   :  { %vm1646_vm5 = vcmp.gt.f32.partialorder %v1642_v61, 0.0 }
 0x432   :  { %v1648_v13 = vsel %vm1646_vm5, %v1642_v61, 1.0 }
 0x433   :  { %7287 = vrcp.f32 %v1648_v13  ;;  %v1871_v13 = vmul.f32 %v7842_v5, %v9832_v39 }
 0x434   :  { %7289 = vrcp.f32 %v1649_v57  ;;  %v1589_v51 = vpop.xlane.xlu1 %1588 }
 0x435   :  { %vm1593_vm14 = vcmp.gt.f32.partialorder %v1589_v51, 0.0 }
 0x436   :  { %v1595_v45 = vsel %vm1593_vm14, %v1589_v51, 1.0 }
 0x437   :  { %7291 = vrcp.f32 %v1595_v45 }
 0x438   :  { %v1857_v55 = vpop.xlane.xlu1 %1856  ;;  %7293 = vrcp.f32 %v1596_v24 }
 0x439   :  { %v7286_v50 = vpop.eup %7285  ;;  %vm1861_vm12 = vcmp.gt.f32.partialorder %v1857_v55, 0.0 }
 0x43a   :  { %v1444_v62 = vsel %vm1438_vm13, %v7286_v50, 0.0  ;;  %v1863_v44 = vsel %vm1861_vm12, %v1857_v55, 1.0  ;;  %vm1998_vm13 = vcmp.gt.f32.partialorder %v8575_v47, 0.0  ;;  %v2007_v55 = vmul.f32 %v7846_v6, %v9832_v39 }
 0x43b   :  { %v1446_v28 = vmul.f32 %v1444_v62, %v8482_v56  ;;  %7295 = vrcp.f32 %v1863_v44  ;;  %v7119_v39 = vunpack.i.h.bf16 %v8709_v63  ;;  %v7118_v44 = vunpack.i.l.bf16 %v8709_v63 }
 0x43c   :  { %v1993_v48 = vpop.xlane.xlu1 %1992  ;;  %7297 = vrcp.f32 %v1864_v32 }
 0x43d   :  { %v7288_v25 = vpop.eup %7287  ;;  %6510 = vmatprep.mubr.msk.f32.mxu0 %vm9745_vm10, %v1446_v28  ;;  %vm1997_vm11 = vcmp.gt.f32.partialorder %v1993_v48, 0.0 }
 0x43e   :  { %v7290_v46 = vpop.eup %7289  ;;  %v1652_v43 = vsel %vm1646_vm5, %v7288_v25, 0.0  ;;  %6511 = vmatmul.mubr.msk.f32.vlgmr.msra.gmra.mrb[14].mxu0 %vm9745_vm10, %v1447_v26  ;;  %vm3231_vm5 = vcmp.gt.f32.partialorder %v8582_v29, 0.0 }
 0x43f   :  { %v1654_v56 = vmul.f32 %v1652_v43, %v8488_v52  ;;  %6514 = vmatpush3.msra.mxu0 %v8687_v37  ;;  %v1653_v35 = vsel %vm1647_vm8, %v7290_v46, 0.0  ;;  %v1999_v52 = vsel %vm1997_vm11, %v1993_v48, 1.0  ;;  %v9833_v37 = vpack.i.bf16 %v8631_v0, %v8628_v38 }
 0x440   :  { %6518 = vmatprep.subr.mxu0 %v1603_v21  ;;  %v8753_v33 = vpop.xlane.xlu1 %3225  ;;  %v1655_v10 = vmul.f32 %v1653_v35, %v8380_v1  ;;  %7299 = vrcp.f32 %v1999_v52  ;;  %v3233_v62 = vsel %vm3231_vm5, %v8582_v29, 1.0  ;;  %v7123_v52 = vunpack.i.l.bf16 %v8619_v11 }
 0x441   :  { %v7292_v2 = vpop.eup %7291  ;;  %6515 = vmatprep.mubr.msk.f32.mxu0 %vm1572_vm4, %v1654_v56  ;;  %vm3230_vm8 = vcmp.gt.f32.partialorder %v8753_v33, 0.0  ;;  %v6858_v56 = vpack.c.bf16 %v7119_v39, %v7118_v44 }
 0x442   :  { %v1599_v14 = vsel %vm1593_vm14, %v7292_v2, 0.0  ;;  %7141 = vrot.lane.b32.xlu0 %v9833_v37, %s7530_s8  ;;  %v7294_v57 = vpop.eup %7293  ;;  %v3232_v20 = vsel %vm3230_vm8, %v8753_v33, 1.0 }
 0x443   :  { %v1601_v61 = vmul.f32 %v1599_v14, %v8499_v23  ;;  %v1600_v1 = vsel %vm1594_vm15, %v7294_v57, 0.0  ;;  %v2000_v23 = vsel %vm1998_vm13, %v8575_v47, 1.0  ;;  %v7124_v14 = vunpack.i.h.bf16 %v8619_v11 }
 0x444   :  { %v8768_v60 = vpop.xlane.xlu1 %3168  ;;  %v1602_v45 = vmul.f32 %v1600_v1, %v8389_v9  ;;  %7301 = vrcp.f32 %v2000_v23  ;;  %v7129_v1 = vunpack.i.h.bf16 %v8716_v27  ;;  %v7128_v23 = vunpack.i.l.bf16 %v8716_v27 }
 0x445   :  { %v7296_v51 = vpop.eup %7295  ;;  %7303 = vrcp.f32 %v3232_v20  ;;  %vm3173_vm14 = vcmp.gt.f32.partialorder %v8768_v60, 0.0  ;;  %v6862_v11 = vpack.c.bf16 %v7124_v14, %v7123_v52 }
 0x446   :  { %6516 = vmatmul.mubr.msk.f32.vlgmr.msra.gmra.mrb[14].mxu0 %vm1572_vm4, %v1655_v10  ;;  %v1867_v38 = vsel %vm1861_vm12, %v7296_v51, 0.0  ;;  %v7298_v53 = vpop.eup %7297  ;;  %v3175_v26 = vsel %vm3173_vm14, %v8768_v60, 1.0  ;;  %7305 = vrcp.f32 %v3233_v62  ;;  %vm3174_vm12 = vcmp.gt.f32.partialorder %v8589_v18, 0.0 }
 0x447   :  { %6519 = vmatpush3.msra.mxu0 %v1603_v21  ;;  %6520 = vmatprep.mubr.msk.f32.mxu0 %vm1572_vm4, %v1601_v61  ;;  %v1869_v59 = vmul.f32 %v1867_v38, %v8508_v17  ;;  %v1868_v17 = vsel %vm1862_vm9, %v7298_v53, 0.0  ;;  %7307 = vrcp.f32 %v3175_v26  ;;  %v6866_v60 = vpack.c.bf16 %v7129_v1, %v7128_v23  ;;  %v9835_v26 = vld [vmem:[#allocation50_spill] sm:$0xff] }
 0x448   :  { %6523 = vmatprep.subr.mxu0 %v1871_v13  ;;  %v8777_v0 = vpop.xlane.xlu1 %3460  ;;  %v1870_v25 = vmul.f32 %v1868_v17, %v8386_v58 }
 0x449   :  { %vm3465_vm9 = vcmp.gt.f32.partialorder %v8777_v0, 0.0 }
 0x44a   :  { %v7300_v24 = vpop.eup %7299  ;;  %v3467_v32 = vsel %vm3465_vm9, %v8777_v0, 1.0 }
 0x44b   :  { %v2003_v28 = vsel %vm1997_vm11, %v7300_v24, 0.0 }
 0x44c   :  { %v8789_v50 = vpop.xlane.xlu1 %3608  ;;  %v2005_v43 = vmul.f32 %v2003_v28, %v8517_v3 }
 0x44d   :  { %vm3613_vm7 = vcmp.gt.f32.partialorder %v8789_v50, 0.0 }
 0x44e   :  { %6521 = vmatmul.mubr.msk.f32.vlgmr.msra.gmra.mrb[14].mxu0 %vm1572_vm4, %v1602_v45  ;;  %v7302_v21 = vpop.eup %7301  ;;  %v3615_v38 = vsel %vm3613_vm7, %v8789_v50, 1.0  ;;  %v9844_v50 = vmov 0.0  }
 0x44f   :  { %6524 = vmatpush3.msra.mxu0 %v1871_v13  ;;  %6525 = vmatprep.mubr.msk.f32.mxu0 %vm1572_vm4, %v1869_v59  ;;  %v7304_v2 = vpop.eup %7303  ;;  %v2004_v3 = vsel %vm1998_vm13, %v7302_v21, 0.0  ;;  %vm3466_vm13 = vcmp.gt.f32.partialorder %v8602_v42, 0.0  ;;  %v9834_v59 = vld [vmem:[#allocation54_spill] sm:$0xff] }
 0x450   :  { %6528 = vmatprep.subr.mxu0 %v2007_v55  ;;  %v8798_v9 = vpop.xlane.xlu1 %2200  ;;  %v3236_v37 = vsel %vm3230_vm8, %v7304_v2, 0.0  ;;  %v2006_v47 = vmul.f32 %v2004_v3, %v8398_v40  ;;  %v7306_v13 = vpop.eup %7305  ;;  %vm3614_vm8 = vcmp.gt.f32.partialorder %v8610_v4, 0.0  ;;  %v9839_v21 = vld [vmem:[#allocation30_spill] sm:$0xff] }
 0x451   :  { %vm2203_vm15 = vcmp.gt.f32.partialorder %v8798_v9, 0.0  ;;  %v3238_v57 = vmul.f32 %v3236_v37, %v8522_v49  ;;  %v7308_v33 = vpop.eup %7307  ;;  %v3237_v51 = vsel %vm3231_vm5, %v7306_v13, 0.0  ;;  %v3468_v49 = vsel %vm3466_vm13, %v8602_v42, 1.0  ;;  %v9843_v42 = vld [vmem:[#allocation57_spill] sm:$0xff] }
 0x452   :  { %v2205_v15 = vsel %vm2203_vm15, %v8798_v9, 1.0  ;;  %v3179_v45 = vsel %vm3173_vm14, %v7308_v33, 0.0  ;;  %v3239_v53 = vmul.f32 %v3237_v51, %v9834_v59  ;;  %v9842_v37 = vmov 0.0|0.0  }
 0x453   :  { %7309 = vrcp.f32 %v2205_v15  ;;  %v3181_v62 = vmul.f32 %v3179_v45, %v8529_v30  ;;  %v3616_v30 = vsel %vm3614_vm8, %v8610_v4, 1.0 }
 0x454   :  { %v3036_v46 = vpop.permute.xlu1 %3035 }
 0x455   :  { %v3038_v63 = vmul.f32 %v3036_v46, %v7852_v8  ;;  %v3039_v48 = vmul.f32 %v7848_v7, %v3036_v46  ;;  %v3176_v8 = vsel %vm3174_vm12, %v8589_v18, 1.0  ;;  %v9838_v18 = vld [vmem:[#allocation55_spill] sm:$0xff] }
 0x456   :  { %6526 = vmatmul.mubr.msk.f32.vlgmr.msra.gmra.mrb[14].mxu0 %vm1572_vm4, %v1870_v25  ;;  %v2198_v58 = vpop.xlane.xlu0 %2197 }
 0x457   :  { %v7150_v35 = vpack.i.bf16 %v3039_v48, %v3038_v63  ;;  %6529 = vmatpush3.msra.mxu0 %v2007_v55  ;;  %vm2202_vm11 = vcmp.gt.f32.partialorder %v2198_v58, 0.0  ;;  %6530 = vmatprep.mubr.msk.f32.mxu0 %vm1572_vm4, %v2005_v43  ;;  %v9836_v43 = vld [vmem:[#allocation36_spill] sm:$0xff]  ;;  %v9837_v63 = vld [vmem:[#allocation37_spill] sm:$0xff] }
 0x458   :  { %v2204_v7 = vsel %vm2202_vm11, %v2198_v58, 1.0  ;;  %6859 = vmatprep.subr.bf16.mxu0 %v6858_v56 }
 0x459   :  { %7311 = vrcp.f32 %v2204_v7  ;;  %7151 = vrot.lane.b32.xlu1 %v7150_v35, %s7530_s8  ;;  %v9840_v7 = vld [vmem:[#allocation56_spill] sm:$0xff] }
 0x45a   :  { %v2144_v10 = vpop.xlane.xlu0 %2143  ;;  %7313 = vrcp.f32 %v3176_v8 }
 0x45b   :  { %vm2148_vm10 = vcmp.gt.f32.partialorder %v2144_v10, 0.0  ;;  %7315 = vrcp.f32 %v3467_v32  ;;  %v9841_v32 = vld [vmem:[#allocation51_spill] sm:$0xff] }
 0x45c   :  { %v2150_v61 = vsel %vm2148_vm10, %v2144_v10, 1.0 }
 0x45d   :  { %7317 = vrcp.f32 %v2150_v61  ;;  %v7310_v40 = vpop.eup %7309 }
 0x45e   :  { %6531 = vmatmul.mubr.msk.f32.vlgmr.msra.gmra.mrb[14].mxu0 %vm1572_vm4, %v2006_v47  ;;  %7319 = vrcp.f32 %v3468_v49  ;;  %v2209_v29 = vsel %vm2203_vm15, %v7310_v40, 0.0  ;;  %v2414_v61 = vpop.xlane.xlu0 %2413 }
 0x45f   :  { %6861 = vmatpush3.bf16.msra.mxu0 %v6858_v56  ;;  %6593 = vmatprep.mubr.msk.f32.mxu0 %vm251_vm0, %v3238_v57  ;;  %7321 = vrcp.f32 %v3615_v38  ;;  %v2211_v44 = vmul.f32 %v2209_v29, %v8554_v19  ;;  %v7132_v28 = vpop.permute.xlu1 %7131 }
 0x460   :  { %6863 = vmatprep.subr.bf16.mxu0 %v6862_v11  ;;  %v7134_v15 = vunpack.i.h.bf16 %v7132_v28  ;;  %v7133_v46 = vunpack.i.l.bf16 %v7132_v28  ;;  %7323 = vrcp.f32 %v3616_v30  ;;  %v9848_v30 = vld [vmem:[#allocation60_spill] sm:$0xff] }
 0x462   :  { %v6870_v2 = vpack.c.bf16 %v7134_v15, %v7133_v46  ;;  %v2417_v57 = vpop.xlane.xlu0 %2416 }
 0x463   :  { %v7312_v20 = vpop.eup %7311 }
 0x464   :  { %v2208_v55 = vsel %vm2202_vm11, %v7312_v20, 0.0  ;;  %v7314_v24 = vpop.eup %7313 }
 0x465   :  { %v2210_v27 = vmul.f32 %v2208_v55, %v8565_v54  ;;  %v7316_v17 = vpop.eup %7315  ;;  %v3180_v54 = vsel %vm3174_vm12, %v7314_v24, 0.0  ;;  %v9845_v55 = vld [vmem:[#allocation53_spill] sm:$0xff] }
 0x466   :  { %6594 = vmatmul.mubr.msk.f32.vlgmr.msra.gmra.mrb[14].mxu0 %vm251_vm0, %v3239_v53  ;;  %v3471_v19 = vsel %vm3465_vm9, %v7316_v17, 0.0  ;;  %v3182_v48 = vmul.f32 %v3180_v54, %v9838_v18 }
 0x467   :  { %v7318_v39 = vpop.eup %7317  ;;  %6865 = vmatpush3.bf16.msra.mxu0 %v6862_v11  ;;  %6537 = vmatprep.mubr.msk.f32.mxu1 %vm251_vm0, %v2210_v27  ;;  %v3473_v58 = vmul.f32 %v3471_v19, %v9839_v21  ;;  %v2551_v11 = vpop.xlane.xlu0 %2550  ;;  %v9849_v21 = vld [vmem:[#allocation61_spill] sm:$0xff] }
 0x468   :  { %v2154_v9 = vsel %vm2148_vm10, %v7318_v39, 0.0  ;;  %6600 = vmatprep.mubr.msk.f32.mxu0 %vm251_vm0, %v3181_v62  ;;  %6867 = vmatprep.subr.bf16.mxu0 %v6866_v60  ;;  %v7320_v56 = vpop.eup %7319  ;;  %vm2419_vm10 = vcmp.gt.f32.partialorder %v2417_v57, 0.0  ;;  %vm2555_vm14 = vcmp.gt.f32.partialorder %v2551_v11, 0.0  ;;  %v9846_v39 = vld [vmem:[#allocation38_spill] sm:$0xff] }
 0x469   :  { %v2156_v25 = vmul.f32 %v2154_v9, %v9835_v26  ;;  %6538 = vmatmul.mubr.msk.f32.vlgmr.msra.gmra.mrb[4].mxu1 %vm251_vm0, %v2211_v44  ;;  %v7322_v35 = vpop.eup %7321  ;;  %v3472_v0 = vsel %vm3466_vm13, %v7320_v56, 0.0  ;;  %v2421_v40 = vsel %vm2419_vm10, %v2417_v57, 1.0  ;;  %v2557_v51 = vsel %vm2555_vm14, %v2551_v11, 1.0  ;;  %v9847_v9 = vld [vmem:[#allocation59_spill] sm:$0xff]  ;;  %v9851_v57 = vld [vmem:[#allocation62_spill] sm:$0xff] }
 0x46a   :  { %6837 = vmatpush3.bf16.msra.mxu1 %v9836_v43  ;;  %v3619_v8 = vsel %vm3613_vm7, %v7322_v35, 0.0  ;;  %v3474_v3 = vmul.f32 %v3472_v0, %v9840_v7  ;;  %v7324_v52 = vpop.eup %7323  ;;  %vm2418_vm7 = vcmp.gt.f32.partialorder %v2414_v61, 0.0 }
 0x46b   :  { %6839 = vmatprep.subr.bf16.mxu1 %v9837_v63  ;;  %6544 = vmatprep.mubr.msk.f32.mxu1 %vm251_vm0, %v2156_v25  ;;  %v3621_v14 = vmul.f32 %v3619_v8, %v9841_v32  ;;  %v3620_v10 = vsel %vm3614_vm8, %v7324_v52, 0.0  ;;  %v2420_v13 = vsel %vm2418_vm7, %v2414_v61, 1.0  ;;  %v2554_v49 = vpop.xlane.xlu0 %2553 }
 0x46c   :  { %v3622_v47 = vmul.f32 %v3620_v10, %v9843_v42  ;;  %7325 = vrcp.f32 %v2420_v13  ;;  %vm2556_vm15 = vcmp.gt.f32.partialorder %v2554_v49, 0.0 }
 0x46d   :  { %v2558_v38 = vsel %vm2556_vm15, %v2554_v49, 1.0 }
 0x46e   :  { %6601 = vmatmul.mubr.msk.f32.vlgmr.msra.gmra.mrb[14].mxu0 %vm251_vm0, %v3182_v48 }
 0x46f   :  { %6869 = vmatpush3.bf16.msra.mxu0 %v6866_v60  ;;  %6607 = vmatprep.mubr.msk.f32.mxu0 %vm251_vm0, %v3473_v58  ;;  %v2682_v59 = vpop.xlane.xlu0 %2681 }
 0x470   :  { %6871 = vmatprep.subr.bf16.mxu0 %v6870_v2  ;;  %vm2683_vm9 = vcmp.gt.f32.partialorder %v2682_v59, 0.0 }
 0x476   :  { %6608 = vmatmul.mubr.msk.f32.vlgmr.msra.gmra.mrb[14].mxu0 %vm251_vm0, %v3474_v3  ;;  %v7326_v1 = vpop.eup %7325 }
 0x477   :  { %6873 = vmatpush3.bf16.msra.mxu0 %v6870_v2  ;;  %6614 = vmatprep.mubr.msk.f32.mxu0 %vm251_vm0, %v3621_v14  ;;  %v2424_v45 = vsel %vm2418_vm7, %v7326_v1, 0.0 }
 0x478   :  { %6890 = vmatprep.subr.bf16.mxu0 %v9842_v37  ;;  %v2426_v24 = vmul.f32 %v2424_v45, %v9845_v55  ;;  %v212_v55 = vld [vmem:[%s9852_s19] sm:$0xff] }
 0x47e   :  { %6615 = vmatmul.mubr.msk.f32.vlgmr.msra.gmra.mrb[14].mxu0 %vm251_vm0, %v3622_v47 }
 0x47f   :  { %6647 = vmatprep.mubr.msk.f32.mxu0 %vm7509_vm1, %v9844_v50 }
 0x49e   :  { %v2147_v33 = vpop.xlane.xlu1 %2146 }
 0x49f   :  { %vm2149_vm5 = vcmp.gt.f32.partialorder %v2147_v33, 0.0 }
 0x4a0   :  { %v2151_v4 = vsel %vm2149_vm5, %v2147_v33, 1.0 }
 0x4a1   :  { %7327 = vrcp.f32 %v2151_v4  ;;  %v208_v4 = vld [vmem:[%s9850_s14] sm:$0xff] }
 0x4a2   :  { %7329 = vrcp.f32 %v2421_v40  ;;  %v2716_v23 = vpop.xlane.xlu1 %2715  ;;  %v209_v40 = vld [vmem:[%s9850_s14 + $0x8] sm:$0xff] }
 0x4a3   :  { %7331 = vrcp.f32 %v2557_v51  ;;  %vm2717_vm12 = vcmp.gt.f32.partialorder %v2716_v23, 0.0 }
 0x4a4   :  { %7333 = vrcp.f32 %v2558_v38  ;;  %v2718_v27 = vsel %vm2717_vm12, %v2716_v23, 1.0  ;;  %v6874_v38 = vpack.c.bf16 %v209_v40, %v208_v4 }
 0x4a5   :  { %7335 = vrcp.f32 %v2718_v27 }
 0x4a6   :  { %v2912_v60 = vpop.xlane.xlu1 %2911 }
 0x4a7   :  { %vm2913_vm11 = vcmp.gt.f32.partialorder %v2912_v60, 0.0 }
 0x4a8   :  { %v2914_v25 = vsel %vm2913_vm11, %v2912_v60, 1.0 }
 0x4aa   :  { %v7137_v19 = vpop.permute.xlu1 %7136 }
 0x4ab   :  { %v7328_v20 = vpop.eup %7327  ;;  %v7139_v46 = vunpack.i.h.bf16 %v7137_v19  ;;  %v7138_v43 = vunpack.i.l.bf16 %v7137_v19 }
 0x4ac   :  { %v2155_v53 = vsel %vm2149_vm5, %v7328_v20, 0.0  ;;  %v7330_v17 = vpop.eup %7329 }
 0x4ad   :  { %v2157_v29 = vmul.f32 %v2155_v53, %v8694_v36  ;;  %v7332_v62 = vpop.eup %7331  ;;  %v2425_v44 = vsel %vm2419_vm10, %v7330_v17, 0.0  ;;  %v2684_v36 = vsel %vm2683_vm9, %v2682_v59, 1.0  ;;  %v6847_v56 = vpack.c.bf16 %v7139_v46, %v7138_v43  ;;  %v210_v59 = vld [vmem:[%s9850_s14 + $0x10] sm:$0xff]  ;;  %v211_v53 = vld [vmem:[%s9850_s14 + $0x18] sm:$0xff]  ;;  %v216_v17 = vld [vmem:[%s9853_s24] sm:$0xff] }
 0x4ae   :  { %v2561_v28 = vsel %vm2555_vm14, %v7332_v62, 0.0  ;;  %v2427_v54 = vmul.f32 %v2425_v44, %v9847_v9  ;;  %7337 = vrcp.f32 %v2684_v36  ;;  %v7334_v15 = vpop.eup %7333  ;;  %v7147_v32 = vpop.permute.xlu1 %7146  ;;  %v217_v62 = vld [vmem:[%s9853_s24 + $0x8] sm:$0xff]  ;;  %v6145_v36 = vld [vmem:[%s9854_s30] ss:$0 sm:$0xff]  ;;  %v214_v46 = vld [vmem:[%s9852_s19 + $0x10] sm:$0xff]  ;;  %vm9883_vm10 = vcmask 97280  }
 0x4af   :  { %6545 = vmatmul.mubr.msk.f32.vlgmr.msra.gmra.mrb[4].mxu1 %vm251_vm0, %v2157_v29  ;;  %v2563_v26 = vmul.f32 %v2561_v28, %v9848_v30  ;;  %7339 = vrcp.f32 %v2914_v25  ;;  %v2562_v18 = vsel %vm2556_vm15, %v7334_v15, 0.0  ;;  %v7336_v48 = vpop.eup %7335  ;;  %v7149_v42 = vunpack.i.h.bf16 %v7147_v32  ;;  %v6154_v28 = vld [vmem:[%s9855_s6] ss:$0 sm:$0xff]  ;;  %v215_v43 = vld [vmem:[%s9852_s19 + $0x18] sm:$0xff]  ;;  %vm9886_vm14 = vmmov %vm9883_vm10 }
 0x4b0   :  { %6841 = vmatpush3.bf16.msra.mxu1 %v9837_v63  ;;  %6551 = vmatprep.mubr.msk.f32.mxu1 %vm251_vm0, %v2426_v24  ;;  %v2564_v58 = vmul.f32 %v2562_v18, %v9849_v21  ;;  %v2720_v35 = vsel %vm2717_vm12, %v7336_v48, 0.0  ;;  %v7148_v47 = vunpack.i.l.bf16 %v7147_v32  ;;  %v6878_v29 = vpack.c.bf16 %v211_v53, %v210_v59  ;;  %v213_v24 = vld [vmem:[%s9852_s19 + $0x8] sm:$0xff]  ;;  %v9864_v53 = vld [vmem:[#allocation58_spill] sm:$0xff] }
 0x4b1   :  { %6843 = vmatprep.subr.bf16.mxu1 %v9846_v39  ;;  %v2721_v52 = vmul.f32 %v2720_v35, %v8699_v31  ;;  %v6882_v27 = vpack.c.bf16 %v213_v24, %v212_v55  ;;  %v6891_v60 = vpack.c.bf16 %v217_v62, %v216_v17  ;;  %v6958_v9 = vadd.f32 %v6154_v28, %v6145_v36  ;;  %v9865_v55 = vld [vmem:[#allocation63_spill] sm:$0xff] }
 0x4b2   :  { %v6853_v11 = vpack.c.bf16 %v7149_v42, %v7148_v47  ;;  %v6886_v48 = vpack.c.bf16 %v215_v43, %v214_v46  ;;  %v9873_v46 = vmov 97   ;;  %v9874_v43 = vmov 102  }
 0x4b3   :  { %6892 = vmatpush3.bf16.msra.mxu0 %v6891_v60 }
 0x4b4   :  { %6893 = vmatprep.subr.bf16.mxu0 %v9842_v37 }
 0x4b7   :  { %6552 = vmatmul.mubr.msk.f32.vlgmr.msra.gmra.mrb[4].mxu1 %vm251_vm0, %v2427_v54  ;;  %v6177_v54 = vld [vmem:[%s9856_s12] ss:$0 sm:$0xff] }
 0x4b8   :  { %6845 = vmatpush3.bf16.msra.mxu1 %v9846_v39  ;;  %6558 = vmatprep.mubr.msk.f32.mxu1 %vm251_vm0, %v2563_v26  ;;  %v7338_v3 = vpop.eup %7337  ;;  %v219_v39 = vld [vmem:[%s9853_s24 + $0x18] sm:$0xff]  ;;  %v6959_v30 = vadd.f32 %v6958_v9, %v6177_v54  ;;  %v9867_v9 = vmov 101   ;;  %v9868_v54 = vmov 98  }
 0x4b9   :  { %v3028_v63 = vpop.xlane.xlu0 %3027  ;;  %6846 = vmatprep.subr.bf16.mxu1 %v9842_v37  ;;  %v2686_v10 = vsel %vm2683_vm9, %v7338_v3, 0.0  ;;  %v7340_v61 = vpop.eup %7339  ;;  %vm9889_vm9 = vmmov %vm9883_vm10 }
 0x4ba   :  { %vm3029_vm13 = vcmp.gt.f32.partialorder %v3028_v63, 0.0  ;;  %v2687_v13 = vmul.f32 %v2686_v10, %v9851_v57  ;;  %v2916_v31 = vsel %vm2913_vm11, %v7340_v61, 0.0 }
 0x4bb   :  { %v3030_v0 = vsel %vm3029_vm13, %v3028_v63, 1.0  ;;  %v2917_v33 = vmul.f32 %v2916_v31, %v8704_v41 }
 0x4bc   :  { %7341 = vrcp.f32 %v3030_v0 }
 0x4bd   :  { %v7142_v2 = vpop.permute.xlu0 %7141 }
 0x4be   :  { %v7144_v8 = vunpack.i.h.bf16 %v7142_v2  ;;  %v7143_v7 = vunpack.i.l.bf16 %v7142_v2 }
 0x4bf   :  { %6559 = vmatmul.mubr.msk.f32.vlgmr.msra.gmra.mrb[4].mxu1 %vm251_vm0, %v2564_v58 }
 0x4c0   :  { %v6850_v14 = vpack.c.bf16 %v7144_v8, %v7143_v7  ;;  %6848 = vmatpush3.bf16.msra.mxu1 %v6847_v56  ;;  %6565 = vmatprep.mubr.msk.f32.mxu1 %vm7509_vm1, %v9844_v50  ;;  %v6163_v56 = vld [vmem:[%s9857_s22] ss:$0 sm:$0xff] }
 0x4c1   :  { %6849 = vmatprep.subr.bf16.mxu1 %v9842_v37 }
 0x4c3   :  { %6566 = vmatmul.mubr.msk.f32.vlgmr.msra.gmra.mrb[6].mxu1 %vm251_vm0, %v2721_v52  ;;  %v220_v52 = vld [vmem:[%s9858_s23] sm:$0xff] }
 0x4c4   :  { %6851 = vmatpush3.bf16.msra.mxu1 %v6850_v14  ;;  %6572 = vmatprep.mubr.msk.f32.mxu1 %vm7509_vm1, %v9844_v50 }
 0x4c5   :  { %6852 = vmatprep.subr.bf16.mxu1 %v9842_v37 }
 0x4c6   :  { %v7342_v51 = vpop.eup %7341 }
 0x4c7   :  { %6573 = vmatmul.mubr.msk.f32.vlgmr.msra.gmra.mrb[8].mxu1 %vm251_vm0, %v2687_v13  ;;  %v3032_v41 = vsel %vm3029_vm13, %v7342_v51, 0.0  ;;  %v221_v13 = vld [vmem:[%s9858_s23 + $0x8] sm:$0xf] }
 0x4c8   :  { %6854 = vmatpush3.bf16.msra.mxu1 %v6853_v11  ;;  %6579 = vmatprep.mubr.msk.f32.mxu1 %vm7509_vm1, %v9844_v50  ;;  %v3033_v45 = vmul.f32 %v3032_v41, %v8722_v12  ;;  %v218_v12 = vld [vmem:[%s9853_s24 + $0x10] sm:$0xff] }
 0x4c9   :  { %6855 = vmatprep.subr.bf16.mxu1 %v9842_v37  ;;  %v6894_v44 = vpack.c.bf16 %v219_v39, %v218_v12  ;;  %v9866_v12 = vld [vmem:[#allocation34_spill] sm:$0xff] }
 0x4cb   :  { %v7152_v49 = vpop.permute.xlu1 %7151  ;;  %6580 = vmatmul.mubr.msk.f32.vlgmr.msra.gmra.mrb[10].mxu1 %vm251_vm0, %v2917_v33  ;;  %6895 = vmatpush3.bf16.msra.mxu0 %v6894_v44  ;;  %v6168_v33 = vld [vmem:[%s9860_s26] ss:$0 sm:$0xff] }
 0x4cc   :  { %v7154_v1 = vunpack.i.h.bf16 %v7152_v49  ;;  %v7153_v23 = vunpack.i.l.bf16 %v7152_v49  ;;  %6586 = vmatprep.mubr.msk.f32.mxu1 %vm7509_vm1, %v9844_v50  ;;  %6902 = vmatprep.subr.bf16.mxu0 %v9842_v37 }
 0x4ce   :  { %v6856_v20 = vpack.c.bf16 %v7154_v1, %v7153_v23  ;;  %v223_v23 = vld [vmem:[%s9861_s28] sm:$0xf] }
 0x4d0   :  { %6857 = vmatpush3.bf16.msra.mxu1 %v6856_v20 }
 0x4d1   :  { %6875 = vmatprep.subr.bf16.mxu1 %v6874_v38 }
 0x4d3   :  { %6587 = vmatmul.mubr.msk.f32.vlgmr.msra.gmra.mrb[12].mxu1 %vm251_vm0, %v3033_v45  ;;  %v9863_v45 = vld [vmem:[#allocation35_spill] sm:$0xff] }
 0x4d4   :  { %6877 = vmatpush3.bf16.msra.mxu1 %v6874_v38  ;;  %v222_v38 = vld [vmem:[%s9862_s1] sm:$0xf] }
 0x4d5   :  { %6879 = vmatprep.subr.bf16.mxu1 %v6878_v29 }
 0x4d8   :  { %6881 = vmatpush3.bf16.msra.mxu1 %v6878_v29 }
 0x4d9   :  { %6883 = vmatprep.subr.bf16.mxu1 %v6882_v27 }
 0x551   :  { %v6616_v26 = vpop.f32.mrb[14].mxu0 }
 0x552   :  { %v6957_v25 = vadd.f32 %v6959_v30, %v6616_v26  ;;  %v3708_v19 = vpop.f32.mrb[15].mxu0  ;;  %v9869_v26 = vmov 103  }
 0x553   :  { %v6960_v15 = vadd.f32 %v6959_v30, %v3708_v19  ;;  %v9871_v19 = vmov 104  }
 0x554   :  { %v3730_v63 = vmax.f32 %v6957_v25, 0.0  ;;  %v9870_v25 = vmov 99  }
 0x555   :  { %v3729_v18 = vmax.f32 %v6960_v15, 0.0  ;;  %v9872_v15 = vmov 100  }
 0x557   :  { %v6896_v21 = vpack.c.bf16 %v3730_v63, %v3729_v18  ;;  %6625 = vmatprep.mubr.msk.f32.mxu1 %vm499_vm2, %v3729_v18  ;;  %v9876_v18 = vmov 96  }
 0x558   :  { %6626 = vmatmul.mubr.msk.f32.vlgmr.msra.gmra.mrb[14].mxu1 %vm499_vm2, %v3730_v63  ;;  %v9875_v63 = vmov 105  }
 0x559   :  { %6885 = vmatpush3.bf16.msra.mxu1 %v6882_v27 }
 0x55a   :  { %6887 = vmatprep.subr.bf16.mxu1 %v6886_v48 }
 0x55d   :  { %6889 = vmatpush3.bf16.msra.mxu1 %v6886_v48  ;;  %v9877_v48 = vmov 106  }
 0x55e   :  { %6898 = vmatprep.subr.msk.bf16.mxu1 %vm7797_vm3, %v6896_v21 }
 0x592   :  { %v6560_v2 = vpop.f32.mrb[4].mxu1 }
 0x593   :  { %v2657_v35 = vadd.f32 %v6560_v2, %v6163_v56  ;;  %v2639_v0 = vpop.f32.mrb[5].mxu1 }
 0x594   :  { %v2656_v8 = vadd.f32 %v6163_v56, %v2639_v0 }
 0x595   :  { %v3732_v7 = vmax.f32 %v2657_v35, 0.0 }
 0x596   :  { %v3731_v3 = vmax.f32 %v2656_v8, 0.0  ;;  %v2805_v32 = vpop.f32.mrb[6].mxu1 }
 0x597   :  { %v6567_v14 = vpop.f32.mrb[7].mxu1 }
 0x598   :  { %v6903_v10 = vpack.c.bf16 %v3732_v7, %v3731_v3  ;;  %6636 = vmatprep.mubr.msk.f32.mxu1 %vm499_vm2, %v3731_v3 }
 0x599   :  { %6637 = vmatmul.mubr.msk.f32.vlgmr.msra.gmra.mrb[16].mxu1 %vm499_vm2, %v3732_v7 }
 0x59a   :  { %6901 = vmatpush3.bf16.xpose.msk.msra.mxu1 %vm7797_vm3, %v6896_v21  ;;  %v2886_v42 = vpop.f32.mrb[8].mxu1  ;;  %6654 = vmatprep.mubr.msk.f32.mxu1 %vm499_vm2, %v220_v52 }
 0x59b   :  { %v2887_v47 = vadd.f32 %v2886_v42, %v2805_v32  ;;  %v6574_v61 = vpop.f32.mrb[9].mxu1  ;;  %6664 = vmatprep.subr.mxu1 %v9844_v50 }
 0x59e   :  { %v3001_v57 = vpop.f32.mrb[10].mxu1 }
 0x59f   :  { %v3005_v31 = vadd.f32 %v3001_v57, %v2887_v47  ;;  %v6581_v11 = vpop.f32.mrb[11].mxu1  ;;  %v9878_v47 = vmov 107  }
 0x5a1   :  { %6655 = vmatmul.mubr.msk.f32.vlgmr.msra.gmra.mrb[18].mxu1 %vm499_vm2, %v221_v13 }
 0x5a2   :  { %6666 = vmatprep.mubr.msk.f32.mxu1 %vm7509_vm1, %v9844_v50 }
 0x5a6   :  { %v3117_v4 = vpop.f32.mrb[12].mxu1 }
 0x5a7   :  { %v3121_v40 = vadd.f32 %v3117_v4, %v3005_v31  ;;  %v6588_v51 = vpop.f32.mrb[13].mxu1 }
 0x5a8   :  { %v9879_v51 = vld [vmem:[#allocation29_spill] sm:$0xff] }
 0x5a9   :  { %v3128_v49 = vadd.f32 %v6168_v33, %v3121_v40 }
 0x5ab   :  { %v3733_v1 = vmax.f32 %v3128_v49, 0.0 }
 0x5ad   :  { %6648 = vmatmul.mubr.msk.f32.vlgmr.msra.gmra.mrb[16].mxu0 %vm499_vm2, %v3733_v1  ;;  %6665 = vmatpush3.xpose.msk.msra.mxu1 %vm499_vm2, %v3733_v1  ;;  %v9880_v1 = vld [vmem:[#allocation28_spill] sm:$0xff] }
 0x5ae   :  { %6905 = vmatpush3.bf16.xpose.msk.msra.mxu0 %vm7797_vm3, %v6903_v10  ;;  %6661 = vmatprep.mubr.msk.f32.mxu0 %vm7509_vm1, %v9844_v50 }
 0x5af   :  { %6946 = vmatprep.subr.bf16.mxu0 %v9842_v37 }
 0x5b0   :  { %6667 = vmatmul.mubr.msk.f32.vlgmr.msra.gmra.mrb[20].mxu1 %vm499_vm2, %v223_v23 }
 0x5b5   :  { %6662 = vmatmul.mubr.msk.f32.vlgmr.msra.gmra.mrb[18].mxu0 %vm499_vm2, %v222_v38 }
 0x5b6   :  { %6753 = vmatprep.mubr.msk.f32.mxu0 %vm7509_vm1, %v9844_v50 }
 0x62b   :  { %v8997_v41 = vpop.f32.mrb[14].mxu1 }
 0x62c   :  { %4202 = vperm.xlu0 %7156, %v8997_v41   ;;  %4256 = vperm.xlu1 %7155, %v8997_v41   ;;  %v9001_v20 = vpop.f32.mrb[15].mxu1  ;;  %v9005_v59 = vmul.f32 %v8997_v41, %v9863_v45  ;;  %v9009_v29 = vmul.f32 %v8997_v41, %v9864_v53  ;;  %v9013_v24 = vmul.f32 %v8997_v41, %v9865_v55 }
 0x62d   :  { %v9017_v27 = vmul.f32 %v9001_v20, %v9863_v45  ;;  %v9021_v17 = vmul.f32 %v9001_v20, %v9864_v53  ;;  %v9025_v62 = vmul.f32 %v9001_v20, %v9865_v55  ;;  %v9029_v60 = vmul.f32 %v9001_v20, %v9866_v12 }
 0x62e   :  { %v9033_v39 = vmul.f32 %v8997_v41, %v9866_v12 }
 0x62f   :  { %v7178_v44 = vpack.i.bf16 %v9005_v59, %v9017_v27  ;;  %v7188_v36 = vpack.i.bf16 %v9009_v29, %v9021_v17 }
 0x630   :  { %7159 = vset.pattern.permute.xlu0 %v9867_v9  ;;  %7157 = vset.pattern.permute.xlu1 %v9868_v54 }
 0x631   :  { %4819 = vperm.xlu0 %7159, %v8997_v41   ;;  %4478 = vperm.xlu1 %7157, %v8997_v41  }
 0x635   :  { %7162 = vset.pattern.permute.xlu0 %v9869_v26  ;;  %7158 = vset.pattern.permute.xlu1 %v9870_v25 }
 0x636   :  { %5170 = vperm.xlu0 %7162, %v8997_v41   ;;  %4618 = vperm.xlu1 %7158, %v8997_v41  }
 0x63a   :  { %7164 = vset.pattern.permute.xlu0 %v9871_v19  ;;  %7160 = vset.pattern.permute.xlu1 %v9872_v15 }
 0x63b   :  { %5316 = vperm.xlu0 %7164, %v8997_v41   ;;  %4766 = vperm.xlu1 %7160, %v8997_v41  }
 0x63f   :  { %7165 = vset.pattern.permute.xlu0 %v9873_v46  ;;  %7161 = vset.pattern.permute.xlu1 %v9874_v43 }
 0x640   :  { %5034 = vperm.xlu1 %7161, %v8997_v41   ;;  %4252 = vperm.xlu0 %7165, %v9001_v20  }
 0x644   :  { %7163 = vset.pattern.permute.xlu1 %v9875_v63  ;;  %7168 = vset.pattern.permute.xlu0 %v9870_v25 }
 0x645   :  { %5370 = vperm.xlu1 %7163, %v8997_v41   ;;  %4614 = vperm.xlu0 %7168, %v9001_v20  }
 0x649   :  { %7166 = vset.pattern.permute.xlu1 %v9876_v18  ;;  %7171 = vset.pattern.permute.xlu0 %v9874_v43  ;;  %v9881_v43 = vld [vmem:[#allocation44_spill] sm:$0xff] }
 0x64a   :  { %4197 = vperm.xlu1 %7166, %v9001_v20   ;;  %5030 = vperm.xlu0 %7171, %v9001_v20   ;;  %vm9882_vm7 = vcmp.gt.f32.partialorder %v9881_v43, 0.0 }
 0x64b   :  { %vm9885_vm5 = vmmov %vm9882_vm7 }
 0x64e   :  { %7167 = vset.pattern.permute.xlu1 %v9868_v54  ;;  %7176 = vset.pattern.permute.xlu0 %v9877_v48 }
 0x64f   :  { %4474 = vperm.xlu1 %7167, %v9001_v20  }
 0x653   :  { %7169 = vset.pattern.permute.xlu1 %v9867_v9 }
 0x654   :  { %4815 = vperm.xlu1 %7169, %v9001_v20  }
 0x658   :  { %7170 = vset.pattern.permute.xlu1 %v9872_v15 }
 0x659   :  { %4762 = vperm.xlu1 %7170, %v9001_v20  }
 0x65d   :  { %7172 = vset.pattern.permute.xlu1 %v9869_v26 }
 0x65e   :  { %5166 = vperm.xlu1 %7172, %v9001_v20  }
 0x662   :  { %7173 = vset.pattern.permute.xlu1 %v9875_v63 }
 0x663   :  { %5366 = vperm.xlu1 %7173, %v9001_v20  }
 0x667   :  { %7174 = vset.pattern.permute.xlu1 %v9871_v19 }
 0x668   :  { %5312 = vperm.xlu1 %7174, %v9001_v20  }
 0x66c   :  { %7175 = vset.pattern.permute.xlu1 %v9877_v48  ;;  %v6638_v21 = vpop.f32.mrb[16].mxu1  ;;  %v9884_v48 = vld [vmem:[#allocation33_spill] sm:$0xff] }
 0x66d   :  { %v4250_v58 = vmul.f32 %v6638_v21, %v7782_v34  ;;  %v4304_v56 = vmul.f32 %v6638_v21, %v9813_v22  ;;  %v4526_v2 = vmul.f32 %v6638_v21, %v7842_v5  ;;  %v4666_v35 = vmul.f32 %v6638_v21, %v7846_v6  ;;  %5598 = vperm.xlu1 %7175, %v9001_v20   ;;  %v3887_v0 = vpop.f32.mrb[17].mxu1 }
 0x66e   :  { %v4249_v8 = vmul.f32 %v3887_v0, %v7782_v34  ;;  %v4303_v7 = vmul.f32 %v3887_v0, %v9813_v22  ;;  %v4525_v3 = vmul.f32 %v3887_v0, %v7842_v5  ;;  %v4665_v32 = vmul.f32 %v3887_v0, %v7846_v6 }
 0x670   :  { %v6906_v14 = vpack.c.bf16 %v4304_v56, %v4303_v7  ;;  %v9090_v52 = vpack.c.bf16 %v4250_v58, %v4249_v8  ;;  %v9092_v10 = vpack.c.bf16 %v4526_v2, %v4525_v3  ;;  %v9094_v42 = vpack.c.bf16 %v4666_v35, %v4665_v32 }
 0x671   :  { %7177 = vset.pattern.permute.xlu1 %v9878_v47 }
 0x672   :  { %6908 = vmatprep.subr.msk.bf16.mxu1 %vm7924_vm6, %v6906_v14 }
 0x673   :  { %6911 = vmatpush3.bf16.msk.msra.mxu1 %vm7924_vm6, %v6906_v14 }
 0x674   :  { %6914 = vmatprep.subr.msk.bf16.mxu1 %vm7924_vm6, %v9090_v52  ;;  %v9104_v61 = vpop.f32.mrb[18].mxu1 }
 0x675   :  { %v4041_v57 = vpop.f32.mrb[19].mxu1  ;;  %v9140_v3 = vrot.slane %v9104_v61, %v9879_v51 }
 0x680   :  { %v9106_v13 = vpop.f32.mrb[16].mxu0 }
 0x681   :  { %v6649_v31 = vpop.f32.mrb[17].mxu0 }
 0x683   :  { %v9108_v11 = vpop.f32.mrb[20].mxu1 }
 0x684   :  { %v6668_v33 = vpop.f32.mrb[21].mxu1  ;;  %v4825_v12 = vrot.slane %v9108_v11, %v9880_v1  ;;  %v9124_v21 = vrot.slane %v9108_v11, %v9884_v48 }
 0x688   :  { %v4118_v4 = vpop.f32.mrb[18].mxu0 }
 0x689   :  { %v6663_v40 = vpop.f32.mrb[19].mxu0  ;;  %v4208_v49 = vrot.slane %v4118_v4, %v9879_v51  ;;  %v4262_v23 = vrot.slane %v4118_v4, %v9880_v1  ;;  %v4624_v56 = vrot.slane %v4118_v4, %v9884_v48 }
 0x6ab   :  { %v4203_v38 = vpop.permute.xlu0 %4202  ;;  %v4257_v45 = vpop.permute.xlu1 %4256 }
 0x6ac   :  { %v4210_v53 = vadd.f32 %v4208_v49, %v4203_v38  ;;  %v4264_v55 = vadd.f32 %v4262_v23, %v4257_v45  ;;  %v9887_v38 = vld [vmem:[#allocation47_spill] sm:$0xff] }
 0x6ad   :  { %vm9888_vm12 = vcmp.gt.f32.partialorder %v9887_v38, 0.0 }
 0x6ae   :  { %vm4212_vm3 = vcmp.gt.f32.partialorder %v4210_v53, 0.0  ;;  %v4214_v9 = vmul.f32 0.2, %v4210_v53  ;;  %vm4266_vm8 = vcmp.gt.f32.partialorder %v4264_v55, 0.0  ;;  %v4268_v54 = vmul.f32 0.2, %v4264_v55  ;;  %vm9890_vm13 = vmmov %vm9888_vm12 }
 0x6b0   :  { %v4820_v26 = vpop.permute.xlu0 %4819  ;;  %v4479_v25 = vpop.permute.xlu1 %4478  ;;  %v4270_v19 = vsel %vm4266_vm8, %v4264_v55, %v4268_v54  ;;  %v4216_v15 = vsel %vm4212_vm3, %v4210_v53, %v4214_v9  ;;  %vm9892_vm3 = vmmov %vm9889_vm9 }
 0x6b1   :  { %v9114_v46 = vadd.f32 %v4825_v12, %v4820_v26  ;;  %v9118_v63 = vsel %vm9882_vm7, %v4270_v19, -1e+30  ;;  %v9128_v58 = vsel %vm9885_vm5, %v4216_v15, -1e+30 }
 0x6b2   :  { %v4276_v18 = vsel %vm9883_vm10, %v9118_v63, -inf  ;;  %v4222_v7 = vsel %vm9886_vm14, %v9128_v58, -inf  ;;  %vm9893_vm10 = vmmov %vm9888_vm12 }
 0x6b3   :  { %4277 = vmax.xlane.f32.xlu1 %v4276_v18  ;;  %vm9894_vm14 = vmmov %vm9892_vm3 }
 0x6b5   :  { %v5171_v2 = vpop.permute.xlu0 %5170  ;;  %v4619_v35 = vpop.permute.xlu1 %4618 }
 0x6b6   :  { %v9132_v0 = vadd.f32 %v9124_v21, %v5171_v2  ;;  %v9134_v8 = vadd.f32 %v4624_v56, %v4619_v35  ;;  %v9891_v35 = vld [vmem:[#allocation32_spill] sm:$0xff] }
 0x6b7   :  { %4223 = vmax.xlane.f32.xlu1 %v4222_v7 }
 0x6ba   :  { %v5317_v32 = vpop.permute.xlu0 %5316  ;;  %v4767_v55 = vpop.permute.xlu1 %4766 }
 0x6bb   :  { %v9143_v14 = vadd.f32 %v9140_v3, %v5317_v32 }
 0x6bf   :  { %v4253_v57 = vpop.permute.xlu0 %4252  ;;  %v9152_v9 = vpop.permute.xlu1 %5034 }
 0x6c0   :  { %v4263_v31 = vadd.f32 %v4262_v23, %v4253_v57 }
 0x6c2   :  { %vm4265_vm15 = vcmp.gt.f32.partialorder %v4263_v31, 0.0  ;;  %v4267_v33 = vmul.f32 0.2, %v4263_v31 }
 0x6c4   :  { %v4269_v40 = vsel %vm4265_vm15, %v4263_v31, %v4267_v33  ;;  %v9154_v54 = vpop.permute.xlu1 %5370  ;;  %v4615_v31 = vpop.permute.xlu0 %4614  ;;  %vm9895_vm15 = vcmp.gt.f32.partialorder %v9881_v43, 0.0 }
 0x6c5   :  { %v9147_v45 = vsel %vm9888_vm12, %v4269_v40, -1e+30 }
 0x6c6   :  { %v4273_v53 = vsel %vm9889_vm9, %v9147_v45, -inf  ;;  %vm9896_vm9 = vmmov %vm9892_vm3 }
 0x6c7   :  { %4274 = vmax.xlane.f32.xlu0 %v4273_v53 }
 0x6c8   :  { %5743 = vperm.xlu1 %7177, %v9001_v20   ;;  %v4484_v20 = vrot.slane %v4118_v4, %v9891_v35 }
 0x6c9   :  { %v4198_v26 = vpop.permute.xlu1 %4197 }
 0x6ca   :  { %v4209_v23 = vadd.f32 %v4208_v49, %v4198_v26  ;;  %v4486_v49 = vadd.f32 %v4484_v20, %v4479_v25 }
 0x6cc   :  { %v4213_v19 = vmul.f32 0.2, %v4209_v23  ;;  %vm4211_vm11 = vcmp.gt.f32.partialorder %v4209_v23, 0.0  ;;  %v4490_v33 = vmul.f32 0.2, %v4486_v49  ;;  %vm4488_vm7 = vcmp.gt.f32.partialorder %v4486_v49, 0.0 }
 0x6ce   :  { %v4215_v15 = vsel %vm4211_vm11, %v4209_v23, %v4213_v19  ;;  %v4475_v2 = vpop.permute.xlu1 %4474  ;;  %v4492_v19 = vsel %vm4488_vm7, %v4486_v49, %v4490_v33  ;;  %vm9897_vm11 = vmmov %vm9893_vm10  ;;  %v4831_v49 = vmul.f32 0.2, %v9114_v46  ;;  %v9898_v33 = vld [vmem:[#allocation48_spill] sm:$0xff] }
 0x6cf   :  { %v9160_v18 = vsel %vm9890_vm13, %v4215_v15, -1e+30  ;;  %v4485_v32 = vadd.f32 %v4484_v20, %v4475_v2  ;;  %v9173_v25 = vsel %vm9895_vm15, %v4492_v19, -1e+30  ;;  %vm4829_vm13 = vcmp.gt.f32.partialorder %v9114_v46, 0.0  ;;  %v9900_v19 = vld [vmem:[#allocation45_spill] sm:$0xff] }
 0x6d0   :  { %v4219_v7 = vsel %vm9892_vm3, %v9160_v18, -inf  ;;  %v4833_v38 = vsel %vm4829_vm13, %v9114_v46, %v4831_v49 }
 0x6d1   :  { %v4489_v57 = vmul.f32 0.2, %v4485_v32  ;;  %vm4487_vm8 = vcmp.gt.f32.partialorder %v4485_v32, 0.0 }
 0x6d3   :  { %v4491_v40 = vsel %vm4487_vm8, %v4485_v32, %v4489_v57  ;;  %v4816_v53 = vpop.permute.xlu1 %4815  ;;  %vm9899_vm8 = vcmp.gt.f32.partialorder %v9898_v33, 0.0 }
 0x6d4   :  { %v9167_v26 = vsel %vm9893_vm10, %v4491_v40, -1e+30  ;;  %v4826_v4 = vadd.f32 %v4825_v12, %v4816_v53  ;;  %v4498_v12 = vsel %vm9896_vm9, %v9173_v25, -inf  ;;  %v5031_v53 = vpop.permute.xlu0 %5030  ;;  %vm9901_vm10 = vcmp.gt.f32.partialorder %v9900_v19, 0.0 }
 0x6d5   :  { %v4495_v15 = vsel %vm9894_vm14, %v9167_v26, -inf  ;;  %vm9902_vm14 = vmmov %vm9899_vm8 }
 0x6d6   :  { %vm4828_vm12 = vcmp.gt.f32.partialorder %v4826_v4, 0.0 }
 0x6d8   :  { %v4763_v20 = vpop.permute.xlu1 %4762 }
 0x6dd   :  { %5602 = vperm.xlu0 %7176, %v8997_v41  }
 0x6e1   :  { %7198 = vset.pattern.permute.xlu0 %v9878_v47  ;;  %v4625_v47 = vadd.f32 %v4624_v56, %v4615_v31  ;;  %v4830_v56 = vmul.f32 0.2, %v4826_v4 }
 0x6e3   :  { %v4629_v23 = vmul.f32 0.2, %v4625_v47  ;;  %vm4627_vm5 = vcmp.gt.f32.partialorder %v4625_v47, 0.0  ;;  %v4832_v31 = vsel %vm4828_vm12, %v4826_v4, %v4830_v56  ;;  %vm9903_vm12 = vmmov %vm9901_vm10 }
 0x6e5   :  { %v4631_v2 = vsel %vm4627_vm5, %v4625_v47, %v4629_v23  ;;  %v5040_v23 = vrot.slane %v9108_v11, %v9891_v35 }
 0x6e6   :  { %v9182_v32 = vsel %vm9897_vm11, %v4631_v2, -1e+30  ;;  %vm9904_vm11 = vmmov %vm9899_vm8 }
 0x6e7   :  { %v5041_v2 = vadd.f32 %v5040_v23, %v5031_v53  ;;  %v5376_v53 = vrot.slane %v9104_v61, %v9880_v1 }
 0x6e9   :  { %vm5043_vm15 = vcmp.gt.f32.partialorder %v5041_v2, 0.0 }
 0x6ec   :  { %4220 = vmax.xlane.f32.xlu1 %v4219_v7  ;;  %v4772_v7 = vrot.slane %v9108_v11, %v9879_v51  ;;  %v9190_v51 = vsel %vm9899_vm8, %v4832_v31, -1e+30  ;;  %vm9905_vm8 = vmmov %vm9901_vm10 }
 0x6ed   :  { %v4836_v4 = vsel %vm1572_vm4, %v9190_v51, -inf }
 0x6ee   :  { %v4773_v57 = vadd.f32 %v4772_v7, %v4763_v20  ;;  %v4774_v47 = vadd.f32 %v4772_v7, %v4767_v55  ;;  %v5167_v55 = vpop.permute.xlu1 %5166  ;;  %v5042_v7 = vadd.f32 %v5040_v23, %v9152_v9 }
 0x6f0   :  { %v4777_v40 = vmul.f32 0.2, %v4773_v57  ;;  %vm4775_vm7 = vcmp.gt.f32.partialorder %v4773_v57, 0.0  ;;  %v4778_v56 = vmul.f32 0.2, %v4774_v47  ;;  %vm4776_vm5 = vcmp.gt.f32.partialorder %v4774_v47, 0.0 }
 0x6f1   :  { %vm5044_vm9 = vcmp.gt.f32.partialorder %v5042_v7, 0.0 }
 0x6f2   :  { %v4779_v20 = vsel %vm4775_vm7, %v4773_v57, %v4777_v40  ;;  %v4780_v49 = vsel %vm4776_vm5, %v4774_v47, %v4778_v56  ;;  %v5177_v40 = vadd.f32 %v9124_v21, %v5167_v55  ;;  %v5367_v9 = vpop.permute.xlu1 %5366  ;;  %v5378_v21 = vadd.f32 %v5376_v53, %v9154_v54  ;;  %vm9906_vm5 = vmmov %vm9904_vm11 }
 0x6f3   :  { %v9205_v11 = vsel %vm9902_vm14, %v4779_v20, -1e+30  ;;  %v9212_v57 = vsel %vm9903_vm12, %v4780_v49, -1e+30  ;;  %v4630_v20 = vmul.f32 0.2, %v9134_v8 }
 0x6f4   :  { %v4783_v31 = vsel %vm1572_vm4, %v9205_v11, -inf  ;;  %v4786_v47 = vsel %vm1572_vm4, %v9212_v57, -inf  ;;  %vm5179_vm13 = vcmp.gt.f32.partialorder %v5177_v40, 0.0  ;;  %v5182_v55 = vmul.f32 0.2, %v9132_v0 }
 0x6f5   :  { %vm5180_vm7 = vcmp.gt.f32.partialorder %v9132_v0, 0.0  ;;  %v5382_v49 = vmul.f32 0.2, %v5378_v21  ;;  %vm9907_vm14 = vcmp.gt.f32.partialorder %v9881_v43, 0.0  ;;  %vm5326_vm12 = vcmp.gt.f32.partialorder %v9143_v14, 0.0 }
 0x6fc   :  { %4496 = vmax.xlane.f32.xlu0 %v4495_v15  ;;  %v9199_v15 = vsel %vm9901_vm10, %v4833_v38, -1e+30  ;;  %vm5380_vm10 = vcmp.gt.f32.partialorder %v5378_v21, 0.0 }
 0x6fd   :  { %5747 = vperm.xlu1 %7177, %v8997_v41   ;;  %v4635_v41 = vsel %vm9892_vm3, %v9182_v32, -inf  ;;  %v4839_v46 = vsel %vm1572_vm4, %v9199_v15, -inf  ;;  %vm4628_vm3 = vcmp.gt.f32.partialorder %v9134_v8, 0.0 }
 0x6fe   :  { %v4632_v54 = vsel %vm4628_vm3, %v9134_v8, %v4630_v20  ;;  %v5184_v8 = vsel %vm5180_vm7, %v9132_v0, %v5182_v55  ;;  %v9910_v20 = vld [vmem:[#allocation46_spill] sm:$0xff] }
 0x700   :  { %4499 = vmax.xlane.f32.xlu0 %v4498_v12  ;;  %v5045_v12 = vmul.f32 0.2, %v5041_v2 }
 0x702   :  { %v5047_v38 = vsel %vm5043_vm15, %v5041_v2, %v5045_v12  ;;  %v5313_v2 = vpop.permute.xlu1 %5312  ;;  %v5377_v12 = vadd.f32 %v5376_v53, %v5367_v9  ;;  %v9246_v53 = vsel %vm9907_vm14, %v4632_v54, -1e+30  ;;  %v5328_v9 = vmul.f32 0.2, %v9143_v14 }
 0x703   :  { %v9221_v23 = vsel %vm9904_vm11, %v5047_v38, -1e+30  ;;  %vm9909_vm11 = vmmov %vm9905_vm8 }
 0x704   :  { %4636 = vmax.xlane.f32.xlu0 %v4635_v41  ;;  %v5046_v41 = vmul.f32 0.2, %v5042_v7  ;;  %v5051_v1 = vsel %vm1572_vm4, %v9221_v23, -inf  ;;  %vm5379_vm15 = vcmp.gt.f32.partialorder %v5377_v12, 0.0  ;;  %v9257_v43 = vsel %vm9909_vm11, %v5184_v8, -1e+30 }
 0x705   :  { %v5190_v55 = vsel %vm1572_vm4, %v9257_v43, -inf }
 0x706   :  { %v5048_v56 = vsel %vm5044_vm9, %v5042_v7, %v5046_v41  ;;  %v5608_v41 = vrot.slane %v9104_v61, %v9891_v35  ;;  %vm9908_vm9 = vcmask 97280  }
 0x708   :  { %4837 = vmax.xlane.f32.xlu0 %v4836_v4  ;;  %v5181_v4 = vmul.f32 0.2, %v5177_v40 }
 0x70a   :  { %v5183_v7 = vsel %vm5179_vm13, %v5177_v40, %v5181_v4  ;;  %v5323_v40 = vadd.f32 %v9140_v3, %v5313_v2  ;;  %v5599_v4 = vpop.permute.xlu1 %5598  ;;  %v4638_v3 = vsel %vm9908_vm9, %v9246_v53, -inf  ;;  %vm9911_vm13 = vcmp.gt.f32.partialorder %v9910_v20, 0.0 }
 0x70b   :  { %v9241_v38 = vsel %vm9906_vm5, %v5183_v7, -1e+30  ;;  %v5609_v0 = vadd.f32 %v5608_v41, %v5599_v4  ;;  %v5330_v2 = vsel %vm5326_vm12, %v9143_v14, %v5328_v9  ;;  %v9912_v7 = vld [vmem:[#allocation49_spill] sm:$0xff]  ;;  %vm9914_vm7 = vmmov %vm9911_vm13 }
 0x70c   :  { %4840 = vmax.xlane.f32.xlu0 %v4839_v46  ;;  %v9230_v46 = vsel %vm9905_vm8, %v5048_v56, -1e+30  ;;  %v5384_v56 = vsel %vm5380_vm10, %v5378_v21, %v5382_v49  ;;  %v5187_v35 = vsel %vm1572_vm4, %v9241_v38, -inf  ;;  %v5327_v33 = vmul.f32 0.2, %v5323_v40  ;;  %vm9918_vm11 = vmmov %vm9914_vm7 }
 0x70d   :  { %vm5325_vm3 = vcmp.gt.f32.partialorder %v5323_v40, 0.0  ;;  %vm9913_vm8 = vcmp.gt.f32.partialorder %v9912_v7, 0.0  ;;  %v5613_v54 = vmul.f32 0.2, %v5609_v0  ;;  %vm5611_vm10 = vcmp.gt.f32.partialorder %v5609_v0, 0.0 }
 0x70e   :  { %vm9915_vm5 = vmmov %vm9913_vm8 }
 0x70f   :  { %v5615_v9 = vsel %vm5611_vm10, %v5609_v0, %v5613_v54  ;;  %vm9916_vm14 = vmmov %vm9915_vm5 }
 0x710   :  { %4784 = vmax.xlane.f32.xlu0 %v4783_v31  ;;  %v5054_v31 = vsel %vm1572_vm4, %v9230_v46, -inf  ;;  %vm9917_vm12 = vmmov %vm9915_vm5 }
 0x714   :  { %4787 = vmax.xlane.f32.xlu0 %v4786_v47  ;;  %v5381_v47 = vmul.f32 0.2, %v5377_v12 }
 0x716   :  { %v5383_v21 = vsel %vm5379_vm15, %v5377_v12, %v5381_v47  ;;  %v5329_v12 = vsel %vm5325_vm3, %v5323_v40, %v5327_v33  ;;  %v9288_v40 = vsel %vm9916_vm14, %v5615_v9, -1e+30  ;;  %v5753_v33 = vrot.slane %v9104_v61, %v9884_v48 }
 0x717   :  { %v9270_v49 = vsel %vm9913_vm8, %v5383_v21, -1e+30  ;;  %v9282_v8 = vsel %vm9915_vm5, %v5329_v12, -1e+30  ;;  %vm9920_vm8 = vmmov %vm9914_vm7 }
 0x718   :  { %5052 = vmax.xlane.f32.xlu0 %v5051_v1  ;;  %v9261_v1 = vsel %vm9911_vm13, %v5384_v56, -1e+30  ;;  %v5387_v14 = vsel %vm251_vm0, %v9270_v49, -inf  ;;  %v5333_v4 = vsel %vm251_vm0, %v9282_v8, -inf  ;;  %v5619_v56 = vsel %vm251_vm0, %v9288_v40, -inf }
 0x719   :  { %v5390_v19 = vsel %vm251_vm0, %v9261_v1, -inf  ;;  %vm9919_vm13 = vcmask 97280  }
 0x71c   :  { %5055 = vmax.xlane.f32.xlu0 %v5054_v31  ;;  %v9274_v31 = vsel %vm9914_vm7, %v5330_v2, -1e+30  ;;  %vm9921_vm7 = vmmov %vm9919_vm13 }
 0x71d   :  { %v5336_v47 = vsel %vm251_vm0, %v9274_v31, -inf  ;;  %vm9922_vm10 = vmmov %vm9921_vm7 }
 0x71e   :  { %vm9923_vm5 = vmmov %vm9921_vm7 }
 0x71f   :  { %vm9924_vm14 = vmmov %vm9923_vm5 }
 0x720   :  { %5188 = vmax.xlane.f32.xlu0 %v5187_v35 }
 0x721   :  { %4639 = vmax.xlane.f32.xlu1 %v4638_v3 }
 0x724   :  { %5191 = vmax.xlane.f32.xlu0 %v5190_v55 }
 0x725   :  { %5391 = vmax.xlane.f32.xlu1 %v5390_v19 }
 0x728   :  { %5388 = vmax.xlane.f32.xlu0 %v5387_v14 }
 0x729   :  { %5337 = vmax.xlane.f32.xlu1 %v5336_v47 }
 0x72c   :  { %5334 = vmax.xlane.f32.xlu0 %v5333_v4 }
 0x730   :  { %5620 = vmax.xlane.f32.xlu0 %v5619_v56 }
 0x740   :  { %v4278_v35 = vpop.xlane.xlu1 %4277 }
 0x744   :  { %v4224_v3 = vpop.xlane.xlu1 %4223 }
 0x748   :  { %v5744_v21 = vpop.permute.xlu1 %5743 }
 0x749   :  { %v5754_v2 = vadd.f32 %v5753_v33, %v5744_v21 }
 0x74b   :  { %vm5756_vm15 = vcmp.gt.f32.partialorder %v5754_v2, 0.0  ;;  %v5758_v0 = vmul.f32 0.2, %v5754_v2 }
 0x74d   :  { %v5760_v55 = vsel %vm5756_vm15, %v5754_v2, %v5758_v0  ;;  %v9308_v2 = vld [vmem:[%s9791_s13] sm:$0xff]  ;;  %v4280_v0 = vsub.f32 %v9118_v63, %v4278_v35  ;;  %v9325_v35 = vld [vmem:[%s9791_s13 + $0x8] sm:$0xff]  ;;  %vm9925_vm15 = vmmov %vm9923_vm5 }
 0x74e   :  { %v9296_v19 = vsel %vm9917_vm12, %v5760_v55, -1e+30  ;;  %vm9926_vm12 = vmmov %vm9923_vm5 }
 0x74f   :  { %v5764_v54 = vsel %vm251_vm0, %v9296_v19, -inf  ;;  %v4283_v55 = vmul.f32 1.442695, %v4280_v0 }
 0x750   :  { %5765 = vmax.xlane.f32.xlu0 %v5764_v54  ;;  %v4226_v54 = vsub.f32 %v9128_v58, %v4224_v3 }
 0x754   :  { %v4275_v12 = vpop.xlane.xlu0 %4274 }
 0x755   :  { %v4279_v14 = vsub.f32 %v9147_v45, %v4275_v12  ;;  %v4229_v12 = vmul.f32 1.442695, %v4226_v54 }
 0x757   :  { %v4281_v47 = vmul.f32 1.442695, %v4279_v14 }
 0x759   :  { %7343 = vpow2.f32 %v4281_v47 }
 0x75a   :  { %7345 = vpow2.f32 %v4283_v55 }
 0x75b   :  { %7347 = vpow2.f32 %v4229_v12 }
 0x75c   :  { %v5603_v61 = vpop.permute.xlu0 %5602 }
 0x75d   :  { %v5610_v48 = vadd.f32 %v5608_v41, %v5603_v61 }
 0x75f   :  { %vm5612_vm9 = vcmp.gt.f32.partialorder %v5610_v48, 0.0  ;;  %v5614_v9 = vmul.f32 0.2, %v5610_v48 }
 0x761   :  { %v5616_v4 = vsel %vm5612_vm9, %v5610_v48, %v5614_v9  ;;  %vm9927_vm9 = vmmov %vm9923_vm5 }
 0x762   :  { %v9303_v7 = vsel %vm9918_vm11, %v5616_v4, -1e+30 }
 0x763   :  { %v7344_v56 = vpop.eup %7343  ;;  %v5622_v21 = vsel %vm251_vm0, %v9303_v7, -inf }
 0x764   :  { %5623 = vmax.xlane.f32.xlu1 %v5622_v21  ;;  %v9311_v45 = vmul.f32 %v9308_v2, %v7344_v56  ;;  %v7346_v56 = vpop.eup %7345 }
 0x765   :  { %v7348_v3 = vpop.eup %7347 }
 0x766   :  { %v4287_v41 = vsel %vm9919_vm13, %v9311_v45, 0.0  ;;  %v9333_v0 = vmul.f32 %v9325_v35, %v7348_v3  ;;  %vm9928_vm13 = vmmov %vm9923_vm5 }
 0x767   :  { %4288 = vadd.xlane.f32.xlu0 %v4287_v41 }
 0x779   :  { %v4221_v14 = vpop.xlane.xlu1 %4220 }
 0x77a   :  { %v4225_v47 = vsub.f32 %v9160_v18, %v4221_v14  ;;  %v9328_v18 = vmul.f32 %v9325_v35, %v7346_v56 }
 0x77c   :  { %v4227_v61 = vmul.f32 1.442695, %v4225_v47  ;;  %v4236_v47 = vsel %vm9923_vm5, %v9333_v0, 0.0 }
 0x77d   :  { %v5748_v48 = vpop.permute.xlu1 %5747 }
 0x77e   :  { %7349 = vpow2.f32 %v4227_v61  ;;  %v5755_v9 = vadd.f32 %v5753_v33, %v5748_v48  ;;  %v4290_v33 = vsel %vm9921_vm7, %v9328_v18, 0.0 }
 0x780   :  { %vm5757_vm3 = vcmp.gt.f32.partialorder %v5755_v9, 0.0  ;;  %v5759_v4 = vmul.f32 0.2, %v5755_v9 }
 0x782   :  { %v5761_v21 = vsel %vm5757_vm3, %v5755_v9, %v5759_v4 }
 0x783   :  { %v9320_v63 = vsel %vm9920_vm8, %v5761_v21, -1e+30 }
 0x784   :  { %v5767_v58 = vsel %vm251_vm0, %v9320_v63, -inf }
 0x785   :  { %5768 = vmax.xlane.f32.xlu1 %v5767_v58 }
 0x788   :  { %v7350_v41 = vpop.eup %7349 }
 0x789   :  { %v4497_v20 = vpop.xlane.xlu0 %4496  ;;  %4291 = vadd.xlane.f32.xlu1 %v4290_v33  ;;  %v9336_v55 = vmul.f32 %v9308_v2, %v7350_v41 }
 0x78a   :  { %v4501_v54 = vsub.f32 %v9167_v26, %v4497_v20 }
 0x78b   :  { %v4233_v12 = vsel %vm9922_vm10, %v9336_v55, 0.0  ;;  %vm9930_vm10 = vmmov %vm9923_vm5 }
 0x78c   :  { %v4503_v14 = vmul.f32 1.442695, %v4501_v54  ;;  %4234 = vadd.xlane.f32.xlu0 %v4233_v12 }
 0x78d   :  { %v4500_v61 = vpop.xlane.xlu0 %4499  ;;  %4237 = vadd.xlane.f32.xlu1 %v4236_v47 }
 0x78e   :  { %7351 = vpow2.f32 %v4503_v14  ;;  %v4502_v48 = vsub.f32 %v9173_v25, %v4500_v61 }
 0x790   :  { %v4505_v9 = vmul.f32 1.442695, %v4502_v48 }
 0x791   :  { %v4637_v4 = vpop.xlane.xlu0 %4636 }
 0x792   :  { %7353 = vpow2.f32 %v4505_v9  ;;  %v4641_v56 = vsub.f32 %v9182_v32, %v4637_v4 }
 0x794   :  { %v4643_v21 = vmul.f32 1.442695, %v4641_v56 }
 0x795   :  { %v4838_v26 = vpop.xlane.xlu0 %4837 }
 0x796   :  { %7355 = vpow2.f32 %v4643_v21  ;;  %v4842_v58 = vsub.f32 %v9190_v51, %v4838_v26  ;;  %v9365_v26 = vld [vmem:[%s9793_s17] sm:$0xff] }
 0x798   :  { %v7352_v3 = vpop.eup %7351  ;;  %v4844_v41 = vmul.f32 1.442695, %v4842_v58 }
 0x799   :  { %v4841_v33 = vpop.xlane.xlu0 %4840  ;;  %v9347_v20 = vmul.f32 %v9308_v2, %v7352_v3 }
 0x79a   :  { %7357 = vpow2.f32 %v4844_v41 }
 0x79b   :  { %v4509_v25 = vsel %vm9924_vm14, %v9347_v20, 0.0  ;;  %vm9931_vm14 = vmmov %vm9927_vm9 }
 0x79c   :  { %v7354_v54 = vpop.eup %7353  ;;  %4510 = vadd.xlane.f32.xlu0 %v4509_v25 }
 0x79d   :  { %v4785_v12 = vpop.xlane.xlu0 %4784  ;;  %v9352_v32 = vmul.f32 %v9325_v35, %v7354_v54 }
 0x79e   :  { %v4789_v14 = vsub.f32 %v9205_v11, %v4785_v12 }
 0x79f   :  { %v4512_v51 = vsel %vm9925_vm15, %v9352_v32, 0.0 }
 0x7a0   :  { %v7356_v47 = vpop.eup %7355  ;;  %v4791_v61 = vmul.f32 1.442695, %v4789_v14  ;;  %4513 = vadd.xlane.f32.xlu1 %v4512_v51 }
 0x7a1   :  { %v4788_v48 = vpop.xlane.xlu0 %4787  ;;  %v9358_v9 = vmul.f32 %v9308_v2, %v7356_v47  ;;  %v4843_v2 = vsub.f32 %v9199_v15, %v4841_v33 }
 0x7a2   :  { %7359 = vpow2.f32 %v4791_v61  ;;  %v4790_v51 = vsub.f32 %v9212_v57, %v4788_v48 }
 0x7a3   :  { %v4649_v4 = vsel %vm9926_vm12, %v9358_v9, 0.0  ;;  %v4846_v54 = vmul.f32 1.442695, %v4843_v2  ;;  %vm9932_vm12 = vmmov %vm9927_vm9 }
 0x7a4   :  { %v7358_v56 = vpop.eup %7357  ;;  %4650 = vadd.xlane.f32.xlu0 %v4649_v4 }
 0x7a5   :  { %v9362_v21 = vpop.xlane.xlu0 %5052  ;;  %v9368_v11 = vmul.f32 %v9365_v26, %v7358_v56  ;;  %7361 = vpow2.f32 %v4846_v54  ;;  %v4793_v56 = vmul.f32 1.442695, %v4790_v51 }
 0x7a7   :  { %v4850_v58 = vsel %vm1572_vm4, %v9368_v11, 0.0 }
 0x7a8   :  { %4851 = vadd.xlane.f32.xlu0 %v4850_v58 }
 0x7a9   :  { %v5056_v3 = vpop.xlane.xlu0 %5055 }
 0x7aa   :  { %v5058_v15 = vsub.f32 %v9230_v46, %v5056_v3 }
 0x7ac   :  { %v7360_v41 = vpop.eup %7359  ;;  %v5061_v2 = vmul.f32 1.442695, %v5058_v15 }
 0x7ad   :  { %v9374_v25 = vmul.f32 %v9365_v26, %v7360_v41  ;;  %v9376_v12 = vpop.xlane.xlu0 %5188 }
 0x7ae   :  { %v4640_v14 = vpop.xlane.xlu1 %4639 }
 0x7af   :  { %v4642_v47 = vsub.f32 %v9246_v53, %v4640_v14  ;;  %v4797_v61 = vsel %vm1572_vm4, %v9374_v25, 0.0  ;;  %v7362_v48 = vpop.eup %7361 }
 0x7b0   :  { %4798 = vadd.xlane.f32.xlu0 %v4797_v61 }
 0x7b1   :  { %v4645_v4 = vmul.f32 1.442695, %v4642_v47  ;;  %v5192_v33 = vpop.xlane.xlu0 %5191  ;;  %v7442_v47 = vld [vmem:[%s9793_s17 + $0x8] sm:$0xff] }
 0x7b2   :  { %v5392_v58 = vpop.xlane.xlu1 %5391  ;;  %v5194_v41 = vsub.f32 %v9257_v43, %v5192_v33 }
 0x7b3   :  { %7363 = vpow2.f32 %v4645_v4  ;;  %v5394_v53 = vsub.f32 %v9261_v1, %v5392_v58  ;;  %v9392_v4 = vmul.f32 %v7442_v47, %v7362_v48  ;;  %v7443_v48 = vld [vmem:[%s9795_s21 + $0x8] sm:$0xff] }
 0x7b4   :  { %7365 = vpow2.f32 %v4793_v56  ;;  %v5197_v57 = vmul.f32 1.442695, %v5194_v41 }
 0x7b5   :  { %7367 = vpow2.f32 %v5061_v2  ;;  %v5397_v46 = vmul.f32 1.442695, %v5394_v53  ;;  %v4853_v56 = vsel %vm1572_vm4, %v9392_v4, 0.0 }
 0x7b6   :  { %v5338_v14 = vpop.xlane.xlu1 %5337  ;;  %7369 = vpow2.f32 %v5197_v57 }
 0x7b7   :  { %v5340_v3 = vsub.f32 %v9274_v31, %v5338_v14  ;;  %7371 = vpow2.f32 %v5397_v46 }
 0x7b9   :  { %v5343_v1 = vmul.f32 1.442695, %v5340_v3 }
 0x7bb   :  { %7373 = vpow2.f32 %v5343_v1 }
 0x7bd   :  { %v7364_v61 = vpop.eup %7363 }
 0x7be   :  { %v9386_v54 = vmul.f32 %v9325_v35, %v7364_v61  ;;  %v7366_v43 = vpop.eup %7365 }
 0x7bf   :  { %v9396_v35 = vmul.f32 %v7442_v47, %v7366_v43  ;;  %v7368_v15 = vpop.eup %7367 }
 0x7c0   :  { %v4652_v51 = vsel %vm9927_vm9, %v9386_v54, 0.0  ;;  %v9400_v33 = vmul.f32 %v7442_v47, %v7368_v15  ;;  %v7370_v58 = vpop.eup %7369 }
 0x7c1   :  { %4653 = vadd.xlane.f32.xlu1 %v4652_v51  ;;  %v4800_v31 = vsel %vm1572_vm4, %v9396_v35, 0.0  ;;  %v9404_v41 = vmul.f32 %v7442_v47, %v7370_v58  ;;  %v7372_v57 = vpop.eup %7371  ;;  %v5389_v47 = vpop.xlane.xlu0 %5388 }
 0x7c2   :  { %v5068_v2 = vsel %vm1572_vm4, %v9400_v33, 0.0  ;;  %v9409_v14 = vmul.f32 %v7443_v48, %v7372_v57 }
 0x7c3   :  { %v5204_v53 = vsel %vm1572_vm4, %v9404_v41, 0.0 }
 0x7c4   :  { %v5404_v46 = vsel %vm251_vm0, %v9409_v14, 0.0 }
 0x7c5   :  { %4854 = vadd.xlane.f32.xlu1 %v4853_v56  ;;  %v7374_v61 = vpop.eup %7373  ;;  %v5335_v43 = vpop.xlane.xlu0 %5334 }
 0x7c6   :  { %v9413_v3 = vmul.f32 %v7443_v48, %v7374_v61 }
 0x7c8   :  { %v5350_v51 = vsel %vm251_vm0, %v9413_v3, 0.0 }
 0x7c9   :  { %4801 = vadd.xlane.f32.xlu1 %v4800_v31  ;;  %v5621_v1 = vpop.xlane.xlu0 %5620 }
 0x7ca   :  { %v5625_v17 = vsub.f32 %v9288_v40, %v5621_v1 }
 0x7cd   :  { %5069 = vadd.xlane.f32.xlu1 %v5068_v2 }
 0x7d1   :  { %5205 = vadd.xlane.f32.xlu1 %v5204_v53 }
 0x7d5   :  { %5405 = vadd.xlane.f32.xlu1 %v5404_v46 }
 0x7d9   :  { %5351 = vadd.xlane.f32.xlu1 %v5350_v51 }
 0x7dd   :  { %v9417_v56 = vpop.xlane.xlu0 %5765 }
 0x7f1   :  { %v5624_v15 = vpop.xlane.xlu1 %5623 }
 0x7f2   :  { %v5626_v31 = vsub.f32 %v9303_v7, %v5624_v15  ;;  %v5057_v7 = vsub.f32 %v9221_v23, %v9362_v21  ;;  %v9929_v21 = vpack.i.bf16 %v9013_v24, %v9025_v62 }
 0x7f4   :  { %v5629_v58 = vmul.f32 1.442695, %v5626_v31  ;;  %v4289_v2 = vpop.xlane.xlu0 %4288  ;;  %v5059_v15 = vmul.f32 1.442695, %v5057_v7  ;;  %v5193_v31 = vsub.f32 %v9241_v38, %v9376_v12 }
 0x7f5   :  { %vm4293_vm11 = vcmp.gt.f32.partialorder %v4289_v2, 0.0 }
 0x7f6   :  { %7375 = vpow2.f32 %v5629_v58  ;;  %v4295_v57 = vsel %vm4293_vm11, %v4289_v2, 1.0 }
 0x7f7   :  { %7377 = vrcp.f32 %v4295_v57 }
 0x7f8   :  { %7379 = vpow2.f32 %v5059_v15 }
 0x800   :  { %v7376_v53 = vpop.eup %7375 }
 0x801   :  { %v7378_v61 = vpop.eup %7377  ;;  %v9420_v46 = vmul.f32 %v7443_v48, %v7376_v53  ;;  %v5770_v53 = vsub.f32 %v9296_v19, %v9417_v56 }
 0x802   :  { %v4299_v30 = vsel %vm4293_vm11, %v7378_v61, 0.0  ;;  %vm9933_vm11 = vmmov %vm9930_vm10 }
 0x803   :  { %v4301_v51 = vmul.f32 %v4299_v30, %v9311_v45  ;;  %v5636_v28 = vsel %vm251_vm0, %v9420_v46, 0.0  ;;  %v5393_v45 = vsub.f32 %v9270_v49, %v5389_v47  ;;  %v5772_v7 = vmul.f32 1.442695, %v5770_v53 }
 0x804   :  { %5637 = vadd.xlane.f32.xlu1 %v5636_v28  ;;  %v5195_v28 = vmul.f32 1.442695, %v5193_v31 }
 0x805   :  { %6673 = vmatprep.mubr.msk.f32.mxu1 %vm9928_vm13, %v4301_v51  ;;  %v5395_v27 = vmul.f32 1.442695, %v5393_v45  ;;  %vm9934_vm13 = vmmov %vm9930_vm10 }
 0x812   :  { %v5769_v58 = vpop.xlane.xlu1 %5768 }
 0x813   :  { %v5771_v2 = vsub.f32 %v9320_v63, %v5769_v58 }
 0x815   :  { %v5774_v57 = vmul.f32 1.442695, %v5771_v2  ;;  %7179 = vrot.lane.b32.xlu1 %v7178_v44, %s7513_s0  ;;  %v5339_v44 = vsub.f32 %v9282_v8, %v5335_v43  ;;  %v5627_v43 = vmul.f32 1.442695, %v5625_v17 }
 0x816   :  { %v4292_v30 = vpop.xlane.xlu1 %4291 }
 0x817   :  { %7381 = vpow2.f32 %v5774_v57  ;;  %vm4294_vm3 = vcmp.gt.f32.partialorder %v4292_v30, 0.0  ;;  %v5341_v29 = vmul.f32 1.442695, %v5339_v44 }
 0x818   :  { %v4296_v23 = vsel %vm4294_vm3, %v4292_v30, 1.0 }
 0x819   :  { %7383 = vrcp.f32 %v4296_v23  ;;  %7189 = vrot.lane.b32.xlu1 %v7188_v36, %s7513_s0  ;;  %v4235_v38 = vpop.xlane.xlu0 %4234  ;;  %v7380_v36 = vpop.eup %7379 }
 0x81a   :  { %7385 = vpow2.f32 %v5195_v28  ;;  %vm4239_vm8 = vcmp.gt.f32.partialorder %v4235_v38, 0.0  ;;  %v4238_v59 = vpop.xlane.xlu1 %4237  ;;  %v9457_v62 = vmul.f32 %v9365_v26, %v7380_v36 }
 0x81b   :  { %v4241_v63 = vsel %vm4239_vm8, %v4235_v38, 1.0  ;;  %vm4240_vm7 = vcmp.gt.f32.partialorder %v4238_v59, 0.0 }
 0x81c   :  { %7387 = vrcp.f32 %v4241_v63  ;;  %v4242_v49 = vsel %vm4240_vm7, %v4238_v59, 1.0  ;;  %v5065_v56 = vsel %vm1572_vm4, %v9457_v62, 0.0 }
 0x81d   :  { %7389 = vrcp.f32 %v4242_v49  ;;  %7194 = vrot.lane.b32.xlu1 %v9929_v21, %s7513_s0 }
 0x81e   :  { %7391 = vpow2.f32 %v5395_v27 }
 0x81f   :  { %7393 = vpow2.f32 %v5341_v29 }
 0x820   :  { %7395 = vpow2.f32 %v5627_v43 }
 0x821   :  { %v7382_v12 = vpop.eup %7381  ;;  %7397 = vpow2.f32 %v5772_v7 }
 0x822   :  { %v9449_v47 = vmul.f32 %v7443_v48, %v7382_v12 }
 0x823   :  { %v7384_v8 = vpop.eup %7383 }
 0x824   :  { %v7386_v61 = vpop.eup %7385  ;;  %v4300_v51 = vsel %vm4294_vm3, %v7384_v8, 0.0  ;;  %v5781_v24 = vsel %vm251_vm0, %v9449_v47, 0.0  ;;  %vm9935_vm3 = vmmov %vm9930_vm10 }
 0x825   :  { %v4302_v40 = vmul.f32 %v4300_v51, %v9328_v18  ;;  %5782 = vadd.xlane.f32.xlu0 %v5781_v24  ;;  %v9469_v18 = vmul.f32 %v9365_v26, %v7386_v61  ;;  %v7444_v26 = vld [vmem:[%s9795_s21] sm:$0xff] }
 0x826   :  { %v7388_v48 = vpop.eup %7387 }
 0x827   :  { %v7390_v1 = vpop.eup %7389  ;;  %v4245_v15 = vsel %vm4239_vm8, %v7388_v48, 0.0  ;;  %6674 = vmatmul.mubr.msk.f32.vlgmr.msra.gmra.mrb[22].mxu1 %vm9930_vm10, %v4302_v40 }
 0x828   :  { %v4247_v19 = vmul.f32 %v4245_v15, %v9336_v55  ;;  %6917 = vmatpush3.bf16.msk.msra.mxu1 %vm7924_vm6, %v9090_v52  ;;  %v7392_v31 = vpop.eup %7391  ;;  %v4246_v2 = vsel %vm4240_vm7, %v7390_v1, 0.0  ;;  %v5201_v55 = vsel %vm1572_vm4, %v9469_v18, 0.0 }
 0x829   :  { %6920 = vmatprep.subr.msk.bf16.mxu1 %vm7924_vm6, %v9092_v10  ;;  %5066 = vadd.xlane.f32.xlu0 %v5065_v56  ;;  %v4511_v58 = vpop.xlane.xlu0 %4510  ;;  %v9480_v57 = vmul.f32 %v7444_v26, %v7392_v31  ;;  %v7394_v28 = vpop.eup %7393  ;;  %v4248_v30 = vmul.f32 %v4246_v2, %v9333_v0 }
 0x82a   :  { %vm4515_vm5 = vcmp.gt.f32.partialorder %v4511_v58, 0.0  ;;  %6680 = vmatprep.mubr.msk.f32.mxu1 %vm9931_vm14, %v4247_v19  ;;  %v9490_v59 = vmul.f32 %v7444_v26, %v7394_v28  ;;  %v7396_v27 = vpop.eup %7395  ;;  %vm9937_vm14 = vmmov %vm9935_vm3 }
 0x82b   :  { %v4517_v52 = vsel %vm4515_vm5, %v4511_v58, 1.0  ;;  %v5401_v38 = vsel %vm251_vm0, %v9480_v57, 0.0  ;;  %v7398_v49 = vpop.eup %7397 }
 0x82c   :  { %7399 = vrcp.f32 %v4517_v52  ;;  %v5347_v63 = vsel %vm251_vm0, %v9490_v59, 0.0  ;;  %v9504_v12 = vmul.f32 %v7444_v26, %v7398_v49 }
 0x82d   :  { %v4514_v45 = vpop.xlane.xlu1 %4513  ;;  %5202 = vadd.xlane.f32.xlu0 %v5201_v55 }
 0x82e   :  { %vm4516_vm15 = vcmp.gt.f32.partialorder %v4514_v45, 0.0  ;;  %v5778_v61 = vsel %vm251_vm0, %v9504_v12, 0.0 }
 0x82f   :  { %v4518_v23 = vsel %vm4516_vm15, %v4514_v45, 1.0  ;;  %6681 = vmatmul.mubr.msk.f32.vlgmr.msra.gmra.mrb[22].mxu1 %vm9932_vm12, %v4248_v30 }
 0x830   :  { %7401 = vrcp.f32 %v4518_v23  ;;  %6923 = vmatpush3.bf16.msk.msra.mxu1 %vm7924_vm6, %v9092_v10  ;;  %v9498_v10 = vmul.f32 %v7444_v26, %v7396_v27  ;;  %v4813_v26 = vmul.f32 %v9106_v13, %v7782_v34 }
 0x831   :  { %6926 = vmatprep.subr.msk.bf16.mxu1 %vm7924_vm6, %v9094_v42  ;;  %5402 = vadd.xlane.f32.xlu0 %v5401_v38  ;;  %v4651_v0 = vpop.xlane.xlu0 %4650  ;;  %v5081_v38 = vmul.f32 %v9106_v13, %v7842_v5 }
 0x832   :  { %vm4655_vm9 = vcmp.gt.f32.partialorder %v4651_v0, 0.0  ;;  %v5633_v36 = vsel %vm251_vm0, %v9498_v10, 0.0 }
 0x833   :  { %v4657_v44 = vsel %vm4655_vm9, %v4651_v0, 1.0 }
 0x834   :  { %7403 = vrcp.f32 %v4657_v44 }
 0x835   :  { %5348 = vadd.xlane.f32.xlu0 %v5347_v63 }
 0x836   :  { %v7400_v21 = vpop.eup %7399 }
 0x837   :  { %v4521_v29 = vsel %vm4515_vm5, %v7400_v21, 0.0 }
 0x838   :  { %v4523_v17 = vmul.f32 %v4521_v29, %v9347_v20  ;;  %v4866_v20 = vmul.f32 %v9106_v13, %v9813_v22 }
 0x839   :  { %5634 = vadd.xlane.f32.xlu0 %v5633_v36 }
 0x83a   :  { %v7402_v8 = vpop.eup %7401  ;;  %6687 = vmatprep.mubr.msk.f32.mxu1 %vm9933_vm11, %v4523_v17 }
 0x83b   :  { %v4522_v43 = vsel %vm4516_vm15, %v7402_v8, 0.0 }
 0x83c   :  { %v4524_v53 = vmul.f32 %v4522_v43, %v9352_v32  ;;  %v4852_v32 = vpop.xlane.xlu0 %4851 }
 0x83d   :  { %5779 = vadd.xlane.f32.xlu0 %v5778_v61  ;;  %vm4856_vm8 = vcmp.gt.f32.partialorder %v4852_v32, 0.0 }
 0x83e   :  { %v7404_v51 = vpop.eup %7403  ;;  %6688 = vmatmul.mubr.msk.f32.vlgmr.msra.gmra.mrb[22].mxu1 %vm9934_vm13, %v4524_v53  ;;  %v4858_v48 = vsel %vm4856_vm8, %v4852_v32, 1.0 }
 0x83f   :  { %v4661_v24 = vsel %vm4655_vm9, %v7404_v51, 0.0  ;;  %6929 = vmatpush3.bf16.msk.msra.mxu1 %vm7924_vm6, %v9094_v42  ;;  %7405 = vrcp.f32 %v4858_v48  ;;  %v9936_v42 = vpack.i.bf16 %v9033_v39, %v9029_v60 }
 0x840   :  { %v4663_v40 = vmul.f32 %v4661_v24, %v9358_v9  ;;  %6697 = vmatprep.subr.mxu1 %v4866_v20  ;;  %v4799_v1 = vpop.xlane.xlu0 %4798 }
 0x841   :  { %vm4803_vm10 = vcmp.gt.f32.partialorder %v4799_v1, 0.0 }
 0x842   :  { %6694 = vmatprep.mubr.msk.f32.mxu1 %vm9935_vm3, %v4663_v40  ;;  %v4805_v16 = vsel %vm4803_vm10, %v4799_v1, 1.0 }
 0x849   :  { %v7406_v56 = vpop.eup %7405 }
 0x84a   :  { %v4862_v2 = vsel %vm4856_vm8, %v7406_v56, 0.0 }
 0x84b   :  { %v4864_v60 = vmul.f32 %v4862_v2, %v9368_v11 }
 0x84e   :  { %v4654_v7 = vpop.xlane.xlu1 %4653 }
 0x84f   :  { %vm4656_vm7 = vcmp.gt.f32.partialorder %v4654_v7, 0.0 }
 0x850   :  { %v4658_v22 = vsel %vm4656_vm7, %v4654_v7, 1.0 }
 0x851   :  { %7407 = vrcp.f32 %v4658_v22 }
 0x852   :  { %v4855_v15 = vpop.xlane.xlu1 %4854 }
 0x853   :  { %vm4857_vm6 = vcmp.gt.f32.partialorder %v4855_v15, 0.0  ;;  %7184 = vrot.lane.b32.xlu0 %v9936_v42, %s7513_s0 }
 0x854   :  { %v4859_v9 = vsel %vm4857_vm6, %v4855_v15, 1.0 }
 0x855   :  { %7409 = vrcp.f32 %v4859_v9 }
 0x856   :  { %7411 = vrcp.f32 %v4805_v16  ;;  %v4802_v19 = vpop.xlane.xlu1 %4801 }
 0x857   :  { %vm4804_vm5 = vcmp.gt.f32.partialorder %v4802_v19, 0.0 }
 0x858   :  { %v4806_v31 = vsel %vm4804_vm5, %v4802_v19, 1.0 }
 0x859   :  { %7413 = vrcp.f32 %v4806_v31 }
 0x85b   :  { %v7408_v58 = vpop.eup %7407 }
 0x85c   :  { %v4662_v52 = vsel %vm4656_vm7, %v7408_v58, 0.0 }
 0x85d   :  { %v4664_v55 = vmul.f32 %v4662_v52, %v9386_v54 }
 0x85f   :  { %v7410_v39 = vpop.eup %7409  ;;  %6695 = vmatmul.mubr.msk.f32.vlgmr.msra.gmra.mrb[22].mxu1 %vm9937_vm14, %v4664_v55  ;;  %vm6056_vm14 = vcmask 0  }
 0x860   :  { %v7412_v28 = vpop.eup %7411  ;;  %6698 = vmatpush3.msra.mxu1 %v4866_v20  ;;  %6699 = vmatprep.mubr.msk.f32.mxu1 %vm1572_vm4, %v4864_v60  ;;  %v4863_v30 = vsel %vm4857_vm6, %v7410_v39, 0.0 }
 0x861   :  { %6702 = vmatprep.subr.mxu1 %v4813_v26  ;;  %v4809_v45 = vsel %vm4803_vm10, %v7412_v28, 0.0  ;;  %v4865_v54 = vmul.f32 %v4863_v30, %v9392_v4  ;;  %v5217_v4 = vmul.f32 %v9106_v13, %v7846_v6 }
 0x862   :  { %v4811_v23 = vmul.f32 %v4809_v45, %v9374_v25  ;;  %v5070_v25 = vpop.xlane.xlu1 %5069 }
 0x863   :  { %v7414_v11 = vpop.eup %7413  ;;  %vm5072_vm15 = vcmp.gt.f32.partialorder %v5070_v25, 0.0 }
 0x864   :  { %v4810_v34 = vsel %vm4804_vm5, %v7414_v11, 0.0  ;;  %v5074_v63 = vsel %vm5072_vm15, %v5070_v25, 1.0 }
 0x865   :  { %v4812_v27 = vmul.f32 %v4810_v34, %v9396_v35  ;;  %7415 = vrcp.f32 %v5074_v63 }
 0x866   :  { %v5206_v0 = vpop.xlane.xlu1 %5205 }
 0x867   :  { %6700 = vmatmul.mubr.msk.f32.vlgmr.msra.gmra.mrb[22].mxu1 %vm1572_vm4, %v4865_v54  ;;  %vm5208_vm9 = vcmp.gt.f32.partialorder %v5206_v0, 0.0 }
 0x868   :  { %6703 = vmatpush3.msra.mxu1 %v4813_v26  ;;  %6704 = vmatprep.mubr.msk.f32.mxu1 %vm1572_vm4, %v4811_v23  ;;  %v5210_v13 = vsel %vm5208_vm9, %v5206_v0, 1.0 }
 0x869   :  { %6707 = vmatprep.subr.mxu1 %v5081_v38 }
 0x86a   :  { %v9550_v44 = vpop.xlane.xlu1 %5405 }
 0x86b   :  { %vm5408_vm3 = vcmp.gt.f32.partialorder %v9550_v44, 0.0 }
 0x86c   :  { %v5410_v24 = vsel %vm5408_vm3, %v9550_v44, 1.0 }
 0x86e   :  { %v9555_v21 = vpop.xlane.xlu1 %5351 }
 0x86f   :  { %6705 = vmatmul.mubr.msk.f32.vlgmr.msra.gmra.mrb[22].mxu1 %vm1572_vm4, %v4812_v27  ;;  %v7416_v8 = vpop.eup %7415  ;;  %vm5354_vm7 = vcmp.gt.f32.partialorder %v9555_v21, 0.0 }
 0x870   :  { %6708 = vmatpush3.msra.mxu1 %v5081_v38  ;;  %v5078_v20 = vsel %vm5072_vm15, %v7416_v8, 0.0  ;;  %v5356_v58 = vsel %vm5354_vm7, %v9555_v21, 1.0 }
 0x871   :  { %6712 = vmatprep.subr.mxu1 %v5217_v4  ;;  %v5080_v22 = vmul.f32 %v5078_v20, %v9400_v33  ;;  %v237_v20 = vld [vmem:[%s9938_s2] sm:$0xff] }
 0x891   :  { %v9559_v29 = vpop.xlane.xlu1 %5637 }
 0x892   :  { %vm5640_vm6 = vcmp.gt.f32.partialorder %v9559_v29, 0.0 }
 0x895   :  { %v7180_v53 = vpop.permute.xlu1 %7179 }
 0x896   :  { %v7182_v40 = vunpack.i.h.bf16 %v7180_v53  ;;  %v7181_v32 = vunpack.i.l.bf16 %v7180_v53 }
 0x898   :  { %v6930_v9 = vpack.c.bf16 %v7182_v40, %v7181_v32  ;;  %v240_v40 = vld [vmem:[%s9938_s2 + $0x18] sm:$0xff] }
 0x899   :  { %v7190_v45 = vpop.permute.xlu1 %7189 }
 0x89a   :  { %v7192_v23 = vunpack.i.h.bf16 %v7190_v45  ;;  %v7191_v11 = vunpack.i.l.bf16 %v7190_v45 }
 0x89c   :  { %v6938_v0 = vpack.c.bf16 %v7192_v23, %v7191_v11 }
 0x89d   :  { %v7195_v63 = vpop.permute.xlu1 %7194 }
 0x8b2   :  { %v9552_v5 = vpop.xlane.xlu0 %5782 }
 0x8b6   :  { %v5067_v49 = vpop.xlane.xlu0 %5066 }
 0x8b7   :  { %vm5071_vm12 = vcmp.gt.f32.partialorder %v5067_v49, 0.0 }
 0x8b8   :  { %v5073_v35 = vsel %vm5071_vm12, %v5067_v49, 1.0 }
 0x8b9   :  { %7417 = vrcp.f32 %v5073_v35  ;;  %v7196_v35 = vunpack.i.l.bf16 %v7195_v63 }
 0x8ba   :  { %v5203_v6 = vpop.xlane.xlu0 %5202 }
 0x8bb   :  { %vm5207_vm11 = vcmp.gt.f32.partialorder %v5203_v6, 0.0 }
 0x8bc   :  { %v5209_v17 = vsel %vm5207_vm11, %v5203_v6, 1.0 }
 0x8bd   :  { %7419 = vrcp.f32 %v5209_v17 }
 0x8be   :  { %7421 = vrcp.f32 %v5210_v13  ;;  %v5403_v36 = vpop.xlane.xlu0 %5402 }
 0x8bf   :  { %vm5407_vm13 = vcmp.gt.f32.partialorder %v5403_v36, 0.0 }
 0x8c0   :  { %v5409_v43 = vsel %vm5407_vm13, %v5403_v36, 1.0 }
 0x8c1   :  { %7423 = vrcp.f32 %v5409_v43 }
 0x8c2   :  { %v5349_v61 = vpop.xlane.xlu0 %5348  ;;  %7425 = vrcp.f32 %v5410_v24 }
 0x8c3   :  { %v7418_v51 = vpop.eup %7417  ;;  %vm5353_vm8 = vcmp.gt.f32.partialorder %v5349_v61, 0.0 }
 0x8c4   :  { %v5077_v48 = vsel %vm5071_vm12, %v7418_v51, 0.0  ;;  %v5355_v1 = vsel %vm5353_vm8, %v5349_v61, 1.0 }
 0x8c5   :  { %v5079_v7 = vmul.f32 %v5077_v48, %v9457_v62  ;;  %7427 = vrcp.f32 %v5355_v1  ;;  %v6204_v48 = vld [vmem:[%s9939_s7] ss:$0 sm:$0xff] }
 0x8c6   :  { %v5635_v15 = vpop.xlane.xlu0 %5634  ;;  %7429 = vrcp.f32 %v5356_v58 }
 0x8c7   :  { %v7420_v16 = vpop.eup %7419  ;;  %6709 = vmatprep.mubr.msk.f32.mxu1 %vm1572_vm4, %v5079_v7  ;;  %vm5639_vm10 = vcmp.gt.f32.partialorder %v5635_v15, 0.0  ;;  %v6222_v7 = vld [vmem:[%s9941_s11] ss:$0 sm:$0xff] }
 0x8c8   :  { %v7422_v42 = vpop.eup %7421  ;;  %v5213_v19 = vsel %vm5207_vm11, %v7420_v16, 0.0  ;;  %6710 = vmatmul.mubr.msk.f32.vlgmr.msra.gmra.mrb[22].mxu1 %vm1572_vm4, %v5080_v22  ;;  %v5641_v52 = vsel %vm5639_vm10, %v5635_v15, 1.0 }
 0x8c9   :  { %v5215_v56 = vmul.f32 %v5213_v19, %v9469_v18  ;;  %6713 = vmatpush3.msra.mxu1 %v5217_v4  ;;  %v5214_v31 = vsel %vm5208_vm9, %v7422_v42, 0.0  ;;  %7431 = vrcp.f32 %v5641_v52 }
 0x8ca   :  { %6931 = vmatprep.subr.bf16.mxu1 %v6930_v9  ;;  %v5780_v33 = vpop.xlane.xlu0 %5779  ;;  %v5216_v55 = vmul.f32 %v5214_v31, %v9404_v41 }
 0x8cb   :  { %v7424_v62 = vpop.eup %7423  ;;  %6714 = vmatprep.mubr.msk.f32.mxu1 %vm1572_vm4, %v5215_v56  ;;  %vm5784_vm5 = vcmp.gt.f32.partialorder %v5780_v33, 0.0 }
 0x8cc   :  { %v5413_v2 = vsel %vm5407_vm13, %v7424_v62, 0.0  ;;  %v7426_v28 = vpop.eup %7425  ;;  %v5786_v34 = vsel %vm5784_vm5, %v5780_v33, 1.0 }
 0x8cd   :  { %v5415_v60 = vmul.f32 %v5413_v2, %v9480_v57  ;;  %v5414_v41 = vsel %vm5408_vm3, %v7426_v28, 0.0  ;;  %v5642_v57 = vsel %vm5640_vm6, %v9559_v29, 1.0  ;;  %v241_v28 = vld [vmem:[%s7720_s27] sm:$0x1] }
 0x8ce   :  { %v7185_v18 = vpop.permute.xlu0 %7184  ;;  %v5416_v27 = vmul.f32 %v5414_v41, %v9409_v14  ;;  %7433 = vrcp.f32 %v5642_v57  ;;  %v244_v57 = vld [vmem:[#allocation2] sm:$0x1] }
 0x8cf   :  { %v7187_v39 = vunpack.i.h.bf16 %v7185_v18  ;;  %v7186_v26 = vunpack.i.l.bf16 %v7185_v18  ;;  %v7428_v30 = vpop.eup %7427  ;;  %7435 = vrcp.f32 %v5786_v34 }
 0x8d0   :  { %6715 = vmatmul.mubr.msk.f32.vlgmr.msra.gmra.mrb[22].mxu1 %vm1572_vm4, %v5216_v55  ;;  %v5359_v38 = vsel %vm5353_vm8, %v7428_v30, 0.0  ;;  %v7430_v25 = vpop.eup %7429  ;;  %vm5785_vm4 = vcmp.gt.f32.partialorder %v9552_v5, 0.0 }
 0x8d1   :  { %v6934_v54 = vpack.c.bf16 %v7187_v39, %v7186_v26  ;;  %6933 = vmatpush3.bf16.msra.mxu1 %v6930_v9  ;;  %6721 = vmatprep.mubr.msk.f32.mxu1 %vm251_vm0, %v5415_v60  ;;  %v5361_v4 = vmul.f32 %v5359_v38, %v9490_v59  ;;  %v5360_v49 = vsel %vm5354_vm7, %v7430_v25, 0.0  ;;  %v5787_v14 = vsel %vm5785_vm4, %v9552_v5, 1.0  ;;  %v6213_v5 = vld [vmem:[%s9940_s10] ss:$0 sm:$0xff]  ;;  %v243_v39 = vld [vmem:[%s7725_s4 + $0x8] sm:$0xff] }
 0x8d2   :  { %v7197_v59 = vunpack.i.h.bf16 %v7195_v63  ;;  %v5362_v13 = vmul.f32 %v5360_v49, %v9413_v3  ;;  %7437 = vrcp.f32 %v5787_v14  ;;  %v6964_v1 = vadd.f32 %v6213_v5, %v6204_v48  ;;  %v242_v60 = vld [vmem:[%s7725_s4] sm:$0xff]  ;;  %s7449_s4 = scalar_lea.vmem %s6065_s15, 32 }
 0x8d3   :  { %6935 = vmatprep.subr.bf16.mxu1 %v6934_v54  ;;  %v7432_v44 = vpop.eup %7431  ;;  %v6953_v26 = vpack.c.bf16 %v243_v39, %v242_v60  ;;  %p7451_p2 = scmp.lt.s32.totalorder %s7449_s4, %s7445_s18 }
 0x8d4   :  { %v5645_v6 = vsel %vm5639_vm10, %v7432_v44, 0.0  ;;  %v6942_v8 = vpack.c.bf16 %v7197_v59, %v7196_v35  ;;  %v6965_v22 = vadd.f32 %v6964_v1, %v6222_v7 }
 0x8d5   :  { %v5647_v17 = vmul.f32 %v5645_v6, %v9498_v10  ;;  %p7452_p3 = por %p7451_p2, %p7450_p1 }
 0x8d7   :  { %p7453_p4 = pnand %p7452_p3, %p7446_p0 }
 0x8d8   :  { %6722 = vmatmul.mubr.msk.f32.vlgmr.msra.gmra.mrb[22].mxu1 %vm251_vm0, %v5416_v27  ;;  %v7434_v36 = vpop.eup %7433 }
 0x8d9   :  { %6937 = vmatpush3.bf16.msra.mxu1 %v6934_v54  ;;  %6728 = vmatprep.mubr.msk.f32.mxu1 %vm251_vm0, %v5361_v4  ;;  %v7436_v21 = vpop.eup %7435  ;;  %v5646_v43 = vsel %vm5640_vm6, %v7434_v36, 0.0 }
 0x8da   :  { %6939 = vmatprep.subr.bf16.mxu1 %v6938_v0  ;;  %v5790_v3 = vsel %vm5784_vm5, %v7436_v21, 0.0  ;;  %v5648_v10 = vmul.f32 %v5646_v43, %v9420_v46  ;;  %v238_v46 = vld [vmem:[%s9938_s2 + $0x8] sm:$0xff] }
 0x8db   :  { %v5792_v53 = vmul.f32 %v5790_v3, %v9504_v12  ;;  %v6947_v24 = vpack.c.bf16 %v238_v46, %v237_v20  ;;  %v239_v12 = vld [vmem:[%s9938_s2 + $0x10] sm:$0xff] }
 0x8dc   :  { %v7438_v61 = vpop.eup %7437  ;;  %v6950_v32 = vpack.c.bf16 %v240_v40, %v239_v12 }
 0x8dd   :  { %v5791_v29 = vsel %vm5785_vm4, %v7438_v61, 0.0  ;;  %6948 = vmatpush3.bf16.msra.mxu0 %v6947_v24 }
 0x8de   :  { %v5793_v51 = vmul.f32 %v5791_v29, %v9449_v47  ;;  %6949 = vmatprep.subr.bf16.mxu0 %v9842_v37 }
 0x8e0   :  { %6729 = vmatmul.mubr.msk.f32.vlgmr.msra.gmra.mrb[22].mxu1 %vm251_vm0, %v5362_v13 }
 0x8e1   :  { %6941 = vmatpush3.bf16.msra.mxu1 %v6938_v0  ;;  %6735 = vmatprep.mubr.msk.f32.mxu1 %vm251_vm0, %v5647_v17 }
 0x8e2   :  { %6943 = vmatprep.subr.bf16.mxu1 %v6942_v8  ;;  %6951 = vmatpush3.bf16.msra.mxu0 %v6950_v32 }
 0x8e3   :  { %6952 = vmatprep.subr.bf16.mxu0 %v9842_v37 }
 0x8e8   :  { %6736 = vmatmul.mubr.msk.f32.vlgmr.msra.gmra.mrb[22].mxu1 %vm251_vm0, %v5648_v10 }
 0x8e9   :  { %6945 = vmatpush3.bf16.msra.mxu1 %v6942_v8  ;;  %6742 = vmatprep.mubr.msk.f32.mxu1 %vm251_vm0, %v5792_v53 }
 0x8f0   :  { %6743 = vmatmul.mubr.msk.f32.vlgmr.msra.gmra.mrb[22].mxu1 %vm251_vm0, %v5793_v51 }
 0x9c3   :  { %v6744_v47 = vpop.f32.mrb[22].mxu1 }
 0x9c4   :  { %v6963_v15 = vadd.f32 %v6965_v22, %v6744_v47  ;;  %v5876_v16 = vpop.f32.mrb[23].mxu1 }
 0x9c5   :  { %v6966_v42 = vadd.f32 %v6965_v22, %v5876_v16 }
 0x9c6   :  { %v5898_v9 = vmax.f32 %v6963_v15, 0.0 }
 0x9c7   :  { %v5897_v19 = vmax.f32 %v6966_v42, 0.0 }
 0x9c8   :  { %v5900_v56 = vsel %vm499_vm2, %v5898_v9, 0.0 }
 0x9c9   :  { %v5899_v33 = vsel %vm499_vm2, %v5897_v19, 0.0 }
 0x9ca   :  { %v5901_v62 = vadd.f32 %v5900_v56, %v5899_v33 }
 0x9cc   :  { %v5902_v37 = vrot.slane %v5901_v62, 4 }
 0x9ce   :  { %v5903_v31 = vadd.f32 %v5902_v37, %v5901_v62 }
 0x9d0   :  { %v5904_v58 = vrot.slane %v5903_v31, 2 }
 0x9d2   :  { %v5905_v2 = vadd.f32 %v5904_v58, %v5903_v31 }
 0x9d4   :  { %v5906_v52 = vrot.slane %v5905_v2, 1 }
 0x9d6   :  { %v5907_v55 = vadd.f32 %v5906_v52, %v5905_v2 }
 0x9d8   :  { %v5908_v18 = vmul.f32 0.0625, %v5907_v55 }
 0x9da   :  { %6754 = vmatmul.mubr.msk.f32.vlgmr.msra.gmra.mrb[20].mxu0 %vm499_vm2, %v5908_v18 }
 0x9db   :  { %6760 = vmatprep.mubr.msk.f32.mxu0 %vm7509_vm1, %v9844_v50  ;;  %6954 = vmatpush3.bf16.msra.mxu0 %v6953_v26 }
 0xaad   :  { %v5978_v30 = vpop.f32.mrb[20].mxu0 }
 0xaae   :  { %v5979_v45 = vadd.f32 %v5978_v30, %v241_v28  ;;  %v6755_v54 = vpop.f32.mrb[21].mxu0 }
 0xab0   :  { %v5982_v41 = vmax.f32 %v5979_v45, 0.0 }
 0xab2   :  { %6761 = vmatmul.mubr.msk.f32.vlgmr.msra.gmra.mrb[22].mxu0 %vm251_vm0, %v5982_v41 }
 0xb85   :  { %v6052_v23 = vpop.f32.mrb[22].mxu0 }
 0xb86   :  { %v6053_v11 = vadd.f32 %v6052_v23, %v244_v57  ;;  %v6762_v38 = vpop.f32.mrb[23].mxu0 }
 0xb88   :  { %6057 = vst.msk [vmem:[#allocation3] sm:$0x1] %vm6056_vm14, %v6053_v11 }
 0xb89   :  { %7456 = shalt.err (!%p7453_p4)
}
 0xb8a   :  { %s7457_s27 = scalar_lea.hbm %s7733_s20, 16 }
 0xb8b   :  { %p7458_p5 = scmp.ne.s32.totalorder %s7733_s20, %s7457_s27  ;;  %p7461_p6 = scmp.lt.u32.totalorder %s7457_s27, %s7733_s20 }
 0xb8d   :  { %p7463_p7 = pnand %p7461_p6, %p7458_p5 }
 0xb8f   :  { %7466 = shalt.err (!%p7463_p7)
}
 0xb90   :  { %6067 = dma.vmem_to_hbm [thread:$0]  %s6065_s15, 16, %s7733_s20, [#allocation4]  }
 0xb91   :  { %7467 = dma.done.wait [#allocation4], 16  }
 0xb92   :  { %7468 = vsyncadd [#allocation4], 4294967280 }
 0xb93   :  { %6071 = vsyncpa [#allocation4], 1 }

</bundles_post_ra>
